<compile_context>
chip_gen: v6e
topology: v6e:2x2x1
jax: 0.10.0
libtpu: 0.0.40
codegen_flags: <defaults>
</compile_context>

<pallas_src>
import jax
import jax.numpy as jnp
import numpy as np
from jax.experimental import pallas as pl
from jax.experimental.pallas import tpu as pltpu

# Keep f32 matmuls bit-comparable between the kernel and the pure-JAX reference.
# TODO(synk): at production channel widths, cast matmul operands to bf16
# (MXU-native on v6e/v7x) and drop this global; kept f32 here because the tiny
# K/N matmuls are nowhere near MXU-bound and the test tolerance is tight.
jax.config.update("jax_default_matmul_precision", "highest")

MSG_EPS = 1e-7    # GENConv message epsilon
LN_EPS = 1e-5     # torch.nn.LayerNorm default eps
ROW_TILE = 128    # destination-node tile (>=128 rows per MXU matmul / grid step)
LANE = 128        # channel padding target (lane width)


def _round_up(n, m):
    return ((n + m - 1) // m) * m


# ----------------------------- math helpers ----------------------------------

def _gelu(x):
    # TODO(synk): torch F.gelu default is the exact erf form; tanh approximation
    # used here (max abs err ~1e-3), matching the reference below.
    c = jnp.float32(0.7978845608028654)  # sqrt(2/pi)
    return 0.5 * x * (1.0 + jnp.tanh(c * (x + 0.044715 * x * x * x)))


def _layer_norm(x, gamma, beta):
    # Unpadded LayerNorm (pure-JAX reference only).
    mu = jnp.mean(x, axis=-1, keepdims=True)
    var = jnp.mean(jnp.square(x - mu), axis=-1, keepdims=True)
    return (x - mu) * jax.lax.rsqrt(var + LN_EPS) * gamma + beta


def _masked_layer_norm(x, gamma, beta, chan_mask, n_real):
    # LayerNorm over the first `n_real` (real) channels of a lane-padded tensor.
    # Padded lanes carry exact zeros and padded gamma/beta are zero, so padded
    # lanes of the output stay exactly zero.
    inv_n = jnp.float32(1.0 / n_real)
    mu = jnp.sum(x * chan_mask, axis=-1, keepdims=True) * inv_n
    d = (x - mu) * chan_mask
    var = jnp.sum(d * d, axis=-1, keepdims=True) * inv_n
    return (x - mu) * jax.lax.rsqrt(var + LN_EPS) * gamma + beta


# ----------------------------- fused GENConv kernel ---------------------------

def _make_genconv_kernel(apply_post, c_hid_real, c_out_real, c_pad):
    """One fused GENConv layer.

    apply_post=True : inter-layer LayerNorm + GELU epilogue.
    apply_post=False: final layer -> fused log_softmax epilogue.
    """

    def kernel(x_src_ref, x_dst_ref, mask_ref, t_ref,
               wsrc_ref, bsrc_ref, wdst_ref, bdst_ref,
               w1_ref, b1_ref, g1_ref, be1_ref,
               w2_ref, b2_ref, gp_ref, bp_ref, o_ref):
        t = t_ref[0]                                             # scalar (SMEM path)
        lane = jax.lax.broadcasted_iota(jnp.int32, (1, c_pad), 1)
        hid_mask = (lane < c_hid_real).astype(jnp.float32)
        out_mask = (lane < c_out_real).astype(jnp.float32)

        # lin_src + message, fused (x_src block is grid-invariant / resident).
        src = jnp.dot(x_src_ref[...], wsrc_ref[...],
                      preferred_element_type=jnp.float32) + bsrc_ref[...]
        msg = jnp.maximum(src, 0.0) + MSG_EPS                    # [Ns, C]

        # Softmax aggregation as two MXU matmuls.  A per-channel GLOBAL max over
        # src cancels in the num/denom ratio, so no -inf sentinel or 3-D
        # [dst, src, C] broadcast is needed; zero in-degree rows give
        # num = denom = 0 -> agg = 0.
        tm = t * msg
        ex = jnp.exp(tm - jnp.max(tm, axis=0, keepdims=True))    # [Ns, C]
        mask = mask_ref[...]                                     # [TD, Ns]
        denom = jnp.dot(mask, ex, preferred_element_type=jnp.float32)      # [TD, C]
        num = jnp.dot(mask, ex * msg, preferred_element_type=jnp.float32)  # [TD, C]
        agg = num * pl.reciprocal(jnp.maximum(denom, 1e-16), approx=True)

        # Residual lin_dst.
        h = agg + jnp.dot(x_dst_ref[...], wdst_ref[...],
                          preferred_element_type=jnp.float32) + bdst_ref[...]

        # MLP([C, 2C, C], norm='layer', act=relu, plain last layer).
        h1 = jnp.dot(h, w1_ref[...], preferred_element_type=jnp.float32) + b1_ref[...]
        h1 = jnp.maximum(
            _masked_layer_norm(h1, g1_ref[...], be1_ref[...], hid_mask, c_hid_real),
            0.0)
        h2 = jnp.dot(h1, w2_ref[...], preferred_element_type=jnp.float32) + b2_ref[...]

        if apply_post:
            # Inter-layer LayerNorm + GELU (padded lanes stay exactly zero).
            h2 = _gelu(_masked_layer_norm(h2, gp_ref[...], bp_ref[...],
                                          out_mask, c_out_real))
        else:
            # Final layer: fused log_softmax over the real output channels only.
            z = jnp.where(out_mask > 0, h2, jnp.float32(-1e30))
            z = z - jnp.max(z, axis=-1, keepdims=True)
            lse = jnp.log(jnp.sum(jnp.exp(z) * out_mask, axis=-1, keepdims=True))
            h2 = (z - lse) * out_mask
        o_ref[...] = h2.astype(o_ref.dtype)

    return kernel


def gen_conv_layer(x_src_p, x_dst_p, mask_p, p, apply_post):
    """One fused GENConv layer over padded operands, tiled over destination rows."""
    n_src_p, c_pad = x_src_p.shape
    n_dst_p = x_dst_p.shape[0]
    kernel = _make_genconv_kernel(apply_post, p["c_hid_real"], p["c_out_real"], c_pad)
    full = lambda a: pl.BlockSpec(a.shape, lambda i: (0, 0))     # grid-invariant block
    return pl.pallas_call(
        kernel,
        out_shape=jax.ShapeDtypeStruct((n_dst_p, c_pad), jnp.float32),
        grid=(n_dst_p // ROW_TILE,),
        in_specs=[
            pl.BlockSpec((n_src_p, c_pad), lambda i: (0, 0)),      # x_src (resident)
            pl.BlockSpec((ROW_TILE, c_pad), lambda i: (i, 0)),     # x_dst tile
            pl.BlockSpec((ROW_TILE, n_src_p), lambda i: (i, 0)),   # 2-D adjacency mask
            pl.BlockSpec(memory_space=pltpu.MemorySpace.SMEM),     # t on the scalar path
            full(p["w_src"]), full(p["b_src"]),
            full(p["w_dst"]), full(p["b_dst"]),
            full(p["w1"]), full(p["b1"]), full(p["g1"]), full(p["be1"]),
            full(p["w2"]), full(p["b2"]),
            full(p["g_post"]), full(p["b_post"]),
        ],
        out_specs=pl.BlockSpec((ROW_TILE, c_pad), lambda i: (i, 0)),
        compiler_params=pltpu.CompilerParams(
            dimension_semantics=("parallel",),    # dst tiles shard across TCs (v7x)
            vmem_limit_bytes=32 * 1024 * 1024,    # explicit budget, <= v7x's 64 MiB
        ),
    )(x_src_p, x_dst_p, mask_p, p["t"],
      p["w_src"], p["b_src"], p["w_dst"], p["b_dst"],
      p["w1"], p["b1"], p["g1"], p["be1"], p["w2"], p["b2"],
      p["g_post"], p["b_post"])


# ----------------------------- model wrapper ---------------------------------

def pna_net_ns_forward(x, adjs, layer_params):
    """adjs: list of (mask2d [n_dst, n_src], size=(n_src, n_dst)), outermost hop first.

    Remainder handling is done by host-side zero padding: dst rows to ROW_TILE,
    channels to the lane-padded width; padded rows/cols carry zero mask entries
    and are sliced away at the end.
    """
    c_pad = layer_params[0]["w_src"].shape[0]
    n_layers = len(layer_params)

    n0, c_in = x.shape
    xp = jnp.zeros((_round_up(n0, 8), c_pad), jnp.float32).at[:n0, :c_in].set(x)

    for i, (mask2d, size) in enumerate(adjs):
        p = layer_params[i]
        n_src_real, n_dst_real = size
        n_src_p = xp.shape[0]
        n_dst_p = _round_up(n_dst_real, ROW_TILE)
        mask_p = jnp.zeros((n_dst_p, n_src_p), jnp.float32)
        mask_p = mask_p.at[:n_dst_real, :n_src_real].set(mask2d)
        x_dst_p = jnp.zeros((n_dst_p, c_pad), jnp.float32).at[:n_dst_real].set(
            xp[:n_dst_real])
        apply_post = (i + 1) < n_layers     # LayerNorm+GELU on all but the last layer
        xp = gen_conv_layer(xp, x_dst_p, mask_p, p, apply_post)

    n_final = adjs[-1][1][1]
    return xp[:n_final, :layer_params[-1]["c_out_real"]]


# ----------------------------- parameter init --------------------------------

def init_genconv_params(key, c_in, c_out, c_pad):
    ks = jax.random.split(key, 8)
    c_hid = 2 * c_out
    assert max(c_in, c_out, c_hid) <= c_pad

    def pad2(a, shape):
        return jnp.zeros(shape, jnp.float32).at[: a.shape[0], : a.shape[1]].set(a)

    w = lambda k, fi, fo: jax.random.normal(k, (fi, fo), jnp.float32) / np.sqrt(fi)
    b = lambda k, fo: jax.random.normal(k, (1, fo), jnp.float32) * 0.01

    p = {"c_in_real": c_in, "c_out_real": c_out, "c_hid_real": c_hid}
    if c_in != c_out:   # GENConv only creates lin_src / lin_dst when dims differ
        w_src, b_src = w(ks[0], c_in, c_out), b(ks[1], c_out)
        w_dst, b_dst = w(ks[2], c_in, c_out), b(ks[3], c_out)
    else:               # identity projections (relu(x @ I) == relu(x))
        w_src = w_dst = jnp.eye(c_out, dtype=jnp.float32)
        b_src = b_dst = jnp.zeros((1, c_out), jnp.float32)
    p["w_src"], p["b_src"] = pad2(w_src, (c_pad, c_pad)), pad2(b_src, (1, c_pad))
    p["w_dst"], p["b_dst"] = pad2(w_dst, (c_pad, c_pad)), pad2(b_dst, (1, c_pad))
    p["t"] = jnp.ones((1,), jnp.float32)                # learnable temperature, init 1.0
    p["w1"] = pad2(w(ks[4], c_out, c_hid), (c_pad, c_pad))
    p["b1"] = pad2(b(ks[5], c_hid), (1, c_pad))
    p["g1"] = pad2(jnp.ones((1, c_hid), jnp.float32), (1, c_pad))
    p["be1"] = jnp.zeros((1, c_pad), jnp.float32)
    p["w2"] = pad2(w(ks[6], c_hid, c_out), (c_pad, c_pad))
    p["b2"] = pad2(b(ks[7], c_out), (1, c_pad))
    p["g_post"] = pad2(jnp.ones((1, c_out), jnp.float32), (1, c_pad))  # torch LN init
    p["b_post"] = jnp.zeros((1, c_pad), jnp.float32)
    return p


def build_params(key, in_c, hid_c, out_c, num_layers):
    c_pad = _round_up(max(in_c, hid_c, out_c, 2 * hid_c, 2 * out_c, LANE), LANE)
    params, c_in = [], in_c
    for i in range(1, num_layers + 1):
        c_out = out_c if i == num_layers else hid_c
        key, sub = jax.random.split(key)
        params.append(init_genconv_params(sub, c_in, c_out, c_pad))
        c_in = c_out
    return params


# ----------------------------- pure-JAX reference ----------------------------

def _ref_layer(x_src, x_dst, mask2d, p, apply_post):
    ci, co, ch = p["c_in_real"], p["c_out_real"], p["c_hid_real"]
    src = x_src @ p["w_src"][:ci, :co] + p["b_src"][:, :co]
    msg = jnp.maximum(src, 0.0) + MSG_EPS
    t = p["t"][0]
    m3 = mask2d[:, :, None]
    logits = jnp.where(m3 > 0, t * msg[None], -1e30)
    ex = jnp.exp(logits - logits.max(axis=1, keepdims=True)) * m3
    agg = (ex * msg[None]).sum(1) / jnp.maximum(ex.sum(1), 1e-16)
    h = agg + x_dst @ p["w_dst"][:ci, :co] + p["b_dst"][:, :co]
    h1 = h @ p["w1"][:co, :ch] + p["b1"][:, :ch]
    h1 = jnp.maximum(_layer_norm(h1, p["g1"][:, :ch], p["be1"][:, :ch]), 0.0)
    h2 = h1 @ p["w2"][:ch, :co] + p["b2"][:, :co]
    if apply_post:
        h2 = _gelu(_layer_norm(h2, p["g_post"][:, :co], p["b_post"][:, :co]))
    return h2


def ref_forward(x, adjs, layer_params):
    n_layers = len(layer_params)
    for i, (mask2d, size) in enumerate(adjs):
        x = _ref_layer(x, x[: size[1]], mask2d, layer_params[i], (i + 1) < n_layers)
    return jax.nn.log_softmax(x, axis=-1)


# ----------------------------- main -------------------------------------------

if __name__ == "__main__":
    IN_C, HID_C, OUT_C, NUM_LAYERS = 16, 32, 8, 2
    N0, N1, N2 = 64, 32, 16     # sampled node counts: hop-0 src, hop-1 src, final targets

    key = jax.random.PRNGKey(0)
    key, k_x, k_m0, k_m1, k_p = jax.random.split(key, 5)

    x = jax.random.normal(k_x, (N0, IN_C), jnp.float32)

    mask0 = jax.random.bernoulli(k_m0, 0.3, (N1, N0)).astype(jnp.float32)
    mask0 = mask0.at[jnp.arange(N1), jnp.arange(N1)].set(1.0)   # targets keep a self edge
    mask1 = jax.random.bernoulli(k_m1, 0.3, (N2, N1)).astype(jnp.float32)
    mask1 = mask1.at[jnp.arange(N2), jnp.arange(N2)].set(1.0)

    adjs = [(mask0, (N0, N1)), (mask1, (N1, N2))]
    params = build_params(k_p, IN_C, HID_C, OUT_C, NUM_LAYERS)

    out = pna_net_ns_forward(x, adjs, params)
    out = jax.block_until_ready(out)

    ref = jax.block_until_ready(ref_forward(x, adjs, params))
    np.testing.assert_allclose(np.asarray(out), np.asarray(ref), rtol=2e-2, atol=2e-2)
    assert out.shape == (N2, OUT_C) and out.dtype == jnp.float32

    print("KERNEL_OK")
</pallas_src>

<mosaic_0001>
module attributes {stable_mosaic.version = 11 : i64} {
  func.func @kernel(%arg0: i32, %arg1: memref<64x128xf32, #tpu.memory_space<vmem>>, %arg2: memref<128x128xf32, #tpu.memory_space<vmem>>, %arg3: memref<128x64xf32, #tpu.memory_space<vmem>>, %arg4: memref<1xf32, #tpu.memory_space<smem>>, %arg5: memref<128x128xf32, #tpu.memory_space<vmem>>, %arg6: memref<1x128xf32, #tpu.memory_space<vmem>>, %arg7: memref<128x128xf32, #tpu.memory_space<vmem>>, %arg8: memref<1x128xf32, #tpu.memory_space<vmem>>, %arg9: memref<128x128xf32, #tpu.memory_space<vmem>>, %arg10: memref<1x128xf32, #tpu.memory_space<vmem>>, %arg11: memref<1x128xf32, #tpu.memory_space<vmem>>, %arg12: memref<1x128xf32, #tpu.memory_space<vmem>>, %arg13: memref<128x128xf32, #tpu.memory_space<vmem>>, %arg14: memref<1x128xf32, #tpu.memory_space<vmem>>, %arg15: memref<1x128xf32, #tpu.memory_space<vmem>>, %arg16: memref<1x128xf32, #tpu.memory_space<vmem>>, %arg17: memref<128x128xf32, #tpu.memory_space<vmem>>) attributes {dimension_semantics = [#tpu.dimension_semantics<parallel>], iteration_bounds = array<i64: 1>, scalar_prefetch = 0 : i64, scratch_operands = 0 : i64, tpu.core_type = #tpu.core_type<tc>, window_params = [{pipeline_mode = #tpu.pipeline_mode<synchronous>, transform_indices = @transform_0, window_bounds = array<i64: 64, 128>}, {transform_indices = @transform_1, window_bounds = array<i64: 128, 128>}, {transform_indices = @transform_2, window_bounds = array<i64: 128, 64>}, {transform_indices = @transform_3, window_bounds = array<i64: 1>}, {pipeline_mode = #tpu.pipeline_mode<synchronous>, transform_indices = @transform_4, window_bounds = array<i64: 128, 128>}, {pipeline_mode = #tpu.pipeline_mode<synchronous>, transform_indices = @transform_5, window_bounds = array<i64: 1, 128>}, {pipeline_mode = #tpu.pipeline_mode<synchronous>, transform_indices = @transform_6, window_bounds = array<i64: 128, 128>}, {pipeline_mode = #tpu.pipeline_mode<synchronous>, transform_indices = @transform_7, window_bounds = array<i64: 1, 128>}, {pipeline_mode = #tpu.pipeline_mode<synchronous>, transform_indices = @transform_8, window_bounds = array<i64: 128, 128>}, {pipeline_mode = #tpu.pipeline_mode<synchronous>, transform_indices = @transform_9, window_bounds = array<i64: 1, 128>}, {pipeline_mode = #tpu.pipeline_mode<synchronous>, transform_indices = @transform_10, window_bounds = array<i64: 1, 128>}, {pipeline_mode = #tpu.pipeline_mode<synchronous>, transform_indices = @transform_11, window_bounds = array<i64: 1, 128>}, {pipeline_mode = #tpu.pipeline_mode<synchronous>, transform_indices = @transform_12, window_bounds = array<i64: 128, 128>}, {pipeline_mode = #tpu.pipeline_mode<synchronous>, transform_indices = @transform_13, window_bounds = array<i64: 1, 128>}, {pipeline_mode = #tpu.pipeline_mode<synchronous>, transform_indices = @transform_14, window_bounds = array<i64: 1, 128>}, {pipeline_mode = #tpu.pipeline_mode<synchronous>, transform_indices = @transform_15, window_bounds = array<i64: 1, 128>}, {transform_indices = @transform_16, window_bounds = array<i64: 128, 128>}]} {
    %c0 = arith.constant 0 : index
    %0 = memref.load %arg4[%c0] : memref<1xf32, #tpu.memory_space<smem>>
    %1 = tpu.iota {dimensions = array<i32: 1>} : vector<1x128xi32>
    %c64_i32 = arith.constant 64 : i32
    %2 = vector.broadcast %c64_i32 : i32 to vector<1x128xi32>
    %3 = arith.cmpi slt, %1, %2 : vector<1x128xi32>
    %4 = arith.extui %3 : vector<1x128xi1> to vector<1x128xi32>
    %5 = arith.sitofp %4 : vector<1x128xi32> to vector<1x128xf32>
    %c32_i32 = arith.constant 32 : i32
    %6 = vector.broadcast %c32_i32 : i32 to vector<1x128xi32>
    %7 = arith.cmpi slt, %1, %6 : vector<1x128xi32>
    %8 = arith.extui %7 : vector<1x128xi1> to vector<1x128xi32>
    %9 = arith.sitofp %8 : vector<1x128xi32> to vector<1x128xf32>
    %c0_0 = arith.constant 0 : index
    %c0_1 = arith.constant 0 : index
    %10 = vector.load %arg1[%c0_0, %c0_1] : memref<64x128xf32, #tpu.memory_space<vmem>>, vector<64x128xf32>
    %c0_2 = arith.constant 0 : index
    %c0_3 = arith.constant 0 : index
    %11 = vector.load %arg5[%c0_2, %c0_3] : memref<128x128xf32, #tpu.memory_space<vmem>>, vector<128x128xf32>
    %cst = arith.constant dense<0.000000e+00> : vector<64x128xf32>
    %12 = tpu.matmul %10, %11, %cst {dimension_numbers = #tpu.dot_dimension_numbers<[1], [0], [0], [1], [0, 0, 1, 1], [], []>, precision = #tpu.contract_precision<fp32>} : vector<64x128xf32>, vector<128x128xf32>, vector<64x128xf32> -> vector<64x128xf32>
    %c0_4 = arith.constant 0 : index
    %c0_5 = arith.constant 0 : index
    %13 = vector.load %arg6[%c0_4, %c0_5] : memref<1x128xf32, #tpu.memory_space<vmem>>, vector<1x128xf32>
    %14 = vector.broadcast %13 : vector<1x128xf32> to vector<64x128xf32>
    %15 = arith.addf %12, %14 : vector<64x128xf32>
    %cst_6 = arith.constant 0.000000e+00 : f32
    %16 = vector.broadcast %cst_6 : f32 to vector<64x128xf32>
    %17 = arith.maximumf %15, %16 : vector<64x128xf32>
    %cst_7 = arith.constant 1.000000e-07 : f32
    %18 = vector.broadcast %cst_7 : f32 to vector<64x128xf32>
    %19 = arith.addf %17, %18 : vector<64x128xf32>
    %20 = vector.broadcast %0 : f32 to vector<64x128xf32>
    %21 = arith.mulf %20, %19 : vector<64x128xf32>
    %cst_8 = arith.constant dense<0xFF800000> : vector<128xf32>
    %22 = vector.multi_reduction <maximumf>, %21, %cst_8 [0] : vector<64x128xf32> to vector<128xf32>
    %23 = vector.shape_cast %22 : vector<128xf32> to vector<1x128xf32>
    %24 = vector.broadcast %23 : vector<1x128xf32> to vector<64x128xf32>
    %25 = arith.subf %21, %24 : vector<64x128xf32>
    %26 = math.exp %25 : vector<64x128xf32>
    %c0_9 = arith.constant 0 : index
    %c0_10 = arith.constant 0 : index
    %27 = vector.load %arg3[%c0_9, %c0_10] : memref<128x64xf32, #tpu.memory_space<vmem>>, vector<128x64xf32>
    %cst_11 = arith.constant dense<0.000000e+00> : vector<128x128xf32>
    %28 = tpu.matmul %27, %26, %cst_11 {dimension_numbers = #tpu.dot_dimension_numbers<[1], [0], [0], [1], [0, 0, 1, 1], [], []>, precision = #tpu.contract_precision<fp32>} : vector<128x64xf32>, vector<64x128xf32>, vector<128x128xf32> -> vector<128x128xf32>
    %29 = arith.mulf %26, %19 : vector<64x128xf32>
    %cst_12 = arith.constant dense<0.000000e+00> : vector<128x128xf32>
    %30 = tpu.matmul %27, %29, %cst_12 {dimension_numbers = #tpu.dot_dimension_numbers<[1], [0], [0], [1], [0, 0, 1, 1], [], []>, precision = #tpu.contract_precision<fp32>} : vector<128x64xf32>, vector<64x128xf32>, vector<128x128xf32> -> vector<128x128xf32>
    %cst_13 = arith.constant 1.000000e-16 : f32
    %31 = vector.broadcast %cst_13 : f32 to vector<128x128xf32>
    %32 = arith.maximumf %28, %31 : vector<128x128xf32>
    %33 = tpu.reciprocal %32 {approx = true} : vector<128x128xf32> -> vector<128x128xf32>
    %34 = arith.mulf %30, %33 : vector<128x128xf32>
    %c0_14 = arith.constant 0 : index
    %c0_15 = arith.constant 0 : index
    %35 = vector.load %arg2[%c0_14, %c0_15] : memref<128x128xf32, #tpu.memory_space<vmem>>, vector<128x128xf32>
    %c0_16 = arith.constant 0 : index
    %c0_17 = arith.constant 0 : index
    %36 = vector.load %arg7[%c0_16, %c0_17] : memref<128x128xf32, #tpu.memory_space<vmem>>, vector<128x128xf32>
    %cst_18 = arith.constant dense<0.000000e+00> : vector<128x128xf32>
    %37 = tpu.matmul %35, %36, %cst_18 {dimension_numbers = #tpu.dot_dimension_numbers<[1], [0], [0], [1], [0, 0, 1, 1], [], []>, precision = #tpu.contract_precision<fp32>} : vector<128x128xf32>, vector<128x128xf32>, vector<128x128xf32> -> vector<128x128xf32>
    %38 = arith.addf %34, %37 : vector<128x128xf32>
    %c0_19 = arith.constant 0 : index
    %c0_20 = arith.constant 0 : index
    %39 = vector.load %arg8[%c0_19, %c0_20] : memref<1x128xf32, #tpu.memory_space<vmem>>, vector<1x128xf32>
    %40 = vector.broadcast %39 : vector<1x128xf32> to vector<128x128xf32>
    %41 = arith.addf %38, %40 : vector<128x128xf32>
    %c0_21 = arith.constant 0 : index
    %c0_22 = arith.constant 0 : index
    %42 = vector.load %arg9[%c0_21, %c0_22] : memref<128x128xf32, #tpu.memory_space<vmem>>, vector<128x128xf32>
    %cst_23 = arith.constant dense<0.000000e+00> : vector<128x128xf32>
    %43 = tpu.matmul %41, %42, %cst_23 {dimension_numbers = #tpu.dot_dimension_numbers<[1], [0], [0], [1], [0, 0, 1, 1], [], []>, precision = #tpu.contract_precision<fp32>} : vector<128x128xf32>, vector<128x128xf32>, vector<128x128xf32> -> vector<128x128xf32>
    %c0_24 = arith.constant 0 : index
    %c0_25 = arith.constant 0 : index
    %44 = vector.load %arg10[%c0_24, %c0_25] : memref<1x128xf32, #tpu.memory_space<vmem>>, vector<1x128xf32>
    %45 = vector.broadcast %44 : vector<1x128xf32> to vector<128x128xf32>
    %46 = arith.addf %43, %45 : vector<128x128xf32>
    %c0_26 = arith.constant 0 : index
    %c0_27 = arith.constant 0 : index
    %47 = vector.load %arg11[%c0_26, %c0_27] : memref<1x128xf32, #tpu.memory_space<vmem>>, vector<1x128xf32>
    %c0_28 = arith.constant 0 : index
    %c0_29 = arith.constant 0 : index
    %48 = vector.load %arg12[%c0_28, %c0_29] : memref<1x128xf32, #tpu.memory_space<vmem>>, vector<1x128xf32>
    %49 = vector.broadcast %5 : vector<1x128xf32> to vector<128x128xf32>
    %50 = arith.mulf %46, %49 : vector<128x128xf32>
    %cst_30 = arith.constant dense<0.000000e+00> : vector<128xf32>
    %51 = vector.multi_reduction <add>, %50, %cst_30 [1] : vector<128x128xf32> to vector<128xf32>
    %52 = vector.shape_cast %51 : vector<128xf32> to vector<128x1xf32>
    %cst_31 = arith.constant 1.562500e-02 : f32
    %53 = vector.broadcast %cst_31 : f32 to vector<128x1xf32>
    %54 = arith.mulf %52, %53 : vector<128x1xf32>
    %55 = vector.broadcast %54 : vector<128x1xf32> to vector<128x128xf32>
    %56 = arith.subf %46, %55 : vector<128x128xf32>
    %57 = vector.broadcast %5 : vector<1x128xf32> to vector<128x128xf32>
    %58 = arith.mulf %56, %57 : vector<128x128xf32>
    %59 = arith.mulf %58, %58 : vector<128x128xf32>
    %cst_32 = arith.constant dense<0.000000e+00> : vector<128xf32>
    %60 = vector.multi_reduction <add>, %59, %cst_32 [1] : vector<128x128xf32> to vector<128xf32>
    %61 = vector.shape_cast %60 : vector<128xf32> to vector<128x1xf32>
    %cst_33 = arith.constant 1.562500e-02 : f32
    %62 = vector.broadcast %cst_33 : f32 to vector<128x1xf32>
    %63 = arith.mulf %61, %62 : vector<128x1xf32>
    %64 = vector.broadcast %54 : vector<128x1xf32> to vector<128x128xf32>
    %65 = arith.subf %46, %64 : vector<128x128xf32>
    %cst_34 = arith.constant 9.99999974E-6 : f32
    %66 = vector.broadcast %cst_34 : f32 to vector<128x1xf32>
    %67 = arith.addf %63, %66 : vector<128x1xf32>
    %68 = math.rsqrt %67 : vector<128x1xf32>
    %69 = vector.broadcast %68 : vector<128x1xf32> to vector<128x128xf32>
    %70 = arith.mulf %65, %69 : vector<128x128xf32>
    %71 = vector.broadcast %47 : vector<1x128xf32> to vector<128x128xf32>
    %72 = arith.mulf %70, %71 : vector<128x128xf32>
    %73 = vector.broadcast %48 : vector<1x128xf32> to vector<128x128xf32>
    %74 = arith.addf %72, %73 : vector<128x128xf32>
    %cst_35 = arith.constant 0.000000e+00 : f32
    %75 = vector.broadcast %cst_35 : f32 to vector<128x128xf32>
    %76 = arith.maximumf %74, %75 : vector<128x128xf32>
    %c0_36 = arith.constant 0 : index
    %c0_37 = arith.constant 0 : index
    %77 = vector.load %arg13[%c0_36, %c0_37] : memref<128x128xf32, #tpu.memory_space<vmem>>, vector<128x128xf32>
    %cst_38 = arith.constant dense<0.000000e+00> : vector<128x128xf32>
    %78 = tpu.matmul %76, %77, %cst_38 {dimension_numbers = #tpu.dot_dimension_numbers<[1], [0], [0], [1], [0, 0, 1, 1], [], []>, precision = #tpu.contract_precision<fp32>} : vector<128x128xf32>, vector<128x128xf32>, vector<128x128xf32> -> vector<128x128xf32>
    %c0_39 = arith.constant 0 : index
    %c0_40 = arith.constant 0 : index
    %79 = vector.load %arg14[%c0_39, %c0_40] : memref<1x128xf32, #tpu.memory_space<vmem>>, vector<1x128xf32>
    %80 = vector.broadcast %79 : vector<1x128xf32> to vector<128x128xf32>
    %81 = arith.addf %78, %80 : vector<128x128xf32>
    %c0_41 = arith.constant 0 : index
    %c0_42 = arith.constant 0 : index
    %82 = vector.load %arg15[%c0_41, %c0_42] : memref<1x128xf32, #tpu.memory_space<vmem>>, vector<1x128xf32>
    %c0_43 = arith.constant 0 : index
    %c0_44 = arith.constant 0 : index
    %83 = vector.load %arg16[%c0_43, %c0_44] : memref<1x128xf32, #tpu.memory_space<vmem>>, vector<1x128xf32>
    %84 = vector.broadcast %9 : vector<1x128xf32> to vector<128x128xf32>
    %85 = arith.mulf %81, %84 : vector<128x128xf32>
    %cst_45 = arith.constant dense<0.000000e+00> : vector<128xf32>
    %86 = vector.multi_reduction <add>, %85, %cst_45 [1] : vector<128x128xf32> to vector<128xf32>
    %87 = vector.shape_cast %86 : vector<128xf32> to vector<128x1xf32>
    %cst_46 = arith.constant 3.125000e-02 : f32
    %88 = vector.broadcast %cst_46 : f32 to vector<128x1xf32>
    %89 = arith.mulf %87, %88 : vector<128x1xf32>
    %90 = vector.broadcast %89 : vector<128x1xf32> to vector<128x128xf32>
    %91 = arith.subf %81, %90 : vector<128x128xf32>
    %92 = vector.broadcast %9 : vector<1x128xf32> to vector<128x128xf32>
    %93 = arith.mulf %91, %92 : vector<128x128xf32>
    %94 = arith.mulf %93, %93 : vector<128x128xf32>
    %cst_47 = arith.constant dense<0.000000e+00> : vector<128xf32>
    %95 = vector.multi_reduction <add>, %94, %cst_47 [1] : vector<128x128xf32> to vector<128xf32>
    %96 = vector.shape_cast %95 : vector<128xf32> to vector<128x1xf32>
    %cst_48 = arith.constant 3.125000e-02 : f32
    %97 = vector.broadcast %cst_48 : f32 to vector<128x1xf32>
    %98 = arith.mulf %96, %97 : vector<128x1xf32>
    %99 = vector.broadcast %89 : vector<128x1xf32> to vector<128x128xf32>
    %100 = arith.subf %81, %99 : vector<128x128xf32>
    %cst_49 = arith.constant 9.99999974E-6 : f32
    %101 = vector.broadcast %cst_49 : f32 to vector<128x1xf32>
    %102 = arith.addf %98, %101 : vector<128x1xf32>
    %103 = math.rsqrt %102 : vector<128x1xf32>
    %104 = vector.broadcast %103 : vector<128x1xf32> to vector<128x128xf32>
    %105 = arith.mulf %100, %104 : vector<128x128xf32>
    %106 = vector.broadcast %82 : vector<1x128xf32> to vector<128x128xf32>
    %107 = arith.mulf %105, %106 : vector<128x128xf32>
    %108 = vector.broadcast %83 : vector<1x128xf32> to vector<128x128xf32>
    %109 = arith.addf %107, %108 : vector<128x128xf32>
    %cst_50 = arith.constant 5.000000e-01 : f32
    %110 = vector.broadcast %cst_50 : f32 to vector<128x128xf32>
    %111 = arith.mulf %110, %109 : vector<128x128xf32>
    %cst_51 = arith.constant 4.471500e-02 : f32
    %112 = vector.broadcast %cst_51 : f32 to vector<128x128xf32>
    %113 = arith.mulf %112, %109 : vector<128x128xf32>
    %114 = arith.mulf %113, %109 : vector<128x128xf32>
    %115 = arith.mulf %114, %109 : vector<128x128xf32>
    %116 = arith.addf %109, %115 : vector<128x128xf32>
    %cst_52 = arith.constant 0.797884583 : f32
    %117 = vector.broadcast %cst_52 : f32 to vector<128x128xf32>
    %118 = arith.mulf %117, %116 : vector<128x128xf32>
    %119 = math.tanh %118 : vector<128x128xf32>
    %cst_53 = arith.constant 1.000000e+00 : f32
    %120 = vector.broadcast %cst_53 : f32 to vector<128x128xf32>
    %121 = arith.addf %120, %119 : vector<128x128xf32>
    %122 = arith.mulf %111, %121 : vector<128x128xf32>
    %c0_54 = arith.constant 0 : index
    %c0_55 = arith.constant 0 : index
    %123 = vector.load %arg17[%c0_54, %c0_55] : memref<128x128xf32, #tpu.memory_space<vmem>>, vector<128x128xf32>
    tpu.vector_store %arg17[%c0_54, %c0_55], %122 {strides = array<i32>} : memref<128x128xf32, #tpu.memory_space<vmem>>, vector<128x128xf32>,
    return
  }
  func.func @transform_0(%arg0: i32) -> (i32, i32) {
    %c0_i32 = arith.constant 0 : i32
    %c0_i32_0 = arith.constant 0 : i32
    %c0_i32_1 = arith.constant 0 : i32
    return %c0_i32, %c0_i32_0 : i32, i32
  }
  func.func @transform_1(%arg0: i32) -> (i32, i32) {
    %c0_i32 = arith.constant 0 : i32
    %c0_i32_0 = arith.constant 0 : i32
    return %arg0, %c0_i32 : i32, i32
  }
  func.func @transform_2(%arg0: i32) -> (i32, i32) {
    %c0_i32 = arith.constant 0 : i32
    %c0_i32_0 = arith.constant 0 : i32
    return %arg0, %c0_i32 : i32, i32
  }
  func.func @transform_3(%arg0: i32) -> i32 {
    %c0_i32 = arith.constant 0 : i32
    %c0_i32_0 = arith.constant 0 : i32
    return %c0_i32 : i32
  }
  func.func @transform_4(%arg0: i32) -> (i32, i32) {
    %c0_i32 = arith.constant 0 : i32
    %c0_i32_0 = arith.constant 0 : i32
    %c0_i32_1 = arith.constant 0 : i32
    return %c0_i32, %c0_i32_0 : i32, i32
  }
  func.func @transform_5(%arg0: i32) -> (i32, i32) {
    %c0_i32 = arith.constant 0 : i32
    %c0_i32_0 = arith.constant 0 : i32
    %c0_i32_1 = arith.constant 0 : i32
    return %c0_i32, %c0_i32_0 : i32, i32
  }
  func.func @transform_6(%arg0: i32) -> (i32, i32) {
    %c0_i32 = arith.constant 0 : i32
    %c0_i32_0 = arith.constant 0 : i32
    %c0_i32_1 = arith.constant 0 : i32
    return %c0_i32, %c0_i32_0 : i32, i32
  }
  func.func @transform_7(%arg0: i32) -> (i32, i32) {
    %c0_i32 = arith.constant 0 : i32
    %c0_i32_0 = arith.constant 0 : i32
    %c0_i32_1 = arith.constant 0 : i32
    return %c0_i32, %c0_i32_0 : i32, i32
  }
  func.func @transform_8(%arg0: i32) -> (i32, i32) {
    %c0_i32 = arith.constant 0 : i32
    %c0_i32_0 = arith.constant 0 : i32
    %c0_i32_1 = arith.constant 0 : i32
    return %c0_i32, %c0_i32_0 : i32, i32
  }
  func.func @transform_9(%arg0: i32) -> (i32, i32) {
    %c0_i32 = arith.constant 0 : i32
    %c0_i32_0 = arith.constant 0 : i32
    %c0_i32_1 = arith.constant 0 : i32
    return %c0_i32, %c0_i32_0 : i32, i32
  }
  func.func @transform_10(%arg0: i32) -> (i32, i32) {
    %c0_i32 = arith.constant 0 : i32
    %c0_i32_0 = arith.constant 0 : i32
    %c0_i32_1 = arith.constant 0 : i32
    return %c0_i32, %c0_i32_0 : i32, i32
  }
  func.func @transform_11(%arg0: i32) -> (i32, i32) {
    %c0_i32 = arith.constant 0 : i32
    %c0_i32_0 = arith.constant 0 : i32
    %c0_i32_1 = arith.constant 0 : i32
    return %c0_i32, %c0_i32_0 : i32, i32
  }
  func.func @transform_12(%arg0: i32) -> (i32, i32) {
    %c0_i32 = arith.constant 0 : i32
    %c0_i32_0 = arith.constant 0 : i32
    %c0_i32_1 = arith.constant 0 : i32
    return %c0_i32, %c0_i32_0 : i32, i32
  }
  func.func @transform_13(%arg0: i32) -> (i32, i32) {
    %c0_i32 = arith.constant 0 : i32
    %c0_i32_0 = arith.constant 0 : i32
    %c0_i32_1 = arith.constant 0 : i32
    return %c0_i32, %c0_i32_0 : i32, i32
  }
  func.func @transform_14(%arg0: i32) -> (i32, i32) {
    %c0_i32 = arith.constant 0 : i32
    %c0_i32_0 = arith.constant 0 : i32
    %c0_i32_1 = arith.constant 0 : i32
    return %c0_i32, %c0_i32_0 : i32, i32
  }
  func.func @transform_15(%arg0: i32) -> (i32, i32) {
    %c0_i32 = arith.constant 0 : i32
    %c0_i32_0 = arith.constant 0 : i32
    %c0_i32_1 = arith.constant 0 : i32
    return %c0_i32, %c0_i32_0 : i32, i32
  }
  func.func @transform_16(%arg0: i32) -> (i32, i32) {
    %c0_i32 = arith.constant 0 : i32
    %c0_i32_0 = arith.constant 0 : i32
    return %arg0, %c0_i32 : i32, i32
  }
}

</mosaic_0001>

<bundles_post_ra>
// kernel: tpu_custom_call.1
= control target key start
LH: loop header
LB: loop body
LE: loop exit
PB: predicated region body
PF: predicated region fallthrough
CT: control target
= control target key end

     0   :  { %s16043_s0 = inlined_call_operand.vmem [shape: f32[64,128], index: 0, kind: input, shape index: {}]   ;;  %s16044_s1 = inlined_call_operand.vmem [shape: f32[128,128], index: 1, kind: input, shape index: {}]   ;;  %s16045_s2 = inlined_call_operand.vmem [shape: f32[128,64], index: 2, kind: input, shape index: {}]   ;;  %s16046_s3 = inlined_call_operand.<no memory space> [shape: f32[1], index: 3, kind: input, shape index: {}]   ;;  %s16047_s4 = inlined_call_operand.hbm [shape: f32[128,128], index: 4, kind: input, shape index: {}]   ;;  %s16048_s5 = inlined_call_operand.vmem [shape: f32[1,128], index: 5, kind: input, shape index: {}]   ;;  %s16049_s6 = inlined_call_operand.hbm [shape: f32[128,128], index: 6, kind: input, shape index: {}]   ;;  %s16050_s7 = inlined_call_operand.vmem [shape: f32[1,128], index: 7, kind: input, shape index: {}]   ;;  %s16051_s8 = inlined_call_operand.hbm [shape: f32[128,128], index: 8, kind: input, shape index: {}]   ;;  %s16052_s9 = inlined_call_operand.vmem [shape: f32[1,128], index: 9, kind: input, shape index: {}]   ;;  %s16053_s10 = inlined_call_operand.vmem [shape: f32[1,128], index: 10, kind: input, shape index: {}]   ;;  %s16054_s11 = inlined_call_operand.vmem [shape: f32[1,128], index: 11, kind: input, shape index: {}]   ;;  %s16055_s12 = inlined_call_operand.hbm [shape: f32[128,128], index: 12, kind: input, shape index: {}]   ;;  %s16056_s13 = inlined_call_operand.vmem [shape: f32[1,128], index: 13, kind: input, shape index: {}]   ;;  %s16057_s14 = inlined_call_operand.vmem [shape: f32[1,128], index: 14, kind: input, shape index: {}]   ;;  %s16058_s15 = inlined_call_operand.vmem [shape: f32[1,128], index: 15, kind: input, shape index: {}]   ;;  %s16059_s16 = inlined_call_operand.hbm [shape: f32[128,128], index: 16, kind: output, shape index: {}]  }
   0x1   :  { %16335 = sst [smem:[#allocation164_spill]] %s16043_s0 }
   0x2   :  { %22 = vsyncpa [#allocation4], 0 }
   0x3   :  { %23 = vsyncpa [#allocation7], 0 }
   0x4   :  { %24 = vsyncpa [#allocation10], 0 }
   0x5   :  { %25 = vsyncpa [#allocation5], 0  ;;  %s11347_s21 = smov [#allocation6]   ;;  %s11348_s23 = smov [#allocation3]  }
   0x6   :  { %s53_s22 = sshll.u32 %s11347_s21, 4  ;;  %s39_s24 = sshll.u32 %s11348_s23, 4  ;;  %s54_s22 = int_to_ptr.vmem [resolvable:$true] %s53_s22  ;;  %s40_s24 = int_to_ptr.vmem [resolvable:$true] %s39_s24 }
   0x7   :  { %s11247_s25 = scalar_lea.vmem %s54_s22, 2048  ;;  %p11252_p1 = scmp.lt.s32.totalorder %s54_s22, %s54_s22 }
   0x8   :  { %p11248_p0 = scmp.ne.s32.totalorder %s54_s22, %s11247_s25  ;;  %p11253_p2 = scmp.lt.s32.totalorder %s11247_s25, %s11247_s25 }
   0xa   :  { %p11254_p3 = por %p11253_p2, %p11252_p1 }
   0xc   :  { %p11255_p4 = pnand %p11254_p3, %p11248_p0 }
   0xe   :  { %11258 = shalt.err (!%p11255_p4)
}
   0xf   :  { %s11349_s26 = smov 128   ;;  %s11350_s27 = smov 8  }
  0x10   :  { %59 = dma.hbm_to_vmem [thread:$0]  %s16049_s6, 2048, %s54_s22, [#allocation7], %s11349_s26, %s11349_s26, %s11350_s27  }
  0x11   :  { %s11267_s30 = scalar_lea.vmem %s40_s24, 2048  ;;  %p11272_p6 = scmp.lt.s32.totalorder %s40_s24, %s40_s24 }
  0x12   :  { %p11268_p5 = scmp.ne.s32.totalorder %s40_s24, %s11267_s30  ;;  %p11273_p7 = scmp.lt.s32.totalorder %s11267_s30, %s11267_s30 }
  0x14   :  { %p11274_p8 = por %p11273_p7, %p11272_p6 }
  0x16   :  { %p11275_p9 = pnand %p11274_p8, %p11268_p5 }
  0x18   :  { %11278 = shalt.err (!%p11275_p9)
}
  0x19   :  { %45 = dma.hbm_to_vmem [thread:$0]  %s16047_s4, 2048, %s40_s24, [#allocation4], %s11349_s26, %s11349_s26, %s11350_s27  }
  0x1a   :  { %s11351_s18 = smov [#allocation8]   ;;  %s11352_s20 = smov [#allocation9]  }
  0x1b   :  { %s67_s19 = sshll.u32 %s11351_s18, 4  ;;  %s85_s21 = sshll.u32 %s11352_s20, 4  ;;  %s68_s19 = int_to_ptr.vmem [resolvable:$true] %s67_s19  ;;  %s86_s21 = int_to_ptr.vmem [resolvable:$true] %s85_s21 }
  0x1c   :  { %s11287_s6 = scalar_lea.vmem %s68_s19, 2048  ;;  %p11292_p11 = scmp.lt.s32.totalorder %s68_s19, %s68_s19 }
  0x1d   :  { %p11288_p10 = scmp.ne.s32.totalorder %s68_s19, %s11287_s6  ;;  %p11293_p12 = scmp.lt.s32.totalorder %s11287_s6, %s11287_s6 }
  0x1f   :  { %p11294_p13 = por %p11293_p12, %p11292_p11 }
  0x21   :  { %p11295_p0 = pnand %p11294_p13, %p11288_p10 }
  0x23   :  { %11298 = shalt.err (!%p11295_p0)
}
  0x24   :  { %73 = dma.hbm_to_vmem [thread:$0]  %s16051_s8, 2048, %s68_s19, [#allocation7], %s11349_s26, %s11349_s26, %s11350_s27  }
  0x25   :  { %s11307_s4 = scalar_lea.vmem %s86_s21, 2048  ;;  %p11312_p2 = scmp.lt.s32.totalorder %s86_s21, %s86_s21 }
  0x26   :  { %p11308_p1 = scmp.ne.s32.totalorder %s86_s21, %s11307_s4  ;;  %p11313_p3 = scmp.lt.s32.totalorder %s11307_s4, %s11307_s4 }
  0x28   :  { %p11314_p4 = por %p11313_p3, %p11312_p2 }
  0x2a   :  { %p11315_p5 = pnand %p11314_p4, %p11308_p1 }
  0x2c   :  { %11318 = shalt.err (!%p11315_p5)
}
  0x2d   :  { %91 = dma.hbm_to_vmem [thread:$0]  %s16055_s12, 2048, %s86_s21, [#allocation10], %s11349_s26, %s11349_s26, %s11350_s27  }
  0x2e   :  { %11339 = dma.done.wait [#allocation4], 2048  }
  0x2f   :  { %11340 = vsyncadd [#allocation4], 4294965248 }
  0x30   :  { %11341 = dma.done.wait [#allocation7], 4096  }
  0x31   :  { %11342 = vsyncadd [#allocation7], 4294963200 }
  0x32   :  { %11343 = dma.done.wait [#allocation10], 2048  }
  0x33   :  { %11344 = vsyncadd [#allocation10], 4294965248  ;;  %v142_v0 = vld [vmem:[#allocation3 + $0x78] sm:$0xff]  ;;  %v141_v1 = vld [vmem:[#allocation3 + $0x70] sm:$0xff]  ;;  %s16336_s28 = sld [smem:[#allocation164_spill]]  ;;  %vm1170_vm0 = vcmask 523264  }
  0x34   :  { %v140_v2 = vld [vmem:[#allocation3 + $0x68] sm:$0xff]  ;;  %v11464_v3 = vand.u32 4294901760, %v142_v0  ;;  %v11466_v4 = vand.u32 4294901760, %v141_v1  ;;  %v139_v6 = vld [vmem:[#allocation3 + $0x60] sm:$0xff]  ;;  %v138_v7 = vld [vmem:[#allocation3 + $0x58] sm:$0xff] }
  0x35   :  { %v11468_v5 = vand.u32 4294901760, %v140_v2  ;;  %v137_v8 = vld [vmem:[#allocation3 + $0x50] sm:$0xff]  ;;  %v11470_v9 = vand.u32 4294901760, %v139_v6  ;;  %v11472_v10 = vand.u32 4294901760, %v138_v7  ;;  %v136_v12 = vld [vmem:[#allocation3 + $0x48] sm:$0xff]  ;;  %v135_v13 = vld [vmem:[#allocation3 + $0x40] sm:$0xff] }
  0x36   :  { %v11474_v11 = vand.u32 4294901760, %v137_v8  ;;  %9335 = vmatprep.subr.mxu0 %v11464_v3  ;;  %v11478_v14 = vsub.f32 %v142_v0, %v11464_v3  ;;  %v11481_v15 = vsub.f32 %v141_v1, %v11466_v4  ;;  %v11483_v16 = vand.u32 4294901760, %v136_v12  ;;  %v134_v18 = vld [vmem:[#allocation3 + $0x38] sm:$0xff]  ;;  %v133_v25 = vld [vmem:[#allocation3 + $0x30] sm:$0xff]  ;;  %v132_v35 = vld [vmem:[#allocation3 + $0x28] sm:$0xff] }
  0x37   :  { %v11486_v17 = vsub.f32 %v140_v2, %v11468_v5  ;;  %9336 = vmatpush3.msra.mxu0 %v11464_v3  ;;  %v11490_v19 = vsub.f32 %v139_v6, %v11470_v9  ;;  %v11493_v20 = vsub.f32 %v138_v7, %v11472_v10  ;;  %v11505_v24 = vand.u32 4294901760, %v135_v13  ;;  %v131_v40 = vld [vmem:[#allocation3 + $0x20] sm:$0xff]  ;;  %v130_v48 = vld [vmem:[#allocation3 + $0x18] sm:$0xff]  ;;  %v129_v59 = vld [vmem:[#allocation3 + $0x10] sm:$0xff] }
  0x38   :  { %9337 = vmatprep.subr.mxu0 %v11466_v4  ;;  %v11497_v21 = vand.u32 4294901760, %v11478_v14  ;;  %v11500_v22 = vand.u32 4294901760, %v11481_v15  ;;  %v11511_v27 = vand.u32 4294901760, %v134_v18  ;;  %v11517_v29 = vsub.f32 %v137_v8, %v11474_v11  ;;  %v128_v2 = vld [vmem:[#allocation3 + $0x8] sm:$0xff] }
  0x39   :  { %v11503_v23 = vand.u32 4294901760, %v11486_v17  ;;  %9338 = vmatpush3.msra.mxu0 %v11466_v4  ;;  %v11509_v26 = vand.u32 4294901760, %v11490_v19  ;;  %v11514_v28 = vand.u32 4294901760, %v11493_v20  ;;  %v11527_v33 = vsub.f32 %v136_v12, %v11483_v16  ;;  %v119_v49 = vld [vmem:[%s16336_s28] sm:$0xff]  ;;  %v120_v54 = vld [vmem:[%s16336_s28 + $0x8] sm:$0xff] }
  0x3a   :  { %9339 = vmatprep.subr.mxu0 %v11468_v5  ;;  %v315_v30 = vsub.f32 %v11478_v14, %v11497_v21  ;;  %v322_v31 = vsub.f32 %v11481_v15, %v11500_v22  ;;  %v11530_v34 = vand.u32 4294901760, %v133_v25  ;;  %v11536_v39 = vand.u32 4294901760, %v11517_v29 }
  0x3b   :  { %v329_v32 = vsub.f32 %v11486_v17, %v11503_v23  ;;  %9340 = vmatpush3.msra.mxu0 %v11468_v5  ;;  %v336_v38 = vsub.f32 %v11490_v19, %v11509_v26  ;;  %v343_v41 = vsub.f32 %v11493_v20, %v11514_v28  ;;  %v11542_v42 = vand.u32 4294901760, %v11527_v33 }
  0x3c   :  { %9341 = vmatprep.subr.mxu0 %v11470_v9  ;;  %v316_v36 = vand.u32 4294901760, %v315_v30  ;;  %v323_v37 = vand.u32 4294901760, %v322_v31  ;;  %v11545_v43 = vsub.f32 %v135_v13, %v11505_v24  ;;  %v11548_v45 = vand.u32 4294901760, %v132_v35 }
  0x3d   :  { %9342 = vmatpush3.msra.mxu0 %v11470_v9  ;;  %v330_v44 = vand.u32 4294901760, %v329_v32  ;;  %v11551_v46 = vsub.f32 %v134_v18, %v11511_v27  ;;  %v11554_v47 = vand.u32 4294901760, %v131_v40  ;;  %v337_v50 = vand.u32 4294901760, %v336_v38  ;;  %v127_v18 = vld [vmem:[#allocation3] sm:$0xff] }
  0x3e   :  { %9343 = vmatprep.subr.mxu0 %v11472_v10  ;;  %9379 = vmatprep.subr.mxu1 %v316_v36  ;;  %v350_v51 = vsub.f32 %v11517_v29, %v11536_v39  ;;  %v11563_v52 = vand.u32 4294901760, %v11545_v43  ;;  %v11566_v53 = vsub.f32 %v133_v25, %v11530_v34  ;;  %v344_v55 = vand.u32 4294901760, %v343_v41 }
  0x3f   :  { %9344 = vmatpush3.msra.mxu0 %v11472_v10  ;;  %9380 = vmatpush3.msra.mxu1 %v316_v36  ;;  %v357_v56 = vsub.f32 %v11527_v33, %v11542_v42  ;;  %v11575_v57 = vand.u32 4294901760, %v130_v48  ;;  %v11578_v58 = vand.u32 4294901760, %v11551_v46  ;;  %v11581_v60 = vsub.f32 %v132_v35, %v11548_v45 }
  0x40   :  { %9345 = vmatprep.subr.mxu0 %v11474_v11  ;;  %9381 = vmatprep.subr.mxu1 %v323_v37  ;;  %v11583_v61 = vand.u32 4294901760, %v119_v49  ;;  %v11586_v62 = vand.u32 4294901760, %v120_v54  ;;  %v351_v63 = vand.u32 4294901760, %v350_v51  ;;  %v364_v0 = vsub.f32 %v11545_v43, %v11563_v52 }
  0x41   :  { %9346 = vmatpush3.msra.mxu0 %v11474_v11  ;;  %9382 = vmatpush3.msra.mxu1 %v323_v37  ;;  %v11592_v1 = vand.u32 4294901760, %v11566_v53  ;;  %v11595_v6 = vsub.f32 %v131_v40, %v11554_v47  ;;  %v358_v7 = vand.u32 4294901760, %v357_v56  ;;  %v11598_v8 = vand.u32 4294901760, %v129_v59 }
  0x42   :  { %9347 = vmatprep.subr.mxu0 %v11483_v16  ;;  %9383 = vmatprep.subr.mxu1 %v330_v44  ;;  %v371_v12 = vsub.f32 %v11551_v46, %v11578_v58  ;;  %v11604_v13 = vand.u32 4294901760, %v11581_v60  ;;  %v11607_v25 = vsub.f32 %v119_v49, %v11583_v61  ;;  %v11610_v30 = vsub.f32 %v130_v48, %v11575_v57 }
  0x43   :  { %9348 = vmatpush3.msra.mxu0 %v11483_v16  ;;  %9384 = vmatpush3.msra.mxu1 %v330_v44  ;;  %v11613_v31 = vand.u32 4294901760, %v128_v2  ;;  %v11616_v32 = vsub.f32 %v120_v54, %v11586_v62  ;;  %v365_v35 = vand.u32 4294901760, %v364_v0  ;;  %v378_v36 = vsub.f32 %v11566_v53, %v11592_v1 }
  0x44   :  { %9349 = vmatprep.subr.mxu0 %v11505_v24  ;;  %9385 = vmatprep.subr.mxu1 %v337_v50  ;;  %v11622_v37 = vand.u32 4294901760, %v11595_v6  ;;  %v11625_v38 = vand.u32 4294901760, %v127_v18  ;;  %v11628_v40 = vsub.f32 %v129_v59, %v11598_v8  ;;  %v372_v41 = vand.u32 4294901760, %v371_v12 }
  0x45   :  { %9350 = vmatpush3.msra.mxu0 %v11505_v24  ;;  %9386 = vmatpush3.msra.mxu1 %v337_v50  ;;  %v385_v44 = vsub.f32 %v11581_v60, %v11604_v13  ;;  %v16062_v48 = vand.u32 4294901760, %v11607_v25  ;;  %v11635_v49 = vand.u32 4294901760, %v11610_v30  ;;  %v16061_v50 = vand.u32 4294901760, %v11616_v32 }
  0x46   :  { %9351 = vmatprep.subr.mxu0 %v11511_v27  ;;  %9387 = vmatprep.subr.mxu1 %v344_v55  ;;  %v11640_v51 = vsub.f32 %v128_v2, %v11613_v31  ;;  %v379_v54 = vand.u32 4294901760, %v378_v36  ;;  %v11647_v56 = vand.u32 4294901760, %v11628_v40  ;;  %v11650_v59 = vsub.f32 %v127_v18, %v11625_v38 }
  0x47   :  { %9352 = vmatpush3.msra.mxu0 %v11511_v27  ;;  %9388 = vmatpush3.msra.mxu1 %v344_v55  ;;  %v392_v55 = vsub.f32 %v11595_v6, %v11622_v37  ;;  %v234_v0 = vsub.f32 %v11607_v25, %v16062_v48  ;;  %v399_v2 = vsub.f32 %v11610_v30, %v11635_v49 }
  0x48   :  { %9353 = vmatprep.subr.mxu0 %v11530_v34  ;;  %9389 = vmatprep.subr.mxu1 %v351_v63  ;;  %v11663_v12 = vand.u32 4294901760, %v11640_v51  ;;  %v11670_v36 = vand.u32 4294901760, %v11650_v59 }
  0x49   :  { %9354 = vmatpush3.msra.mxu0 %v11530_v34  ;;  %9390 = vmatpush3.msra.mxu1 %v351_v63  ;;  %v386_v63 = vand.u32 4294901760, %v385_v44  ;;  %v393_v18 = vand.u32 4294901760, %v392_v55  ;;  %v400_v44 = vand.u32 4294901760, %v399_v2 }
  0x4a   :  { %9355 = vmatprep.subr.mxu0 %v11548_v45  ;;  %9391 = vmatprep.subr.mxu1 %v358_v7  ;;  %v413_v55 = vsub.f32 %v11640_v51, %v11663_v12 }
  0x4b   :  { %9356 = vmatpush3.msra.mxu0 %v11548_v45  ;;  %9392 = vmatpush3.msra.mxu1 %v358_v7  ;;  %v244_v7 = vsub.f32 %v11616_v32, %v16061_v50 }
  0x4c   :  { %9357 = vmatprep.subr.mxu0 %v11554_v47  ;;  %9393 = vmatprep.subr.mxu1 %v365_v35  ;;  %v414_v2 = vand.u32 4294901760, %v413_v55 }
  0x4d   :  { %9358 = vmatpush3.msra.mxu0 %v11554_v47  ;;  %9394 = vmatpush3.msra.mxu1 %v365_v35  ;;  %v406_v35 = vsub.f32 %v11628_v40, %v11647_v56  ;;  %v245_v50 = vand.u32 4294901760, %v244_v7 }
  0x4e   :  { %9359 = vmatprep.subr.mxu0 %v11575_v57  ;;  %9395 = vmatprep.subr.mxu1 %v372_v41 }
  0x4f   :  { %9360 = vmatpush3.msra.mxu0 %v11575_v57  ;;  %9396 = vmatpush3.msra.mxu1 %v372_v41  ;;  %v235_v41 = vand.u32 4294901760, %v234_v0  ;;  %v407_v48 = vand.u32 4294901760, %v406_v35  ;;  %v420_v0 = vsub.f32 %v11650_v59, %v11670_v36 }
  0x50   :  { %9361 = vmatprep.subr.mxu0 %v11598_v8  ;;  %9397 = vmatprep.subr.mxu1 %v379_v54 }
  0x51   :  { %9362 = vmatpush3.msra.mxu0 %v11598_v8  ;;  %9398 = vmatpush3.msra.mxu1 %v379_v54  ;;  %v121_v54 = vld [vmem:[%s16336_s28 + $0x10] sm:$0xff]  ;;  %v421_v35 = vand.u32 4294901760, %v420_v0 }
  0x52   :  { %9363 = vmatprep.subr.mxu0 %v11613_v31  ;;  %9399 = vmatprep.subr.mxu1 %v386_v63  ;;  %v11687_v7 = vand.u32 4294901760, %v121_v54 }
  0x53   :  { %9364 = vmatpush3.msra.mxu0 %v11613_v31  ;;  %9400 = vmatpush3.msra.mxu1 %v386_v63  ;;  %v122_v63 = vld [vmem:[%s16336_s28 + $0x18] sm:$0xff] }
  0x54   :  { %9365 = vmatprep.subr.mxu0 %v11625_v38  ;;  %9401 = vmatprep.subr.mxu1 %v393_v18 }
  0x55   :  { %9366 = vmatpush3.msra.mxu0 %v11625_v38  ;;  %9402 = vmatpush3.msra.mxu1 %v393_v18  ;;  %v11690_v18 = vand.u32 4294901760, %v122_v63 }
  0x56   :  { %9367 = vmatprep.mubr.f32.mxu0 %v235_v41  ;;  %9403 = vmatprep.subr.mxu1 %v400_v44  ;;  %v123_v41 = vld [vmem:[%s16336_s28 + $0x20] sm:$0xff] }
  0x57   :  { %9423 = vmatprep.subr.mxu0 %v11478_v14  ;;  %9368 = vmatmul.mubr.f32.vlgmr.msra.gmra.mxu0 %v245_v50  ;;  %v124_v50 = vld [vmem:[%s16336_s28 + $0x28] sm:$0xff]  ;;  %v11708_v55 = vand.u32 4294901760, %v123_v41 }
  0x58   :  { %9404 = vmatpush3.msra.mxu1 %v400_v44  ;;  %9424 = vmatpush3.msra.mxu0 %v11478_v14  ;;  %v11702_v14 = vsub.f32 %v121_v54, %v11687_v7  ;;  %v11706_v44 = vsub.f32 %v122_v63, %v11690_v18  ;;  %v126_v63 = vld [vmem:[%s16336_s28 + $0x38] sm:$0xff] }
  0x59   :  { %9405 = vmatprep.subr.mxu1 %v407_v48  ;;  %9425 = vmatprep.subr.mxu0 %v11481_v15  ;;  %v11724_v0 = vsub.f32 %v123_v41, %v11708_v55 }
  0x5a   :  { %9406 = vmatpush3.msra.mxu1 %v407_v48  ;;  %9426 = vmatpush3.msra.mxu0 %v11481_v15  ;;  %v11711_v15 = vand.u32 4294901760, %v124_v50  ;;  %v125_v48 = vld [vmem:[%s16336_s28 + $0x30] sm:$0xff]  ;;  %v16064_v54 = vand.u32 4294901760, %v11706_v44 }
  0x5b   :  { %9407 = vmatprep.subr.mxu1 %v414_v2  ;;  %9427 = vmatprep.subr.mxu0 %v11486_v17 }
  0x5c   :  { %9408 = vmatpush3.msra.mxu1 %v414_v2  ;;  %9428 = vmatpush3.msra.mxu0 %v11486_v17  ;;  %v16063_v17 = vand.u32 4294901760, %v11702_v14  ;;  %v11734_v2 = vand.u32 4294901760, %v125_v48  ;;  %v264_v41 = vsub.f32 %v11706_v44, %v16064_v54 }
  0x5d   :  { %9409 = vmatprep.subr.mxu1 %v421_v35  ;;  %9429 = vmatprep.subr.mxu0 %v11490_v19 }
  0x5e   :  { %9410 = vmatpush3.msra.mxu1 %v421_v35  ;;  %9411 = vmatprep.mubr.f32.mxu1 %v11583_v61  ;;  %v254_v35 = vsub.f32 %v11702_v14, %v16063_v17  ;;  %v11755_v17 = vsub.f32 %v125_v48, %v11734_v2  ;;  %v16337_v48 = vand.u32 4294901760, %v11724_v0 }
  0x5f   :  { %9430 = vmatpush3.msra.mxu0 %v11490_v19  ;;  %9412 = vmatmul.mubr.f32.vlgmr.msra.gmra.mxu1 %v11586_v62  ;;  %v11732_v19 = vsub.f32 %v124_v50, %v11711_v15 }
  0x60   :  { %9431 = vmatprep.subr.mxu0 %v11493_v20  ;;  %9467 = vmatprep.subr.mxu1 %v11464_v3  ;;  %v255_v54 = vand.u32 4294901760, %v254_v35 }
  0x61   :  { %9432 = vmatpush3.msra.mxu0 %v11493_v20  ;;  %9468 = vmatpush3.msra.mxu1 %v11464_v3  ;;  %v11743_v20 = vand.u32 4294901760, %v126_v63 }
  0x62   :  { %9433 = vmatprep.subr.mxu0 %v11517_v29  ;;  %9469 = vmatprep.subr.mxu1 %v11466_v4 }
  0x63   :  { %9434 = vmatpush3.msra.mxu0 %v11517_v29  ;;  %9470 = vmatpush3.msra.mxu1 %v11466_v4  ;;  %v11762_v50 = vsub.f32 %v126_v63, %v11743_v20  ;;  %v274_v29 = vsub.f32 %v11724_v0, %v16337_v48  ;;  %v293_v63 = vand.u32 4294901760, %v11755_v17 }
  0x64   :  { %9435 = vmatprep.subr.mxu0 %v11527_v33  ;;  %9471 = vmatprep.subr.mxu1 %v11468_v5 }
  0x65   :  { %9436 = vmatpush3.msra.mxu0 %v11527_v33  ;;  %9472 = vmatpush3.msra.mxu1 %v11468_v5  ;;  %v265_v33 = vand.u32 4294901760, %v264_v41  ;;  %v303_v41 = vand.u32 4294901760, %v11762_v50 }
  0x66   :  { %9437 = vmatprep.subr.mxu0 %v11545_v43  ;;  %9473 = vmatprep.subr.mxu1 %v11470_v9 }
  0x67   :  { %9438 = vmatpush3.msra.mxu0 %v11545_v43  ;;  %9474 = vmatpush3.msra.mxu1 %v11470_v9  ;;  %v16338_v43 = vand.u32 4294901760, %v11732_v19 }
  0x68   :  { %9439 = vmatprep.subr.mxu0 %v11551_v46  ;;  %9475 = vmatprep.subr.mxu1 %v11472_v10 }
  0x69   :  { %9440 = vmatpush3.msra.mxu0 %v11551_v46  ;;  %9476 = vmatpush3.msra.mxu1 %v11472_v10  ;;  %v284_v35 = vsub.f32 %v11732_v19, %v16338_v43  ;;  %v275_v46 = vand.u32 4294901760, %v274_v29  ;;  %v294_v43 = vsub.f32 %v11755_v17, %v293_v63 }
  0x6a   :  { %9441 = vmatprep.subr.mxu0 %v11566_v53  ;;  %9477 = vmatprep.subr.mxu1 %v11474_v11 }
  0x6b   :  { %9370 = vmatprep.mubr.f32.mxu0 %v255_v54  ;;  %9442 = vmatpush3.msra.mxu0 %v11566_v53  ;;  %v285_v48 = vand.u32 4294901760, %v284_v35  ;;  %v304_v53 = vsub.f32 %v11762_v50, %v303_v41  ;;  %v295_v54 = vand.u32 4294901760, %v294_v43 }
  0x6c   :  { %9478 = vmatpush3.msra.mxu1 %v11474_v11  ;;  %9371 = vmatmul.mubr.f32.gmra.mxu0 %v265_v33 }
  0x6d   :  { %9443 = vmatprep.subr.mxu0 %v11581_v60  ;;  %9479 = vmatprep.subr.mxu1 %v11483_v16 }
  0x6e   :  { %9444 = vmatpush3.msra.mxu0 %v11581_v60  ;;  %9480 = vmatpush3.msra.mxu1 %v11483_v16  ;;  %v305_v60 = vand.u32 4294901760, %v304_v53 }
  0x6f   :  { %9445 = vmatprep.subr.mxu0 %v11595_v6  ;;  %9481 = vmatprep.subr.mxu1 %v11505_v24 }
  0x70   :  { %9373 = vmatprep.mubr.f32.mxu0 %v275_v46  ;;  %9446 = vmatpush3.msra.mxu0 %v11595_v6 }
  0x71   :  { %9482 = vmatpush3.msra.mxu1 %v11505_v24  ;;  %9374 = vmatmul.mubr.f32.gmra.mxu0 %v285_v48 }
  0x72   :  { %9447 = vmatprep.subr.mxu0 %v11610_v30  ;;  %9483 = vmatprep.subr.mxu1 %v11511_v27 }
  0x73   :  { %9448 = vmatpush3.msra.mxu0 %v11610_v30  ;;  %9484 = vmatpush3.msra.mxu1 %v11511_v27 }
  0x74   :  { %9414 = vmatprep.mubr.f32.mxu1 %v11687_v7  ;;  %9449 = vmatprep.subr.mxu0 %v11628_v40 }
  0x75   :  { %9485 = vmatprep.subr.mxu1 %v11530_v34  ;;  %9376 = vmatprep.mubr.f32.mxu0 %v295_v54 }
  0x76   :  { %9415 = vmatmul.mubr.f32.gmra.mxu1 %v11690_v18  ;;  %9450 = vmatpush3.msra.mxu0 %v11628_v40 }
  0x77   :  { %9486 = vmatpush3.msra.mxu1 %v11530_v34  ;;  %9377 = vmatmul.mubr.f32.gmra.mxu0 %v305_v60 }
  0x78   :  { %9451 = vmatprep.subr.mxu0 %v11640_v51  ;;  %9487 = vmatprep.subr.mxu1 %v11548_v45 }
  0x79   :  { %9452 = vmatpush3.msra.mxu0 %v11640_v51  ;;  %9488 = vmatpush3.msra.mxu1 %v11548_v45 }
  0x7a   :  { %9417 = vmatprep.mubr.f32.mxu1 %v11708_v55  ;;  %9453 = vmatprep.subr.mxu0 %v11650_v59 }
  0x7b   :  { %9489 = vmatprep.subr.mxu1 %v11554_v47  ;;  %9418 = vmatmul.mubr.f32.gmra.mxu1 %v11711_v15 }
  0x7c   :  { %9454 = vmatpush3.msra.mxu0 %v11650_v59  ;;  %9455 = vmatprep.mubr.f32.mxu0 %v11607_v25 }
  0x7d   :  { %9490 = vmatpush3.msra.mxu1 %v11554_v47  ;;  %9456 = vmatmul.mubr.f32.vlgmr.msra.gmra.mxu0 %v11616_v32 }
  0x7e   :  { %9491 = vmatprep.subr.mxu1 %v11575_v57  ;;  %9511 = vmatprep.subr.mxu0 %v11497_v21 }
  0x7f   :  { %9492 = vmatpush3.msra.mxu1 %v11575_v57  ;;  %9512 = vmatpush3.msra.mxu0 %v11497_v21  ;;  %v16339_v21 = vand.u32 4294901760, %v11607_v25 }
  0x80   :  { %9420 = vmatprep.mubr.f32.mxu1 %v11734_v2  ;;  %9493 = vmatprep.subr.mxu1 %v11598_v8 }
  0x81   :  { %9513 = vmatprep.subr.mxu0 %v11500_v22  ;;  %9421 = vmatmul.mubr.f32.gmra.mxu1 %v11743_v20 }
  0x82   :  { %9458 = vmatprep.mubr.f32.mxu0 %v11702_v14  ;;  %9494 = vmatpush3.msra.mxu1 %v11598_v8 }
  0x83   :  { %9514 = vmatpush3.msra.mxu0 %v11500_v22  ;;  %9495 = vmatprep.subr.mxu1 %v11613_v31  ;;  %v16340_v22 = vand.u32 4294901760, %v11616_v32 }
  0x84   :  { %9459 = vmatmul.mubr.f32.gmra.mxu0 %v11706_v44  ;;  %9515 = vmatprep.subr.mxu0 %v11503_v23 }
  0x85   :  { %9496 = vmatpush3.msra.mxu1 %v11613_v31  ;;  %9516 = vmatpush3.msra.mxu0 %v11503_v23  ;;  %v16341_v23 = vand.u32 4294901760, %v11702_v14  ;;  %v8319_v14 = vld [vmem:[%s16048_s5] ss:$0 sm:$0xff] }
  0x86   :  { %9497 = vmatprep.subr.mxu1 %v11625_v38  ;;  %9517 = vmatprep.subr.mxu0 %v11509_v26 }
  0x87   :  { %9461 = vmatprep.mubr.f32.mxu0 %v11724_v0  ;;  %9498 = vmatpush3.msra.mxu1 %v11625_v38 }
  0x88   :  { %9499 = vmatprep.mubr.f32.mxu1 %v16339_v21  ;;  %9518 = vmatpush3.msra.mxu0 %v11509_v26  ;;  %v16342_v26 = vand.u32 4294901760, %v11706_v44 }
  0x89   :  { %9462 = vmatmul.mubr.f32.gmra.mxu0 %v11732_v19  ;;  %9500 = vmatmul.mubr.f32.vlgmr.msra.gmra.mxu1 %v16340_v22 }
  0x8a   :  { %9519 = vmatprep.subr.mxu0 %v11514_v28  ;;  %9555 = vmatprep.subr.mxu1 %v11464_v3 }
  0x8b   :  { %9520 = vmatpush3.msra.mxu0 %v11514_v28  ;;  %9556 = vmatpush3.msra.mxu1 %v11464_v3  ;;  %v16343_v3 = vand.u32 4294901760, %v11724_v0 }
  0x8c   :  { %9521 = vmatprep.subr.mxu0 %v11536_v39  ;;  %9557 = vmatprep.subr.mxu1 %v11466_v4 }
  0x8d   :  { %9464 = vmatprep.mubr.f32.mxu0 %v11755_v17  ;;  %9502 = vmatprep.mubr.f32.mxu1 %v16341_v23 }
  0x8e   :  { %9522 = vmatpush3.msra.mxu0 %v11536_v39  ;;  %9558 = vmatpush3.msra.mxu1 %v11466_v4  ;;  %v16344_v4 = vand.u32 4294901760, %v11732_v19 }
  0x8f   :  { %9465 = vmatmul.mubr.f32.gmra.mxu0 %v11762_v50  ;;  %9503 = vmatmul.mubr.f32.gmra.mxu1 %v16342_v26 }
  0x90   :  { %9523 = vmatprep.subr.mxu0 %v11542_v42  ;;  %9559 = vmatprep.subr.mxu1 %v11468_v5 }
  0x91   :  { %9524 = vmatpush3.msra.mxu0 %v11542_v42  ;;  %9560 = vmatpush3.msra.mxu1 %v11468_v5 }
  0x92   :  { %9525 = vmatprep.subr.mxu0 %v11563_v52  ;;  %9561 = vmatprep.subr.mxu1 %v11470_v9 }
  0x93   :  { %9505 = vmatprep.mubr.f32.mxu1 %v16343_v3  ;;  %9526 = vmatpush3.msra.mxu0 %v11563_v52 }
  0x94   :  { %9562 = vmatpush3.msra.mxu1 %v11470_v9  ;;  %9527 = vmatprep.subr.mxu0 %v11578_v58 }
  0x95   :  { %9506 = vmatmul.mubr.f32.gmra.mxu1 %v16344_v4  ;;  %9563 = vmatprep.subr.mxu1 %v11472_v10 }
  0x96   :  { %9528 = vmatpush3.msra.mxu0 %v11578_v58  ;;  %9564 = vmatpush3.msra.mxu1 %v11472_v10 }
  0x97   :  { %9529 = vmatprep.subr.mxu0 %v11592_v1  ;;  %9565 = vmatprep.subr.mxu1 %v11474_v11 }
  0x98   :  { %9508 = vmatprep.mubr.f32.mxu1 %v293_v63  ;;  %9530 = vmatpush3.msra.mxu0 %v11592_v1 }
  0x99   :  { %9566 = vmatpush3.msra.mxu1 %v11474_v11  ;;  %9531 = vmatprep.subr.mxu0 %v11604_v13 }
  0x9a   :  { %9509 = vmatmul.mubr.f32.gmra.mxu1 %v303_v41  ;;  %9567 = vmatprep.subr.mxu1 %v11483_v16 }
  0x9b   :  { %9532 = vmatpush3.msra.mxu0 %v11604_v13  ;;  %9568 = vmatpush3.msra.mxu1 %v11483_v16 }
  0x9c   :  { %9533 = vmatprep.subr.mxu0 %v11622_v37  ;;  %9569 = vmatprep.subr.mxu1 %v11505_v24 }
  0x9d   :  { %9534 = vmatpush3.msra.mxu0 %v11622_v37  ;;  %9570 = vmatpush3.msra.mxu1 %v11505_v24  ;;  %v1154_v24 = vld [vmem:[%s16045_s2] sm:$0xff] }
  0x9e   :  { %9535 = vmatprep.subr.mxu0 %v11635_v49  ;;  %9571 = vmatprep.subr.mxu1 %v11511_v27  ;;  %v1172_v28 = vsel %vm1170_vm0, %v1154_v24, 0 }
  0x9f   :  { %9536 = vmatpush3.msra.mxu0 %v11635_v49  ;;  %9572 = vmatpush3.msra.mxu1 %v11511_v27  ;;  %v11932_v39 = vand.u32 4294901760, %v1172_v28 }
  0xa0   :  { %9537 = vmatprep.subr.mxu0 %v11647_v56  ;;  %9573 = vmatprep.subr.mxu1 %v11530_v34 }
  0xa1   :  { %9538 = vmatpush3.msra.mxu0 %v11647_v56  ;;  %9574 = vmatpush3.msra.mxu1 %v11530_v34  ;;  %16345 = vst [vmem:[#allocation16_spill] sm:$0xff] %v11932_v39 }
  0xa2   :  { %9539 = vmatprep.subr.mxu0 %v11663_v12  ;;  %9575 = vmatprep.subr.mxu1 %v11548_v45 }
  0xa3   :  { %9540 = vmatpush3.msra.mxu0 %v11663_v12  ;;  %9576 = vmatpush3.msra.mxu1 %v11548_v45  ;;  %v11935_v45 = vsub.f32 %v1172_v28, %v11932_v39 }
  0xa4   :  { %9541 = vmatprep.subr.mxu0 %v11670_v36  ;;  %9577 = vmatprep.subr.mxu1 %v11554_v47 }
  0xa5   :  { %9542 = vmatpush3.msra.mxu0 %v11670_v36  ;;  %9543 = vmatprep.mubr.f32.mxu0 %v11583_v61  ;;  %v11939_v52 = vand.u32 4294901760, %v11935_v45 }
  0xa6   :  { %9578 = vmatpush3.msra.mxu1 %v11554_v47  ;;  %9544 = vmatmul.mubr.f32.vlgmr.msra.gmra.mxu0 %v11586_v62 }
  0xa7   :  { %9579 = vmatprep.subr.mxu1 %v11575_v57  ;;  %9546 = vmatprep.mubr.f32.mxu0 %v11687_v7  ;;  %v1295_v58 = vsub.f32 %v11935_v45, %v11939_v52 }
  0xa8   :  { %9580 = vmatpush3.msra.mxu1 %v11575_v57  ;;  %9587 = vmatprep.mubr.f32.mxu1 %v11583_v61 }
  0xa9   :  { %9581 = vmatprep.subr.mxu1 %v11598_v8 }
  0xaa   :  { %9582 = vmatpush3.msra.mxu1 %v11598_v8  ;;  %9547 = vmatmul.mubr.f32.gmra.mxu0 %v11690_v18 }
  0xab   :  { %9583 = vmatprep.subr.mxu1 %v11613_v31  ;;  %9549 = vmatprep.mubr.f32.mxu0 %v11708_v55 }
  0xac   :  { %9584 = vmatpush3.msra.mxu1 %v11613_v31 }
  0xad   :  { %9585 = vmatprep.subr.mxu1 %v11625_v38 }
  0xae   :  { %9586 = vmatpush3.msra.mxu1 %v11625_v38  ;;  %9550 = vmatmul.mubr.f32.gmra.mxu0 %v11711_v15 }
  0xaf   :  { %9588 = vmatmul.mubr.f32.vlgmr.msra.gmra.mxu1 %v11586_v62  ;;  %9552 = vmatprep.mubr.f32.mxu0 %v11734_v2  ;;  %v11943_v62 = vand.u32 4294901760, %v1295_v58 }
  0xb0   :  { %9590 = vmatprep.mubr.f32.mxu1 %v11687_v7 }
  0xb1   :  { %16346 = vst [vmem:[#allocation17_spill] sm:$0xff] %v11943_v62 }
  0xb2   :  { %9553 = vmatmul.mubr.f32.gmra.mxu0 %v11743_v20 }
  0xb3   :  { %9591 = vmatmul.mubr.f32.gmra.mxu1 %v11690_v18  ;;  %9615 = vmatprep.mubr.f32.mxu0 %v11943_v62 }
  0xb4   :  { %9593 = vmatprep.mubr.f32.mxu1 %v11708_v55 }
  0xb7   :  { %9594 = vmatmul.mubr.f32.gmra.mxu1 %v11711_v15 }
  0xb8   :  { %9596 = vmatprep.mubr.f32.mxu1 %v11734_v2 }
  0xbb   :  { %9597 = vmatmul.mubr.f32.gmra.mxu1 %v11743_v20 }
  0xbc   :  { %9655 = vmatprep.mubr.f32.mxu1 %v11932_v39 }
 0x117   :  { %v9369_v5 = vpop.f32.mrf.mxu0 }
 0x118   :  { %v248_v19 = vadd.f32 %v9369_v5, %v8319_v14 }
 0x119   :  { %v237_v9 = vpop.f32.mrf.mxu0 }
 0x11a   :  { %v238_v15 = vadd.f32 %v8319_v14, %v237_v9 }
 0x11f   :  { %v9413_v11 = vpop.f32.mrf.mxu1 }
 0x120   :  { %v465_v46 = vadd.f32 %v9413_v11, %v248_v19 }
 0x121   :  { %v458_v27 = vpop.f32.mrf.mxu1 }
 0x122   :  { %v459_v33 = vadd.f32 %v458_v27, %v238_v15 }
 0x12c   :  { %v9372_v10 = vpop.f32.mrf.mxu0 }
 0x12d   :  { %v268_v2 = vadd.f32 %v9372_v10, %v8319_v14 }
 0x12e   :  { %v257_v16 = vpop.f32.mrf.mxu0 }
 0x12f   :  { %v258_v20 = vadd.f32 %v8319_v14, %v257_v16 }
 0x131   :  { %v9375_v34 = vpop.f32.mrf.mxu0 }
 0x132   :  { %v288_v50 = vadd.f32 %v9375_v34, %v8319_v14 }
 0x133   :  { %v277_v47 = vpop.f32.mrf.mxu0 }
 0x134   :  { %v278_v63 = vadd.f32 %v8319_v14, %v277_v47 }
 0x136   :  { %v9416_v42 = vpop.f32.mrf.mxu1 }
 0x137   :  { %v9378_v61 = vpop.f32.mrf.mxu0  ;;  %v477_v48 = vadd.f32 %v9416_v42, %v268_v2 }
 0x138   :  { %v470_v57 = vpop.f32.mrf.mxu1  ;;  %v308_v54 = vadd.f32 %v9378_v61, %v8319_v14 }
 0x139   :  { %v297_v6 = vpop.f32.mrf.mxu0  ;;  %v471_v60 = vadd.f32 %v470_v57, %v258_v20 }
 0x13a   :  { %v298_v22 = vadd.f32 %v8319_v14, %v297_v6 }
 0x13b   :  { %v9419_v1 = vpop.f32.mrf.mxu1 }
 0x13c   :  { %v489_v21 = vadd.f32 %v9419_v1, %v288_v50 }
 0x13d   :  { %v482_v8 = vpop.f32.mrf.mxu1  ;;  %v9457_v13 = vpop.f32.mrf.mxu0 }
 0x13e   :  { %v612_v23 = vadd.f32 %v9457_v13, %v465_v46  ;;  %v483_v9 = vadd.f32 %v482_v8, %v278_v63 }
 0x13f   :  { %v604_v30 = vpop.f32.mrf.mxu0 }
 0x140   :  { %v605_v43 = vadd.f32 %v604_v30, %v459_v33 }
 0x141   :  { %v9422_v25 = vpop.f32.mrf.mxu1 }
 0x142   :  { %v501_v11 = vadd.f32 %v9422_v25, %v308_v54 }
 0x143   :  { %v494_v31 = vpop.f32.mrf.mxu1 }
 0x144   :  { %v9460_v32 = vpop.f32.mrf.mxu0  ;;  %v495_v61 = vadd.f32 %v494_v31, %v298_v22 }
 0x145   :  { %v626_v26 = vadd.f32 %v9460_v32, %v477_v48 }
 0x146   :  { %v618_v38 = vpop.f32.mrf.mxu0 }
 0x147   :  { %v619_v10 = vadd.f32 %v618_v38, %v471_v60 }
 0x149   :  { %v9501_v37 = vpop.f32.mrf.mxu1  ;;  %v9463_v49 = vpop.f32.mrf.mxu0 }
 0x14a   :  { %v640_v16 = vadd.f32 %v9463_v49, %v489_v21  ;;  %v751_v24 = vadd.f32 %v9501_v37, %v612_v23 }
 0x14b   :  { %v742_v40 = vpop.f32.mrf.mxu1  ;;  %v632_v56 = vpop.f32.mrf.mxu0 }
 0x14c   :  { %v743_v3 = vadd.f32 %v742_v40, %v605_v43  ;;  %v633_v42 = vadd.f32 %v632_v56, %v483_v9 }
 0x14f   :  { %v9504_v51 = vpop.f32.mrf.mxu1  ;;  %v9466_v12 = vpop.f32.mrf.mxu0 }
 0x150   :  { %v767_v27 = vadd.f32 %v9504_v51, %v626_v26  ;;  %v654_v32 = vadd.f32 %v9466_v12, %v501_v11 }
 0x151   :  { %v758_v59 = vpop.f32.mrf.mxu1  ;;  %v646_v7 = vpop.f32.mrf.mxu0 }
 0x152   :  { %v759_v47 = vadd.f32 %v758_v59, %v619_v10  ;;  %v647_v38 = vadd.f32 %v646_v7, %v495_v61 }
 0x155   :  { %v9507_v36 = vpop.f32.mrf.mxu1 }
 0x156   :  { %v783_v58 = vadd.f32 %v9507_v36, %v640_v16 }
 0x157   :  { %v774_v18 = vpop.f32.mrf.mxu1 }
 0x158   :  { %v775_v40 = vadd.f32 %v774_v18, %v633_v42 }
 0x15a   :  { %v9510_v17 = vpop.f32.mrf.mxu1 }
 0x15c   :  { %v790_v35 = vpop.f32.mrf.mxu1 }
 0x166   :  { %v9545_v44 = vpop.f32.mrf.mxu0 }
 0x167   :  { %v924_v57 = vadd.f32 %v9545_v44, %v751_v24  ;;  %v791_v44 = vadd.f32 %v790_v35, %v647_v38 }
 0x168   :  { %v917_v55 = vpop.f32.mrf.mxu0 }
 0x169   :  { %v918_v28 = vadd.f32 %v917_v55, %v743_v3  ;;  %v799_v55 = vadd.f32 %v9510_v17, %v654_v32 }
 0x16a   :  { %v9548_v0 = vpop.f32.mrf.mxu0 }
 0x16b   :  { %v936_v1 = vadd.f32 %v9548_v0, %v767_v27 }
 0x16c   :  { %v929_v29 = vpop.f32.mrf.mxu0 }
 0x16d   :  { %v930_v14 = vadd.f32 %v929_v29, %v759_v47 }
 0x16e   :  { %v9551_v41 = vpop.f32.mrf.mxu0 }
 0x16f   :  { %v9589_v53 = vpop.f32.mrf.mxu1  ;;  %v948_v8 = vadd.f32 %v9551_v41, %v783_v58 }
 0x170   :  { %v941_v4 = vpop.f32.mrf.mxu0  ;;  %v1053_v49 = vadd.f32 %v9589_v53, %v924_v57  ;;  %v1108_v53 = vstv %s16046_s3 }
 0x171   :  { %v1046_v5 = vpop.f32.mrf.mxu1  ;;  %v942_v15 = vadd.f32 %v941_v4, %v775_v40 }
 0x172   :  { %v1047_v6 = vadd.f32 %v1046_v5, %v918_v28  ;;  %v9554_v13 = vpop.f32.mrf.mxu0  ;;  %v1093_v20 = vmax.f32 %v1053_v49, 0.0 }
 0x173   :  { %v9592_v34 = vpop.f32.mrf.mxu1  ;;  %v960_v0 = vadd.f32 %v9554_v13, %v799_v55 }
 0x174   :  { %v1065_v37 = vadd.f32 %v9592_v34, %v936_v1  ;;  %v1092_v59 = vmax.f32 %v1047_v6, 0.0  ;;  %v953_v36 = vpop.f32.mrf.mxu0  ;;  %v1101_v35 = vadd.f32 1e-07, %v1093_v20 }
 0x175   :  { %v1058_v30 = vpop.f32.mrf.mxu1  ;;  %v954_v50 = vadd.f32 %v953_v36, %v791_v44 }
 0x176   :  { %v1059_v25 = vadd.f32 %v1058_v30, %v930_v14  ;;  %v1095_v12 = vmax.f32 %v1065_v37, 0.0  ;;  %v11949_v63 = vadd.f32 1e-07, %v1092_v59  ;;  %v1110_v9 = vmul.f32 %v1108_v53, %v1101_v35 }
 0x177   :  { %v9595_v51 = vpop.f32.mrf.mxu1 }
 0x178   :  { %v1077_v56 = vadd.f32 %v9595_v51, %v948_v8  ;;  %v1094_v29 = vmax.f32 %v1059_v25, 0.0  ;;  %v11958_v54 = vadd.f32 1e-07, %v1095_v12  ;;  %v1109_v26 = vmul.f32 %v1108_v53, %v11949_v63  ;;  %v1156_v12 = vld [vmem:[%s16045_s2 + $0x10] sm:$0xff] }
 0x179   :  { %v1070_v31 = vpop.f32.mrf.mxu1 }
 0x17a   :  { %v1097_v19 = vmax.f32 %v1077_v56, 0.0  ;;  %v1071_v2 = vadd.f32 %v1070_v31, %v942_v15  ;;  %v1102_v60 = vadd.f32 1e-07, %v1094_v29  ;;  %v1112_v10 = vmul.f32 %v1108_v53, %v11958_v54 }
 0x17b   :  { %v9598_v18 = vpop.f32.mrf.mxu1 }
 0x17c   :  { %v1096_v7 = vmax.f32 %v1071_v2, 0.0  ;;  %v1089_v33 = vadd.f32 %v9598_v18, %v960_v0  ;;  %v11951_v41 = vadd.f32 1e-07, %v1097_v19  ;;  %v1111_v16 = vmul.f32 %v1108_v53, %v1102_v60  ;;  %v1155_v0 = vld [vmem:[%s16045_s2 + $0x8] sm:$0xff] }
 0x17d   :  { %v1082_v17 = vpop.f32.mrf.mxu1  ;;  %v1175_v2 = vsel %vm1170_vm0, %v1155_v0, 0 }
 0x17e   :  { %v11953_v46 = vadd.f32 1e-07, %v1096_v7  ;;  %v1099_v48 = vmax.f32 %v1089_v33, 0.0  ;;  %v1083_v43 = vadd.f32 %v1082_v17, %v954_v50  ;;  %v1114_v3 = vmul.f32 %v1108_v53, %v11951_v41 }
 0x17f   :  { %v11988_v33 = vand.u32 4294901760, %v1175_v2 }
 0x180   :  { %v1113_v21 = vmul.f32 %v1108_v53, %v11953_v46  ;;  %v11961_v22 = vadd.f32 1e-07, %v1099_v48  ;;  %v1098_v23 = vmax.f32 %v1083_v43, 0.0  ;;  %v1118_v28 = vmax.f32 %v1110_v9, %v1114_v3 }
 0x181   :  { %16349 = vst [vmem:[#allocation20_spill] sm:$0xff] %v11988_v33  ;;  %v1178_v43 = vsel %vm1170_vm0, %v1156_v12, 0 }
 0x182   :  { %v1116_v4 = vmul.f32 %v1108_v53, %v11961_v22  ;;  %v11966_v5 = vadd.f32 1e-07, %v1098_v23  ;;  %v1117_v24 = vmax.f32 %v1109_v26, %v1113_v21 }
 0x184   :  { %v1115_v27 = vmul.f32 %v1108_v53, %v11966_v5  ;;  %v1120_v34 = vmax.f32 %v1112_v10, %v1116_v4  ;;  %v1121_v42 = vmax.f32 %v1117_v24, %v1118_v28 }
 0x186   :  { %v1119_v11 = vmax.f32 %v1111_v16, %v1115_v27 }
 0x188   :  { %v1122_v47 = vmax.f32 %v1119_v11, %v1120_v34 }
 0x18a   :  { %v1123_v58 = vmax.f32 %v1121_v42, %v1122_v47 }
 0x18c   :  { %v1124_v61 = vrot.slane %v1123_v58, 4 }
 0x18e   :  { %v1125_v57 = vmax.f32 %v1123_v58, %v1124_v61  ;;  %v1159_v58 = vld [vmem:[%s16045_s2 + $0x28] sm:$0xff] }
 0x190   :  { %v1126_v1 = vrot.slane %v1125_v57, 2 }
 0x192   :  { %v1127_v6 = vmax.f32 %v1125_v57, %v1126_v1 }
 0x194   :  { %v1128_v13 = vrot.slane %v1127_v6, 1 }
 0x196   :  { %v1129_v30 = vmax.f32 %v1127_v6, %v1128_v13 }
 0x198   :  { %v1130_v32 = vsub.f32 %v1109_v26, %v1129_v30  ;;  %v1131_v40 = vsub.f32 %v1110_v9, %v1129_v30  ;;  %v1132_v14 = vsub.f32 %v1111_v16, %v1129_v30  ;;  %v1133_v8 = vsub.f32 %v1112_v10, %v1129_v30 }
 0x199   :  { %v1134_v38 = vsub.f32 %v1113_v21, %v1129_v30  ;;  %v1135_v49 = vsub.f32 %v1114_v3, %v1129_v30  ;;  %v1136_v37 = vsub.f32 %v1115_v27, %v1129_v30  ;;  %v1137_v25 = vsub.f32 %v1116_v4, %v1129_v30 }
 0x19a   :  { %v1138_v51 = vmul.f32 1.442695, %v1130_v32  ;;  %v1140_v55 = vmul.f32 1.442695, %v1131_v40  ;;  %v1142_v15 = vmul.f32 1.442695, %v1132_v14  ;;  %v12015_v10 = vsub.f32 %v1175_v2, %v11988_v33 }
 0x19b   :  { %v1144_v56 = vmul.f32 1.442695, %v1133_v8  ;;  %v1146_v59 = vmul.f32 1.442695, %v1134_v38  ;;  %v1148_v36 = vmul.f32 1.442695, %v1135_v49 }
 0x19c   :  { %11095 = vpow2.f32 %v1138_v51  ;;  %v1150_v31 = vmul.f32 1.442695, %v1136_v37  ;;  %v1152_v44 = vmul.f32 1.442695, %v1137_v25  ;;  %v12017_v16 = vand.u32 4294901760, %v1178_v43 }
 0x19d   :  { %11097 = vpow2.f32 %v1140_v55  ;;  %v12051_v57 = vand.u32 4294901760, %v12015_v10  ;;  %v1187_v8 = vsel %vm1170_vm0, %v1159_v58, 0  ;;  %v1162_v58 = vld [vmem:[%s16045_s2 + $0x40] sm:$0xff] }
 0x19e   :  { %11099 = vpow2.f32 %v1142_v15  ;;  %16355 = vst [vmem:[#allocation26_spill] sm:$0xff] %v12017_v16  ;;  %v12066_v32 = vsub.f32 %v1178_v43, %v12017_v16  ;;  %v1160_v15 = vld [vmem:[%s16045_s2 + $0x30] sm:$0xff]  ;;  %v12110_v0 = vand.u32 4294901760, %v1187_v8 }
 0x19f   :  { %11101 = vpow2.f32 %v1144_v56  ;;  %v1305_v25 = vsub.f32 %v12015_v10, %v12051_v57 }
 0x1a0   :  { %11103 = vpow2.f32 %v1146_v59  ;;  %v1161_v59 = vld [vmem:[%s16045_s2 + $0x38] sm:$0xff]  ;;  %16357 = vst [vmem:[#allocation28_spill] sm:$0xff] %v12110_v0  ;;  %v12114_v2 = vand.u32 4294901760, %v12066_v32 }
 0x1a1   :  { %11105 = vpow2.f32 %v1148_v36 }
 0x1a2   :  { %11107 = vpow2.f32 %v1150_v31 }
 0x1a3   :  { %11109 = vpow2.f32 %v1152_v44 }
 0x1a9   :  { %v11973_v19 = vpop.eup %11095 }
 0x1aa   :  { %v11976_v20 = vpop.eup %11097  ;;  %v11983_v18 = vmul.f32 %v11973_v19, %v11949_v63  ;;  %v1157_v63 = vld [vmem:[%s16045_s2 + $0x18] sm:$0xff] }
 0x1ab   :  { %v11100_v50 = vpop.eup %11099  ;;  %v11986_v29 = vmul.f32 %v11976_v20, %v1101_v35  ;;  %v12070_v40 = vand.u32 4294901760, %v11976_v20 }
 0x1ac   :  { %16347 = vst [vmem:[#allocation18_spill] sm:$0xff] %v11983_v18  ;;  %v11102_v7 = vpop.eup %11101  ;;  %v11990_v17 = vmul.f32 %v11100_v50, %v1102_v60  ;;  %v12037_v11 = vand.u32 4294901760, %v11100_v50 }
 0x1ad   :  { %16348 = vst [vmem:[#allocation19_spill] sm:$0xff] %v11986_v29  ;;  %v11104_v48 = vpop.eup %11103  ;;  %v11994_v53 = vmul.f32 %v11102_v7, %v11958_v54  ;;  %v12024_v27 = vand.u32 4294901760, %v11102_v7  ;;  %v12118_v12 = vsub.f32 %v11976_v20, %v12070_v40 }
 0x1ae   :  { %16350 = vst [vmem:[#allocation21_spill] sm:$0xff] %v11990_v17  ;;  %v11106_v21 = vpop.eup %11105  ;;  %v12000_v23 = vmul.f32 %v11104_v48, %v11953_v46  ;;  %v12004_v3 = vand.u32 4294901760, %v11104_v48  ;;  %v1158_v46 = vld [vmem:[%s16045_s2 + $0x20] sm:$0xff]  ;;  %v12087_v55 = vsub.f32 %v11100_v50, %v12037_v11 }
 0x1af   :  { %16351 = vst [vmem:[#allocation22_spill] sm:$0xff] %v11994_v53  ;;  %v11108_v35 = vpop.eup %11107  ;;  %v12002_v26 = vand.u32 4294901760, %v11106_v21  ;;  %v12007_v60 = vmul.f32 %v11106_v21, %v11951_v41  ;;  %v1184_v47 = vsel %vm1170_vm0, %v1158_v46, 0  ;;  %v12063_v30 = vsub.f32 %v11102_v7, %v12024_v27 }
 0x1b0   :  { %16352 = vst [vmem:[#allocation23_spill] sm:$0xff] %v12000_v23  ;;  %v11110_v4 = vpop.eup %11109  ;;  %v12010_v54 = vmul.f32 %v11108_v35, %v11966_v5  ;;  %v12012_v9 = vand.u32 4294901760, %v11108_v35  ;;  %v1181_v5 = vsel %vm1170_vm0, %v1157_v63, 0  ;;  %v12040_v42 = vsub.f32 %v11104_v48, %v12004_v3 }
 0x1b1   :  { %16353 = vst [vmem:[#allocation24_spill] sm:$0xff] %v12007_v60  ;;  %v12022_v24 = vand.u32 4294901760, %v11110_v4  ;;  %v12027_v41 = vsub.f32 %v11106_v21, %v12002_v26  ;;  %v12053_v1 = vand.u32 4294901760, %v1181_v5  ;;  %v12072_v14 = vand.u32 4294901760, %v1184_v47 }
 0x1b2   :  { %16354 = vst [vmem:[#allocation25_spill] sm:$0xff] %v12010_v54  ;;  %v12031_v28 = vsub.f32 %v11108_v35, %v12012_v9  ;;  %v12076_v38 = vmul.f32 %v11110_v4, %v11961_v22  ;;  %v12084_v51 = vand.u32 4294901760, %v12040_v42  ;;  %v12094_v22 = vand.u32 4294901760, %v11973_v19 }
 0x1b3   :  { %9599 = vmatprep.subr.mxu0 %v12022_v24  ;;  %v12035_v34 = vsub.f32 %v11110_v4, %v12022_v24  ;;  %16356 = vst [vmem:[#allocation27_spill] sm:$0xff] %v12053_v1  ;;  %v12060_v13 = vand.u32 4294901760, %v12027_v41  ;;  %v12099_v56 = vsub.f32 %v1181_v5, %v12053_v1  ;;  %v12108_v44 = vand.u32 4294901760, %v12063_v30 }
 0x1b4   :  { %9600 = vmatpush3.msra.mxu0 %v12022_v24  ;;  %v12048_v61 = vand.u32 4294901760, %v12031_v28  ;;  %v12121_v50 = vsub.f32 %v1184_v47, %v12072_v14  ;;  %v1190_v7 = vsel %vm1170_vm0, %v1160_v15, 0  ;;  %v1493_v43 = vsub.f32 %v12040_v42, %v12084_v51 }
 0x1b5   :  { %9601 = vmatprep.subr.mxu0 %v12012_v9  ;;  %v12057_v6 = vand.u32 4294901760, %v12035_v34  ;;  %v1486_v31 = vsub.f32 %v12027_v41, %v12060_v13  ;;  %v12128_v21 = vand.u32 4294901760, %v12087_v55  ;;  %v1193_v63 = vsel %vm1170_vm0, %v1161_v59, 0 }
 0x1b6   :  { %9602 = vmatpush3.msra.mxu0 %v12012_v9  ;;  %v1479_v37 = vsub.f32 %v12031_v28, %v12048_v61  ;;  %v12133_v20 = vand.u32 4294901760, %v12099_v56  ;;  %v12137_v35 = vsub.f32 %v11973_v19, %v12094_v22  ;;  %v1500_v46 = vsub.f32 %v12063_v30, %v12108_v44 }
 0x1b7   :  { %9603 = vmatprep.subr.mxu0 %v12002_v26  ;;  %v1472_v49 = vsub.f32 %v12035_v34, %v12057_v6  ;;  %v1487_v4 = vand.u32 4294901760, %v1486_v31  ;;  %v12143_v5 = vsub.f32 %v1187_v8, %v12110_v0  ;;  %v12145_v47 = vand.u32 4294901760, %v1190_v7  ;;  %v1163_v31 = vld [vmem:[%s16045_s2 + $0x48] sm:$0xff] }
 0x1b8   :  { %9604 = vmatpush3.msra.mxu0 %v12002_v26  ;;  %v1480_v48 = vand.u32 4294901760, %v1479_v37  ;;  %16358 = vst [vmem:[#allocation29_spill] sm:$0xff] %v12133_v20  ;;  %v1315_v19 = vsub.f32 %v12066_v32, %v12114_v2  ;;  %v12156_v37 = vand.u32 4294901760, %v1193_v63  ;;  %v1494_v8 = vand.u32 4294901760, %v1493_v43 }
 0x1b9   :  { %9605 = vmatprep.subr.mxu0 %v12004_v3  ;;  %v1473_v36 = vand.u32 4294901760, %v1472_v49  ;;  %v12154_v49 = vand.u32 4294901760, %v12118_v12  ;;  %v12159_v15 = vand.u32 4294901760, %v1305_v25  ;;  %v1507_v59 = vsub.f32 %v12087_v55, %v12128_v21 }
 0x1ba   :  { %9606 = vmatpush3.msra.mxu0 %v12004_v3  ;;  %v12173_v43 = vand.u32 4294901760, %v12137_v35  ;;  %v1196_v25 = vsel %vm1170_vm0, %v1162_v58, 0  ;;  %v1501_v62 = vand.u32 4294901760, %v1500_v46  ;;  %v12178_v18 = vand.u32 4294901760, %v12143_v5 }
 0x1bb   :  { %9607 = vmatprep.subr.mxu0 %v12024_v27  ;;  %9639 = vmatprep.subr.mxu1 %v1473_v36  ;;  %16359 = vst [vmem:[#allocation30_spill] sm:$0xff] %v12159_v15  ;;  %v12181_v29 = vsub.f32 %v1190_v7, %v12145_v47  ;;  %v12187_v17 = vand.u32 4294901760, %v1315_v19  ;;  %v1514_v58 = vsub.f32 %v12118_v12, %v12154_v49  ;;  %v1199_v53 = vsel %vm1170_vm0, %v1163_v31, 0  ;;  %v1165_v19 = vld [vmem:[%s16045_s2 + $0x58] sm:$0xff] }
 0x1bc   :  { %9608 = vmatpush3.msra.mxu0 %v12024_v27  ;;  %9640 = vmatpush3.msra.mxu1 %v1473_v36  ;;  %v12164_v36 = vand.u32 4294901760, %v12121_v50  ;;  %16361 = vst [vmem:[#allocation32_spill] sm:$0xff] %v12178_v18  ;;  %v12192_v46 = vsub.f32 %v1193_v63, %v12156_v37  ;;  %v1508_v7 = vand.u32 4294901760, %v1507_v59  ;;  %v12198_v39 = vand.u32 4294901760, %v1196_v25 }
 0x1bd   :  { %9609 = vmatprep.subr.mxu0 %v12037_v11  ;;  %9641 = vmatprep.subr.mxu1 %v1480_v48  ;;  %16362 = vst [vmem:[#allocation33_spill] sm:$0xff] %v12187_v17  ;;  %v1345_v59 = vsub.f32 %v12143_v5, %v12178_v18  ;;  %v12215_v60 = vand.u32 4294901760, %v1199_v53 }
 0x1be   :  { %9610 = vmatpush3.msra.mxu0 %v12037_v11  ;;  %9642 = vmatpush3.msra.mxu1 %v1480_v48  ;;  %16360 = vst [vmem:[#allocation31_spill] sm:$0xff] %v12164_v36  ;;  %v1325_v48 = vsub.f32 %v12099_v56, %v12133_v20  ;;  %v1335_v23 = vsub.f32 %v12121_v50, %v12164_v36 }
 0x1bf   :  { %9611 = vmatprep.subr.mxu0 %v12070_v40  ;;  %9643 = vmatprep.subr.mxu1 %v1487_v4  ;;  %v12230_v18 = vsub.f32 %v1196_v25, %v12198_v39  ;;  %v12245_v25 = vsub.f32 %v1199_v53, %v12215_v60 }
 0x1c0   :  { %9612 = vmatpush3.msra.mxu0 %v12070_v40  ;;  %9644 = vmatpush3.msra.mxu1 %v1487_v4  ;;  %v1164_v4 = vld [vmem:[%s16045_s2 + $0x50] sm:$0xff]  ;;  %v12204_v63 = vand.u32 4294901760, %v1325_v48  ;;  %v1515_v48 = vand.u32 4294901760, %v1514_v58  ;;  %v12227_v54 = vand.u32 4294901760, %v1335_v23  ;;  %v12240_v23 = vand.u32 4294901760, %v1345_v59 }
 0x1c1   :  { %9613 = vmatprep.subr.mxu0 %v12094_v22  ;;  %9645 = vmatprep.subr.mxu1 %v1494_v8  ;;  %v1202_v31 = vsel %vm1170_vm0, %v1164_v4, 0  ;;  %v1205_v4 = vsel %vm1170_vm0, %v1165_v19, 0  ;;  %16367 = vst [vmem:[#allocation38_spill] sm:$0xff] %v12230_v18  ;;  %16369 = vst [vmem:[#allocation40_spill] sm:$0xff] %v12245_v25  ;;  %v12259_v53 = vand.u32 4294901760, %v12230_v18 }
 0x1c2   :  { %9614 = vmatpush3.msra.mxu0 %v12094_v22  ;;  %9646 = vmatpush3.msra.mxu1 %v1494_v8  ;;  %16363 = vst [vmem:[#allocation34_spill] sm:$0xff] %v12204_v63  ;;  %v1521_v8 = vsub.f32 %v12137_v35, %v12173_v43  ;;  %16366 = vst [vmem:[#allocation37_spill] sm:$0xff] %v12227_v54  ;;  %v12232_v36 = vand.u32 4294901760, %v1202_v31 }
 0x1c3   :  { %9616 = vmatmul.mubr.f32.vlgmr.msra.gmra.mxu0 %v12159_v15  ;;  %9647 = vmatprep.subr.mxu1 %v1501_v62  ;;  %v12213_v15 = vand.u32 4294901760, %v12181_v29  ;;  %16368 = vst [vmem:[#allocation39_spill] sm:$0xff] %v12240_v23  ;;  %16370 = vst [vmem:[#allocation41_spill] sm:$0xff] %v12259_v53 }
 0x1c4   :  { %9679 = vmatprep.subr.mxu0 %v12035_v34  ;;  %9648 = vmatpush3.msra.mxu1 %v1501_v62  ;;  %v1166_v62 = vld [vmem:[%s16045_s2 + $0x60] sm:$0xff]  ;;  %v1522_v58 = vand.u32 4294901760, %v1521_v8 }
 0x1c5   :  { %9680 = vmatpush3.msra.mxu0 %v12035_v34  ;;  %9649 = vmatprep.subr.mxu1 %v1508_v7  ;;  %16364 = vst [vmem:[#allocation35_spill] sm:$0xff] %v12213_v15  ;;  %v12223_v34 = vand.u32 4294901760, %v12192_v46  ;;  %v1208_v19 = vsel %vm1170_vm0, %v1166_v62, 0  ;;  %v12262_v62 = vsub.f32 %v1202_v31, %v12232_v36  ;;  %v12276_v31 = vand.u32 4294901760, %v12245_v25 }
 0x1c6   :  { %9681 = vmatprep.subr.mxu0 %v12031_v28  ;;  %9618 = vmatprep.mubr.f32.mxu0 %v12187_v17  ;;  %v1167_v17 = vld [vmem:[%s16045_s2 + $0x68] sm:$0xff] }
 0x1c7   :  { %16365 = vst [vmem:[#allocation36_spill] sm:$0xff] %v12223_v34  ;;  %9650 = vmatpush3.msra.mxu1 %v1508_v7  ;;  %9682 = vmatpush3.msra.mxu0 %v12031_v28  ;;  %v1355_v28 = vsub.f32 %v12181_v29, %v12213_v15  ;;  %v12247_v7 = vand.u32 4294901760, %v1205_v4  ;;  %v1365_v8 = vsub.f32 %v12192_v46, %v12223_v34  ;;  %v1211_v59 = vsel %vm1170_vm0, %v1167_v17, 0 }
 0x1c8   :  { %9619 = vmatmul.mubr.f32.gmra.mxu0 %v12204_v63  ;;  %9651 = vmatprep.subr.mxu1 %v1515_v48  ;;  %v1168_v63 = vld [vmem:[%s16045_s2 + $0x70] sm:$0xff]  ;;  %16371 = vst [vmem:[#allocation42_spill] sm:$0xff] %v12262_v62  ;;  %16373 = vst [vmem:[#allocation44_spill] sm:$0xff] %v12276_v31  ;;  %v12281_v15 = vand.u32 4294901760, %v1211_v59 }
 0x1c9   :  { %9683 = vmatprep.subr.mxu0 %v12027_v41  ;;  %9652 = vmatpush3.msra.mxu1 %v1515_v48  ;;  %v12264_v48 = vand.u32 4294901760, %v1208_v19  ;;  %v1214_v17 = vsel %vm1170_vm0, %v1168_v63, 0  ;;  %v12279_v34 = vsub.f32 %v1205_v4, %v12247_v7  ;;  %v12293_v4 = vand.u32 4294901760, %v12262_v62 }
 0x1ca   :  { %9684 = vmatpush3.msra.mxu0 %v12027_v41  ;;  %9653 = vmatprep.subr.mxu1 %v1522_v58  ;;  %v1169_v41 = vld [vmem:[%s16045_s2 + $0x78] sm:$0xff] }
 0x1cb   :  { %9685 = vmatprep.subr.mxu0 %v12040_v42  ;;  %9621 = vmatprep.mubr.f32.mxu0 %v12227_v54  ;;  %v12273_v54 = vand.u32 4294901760, %v1355_v28  ;;  %16374 = vst [vmem:[#allocation45_spill] sm:$0xff] %v12279_v34  ;;  %v1217_v63 = vsel %vm1170_vm0, %v1169_v41, 0  ;;  %16376 = vst [vmem:[#allocation47_spill] sm:$0xff] %v12293_v4  ;;  %v12296_v28 = vsub.f32 %v1208_v19, %v12264_v48 }
 0x1cc   :  { %9654 = vmatpush3.msra.mxu1 %v1522_v58  ;;  %9686 = vmatpush3.msra.mxu0 %v12040_v42  ;;  %v12285_v42 = vand.u32 4294901760, %v1365_v8  ;;  %v1375_v58 = vsub.f32 %v12230_v18, %v12259_v53  ;;  %v12307_v8 = vand.u32 4294901760, %v12279_v34  ;;  %v12310_v41 = vsub.f32 %v1211_v59, %v12281_v15 }
 0x1cd   :  { %9622 = vmatmul.mubr.f32.gmra.mxu0 %v12240_v23  ;;  %9656 = vmatmul.mubr.f32.vlgmr.msra.gmra.mxu1 %v11988_v33  ;;  %16372 = vst [vmem:[#allocation43_spill] sm:$0xff] %v12273_v54  ;;  %16377 = vst [vmem:[#allocation48_spill] sm:$0xff] %v12296_v28  ;;  %v12298_v23 = vand.u32 4294901760, %v1214_v17  ;;  %v12312_v19 = vand.u32 4294901760, %v1217_v63  ;;  %v12323_v33 = vand.u32 4294901760, %v12296_v28 }
 0x1ce   :  { %9687 = vmatprep.subr.mxu0 %v12063_v30  ;;  %9719 = vmatprep.subr.mxu1 %v12022_v24  ;;  %16375 = vst [vmem:[#allocation46_spill] sm:$0xff] %v12285_v42  ;;  %16378 = vst [vmem:[#allocation49_spill] sm:$0xff] %v12307_v8 }
 0x1cf   :  { %9688 = vmatpush3.msra.mxu0 %v12063_v30  ;;  %9720 = vmatpush3.msra.mxu1 %v12022_v24  ;;  %v1385_v30 = vsub.f32 %v12245_v25, %v12276_v31  ;;  %16379 = vst [vmem:[#allocation50_spill] sm:$0xff] %v12310_v41  ;;  %16381 = vst [vmem:[#allocation52_spill] sm:$0xff] %v12323_v33  ;;  %v12326_v59 = vsub.f32 %v1214_v17, %v12298_v23 }
 0x1d0   :  { %9689 = vmatprep.subr.mxu0 %v12087_v55  ;;  %9721 = vmatprep.subr.mxu1 %v12012_v9  ;;  %v1415_v17 = vsub.f32 %v12296_v28, %v12323_v33 }
 0x1d1   :  { %9624 = vmatprep.mubr.f32.mxu0 %v12273_v54  ;;  %9658 = vmatprep.mubr.f32.mxu1 %v12017_v16  ;;  %v12318_v54 = vand.u32 4294901760, %v1375_v58  ;;  %v1395_v16 = vsub.f32 %v12262_v62, %v12293_v4  ;;  %16382 = vst [vmem:[#allocation53_spill] sm:$0xff] %v12326_v59  ;;  %v1405_v58 = vsub.f32 %v12279_v34, %v12307_v8 }
 0x1d2   :  { %9690 = vmatpush3.msra.mxu0 %v12087_v55  ;;  %9722 = vmatpush3.msra.mxu1 %v12012_v9  ;;  %v12332_v55 = vand.u32 4294901760, %v1385_v30  ;;  %v12351_v30 = vand.u32 4294901760, %v12326_v59 }
 0x1d3   :  { %9625 = vmatmul.mubr.f32.gmra.mxu0 %v12285_v42  ;;  %9659 = vmatmul.mubr.f32.gmra.mxu1 %v12053_v1  ;;  %16380 = vst [vmem:[#allocation51_spill] sm:$0xff] %v12318_v54  ;;  %v12337_v42 = vand.u32 4294901760, %v12310_v41  ;;  %v12340_v1 = vsub.f32 %v1217_v63, %v12312_v19  ;;  %v12357_v63 = vand.u32 4294901760, %v1405_v58 }
 0x1d4   :  { %9691 = vmatprep.subr.mxu0 %v12118_v12  ;;  %9723 = vmatprep.subr.mxu1 %v12002_v26  ;;  %16383 = vst [vmem:[#allocation54_spill] sm:$0xff] %v12332_v55  ;;  %16386 = vst [vmem:[#allocation57_spill] sm:$0xff] %v12351_v30  ;;  %v1435_v58 = vsub.f32 %v12326_v59, %v12351_v30 }
 0x1d5   :  { %9692 = vmatpush3.msra.mxu0 %v12118_v12  ;;  %9724 = vmatpush3.msra.mxu1 %v12002_v26  ;;  %16384 = vst [vmem:[#allocation55_spill] sm:$0xff] %v12337_v42  ;;  %16385 = vst [vmem:[#allocation56_spill] sm:$0xff] %v12340_v1  ;;  %v12346_v12 = vand.u32 4294901760, %v1395_v16  ;;  %v1425_v16 = vsub.f32 %v12310_v41, %v12337_v42 }
 0x1d6   :  { %9693 = vmatprep.subr.mxu0 %v12137_v35  ;;  %9725 = vmatprep.subr.mxu1 %v12004_v3 }
 0x1d7   :  { %9627 = vmatprep.mubr.f32.mxu0 %v12318_v54  ;;  %9661 = vmatprep.mubr.f32.mxu1 %v12072_v14  ;;  %v12362_v54 = vand.u32 4294901760, %v12340_v1 }
 0x1d8   :  { %9694 = vmatpush3.msra.mxu0 %v12137_v35  ;;  %9726 = vmatpush3.msra.mxu1 %v12004_v3  ;;  %v12368_v35 = vand.u32 4294901760, %v1415_v17  ;;  %v12384_v17 = vand.u32 4294901760, %v1435_v58 }
 0x1d9   :  { %9628 = vmatmul.mubr.f32.gmra.mxu0 %v12332_v55  ;;  %9662 = vmatmul.mubr.f32.gmra.mxu1 %v12110_v0  ;;  %16387 = vst [vmem:[#allocation58_spill] sm:$0xff] %v12362_v54  ;;  %v12376_v55 = vand.u32 4294901760, %v1425_v16  ;;  %v1445_v0 = vsub.f32 %v12340_v1, %v12362_v54 }
 0x1da   :  { %9727 = vmatprep.subr.mxu1 %v12024_v27  ;;  %9759 = vmatprep.subr.mxu0 %v12057_v6 }
 0x1db   :  { %9728 = vmatpush3.msra.mxu1 %v12024_v27  ;;  %9630 = vmatprep.mubr.f32.mxu0 %v12346_v12  ;;  %v12390_v16 = vand.u32 4294901760, %v1445_v0  ;;  %v16394_v0 = vld [vmem:[#allocation16_spill] sm:$0xff] }
 0x1dc   :  { %9729 = vmatprep.subr.mxu1 %v12037_v11  ;;  %9664 = vmatprep.mubr.f32.mxu1 %v12145_v47 }
 0x1dd   :  { %9730 = vmatpush3.msra.mxu1 %v12037_v11  ;;  %9631 = vmatmul.mubr.f32.gmra.mxu0 %v12357_v63 }
 0x1de   :  { %9665 = vmatmul.mubr.f32.gmra.mxu1 %v12156_v37  ;;  %9731 = vmatprep.subr.mxu1 %v12070_v40 }
 0x1df   :  { %9732 = vmatpush3.msra.mxu1 %v12070_v40  ;;  %9633 = vmatprep.mubr.f32.mxu0 %v12368_v35 }
 0x1e0   :  { %9733 = vmatprep.subr.mxu1 %v12094_v22  ;;  %9667 = vmatprep.mubr.f32.mxu1 %v12198_v39 }
 0x1e1   :  { %9734 = vmatpush3.msra.mxu1 %v12094_v22  ;;  %9634 = vmatmul.mubr.f32.gmra.mxu0 %v12376_v55 }
 0x1e2   :  { %9668 = vmatmul.mubr.f32.gmra.mxu1 %v12215_v60  ;;  %9799 = vmatprep.subr.mxu1 %v12022_v24 }
 0x1e3   :  { %9636 = vmatprep.mubr.f32.mxu0 %v12384_v17  ;;  %9670 = vmatprep.mubr.f32.mxu1 %v12232_v36 }
 0x1e5   :  { %9637 = vmatmul.mubr.f32.gmra.mxu0 %v12390_v16 }
 0x1e6   :  { %9671 = vmatmul.mubr.f32.gmra.mxu1 %v12247_v7  ;;  %9695 = vmatprep.mubr.f32.mxu0 %v11935_v45 }
 0x1e7   :  { %9673 = vmatprep.mubr.f32.mxu1 %v12264_v48 }
 0x1e9   :  { %9696 = vmatmul.mubr.f32.vlgmr.msra.gmra.mxu0 %v12015_v10 }
 0x1ea   :  { %9674 = vmatmul.mubr.f32.gmra.mxu1 %v12281_v15  ;;  %9760 = vmatpush3.msra.mxu0 %v12057_v6 }
 0x1eb   :  { %9761 = vmatprep.subr.mxu0 %v12048_v61  ;;  %9676 = vmatprep.mubr.f32.mxu1 %v12298_v23 }
 0x1ec   :  { %9762 = vmatpush3.msra.mxu0 %v12048_v61  ;;  %9698 = vmatprep.mubr.f32.mxu0 %v12066_v32  ;;  %v12424_v61 = vand.u32 4294901760, %v12076_v38 }
 0x1ed   :  { %9763 = vmatprep.subr.mxu0 %v12060_v13  ;;  %9699 = vmatmul.mubr.f32.gmra.mxu0 %v12099_v56 }
 0x1ee   :  { %9677 = vmatmul.mubr.f32.gmra.mxu1 %v12312_v19  ;;  %9764 = vmatpush3.msra.mxu0 %v12060_v13 }
 0x1ef   :  { %9765 = vmatprep.subr.mxu0 %v12084_v51  ;;  %9701 = vmatprep.mubr.f32.mxu0 %v12121_v50 }
 0x1f0   :  { %9766 = vmatpush3.msra.mxu0 %v12084_v51  ;;  %9735 = vmatprep.mubr.f32.mxu1 %v11939_v52 }
 0x1f1   :  { %9767 = vmatprep.subr.mxu0 %v12108_v44  ;;  %9702 = vmatmul.mubr.f32.gmra.mxu0 %v12143_v5 }
 0x1f2   :  { %9736 = vmatmul.mubr.f32.vlgmr.msra.gmra.mxu1 %v12051_v57  ;;  %9768 = vmatpush3.msra.mxu0 %v12108_v44 }
 0x1f3   :  { %9800 = vmatpush3.msra.mxu1 %v12022_v24  ;;  %9769 = vmatprep.subr.mxu0 %v12128_v21  ;;  %v12436_v24 = vsub.f32 %v12076_v38, %v12424_v61  ;;  %v16391_v38 = vld [vmem:[#allocation36_spill] sm:$0xff] }
 0x1f4   :  { %9801 = vmatprep.subr.mxu1 %v12012_v9  ;;  %9770 = vmatpush3.msra.mxu0 %v12128_v21  ;;  %v16395_v21 = vld [vmem:[#allocation23_spill] sm:$0xff] }
 0x1f5   :  { %9802 = vmatpush3.msra.mxu1 %v12012_v9  ;;  %9704 = vmatprep.mubr.f32.mxu0 %v12181_v29  ;;  %v16388_v9 = vld [vmem:[#allocation31_spill] sm:$0xff]  ;;  %v12447_v6 = vand.u32 4294901760, %v12436_v24 }
 0x1f6   :  { %9738 = vmatprep.mubr.f32.mxu1 %v12114_v2  ;;  %9771 = vmatprep.subr.mxu0 %v12154_v49 }
 0x1f7   :  { %9803 = vmatprep.subr.mxu1 %v12002_v26  ;;  %9705 = vmatmul.mubr.f32.gmra.mxu0 %v12192_v46  ;;  %v2662_v13 = vsub.f32 %v12436_v24, %v12447_v6 }
 0x1f8   :  { %9739 = vmatmul.mubr.f32.gmra.mxu1 %v12133_v20  ;;  %9772 = vmatpush3.msra.mxu0 %v12154_v49  ;;  %v12486_v49 = vand.u32 4294901760, %v16395_v21 }
 0x1f9   :  { %9804 = vmatpush3.msra.mxu1 %v12002_v26  ;;  %9773 = vmatprep.subr.mxu0 %v12173_v43  ;;  %v16389_v26 = vld [vmem:[#allocation32_spill] sm:$0xff] }
 0x1fa   :  { %9805 = vmatprep.subr.mxu1 %v12004_v3  ;;  %9774 = vmatpush3.msra.mxu0 %v12173_v43  ;;  %v16396_v43 = vld [vmem:[#allocation20_spill] sm:$0xff] }
 0x1fb   :  { %9806 = vmatpush3.msra.mxu1 %v12004_v3  ;;  %9707 = vmatprep.mubr.f32.mxu0 %v12230_v18  ;;  %v16390_v3 = vld [vmem:[#allocation35_spill] sm:$0xff] }
 0x1fc   :  { %9741 = vmatprep.mubr.f32.mxu1 %v16388_v9  ;;  %9807 = vmatprep.subr.mxu1 %v12024_v27 }
 0x1fd   :  { %9839 = vmatprep.subr.mxu0 %v12424_v61  ;;  %9708 = vmatmul.mubr.f32.gmra.mxu0 %v12245_v25 }
 0x1fe   :  { %9742 = vmatmul.mubr.f32.gmra.mxu1 %v16389_v26  ;;  %9710 = vmatprep.mubr.f32.mxu0 %v12262_v62 }
 0x1ff   :  { %9808 = vmatpush3.msra.mxu1 %v12024_v27  ;;  %9744 = vmatprep.mubr.f32.mxu1 %v16390_v3  ;;  %v2663_v27 = vand.u32 4294901760, %v2662_v13  ;;  %v16397_v13 = vld [vmem:[#allocation22_spill] sm:$0xff] }
 0x200   :  { %9809 = vmatprep.subr.mxu1 %v12037_v11 }
 0x201   :  { %9810 = vmatpush3.msra.mxu1 %v12037_v11  ;;  %9711 = vmatmul.mubr.f32.gmra.mxu0 %v12279_v34  ;;  %v16392_v11 = vld [vmem:[#allocation25_spill] sm:$0xff] }
 0x202   :  { %9811 = vmatprep.subr.mxu1 %v12070_v40  ;;  %9745 = vmatmul.mubr.f32.gmra.mxu1 %v16391_v38  ;;  %v12469_v51 = vand.u32 4294901760, %v16392_v11  ;;  %v16403_v38 = vld [vmem:[#allocation18_spill] sm:$0xff] }
 0x203   :  { %9812 = vmatpush3.msra.mxu1 %v12070_v40  ;;  %9713 = vmatprep.mubr.f32.mxu0 %v12296_v28  ;;  %v16393_v40 = vld [vmem:[#allocation24_spill] sm:$0xff]  ;;  %v12542_v34 = vand.u32 4294901760, %v16403_v38 }
 0x204   :  { %9813 = vmatprep.subr.mxu1 %v12094_v22  ;;  %9747 = vmatprep.mubr.f32.mxu1 %v12259_v53  ;;  %v12476_v44 = vand.u32 4294901760, %v16393_v40  ;;  %v16402_v53 = vld [vmem:[#allocation28_spill] sm:$0xff] }
 0x205   :  { %9814 = vmatpush3.msra.mxu1 %v12094_v22  ;;  %9714 = vmatmul.mubr.f32.gmra.mxu0 %v12310_v41  ;;  %v12480_v22 = vsub.f32 %v16392_v11, %v12469_v51  ;;  %v12496_v11 = vand.u32 4294901760, %v16397_v13  ;;  %v12569_v9 = vsub.f32 %v16403_v38, %v12542_v34 }
 0x206   :  { %9879 = vmatprep.subr.mxu1 %v2663_v27  ;;  %9748 = vmatmul.mubr.f32.gmra.mxu1 %v12276_v31  ;;  %v12491_v58 = vsub.f32 %v16393_v40, %v12476_v44  ;;  %v12507_v40 = vsub.f32 %v16395_v21, %v12486_v49 }
 0x207   :  { %9716 = vmatprep.mubr.f32.mxu0 %v12326_v59  ;;  %9750 = vmatprep.mubr.f32.mxu1 %v12293_v4  ;;  %v12523_v21 = vsub.f32 %v16397_v13, %v12496_v11  ;;  %v12582_v18 = vand.u32 4294901760, %v12569_v9 }
 0x208   :  { %v12533_v41 = vand.u32 4294901760, %v12507_v40 }
 0x209   :  { %9717 = vmatmul.mubr.f32.gmra.mxu0 %v12340_v1  ;;  %v12512_v1 = vand.u32 4294901760, %v12491_v58  ;;  %v12545_v3 = vand.u32 4294901760, %v12523_v21 }
 0x20a   :  { %9751 = vmatmul.mubr.f32.gmra.mxu1 %v12307_v8  ;;  %9775 = vmatprep.mubr.f32.mxu0 %v16394_v0  ;;  %v12499_v8 = vand.u32 4294901760, %v12480_v22  ;;  %v2683_v26 = vsub.f32 %v12507_v40, %v12533_v41 }
 0x20b   :  { %9753 = vmatprep.mubr.f32.mxu1 %v12323_v33  ;;  %v16398_v33 = vld [vmem:[#allocation26_spill] sm:$0xff]  ;;  %v2676_v13 = vsub.f32 %v12491_v58, %v12512_v1 }
 0x20c   :  { %v2669_v59 = vsub.f32 %v12480_v22, %v12499_v8 }
 0x20d   :  { %9776 = vmatmul.mubr.f32.vlgmr.msra.gmra.mxu0 %v16396_v43  ;;  %v2677_v25 = vand.u32 4294901760, %v2676_v13 }
 0x20e   :  { %9754 = vmatmul.mubr.f32.gmra.mxu1 %v12337_v42  ;;  %9840 = vmatpush3.msra.mxu0 %v12424_v61  ;;  %v16399_v42 = vld [vmem:[#allocation27_spill] sm:$0xff]  ;;  %v2670_v28 = vand.u32 4294901760, %v2669_v59 }
 0x20f   :  { %9841 = vmatprep.subr.mxu0 %v12469_v51  ;;  %9756 = vmatprep.mubr.f32.mxu1 %v12351_v30  ;;  %v16400_v30 = vld [vmem:[#allocation21_spill] sm:$0xff] }
 0x210   :  { %9842 = vmatpush3.msra.mxu0 %v12469_v51  ;;  %9778 = vmatprep.mubr.f32.mxu0 %v16398_v33  ;;  %v12517_v4 = vand.u32 4294901760, %v16400_v30 }
 0x211   :  { %9843 = vmatprep.subr.mxu0 %v12476_v44  ;;  %9779 = vmatmul.mubr.f32.gmra.mxu0 %v16399_v42 }
 0x212   :  { %9757 = vmatmul.mubr.f32.gmra.mxu1 %v12362_v54  ;;  %9844 = vmatpush3.msra.mxu0 %v12476_v44  ;;  %v16401_v54 = vld [vmem:[#allocation19_spill] sm:$0xff]  ;;  %v12549_v62 = vsub.f32 %v16400_v30, %v12517_v4  ;;  %v2690_v30 = vsub.f32 %v12523_v21, %v12545_v3 }
 0x213   :  { %9845 = vmatprep.subr.mxu0 %v12486_v49  ;;  %9781 = vmatprep.mubr.f32.mxu0 %v12072_v14  ;;  %v12530_v31 = vand.u32 4294901760, %v16401_v54 }
 0x214   :  { %9846 = vmatpush3.msra.mxu0 %v12486_v49  ;;  %9815 = vmatprep.mubr.f32.mxu1 %v16394_v0  ;;  %v2691_v13 = vand.u32 4294901760, %v2690_v30  ;;  %v2711_v30 = vsub.f32 %v12569_v9, %v12582_v18 }
 0x215   :  { %9847 = vmatprep.subr.mxu0 %v12496_v11  ;;  %9782 = vmatmul.mubr.f32.gmra.mxu0 %v16402_v53  ;;  %v12557_v59 = vsub.f32 %v16401_v54, %v12530_v31  ;;  %v2684_v54 = vand.u32 4294901760, %v2683_v26 }
 0x216   :  { %9816 = vmatmul.mubr.f32.vlgmr.msra.gmra.mxu1 %v16396_v43  ;;  %9848 = vmatpush3.msra.mxu0 %v12496_v11  ;;  %v2712_v20 = vand.u32 4294901760, %v2711_v30 }
 0x217   :  { %9880 = vmatpush3.msra.mxu1 %v2663_v27  ;;  %9849 = vmatprep.subr.mxu0 %v12517_v4  ;;  %v12565_v27 = vand.u32 4294901760, %v12549_v62 }
 0x218   :  { %9881 = vmatprep.subr.mxu1 %v2670_v28  ;;  %9850 = vmatpush3.msra.mxu0 %v12517_v4 }
 0x219   :  { %9882 = vmatpush3.msra.mxu1 %v2670_v28  ;;  %9784 = vmatprep.mubr.f32.mxu0 %v12145_v47  ;;  %v12575_v28 = vand.u32 4294901760, %v12557_v59  ;;  %v2697_v38 = vsub.f32 %v12549_v62, %v12565_v27 }
 0x21a   :  { %9818 = vmatprep.mubr.f32.mxu1 %v16398_v33  ;;  %9851 = vmatprep.subr.mxu0 %v12530_v31 }
 0x21b   :  { %9883 = vmatprep.subr.mxu1 %v2677_v25  ;;  %9785 = vmatmul.mubr.f32.gmra.mxu0 %v12156_v37  ;;  %v2698_v26 = vand.u32 4294901760, %v2697_v38  ;;  %v16405_v38 = vld [vmem:[#allocation30_spill] sm:$0xff] }
 0x21c   :  { %9819 = vmatmul.mubr.f32.gmra.mxu1 %v16399_v42  ;;  %9852 = vmatpush3.msra.mxu0 %v12530_v31 }
 0x21d   :  { %9884 = vmatpush3.msra.mxu1 %v2677_v25  ;;  %9853 = vmatprep.subr.mxu0 %v12542_v34  ;;  %v2704_v25 = vsub.f32 %v12557_v59, %v12575_v28 }
 0x21e   :  { %9885 = vmatprep.subr.mxu1 %v2684_v54  ;;  %9854 = vmatpush3.msra.mxu0 %v12542_v34 }
 0x21f   :  { %9886 = vmatpush3.msra.mxu1 %v2684_v54  ;;  %9787 = vmatprep.mubr.f32.mxu0 %v12198_v39  ;;  %v2705_v54 = vand.u32 4294901760, %v2704_v25  ;;  %v16407_v25 = vld [vmem:[#allocation34_spill] sm:$0xff] }
 0x220   :  { %9821 = vmatprep.mubr.f32.mxu1 %v12072_v14  ;;  %9887 = vmatprep.subr.mxu1 %v2691_v13 }
 0x221   :  { %9919 = vmatprep.subr.mxu0 %v12436_v24  ;;  %9788 = vmatmul.mubr.f32.gmra.mxu0 %v12215_v60 }
 0x222   :  { %9822 = vmatmul.mubr.f32.gmra.mxu1 %v16402_v53  ;;  %9790 = vmatprep.mubr.f32.mxu0 %v12232_v36 }
 0x223   :  { %9888 = vmatpush3.msra.mxu1 %v2691_v13  ;;  %9824 = vmatprep.mubr.f32.mxu1 %v12145_v47  ;;  %v16404_v13 = vld [vmem:[#allocation17_spill] sm:$0xff] }
 0x224   :  { %9889 = vmatprep.subr.mxu1 %v2698_v26 }
 0x225   :  { %9890 = vmatpush3.msra.mxu1 %v2698_v26  ;;  %9791 = vmatmul.mubr.f32.gmra.mxu0 %v12247_v7  ;;  %v16408_v26 = vld [vmem:[#allocation37_spill] sm:$0xff] }
 0x226   :  { %9891 = vmatprep.subr.mxu1 %v2705_v54  ;;  %9825 = vmatmul.mubr.f32.gmra.mxu1 %v12156_v37 }
 0x227   :  { %9892 = vmatpush3.msra.mxu1 %v2705_v54  ;;  %9793 = vmatprep.mubr.f32.mxu0 %v12264_v48 }
 0x228   :  { %9893 = vmatprep.subr.mxu1 %v2712_v20  ;;  %9827 = vmatprep.mubr.f32.mxu1 %v12198_v39 }
 0x229   :  { %9894 = vmatpush3.msra.mxu1 %v2712_v20  ;;  %9794 = vmatmul.mubr.f32.gmra.mxu0 %v12281_v15  ;;  %v16406_v20 = vld [vmem:[#allocation33_spill] sm:$0xff] }
 0x22a   :  { %9959 = vmatprep.subr.mxu1 %v12424_v61  ;;  %9828 = vmatmul.mubr.f32.gmra.mxu1 %v12215_v60 }
 0x22b   :  { %9796 = vmatprep.mubr.f32.mxu0 %v12298_v23  ;;  %9830 = vmatprep.mubr.f32.mxu1 %v12232_v36 }
 0x22d   :  { %9797 = vmatmul.mubr.f32.gmra.mxu0 %v12312_v19 }
 0x22e   :  { %9831 = vmatmul.mubr.f32.gmra.mxu1 %v12247_v7  ;;  %9855 = vmatprep.mubr.f32.mxu0 %v16404_v13  ;;  %v16435_v13 = vld [vmem:[#allocation57_spill] sm:$0xff] }
 0x22f   :  { %9833 = vmatprep.mubr.f32.mxu1 %v12264_v48 }
 0x231   :  { %9856 = vmatmul.mubr.f32.vlgmr.msra.gmra.mxu0 %v16405_v38 }
 0x232   :  { %9834 = vmatmul.mubr.f32.gmra.mxu1 %v12281_v15  ;;  %9920 = vmatpush3.msra.mxu0 %v12436_v24  ;;  %v16409_v24 = vld [vmem:[#allocation39_spill] sm:$0xff] }
 0x233   :  { %9921 = vmatprep.subr.mxu0 %v12480_v22  ;;  %9836 = vmatprep.mubr.f32.mxu1 %v12298_v23 }
 0x234   :  { %9922 = vmatpush3.msra.mxu0 %v12480_v22  ;;  %9858 = vmatprep.mubr.f32.mxu0 %v16406_v20  ;;  %v16410_v22 = vld [vmem:[#allocation43_spill] sm:$0xff] }
 0x235   :  { %9923 = vmatprep.subr.mxu0 %v12491_v58  ;;  %9859 = vmatmul.mubr.f32.gmra.mxu0 %v16407_v25 }
 0x236   :  { %9837 = vmatmul.mubr.f32.gmra.mxu1 %v12312_v19  ;;  %9924 = vmatpush3.msra.mxu0 %v12491_v58  ;;  %v16411_v58 = vld [vmem:[#allocation46_spill] sm:$0xff] }
 0x237   :  { %9925 = vmatprep.subr.mxu0 %v12507_v40  ;;  %9861 = vmatprep.mubr.f32.mxu0 %v16408_v26  ;;  %v3664_v26 = vld [vmem:[#allocation6 + $0x48] sm:$0xff] }
 0x238   :  { %9926 = vmatpush3.msra.mxu0 %v12507_v40  ;;  %9895 = vmatprep.mubr.f32.mxu1 %v16394_v0  ;;  %v16413_v40 = vld [vmem:[#allocation54_spill] sm:$0xff] }
 0x239   :  { %9927 = vmatprep.subr.mxu0 %v12523_v21  ;;  %9862 = vmatmul.mubr.f32.gmra.mxu0 %v16409_v24  ;;  %v16437_v24 = vld [vmem:[#allocation58_spill] sm:$0xff] }
 0x23a   :  { %9896 = vmatmul.mubr.f32.vlgmr.msra.gmra.mxu1 %v16396_v43  ;;  %9928 = vmatpush3.msra.mxu0 %v12523_v21 }
 0x23b   :  { %9960 = vmatpush3.msra.mxu1 %v12424_v61  ;;  %9929 = vmatprep.subr.mxu0 %v12549_v62 }
 0x23c   :  { %9961 = vmatprep.subr.mxu1 %v12469_v51  ;;  %9930 = vmatpush3.msra.mxu0 %v12549_v62  ;;  %v16412_v62 = vld [vmem:[#allocation51_spill] sm:$0xff] }
 0x23d   :  { %9962 = vmatpush3.msra.mxu1 %v12469_v51  ;;  %9864 = vmatprep.mubr.f32.mxu0 %v16410_v22  ;;  %v3663_v22 = vld [vmem:[#allocation6 + $0x40] sm:$0xff] }
 0x23e   :  { %9898 = vmatprep.mubr.f32.mxu1 %v16398_v33  ;;  %9931 = vmatprep.subr.mxu0 %v12557_v59 }
 0x23f   :  { %9963 = vmatprep.subr.mxu1 %v12476_v44  ;;  %9865 = vmatmul.mubr.f32.gmra.mxu0 %v16411_v58 }
 0x240   :  { %9899 = vmatmul.mubr.f32.gmra.mxu1 %v16399_v42  ;;  %9932 = vmatpush3.msra.mxu0 %v12557_v59 }
 0x241   :  { %9964 = vmatpush3.msra.mxu1 %v12476_v44  ;;  %9933 = vmatprep.subr.mxu0 %v12569_v9 }
 0x242   :  { %9965 = vmatprep.subr.mxu1 %v12486_v49  ;;  %9934 = vmatpush3.msra.mxu0 %v12569_v9  ;;  %v16429_v9 = vld [vmem:[#allocation47_spill] sm:$0xff] }
 0x243   :  { %9966 = vmatpush3.msra.mxu1 %v12486_v49  ;;  %9867 = vmatprep.mubr.f32.mxu0 %v16412_v62 }
 0x244   :  { %9901 = vmatprep.mubr.f32.mxu1 %v12072_v14  ;;  %9967 = vmatprep.subr.mxu1 %v12496_v11 }
 0x245   :  { %9999 = vmatprep.subr.mxu0 %v12447_v6  ;;  %9868 = vmatmul.mubr.f32.gmra.mxu0 %v16413_v40 }
 0x246   :  { %9902 = vmatmul.mubr.f32.gmra.mxu1 %v16402_v53  ;;  %9870 = vmatprep.mubr.f32.mxu0 %v12346_v12  ;;  %v16425_v12 = vld [vmem:[#allocation41_spill] sm:$0xff] }
 0x247   :  { %9968 = vmatpush3.msra.mxu1 %v12496_v11  ;;  %9904 = vmatprep.mubr.f32.mxu1 %v12145_v47 }
 0x248   :  { %9969 = vmatprep.subr.mxu1 %v12517_v4 }
 0x249   :  { %9970 = vmatpush3.msra.mxu1 %v12517_v4  ;;  %9871 = vmatmul.mubr.f32.gmra.mxu0 %v12357_v63 }
 0x24a   :  { %9971 = vmatprep.subr.mxu1 %v12530_v31  ;;  %9905 = vmatmul.mubr.f32.gmra.mxu1 %v12156_v37 }
 0x24b   :  { %9972 = vmatpush3.msra.mxu1 %v12530_v31  ;;  %9873 = vmatprep.mubr.f32.mxu0 %v12368_v35 }
 0x24c   :  { %9973 = vmatprep.subr.mxu1 %v12542_v34  ;;  %9907 = vmatprep.mubr.f32.mxu1 %v12198_v39 }
 0x24d   :  { %9974 = vmatpush3.msra.mxu1 %v12542_v34  ;;  %9874 = vmatmul.mubr.f32.gmra.mxu0 %v12376_v55  ;;  %v16424_v55 = vld [vmem:[#allocation48_spill] sm:$0xff] }
 0x24e   :  { %10039 = vmatprep.subr.mxu1 %v12424_v61  ;;  %9908 = vmatmul.mubr.f32.gmra.mxu1 %v12215_v60 }
 0x24f   :  { %9876 = vmatprep.mubr.f32.mxu0 %v12384_v17  ;;  %9910 = vmatprep.mubr.f32.mxu1 %v12232_v36  ;;  %v3668_v17 = vld [vmem:[#allocation6 + $0x68] sm:$0xff] }
 0x251   :  { %9877 = vmatmul.mubr.f32.gmra.mxu0 %v12390_v16  ;;  %v16427_v16 = vld [vmem:[#allocation44_spill] sm:$0xff] }
 0x252   :  { %9911 = vmatmul.mubr.f32.gmra.mxu1 %v12247_v7  ;;  %9935 = vmatprep.mubr.f32.mxu0 %v11935_v45  ;;  %v3670_v45 = vld [vmem:[#allocation6 + $0x78] sm:$0xff] }
 0x253   :  { %9913 = vmatprep.mubr.f32.mxu1 %v12264_v48 }
 0x255   :  { %9936 = vmatmul.mubr.f32.vlgmr.msra.gmra.mxu0 %v12015_v10  ;;  %v12693_v10 = vand.u32 4294901760, %v3670_v45 }
 0x256   :  { %9914 = vmatmul.mubr.f32.gmra.mxu1 %v12281_v15  ;;  %10000 = vmatpush3.msra.mxu0 %v12447_v6  ;;  %v3667_v6 = vld [vmem:[#allocation6 + $0x60] sm:$0xff] }
 0x257   :  { %10001 = vmatprep.subr.mxu0 %v12499_v8  ;;  %9916 = vmatprep.mubr.f32.mxu1 %v12298_v23 }
 0x258   :  { %10002 = vmatpush3.msra.mxu0 %v12499_v8  ;;  %9938 = vmatprep.mubr.f32.mxu0 %v12066_v32  ;;  %v16417_v32 = vld [vmem:[#allocation31_spill] sm:$0xff]  ;;  %v3669_v8 = vld [vmem:[#allocation6 + $0x70] sm:$0xff] }
 0x259   :  { %10003 = vmatprep.subr.mxu0 %v12512_v1  ;;  %9939 = vmatmul.mubr.f32.gmra.mxu0 %v12099_v56  ;;  %v16418_v56 = vld [vmem:[#allocation40_spill] sm:$0xff]  ;;  %v12736_v35 = vand.u32 4294901760, %v3669_v8 }
 0x25a   :  { %9917 = vmatmul.mubr.f32.gmra.mxu1 %v12312_v19  ;;  %10004 = vmatpush3.msra.mxu0 %v12512_v1 }
 0x25b   :  { %10005 = vmatprep.subr.mxu0 %v12533_v41  ;;  %9941 = vmatprep.mubr.f32.mxu0 %v12121_v50  ;;  %v16420_v50 = vld [vmem:[#allocation42_spill] sm:$0xff] }
 0x25c   :  { %10006 = vmatpush3.msra.mxu0 %v12533_v41  ;;  %9975 = vmatprep.mubr.f32.mxu1 %v11939_v52  ;;  %v12704_v52 = vsub.f32 %v3670_v45, %v12693_v10  ;;  %v16423_v41 = vld [vmem:[#allocation36_spill] sm:$0xff]  ;;  %v12793_v45 = vand.u32 4294901760, %v3664_v26 }
 0x25d   :  { %10007 = vmatprep.subr.mxu0 %v12545_v3  ;;  %9942 = vmatmul.mubr.f32.gmra.mxu0 %v12143_v5 }
 0x25e   :  { %9976 = vmatmul.mubr.f32.vlgmr.msra.gmra.mxu1 %v12051_v57  ;;  %10008 = vmatpush3.msra.mxu0 %v12545_v3  ;;  %v16414_v57 = vld [vmem:[#allocation29_spill] sm:$0xff]  ;;  %v12715_v1 = vand.u32 4294901760, %v12704_v52  ;;  %v12746_v3 = vsub.f32 %v3669_v8, %v12736_v35 }
 0x25f   :  { %10040 = vmatpush3.msra.mxu1 %v12424_v61  ;;  %10009 = vmatprep.subr.mxu0 %v12565_v27  ;;  %v16428_v61 = vld [vmem:[#allocation53_spill] sm:$0xff] }
 0x260   :  { %10041 = vmatprep.subr.mxu1 %v12469_v51  ;;  %10010 = vmatpush3.msra.mxu0 %v12565_v27  ;;  %16416 = vst [vmem:[#allocation25_spill] sm:$0xff] %v12715_v1  ;;  %v3916_v5 = vsub.f32 %v12704_v52, %v12715_v1  ;;  %v12755_v21 = vand.u32 4294901760, %v12746_v3  ;;  %v3665_v27 = vld [vmem:[#allocation6 + $0x50] sm:$0xff] }
 0x261   :  { %10042 = vmatpush3.msra.mxu1 %v12469_v51  ;;  %9944 = vmatprep.mubr.f32.mxu0 %v12181_v29  ;;  %v16415_v29 = vld [vmem:[#allocation38_spill] sm:$0xff]  ;;  %v16430_v51 = vld [vmem:[#allocation56_spill] sm:$0xff]  ;;  %v12772_v38 = vand.u32 4294901760, %v3665_v27 }
 0x262   :  { %9978 = vmatprep.mubr.f32.mxu1 %v12114_v2  ;;  %10011 = vmatprep.subr.mxu0 %v12575_v28  ;;  %v16419_v2 = vld [vmem:[#allocation32_spill] sm:$0xff]  ;;  %v3917_v63 = vand.u32 4294901760, %v3916_v5  ;;  %16433 = vst [vmem:[#allocation24_spill] sm:$0xff] %v12755_v21  ;;  %v3923_v20 = vsub.f32 %v12746_v3, %v12755_v21  ;;  %v3661_v5 = vld [vmem:[#allocation6 + $0x30] sm:$0xff] }
 0x263   :  { %10043 = vmatprep.subr.mxu1 %v12476_v44  ;;  %9945 = vmatmul.mubr.f32.gmra.mxu0 %v12192_v46  ;;  %v16422_v46 = vld [vmem:[#allocation45_spill] sm:$0xff] }
 0x264   :  { %9979 = vmatmul.mubr.f32.gmra.mxu1 %v16414_v57  ;;  %10012 = vmatpush3.msra.mxu0 %v12575_v28  ;;  %v16434_v28 = vld [vmem:[#allocation55_spill] sm:$0xff]  ;;  %v3924_v40 = vand.u32 4294901760, %v3923_v20 }
 0x265   :  { %10044 = vmatpush3.msra.mxu1 %v12476_v44  ;;  %10013 = vmatprep.subr.mxu0 %v12582_v18  ;;  %v16431_v44 = vld [vmem:[#allocation49_spill] sm:$0xff]  ;;  %v3658_v20 = vld [vmem:[#allocation6 + $0x18] sm:$0xff] }
 0x266   :  { %10045 = vmatprep.subr.mxu1 %v12486_v49  ;;  %10014 = vmatpush3.msra.mxu0 %v12582_v18  ;;  %v16421_v18 = vld [vmem:[#allocation35_spill] sm:$0xff] }
 0x267   :  { %10046 = vmatpush3.msra.mxu1 %v12486_v49  ;;  %9947 = vmatprep.mubr.f32.mxu0 %v16415_v29  ;;  %v16432_v49 = vld [vmem:[#allocation52_spill] sm:$0xff]  ;;  %v12798_v29 = vsub.f32 %v3665_v27, %v12772_v38 }
 0x268   :  { %9981 = vmatprep.mubr.f32.mxu1 %v16417_v32  ;;  %10047 = vmatprep.subr.mxu1 %v12496_v11  ;;  %v12802_v32 = vand.u32 4294901760, %v3663_v22 }
 0x269   :  { %9948 = vmatmul.mubr.f32.gmra.mxu0 %v16418_v56  ;;  %9982 = vmatmul.mubr.f32.gmra.mxu1 %v16419_v2  ;;  %v3662_v2 = vld [vmem:[#allocation6 + $0x38] sm:$0xff] }
 0x26a   :  { %10048 = vmatpush3.msra.mxu1 %v12496_v11  ;;  %9950 = vmatprep.mubr.f32.mxu0 %v16420_v50  ;;  %v3666_v11 = vld [vmem:[#allocation6 + $0x58] sm:$0xff]  ;;  %v12822_v8 = vsub.f32 %v3663_v22, %v12802_v32 }
 0x26b   :  { %10049 = vmatprep.subr.mxu1 %v12517_v4  ;;  %9984 = vmatprep.mubr.f32.mxu1 %v16421_v18  ;;  %v12763_v30 = vand.u32 4294901760, %v3666_v11 }
 0x26c   :  { %10050 = vmatpush3.msra.mxu1 %v12517_v4  ;;  %10079 = vmatprep.subr.mxu0 %v12693_v10  ;;  %v16426_v4 = vld [vmem:[#allocation50_spill] sm:$0xff] }
 0x26d   :  { %10051 = vmatprep.subr.mxu1 %v12530_v31  ;;  %9951 = vmatmul.mubr.f32.gmra.mxu0 %v16422_v46  ;;  %v12787_v62 = vsub.f32 %v3666_v11, %v12763_v30  ;;  %v12817_v46 = vsub.f32 %v3664_v26, %v12793_v45  ;;  %v3639_v11 = vld [vmem:[%s16044_s1] sm:$0xff]  ;;  %v3640_v26 = vld [vmem:[%s16044_s1 + $0x8] sm:$0xff] }
 0x26e   :  { %9985 = vmatmul.mubr.f32.gmra.mxu1 %v16423_v41  ;;  %9953 = vmatprep.mubr.f32.mxu0 %v16424_v55 }
 0x26f   :  { %10052 = vmatpush3.msra.mxu1 %v12530_v31  ;;  %9987 = vmatprep.mubr.f32.mxu1 %v16425_v12  ;;  %v12743_v31 = vand.u32 4294901760, %v3668_v17  ;;  %v12809_v56 = vand.u32 4294901760, %v12787_v62  ;;  %v12827_v12 = vand.u32 4294901760, %v3662_v2 }
 0x270   :  { %10053 = vmatprep.subr.mxu1 %v12542_v34 }
 0x271   :  { %10054 = vmatpush3.msra.mxu1 %v12542_v34  ;;  %9954 = vmatmul.mubr.f32.gmra.mxu0 %v16426_v4  ;;  %v12751_v34 = vand.u32 4294901760, %v3667_v6  ;;  %v12758_v59 = vsub.f32 %v3668_v17, %v12743_v31  ;;  %16439 = vst [vmem:[#allocation20_spill] sm:$0xff] %v12809_v56  ;;  %16442 = vst [vmem:[#allocation27_spill] sm:$0xff] %v12827_v12  ;;  %v12839_v17 = vand.u32 4294901760, %v12817_v46 }
 0x272   :  { %9988 = vmatmul.mubr.f32.gmra.mxu1 %v16427_v16  ;;  %9956 = vmatprep.mubr.f32.mxu0 %v16428_v61  ;;  %v3660_v61 = vld [vmem:[#allocation6 + $0x28] sm:$0xff] }
 0x273   :  { %9990 = vmatprep.mubr.f32.mxu1 %v16429_v9  ;;  %10135 = vmatprep.subr.mxu1 %v3917_v63  ;;  %v12766_v54 = vsub.f32 %v3667_v6, %v12751_v34  ;;  %v12777_v25 = vand.u32 4294901760, %v12758_v59  ;;  %16444 = vst [vmem:[#allocation19_spill] sm:$0xff] %v12839_v17  ;;  %v12849_v6 = vsub.f32 %v3662_v2, %v12827_v12 }
 0x275   :  { %9957 = vmatmul.mubr.f32.gmra.mxu0 %v16430_v51  ;;  %16436 = vst [vmem:[#allocation16_spill] sm:$0xff] %v12777_v25  ;;  %v12784_v58 = vand.u32 4294901760, %v12766_v54  ;;  %v3930_v57 = vsub.f32 %v12758_v59, %v12777_v25 }
 0x276   :  { %9991 = vmatmul.mubr.f32.gmra.mxu1 %v16431_v44  ;;  %10015 = vmatprep.mubr.f32.mxu0 %v16394_v0  ;;  %v3659_v44 = vld [vmem:[#allocation6 + $0x20] sm:$0xff] }
 0x277   :  { %9993 = vmatprep.mubr.f32.mxu1 %v16432_v49  ;;  %16438 = vst [vmem:[#allocation23_spill] sm:$0xff] %v12784_v58  ;;  %v3931_v18 = vand.u32 4294901760, %v3930_v57  ;;  %v12881_v57 = vand.u32 4294901760, %v3639_v11 }
 0x279   :  { %10016 = vmatmul.mubr.f32.vlgmr.msra.gmra.mxu0 %v16396_v43 }
 0x27a   :  { %9994 = vmatmul.mubr.f32.gmra.mxu1 %v16434_v28  ;;  %10080 = vmatpush3.msra.mxu0 %v12693_v10  ;;  %v12862_v28 = vand.u32 4294901760, %v3660_v61 }
 0x27b   :  { %10081 = vmatprep.subr.mxu0 %v12736_v35  ;;  %9996 = vmatprep.mubr.f32.mxu1 %v16435_v13  ;;  %v3958_v13 = vsub.f32 %v12817_v46, %v12839_v17 }
 0x27c   :  { %10018 = vmatprep.mubr.f32.mxu0 %v16398_v33  ;;  %10082 = vmatpush3.msra.mxu0 %v12736_v35  ;;  %16447 = vst [vmem:[#allocation17_spill] sm:$0xff] %v12862_v28 }
 0x27d   :  { %10019 = vmatmul.mubr.f32.gmra.mxu0 %v16399_v42  ;;  %10083 = vmatprep.subr.mxu0 %v12743_v31 }
 0x27e   :  { %9997 = vmatmul.mubr.f32.gmra.mxu1 %v16437_v24  ;;  %10084 = vmatpush3.msra.mxu0 %v12743_v31 }
 0x27f   :  { %10085 = vmatprep.subr.mxu0 %v12751_v34  ;;  %10021 = vmatprep.mubr.f32.mxu0 %v12072_v14 }
 0x280   :  { %10055 = vmatprep.mubr.f32.mxu1 %v16394_v0  ;;  %10086 = vmatpush3.msra.mxu0 %v12751_v34  ;;  %v3937_v0 = vsub.f32 %v12766_v54, %v12784_v58 }
 0x281   :  { %10022 = vmatmul.mubr.f32.gmra.mxu0 %v16402_v53  ;;  %10087 = vmatprep.subr.mxu0 %v12763_v30 }
 0x282   :  { %10056 = vmatmul.mubr.f32.vlgmr.msra.gmra.mxu1 %v16396_v43  ;;  %10088 = vmatpush3.msra.mxu0 %v12763_v30  ;;  %v12814_v43 = vand.u32 4294901760, %v12798_v29  ;;  %v3938_v55 = vand.u32 4294901760, %v3937_v0 }
 0x283   :  { %10136 = vmatpush3.msra.mxu1 %v3917_v63  ;;  %10089 = vmatprep.subr.mxu0 %v12772_v38  ;;  %v9617_v50 = vpop.f32.mrf.mxu0  ;;  %v3944_v63 = vsub.f32 %v12787_v62, %v12809_v56 }
 0x284   :  { %10137 = vmatprep.subr.mxu1 %v3924_v40  ;;  %10024 = vmatprep.mubr.f32.mxu0 %v12145_v47  ;;  %16440 = vst [vmem:[#allocation22_spill] sm:$0xff] %v12814_v43  ;;  %v3951_v4 = vsub.f32 %v12798_v29, %v12814_v43 }
 0x285   :  { %10058 = vmatprep.mubr.f32.mxu1 %v16398_v33  ;;  %10090 = vmatpush3.msra.mxu0 %v12772_v38  ;;  %v12824_v41 = vpop.f32.mrf.mxu0  ;;  %v12833_v33 = vand.u32 4294901760, %v3661_v5  ;;  %v3945_v9 = vand.u32 4294901760, %v3944_v63  ;;  %v12894_v63 = vand.u32 4294901760, %v3658_v20 }
 0x286   :  { %16441 = vst [vmem:[#allocation26_spill] sm:$0xff] %v12824_v41  ;;  %10138 = vmatpush3.msra.mxu1 %v3924_v40  ;;  %10025 = vmatmul.mubr.f32.gmra.mxu0 %v12156_v37  ;;  %v3952_v27 = vand.u32 4294901760, %v3951_v4  ;;  %v12876_v40 = vand.u32 4294901760, %v3659_v44  ;;  %v3657_v4 = vld [vmem:[#allocation6 + $0x10] sm:$0xff] }
 0x287   :  { %10059 = vmatmul.mubr.f32.gmra.mxu1 %v16399_v42  ;;  %10091 = vmatprep.subr.mxu0 %v12793_v45  ;;  %16443 = vst [vmem:[#allocation21_spill] sm:$0xff] %v12833_v33  ;;  %v12845_v42 = vand.u32 4294901760, %v12822_v8  ;;  %v12856_v49 = vsub.f32 %v3661_v5, %v12833_v33  ;;  %16453 = vst [vmem:[#allocation43_spill] sm:$0xff] %v12894_v63 }
 0x288   :  { %10139 = vmatprep.subr.mxu1 %v3931_v18  ;;  %10092 = vmatpush3.msra.mxu0 %v12793_v45  ;;  %v12841_v16 = vpop.f32.mrf.mxu0  ;;  %16448 = vst [vmem:[#allocation30_spill] sm:$0xff] %v12876_v40 }
 0x289   :  { %10140 = vmatpush3.msra.mxu1 %v3931_v18  ;;  %10093 = vmatprep.subr.mxu0 %v12802_v32  ;;  %16445 = vst [vmem:[#allocation28_spill] sm:$0xff] %v12845_v42  ;;  %v12887_v2 = vand.u32 4294901760, %v12856_v49 }
 0x28a   :  { %10141 = vmatprep.subr.mxu1 %v3938_v55  ;;  %10027 = vmatprep.mubr.f32.mxu0 %v12198_v39  ;;  %v12851_v51 = vpop.f32.mrf.mxu0 }
 0x28b   :  { %16446 = vst [vmem:[#allocation18_spill] sm:$0xff] %v12851_v51  ;;  %10061 = vmatprep.mubr.f32.mxu1 %v12072_v14  ;;  %10094 = vmatpush3.msra.mxu0 %v12802_v32  ;;  %v3965_v14 = vsub.f32 %v12822_v8, %v12845_v42  ;;  %16450 = vst [vmem:[#allocation34_spill] sm:$0xff] %v12887_v2  ;;  %v12910_v51 = vsub.f32 %v3639_v11, %v12881_v57  ;;  %v3656_v11 = vld [vmem:[#allocation6 + $0x8] sm:$0xff] }
 0x28c   :  { %10142 = vmatpush3.msra.mxu1 %v3938_v55  ;;  %10028 = vmatmul.mubr.f32.gmra.mxu0 %v12215_v60  ;;  %v3959_v55 = vand.u32 4294901760, %v3958_v13  ;;  %v12907_v13 = vsub.f32 %v3659_v44, %v12876_v40 }
 0x28d   :  { %10062 = vmatmul.mubr.f32.gmra.mxu1 %v16402_v53  ;;  %10095 = vmatprep.subr.mxu0 %v12827_v12  ;;  %v12873_v24 = vpop.f32.mrf.mxu0  ;;  %v9657_v22 = vpop.f32.mrf.mxu1  ;;  %v12879_v53 = vand.u32 4294901760, %v12849_v6  ;;  %16454 = vst [vmem:[#allocation46_spill] sm:$0xff] %v12910_v51 }
 0x28e   :  { %10143 = vmatprep.subr.mxu1 %v3945_v9  ;;  %10096 = vmatpush3.msra.mxu0 %v12827_v12  ;;  %v12883_v0 = vadd.f32 %v9657_v22, %v9617_v50  ;;  %v12897_v50 = vsub.f32 %v3660_v61, %v12862_v28  ;;  %v3966_v22 = vand.u32 4294901760, %v3965_v14  ;;  %v3641_v61 = vld [vmem:[%s16044_s1 + $0x10] sm:$0xff]  ;;  %v12948_v56 = vand.u32 4294901760, %v12907_v13 }
 0x28f   :  { %16449 = vst [vmem:[#allocation33_spill] sm:$0xff] %v12879_v53  ;;  %10144 = vmatpush3.msra.mxu1 %v3945_v9  ;;  %10097 = vmatprep.subr.mxu0 %v12833_v33  ;;  %v12889_v18 = vpop.f32.mrf.mxu0  ;;  %v12891_v5 = vpop.f32.mrf.mxu1  ;;  %v12899_v9 = vand.u32 4294901760, %v3640_v26  ;;  %v12940_v42 = vand.u32 4294901760, %v3641_v61 }
 0x290   :  { %16451 = vst [vmem:[#allocation37_spill] sm:$0xff] %v12889_v18  ;;  %16452 = vst [vmem:[#allocation39_spill] sm:$0xff] %v12891_v5  ;;  %10145 = vmatprep.subr.mxu1 %v3952_v27  ;;  %10030 = vmatprep.mubr.f32.mxu0 %v12232_v36  ;;  %v3972_v18 = vsub.f32 %v12849_v6, %v12879_v53  ;;  %v12925_v5 = vand.u32 4294901760, %v12897_v50 }
 0x291   :  { %10064 = vmatprep.mubr.f32.mxu1 %v12145_v47  ;;  %10098 = vmatpush3.msra.mxu0 %v12833_v33  ;;  %v12917_v47 = vand.u32 4294901760, %v3657_v4  ;;  %v12928_v41 = vsub.f32 %v3640_v26, %v12899_v9  ;;  %v3655_v26 = vld [vmem:[#allocation6] sm:$0xff]  ;;  %16460 = vst [vmem:[#allocation40_spill] sm:$0xff] %v12948_v56  ;;  %v12975_v25 = vsub.f32 %v3641_v61, %v12940_v42  ;;  %v3644_v61 = vld [vmem:[%s16044_s1 + $0x28] sm:$0xff] }
 0x292   :  { %10146 = vmatpush3.msra.mxu1 %v3952_v27  ;;  %10031 = vmatmul.mubr.f32.gmra.mxu0 %v12247_v7  ;;  %v3979_v27 = vsub.f32 %v12856_v49, %v12887_v2  ;;  %16456 = vst [vmem:[#allocation54_spill] sm:$0xff] %v12925_v5  ;;  %v3642_v2 = vld [vmem:[%s16044_s1 + $0x18] sm:$0xff] }
 0x293   :  { %10065 = vmatmul.mubr.f32.gmra.mxu1 %v12156_v37  ;;  %10099 = vmatprep.subr.mxu0 %v12862_v28  ;;  %16455 = vst [vmem:[#allocation51_spill] sm:$0xff] %v12917_v47  ;;  %v12921_v14 = vpop.f32.mrf.mxu0  ;;  %v9660_v44 = vpop.f32.mrf.mxu1  ;;  %16457 = vst [vmem:[#allocation29_spill] sm:$0xff] %v12928_v41  ;;  %v12931_v37 = vsub.f32 %v3658_v20, %v12894_v63  ;;  %v3973_v20 = vand.u32 4294901760, %v3972_v18  ;;  %v3643_v18 = vld [vmem:[%s16044_s1 + $0x20] sm:$0xff] }
 0x294   :  { %10147 = vmatprep.subr.mxu1 %v3959_v55  ;;  %10100 = vmatpush3.msra.mxu0 %v12862_v28  ;;  %v12937_v53 = vadd.f32 %v9660_v44, %v12841_v16  ;;  %v12956_v44 = vsub.f32 %v3657_v4, %v12917_v47  ;;  %v12972_v4 = vand.u32 4294901760, %v3655_v26  ;;  %16465 = vst [vmem:[#allocation36_spill] sm:$0xff] %v12975_v25  ;;  %v12985_v21 = vand.u32 4294901760, %v3643_v18 }
 0x295   :  { %10148 = vmatpush3.msra.mxu1 %v3959_v55  ;;  %10101 = vmatprep.subr.mxu0 %v12876_v40  ;;  %v12942_v17 = vpop.f32.mrf.mxu0  ;;  %v12944_v43 = vpop.f32.mrf.mxu1  ;;  %v12953_v55 = vand.u32 4294901760, %v3656_v11  ;;  %v12968_v58 = vand.u32 4294901760, %v12931_v37  ;;  %v3993_v16 = vsub.f32 %v12907_v13, %v12948_v56 }
 0x296   :  { %16458 = vst [vmem:[#allocation38_spill] sm:$0xff] %v12942_v17  ;;  %16459 = vst [vmem:[#allocation31_spill] sm:$0xff] %v12944_v43  ;;  %10149 = vmatprep.subr.mxu1 %v3966_v22  ;;  %10033 = vmatprep.mubr.f32.mxu0 %v12264_v48  ;;  %v12958_v17 = vand.u32 4294901760, %v3642_v2  ;;  %v3980_v43 = vand.u32 4294901760, %v3979_v27 }
 0x297   :  { %10067 = vmatprep.mubr.f32.mxu1 %v12198_v39  ;;  %10102 = vmatpush3.msra.mxu0 %v12876_v40  ;;  %16461 = vst [vmem:[#allocation32_spill] sm:$0xff] %v12953_v55  ;;  %v3986_v39 = vsub.f32 %v12897_v50, %v12925_v5  ;;  %16463 = vst [vmem:[#allocation35_spill] sm:$0xff] %v12968_v58  ;;  %v16466_v5 = vand.u32 4294901760, %v12910_v51  ;;  %v4000_v28 = vsub.f32 %v12931_v37, %v12968_v58 }
 0x298   :  { %16462 = vst [vmem:[#allocation42_spill] sm:$0xff] %v12958_v17  ;;  %10150 = vmatpush3.msra.mxu1 %v3966_v22  ;;  %10034 = vmatmul.mubr.f32.gmra.mxu0 %v12281_v15  ;;  %16464 = vst [vmem:[#allocation45_spill] sm:$0xff] %v12972_v4  ;;  %v12998_v56 = vsub.f32 %v3642_v2, %v12958_v17 }
 0x299   :  { %10068 = vmatmul.mubr.f32.gmra.mxu1 %v12215_v60  ;;  %10103 = vmatprep.subr.mxu0 %v12894_v63  ;;  %v12977_v22 = vpop.f32.mrf.mxu0  ;;  %v9663_v27 = vpop.f32.mrf.mxu1  ;;  %v3755_v60 = vsub.f32 %v12910_v51, %v16466_v5  ;;  %v13001_v5 = vsub.f32 %v3656_v11, %v12953_v55  ;;  %v13017_v11 = vsub.f32 %v3655_v26, %v12972_v4  ;;  %v3646_v26 = vld [vmem:[%s16044_s1 + $0x38] sm:$0xff] }
 0x29a   :  { %10151 = vmatprep.subr.mxu1 %v3973_v20  ;;  %10104 = vmatpush3.msra.mxu0 %v12894_v63  ;;  %v12991_v1 = vadd.f32 %v9663_v27, %v12873_v24  ;;  %v12995_v63 = vand.u32 4294901760, %v12956_v44  ;;  %v3987_v24 = vand.u32 4294901760, %v3986_v39  ;;  %v3645_v39 = vld [vmem:[%s16044_s1 + $0x30] sm:$0xff] }
 0x29b   :  { %10152 = vmatpush3.msra.mxu1 %v3973_v20  ;;  %10105 = vmatprep.subr.mxu0 %v12917_v47  ;;  %v13003_v51 = vpop.f32.mrf.mxu0  ;;  %v13005_v40 = vpop.f32.mrf.mxu1  ;;  %v16470_v20 = vand.u32 4294901760, %v12928_v41  ;;  %v3756_v58 = vand.u32 4294901760, %v3755_v60  ;;  %v13045_v33 = vand.u32 4294901760, %v3645_v39 }
 0x29c   :  { %16467 = vst [vmem:[#allocation48_spill] sm:$0xff] %v12995_v63  ;;  %16468 = vst [vmem:[#allocation41_spill] sm:$0xff] %v13003_v51  ;;  %10153 = vmatprep.subr.mxu1 %v3980_v43  ;;  %10036 = vmatprep.mubr.f32.mxu0 %v12298_v23  ;;  %v13019_v51 = vand.u32 4294901760, %v3644_v61 }
 0x29d   :  { %16469 = vst [vmem:[#allocation50_spill] sm:$0xff] %v13005_v40  ;;  %v3765_v27 = vsub.f32 %v12928_v41, %v16470_v20  ;;  %10070 = vmatprep.mubr.f32.mxu1 %v12232_v36  ;;  %10106 = vmatpush3.msra.mxu0 %v12917_v47  ;;  %v9632_v40 = vpop.f32.mrf.mxu0  ;;  %v3994_v20 = vand.u32 4294901760, %v3993_v16  ;;  %v13026_v36 = vsub.f32 %v3643_v18, %v12985_v21  ;;  %v13037_v16 = vand.u32 4294901760, %v13001_v5 }
 0x29e   :  { %10154 = vmatpush3.msra.mxu1 %v3980_v43  ;;  %10037 = vmatmul.mubr.f32.gmra.mxu0 %v12312_v19  ;;  %v9666_v2 = vpop.f32.mrf.mxu1  ;;  %v4007_v47 = vsub.f32 %v12956_v44, %v12995_v63  ;;  %v16474_v43 = vand.u32 4294901760, %v12975_v25 }
 0x29f   :  { %10071 = vmatmul.mubr.f32.gmra.mxu1 %v12247_v7  ;;  %10107 = vmatprep.subr.mxu0 %v12953_v55  ;;  %16471 = vst [vmem:[#allocation44_spill] sm:$0xff] %v13037_v16  ;;  %v13040_v18 = vadd.f32 %v9666_v2, %v12921_v14  ;;  %v13042_v60 = vpop.f32.mrf.mxu0  ;;  %v3766_v41 = vand.u32 4294901760, %v3765_v27  ;;  %v4001_v7 = vand.u32 4294901760, %v4000_v28  ;;  %v13054_v14 = vand.u32 4294901760, %v13017_v11 }
 0x2a0   :  { %16472 = vst [vmem:[#allocation53_spill] sm:$0xff] %v13042_v60  ;;  %10155 = vmatprep.subr.mxu1 %v3987_v24  ;;  %10108 = vmatpush3.msra.mxu0 %v12953_v55  ;;  %v13047_v12 = vpop.f32.mrf.mxu1  ;;  %v3775_v63 = vsub.f32 %v12975_v25, %v16474_v43  ;;  %v13057_v2 = vsub.f32 %v3644_v61, %v13019_v51  ;;  %v13059_v60 = vand.u32 4294901760, %v3646_v26  ;;  %v16476_v43 = vand.u32 4294901760, %v12998_v56  ;;  %v3647_v25 = vld [vmem:[%s16044_s1 + $0x40] sm:$0xff] }
 0x2a1   :  { %16473 = vst [vmem:[#allocation47_spill] sm:$0xff] %v13047_v12  ;;  %10156 = vmatpush3.msra.mxu1 %v3987_v24  ;;  %10109 = vmatprep.subr.mxu0 %v12972_v4  ;;  %16475 = vst [vmem:[#allocation56_spill] sm:$0xff] %v13054_v14  ;;  %v9635_v28 = vpop.f32.mrf.mxu0  ;;  %v4008_v12 = vand.u32 4294901760, %v4007_v47  ;;  %v4014_v61 = vsub.f32 %v13001_v5, %v13037_v16  ;;  %v3648_v47 = vld [vmem:[%s16044_s1 + $0x48] sm:$0xff] }
 0x2a2   :  { %10157 = vmatprep.subr.mxu1 %v3994_v20  ;;  %10073 = vmatprep.mubr.f32.mxu1 %v12264_v48  ;;  %v9669_v27 = vpop.f32.mrf.mxu1  ;;  %v3785_v55 = vsub.f32 %v12998_v56, %v16476_v43  ;;  %v3776_v16 = vand.u32 4294901760, %v3775_v63 }
 0x2a3   :  { %10110 = vmatpush3.msra.mxu0 %v12972_v4  ;;  %10111 = vmatprep.mubr.f32.mxu0 %v3756_v58  ;;  %v13073_v48 = vadd.f32 %v9669_v27, %v12977_v22  ;;  %v13075_v24 = vpop.f32.mrf.mxu0  ;;  %v13078_v58 = vsub.f32 %v3645_v39, %v13045_v33  ;;  %v4021_v22 = vsub.f32 %v13017_v11, %v13054_v14  ;;  %v4015_v14 = vand.u32 4294901760, %v4014_v61 }
 0x2a4   :  { %16477 = vst [vmem:[#allocation49_spill] sm:$0xff] %v13075_v24  ;;  %10158 = vmatpush3.msra.mxu1 %v3994_v20  ;;  %10112 = vmatmul.mubr.f32.vlgmr.msra.gmra.mxu0 %v3766_v41  ;;  %v13083_v43 = vpop.f32.mrf.mxu1  ;;  %v13090_v41 = vsub.f32 %v3646_v26, %v13059_v60  ;;  %v16479_v20 = vand.u32 4294901760, %v13026_v36  ;;  %v3786_v63 = vand.u32 4294901760, %v3785_v55  ;;  %v13099_v27 = vand.u32 4294901760, %v3648_v47 }
 0x2a5   :  { %16478 = vst [vmem:[#allocation52_spill] sm:$0xff] %v13083_v43  ;;  %10074 = vmatmul.mubr.f32.gmra.mxu1 %v12281_v15  ;;  %10159 = vmatprep.subr.mxu1 %v4001_v7  ;;  %v9638_v39 = vpop.f32.mrf.mxu0  ;;  %v13096_v43 = vand.u32 4294901760, %v3647_v25  ;;  %v16482_v55 = vand.u32 4294901760, %v13057_v2 }
 0x2a6   :  { %10191 = vmatprep.subr.mxu0 %v12704_v52  ;;  %10160 = vmatpush3.msra.mxu1 %v4001_v7  ;;  %v3795_v24 = vsub.f32 %v13026_v36, %v16479_v20  ;;  %v9672_v15 = vpop.f32.mrf.mxu1 }
 0x2a7   :  { %10192 = vmatpush3.msra.mxu0 %v12704_v52  ;;  %10161 = vmatprep.subr.mxu1 %v4008_v12  ;;  %v13101_v26 = vadd.f32 %v9672_v15, %v9632_v40  ;;  %v13103_v4 = vpop.f32.mrf.mxu0  ;;  %v4022_v52 = vand.u32 4294901760, %v4021_v22  ;;  %v3805_v61 = vsub.f32 %v13057_v2, %v16482_v55  ;;  %v3649_v15 = vld [vmem:[%s16044_s1 + $0x50] sm:$0xff]  ;;  %v13124_v55 = vsub.f32 %v3648_v47, %v13099_v27  ;;  %v3650_v40 = vld [vmem:[%s16044_s1 + $0x58] sm:$0xff] }
 0x2a8   :  { %16480 = vst [vmem:[#allocation55_spill] sm:$0xff] %v13103_v4  ;;  %10193 = vmatprep.subr.mxu0 %v12746_v3  ;;  %10076 = vmatprep.mubr.f32.mxu1 %v12298_v23  ;;  %v13108_v20 = vpop.f32.mrf.mxu1  ;;  %v3796_v23 = vand.u32 4294901760, %v3795_v24 }
 0x2a9   :  { %16481 = vst [vmem:[#allocation57_spill] sm:$0xff] %v13108_v20  ;;  %10114 = vmatprep.mubr.f32.mxu0 %v3776_v16  ;;  %10162 = vmatpush3.msra.mxu1 %v4008_v12  ;;  %v9697_v4 = vpop.f32.mrf.mxu0  ;;  %v13120_v16 = vsub.f32 %v3647_v25, %v13096_v43  ;;  %v3806_v24 = vand.u32 4294901760, %v3805_v61  ;;  %v3651_v61 = vld [vmem:[%s16044_s1 + $0x60] sm:$0xff] }
 0x2aa   :  { %10194 = vmatpush3.msra.mxu0 %v12746_v3  ;;  %10077 = vmatmul.mubr.f32.gmra.mxu1 %v12312_v19  ;;  %v9675_v12 = vpop.f32.mrf.mxu1  ;;  %v1745_v22 = vadd.f32 %v9697_v4, %v12883_v0  ;;  %v16484_v19 = vand.u32 4294901760, %v13078_v58  ;;  %v13137_v0 = vand.u32 4294901760, %v3649_v15 }
 0x2ab   :  { %10115 = vmatmul.mubr.f32.gmra.mxu0 %v3786_v63  ;;  %10163 = vmatprep.subr.mxu1 %v4015_v14  ;;  %v13129_v7 = vadd.f32 %v9675_v12, %v9635_v28  ;;  %v13131_v3 = vpop.f32.mrf.mxu0  ;;  %v16486_v28 = vand.u32 4294901760, %v13090_v41  ;;  %v13147_v12 = vand.u32 4294901760, %v3650_v40 }
 0x2ac   :  { %16483 = vst [vmem:[#allocation58_spill] sm:$0xff] %v13131_v3  ;;  %10195 = vmatprep.subr.mxu0 %v12758_v59  ;;  %10164 = vmatpush3.msra.mxu1 %v4015_v14  ;;  %v3815_v25 = vsub.f32 %v13078_v58, %v16484_v19  ;;  %v13139_v4 = vpop.f32.mrf.mxu1  ;;  %v16171_v14 = vand.u32 4294901760, %v13120_v16 }
 0x2ad   :  { %16485 = vst [vmem:[#allocation59_spill] sm:$0xff] %v13139_v4  ;;  %10196 = vmatpush3.msra.mxu0 %v12758_v59  ;;  %10165 = vmatprep.subr.mxu1 %v4022_v52  ;;  %v3825_v47 = vsub.f32 %v13090_v41, %v16486_v28  ;;  %v9700_v63 = vpop.f32.mrf.mxu0  ;;  %v16172_v59 = vand.u32 4294901760, %v13124_v55 }
 0x2ae   :  { %10197 = vmatprep.subr.mxu0 %v12766_v54  ;;  %10117 = vmatprep.mubr.f32.mxu0 %v3796_v23  ;;  %v9678_v19 = vpop.f32.mrf.mxu1  ;;  %v1759_v20 = vadd.f32 %v9700_v63, %v12937_v53  ;;  %v3816_v23 = vand.u32 4294901760, %v3815_v25  ;;  %v13162_v53 = vsub.f32 %v3649_v15, %v13137_v0  ;;  %v13176_v15 = vsub.f32 %v3650_v40, %v13147_v12 }
 0x2af   :  { %10166 = vmatpush3.msra.mxu1 %v4022_v52  ;;  %10167 = vmatprep.mubr.f32.mxu1 %v12881_v57  ;;  %v13155_v28 = vadd.f32 %v9678_v19, %v9638_v39  ;;  %v13157_v4 = vpop.f32.mrf.mxu0  ;;  %v3826_v63 = vand.u32 4294901760, %v3825_v47  ;;  %v3652_v39 = vld [vmem:[%s16044_s1 + $0x68] sm:$0xff]  ;;  %v13178_v25 = vand.u32 4294901760, %v3651_v61 }
 0x2b0   :  { %16487 = vst [vmem:[#allocation60_spill] sm:$0xff] %v13157_v4  ;;  %10198 = vmatpush3.msra.mxu0 %v12766_v54  ;;  %10168 = vmatmul.mubr.f32.vlgmr.msra.gmra.mxu1 %v12899_v9  ;;  %v13164_v52 = vpop.f32.mrf.mxu1  ;;  %v3835_v54 = vsub.f32 %v13120_v16, %v16171_v14  ;;  %v13192_v14 = vand.u32 4294901760, %v3652_v39 }
 0x2b1   :  { %16488 = vst [vmem:[#allocation61_spill] sm:$0xff] %v13164_v52  ;;  %10118 = vmatmul.mubr.f32.gmra.mxu0 %v3806_v24  ;;  %10199 = vmatprep.subr.mxu0 %v12787_v62  ;;  %v9703_v19 = vpop.f32.mrf.mxu0 }
 0x2b2   :  { %10247 = vmatprep.subr.mxu1 %v12693_v10  ;;  %10200 = vmatpush3.msra.mxu0 %v12787_v62  ;;  %v1773_v24 = vadd.f32 %v9703_v19, %v12991_v1  ;;  %v9737_v47 = vpop.f32.mrf.mxu1  ;;  %v3845_v62 = vsub.f32 %v13124_v55, %v16172_v59  ;;  %v3836_v19 = vand.u32 4294901760, %v3835_v54 }
 0x2b3   :  { %10248 = vmatpush3.msra.mxu1 %v12693_v10  ;;  %10201 = vmatprep.subr.mxu0 %v12798_v29  ;;  %v13186_v52 = vadd.f32 %v9737_v47, %v1745_v22  ;;  %v13188_v4 = vpop.f32.mrf.mxu0  ;;  %v3653_v22 = vld [vmem:[%s16044_s1 + $0x70] sm:$0xff]  ;;  %v13204_v47 = vsub.f32 %v3651_v61, %v13178_v25  ;;  %v13217_v61 = vsub.f32 %v3652_v39, %v13192_v14 }
 0x2b4   :  { %16489 = vst [vmem:[#allocation62_spill] sm:$0xff] %v13188_v4  ;;  %10249 = vmatprep.subr.mxu1 %v12736_v35  ;;  %10120 = vmatprep.mubr.f32.mxu0 %v3816_v23  ;;  %v13194_v1 = vpop.f32.mrf.mxu1  ;;  %v3846_v59 = vand.u32 4294901760, %v3845_v62  ;;  %v13219_v23 = vand.u32 4294901760, %v3653_v22 }
 0x2b5   :  { %16490 = vst [vmem:[#allocation63_spill] sm:$0xff] %v13194_v1  ;;  %10170 = vmatprep.mubr.f32.mxu1 %v12940_v42  ;;  %10202 = vmatpush3.msra.mxu0 %v12798_v29  ;;  %v3654_v29 = vld [vmem:[%s16044_s1 + $0x78] sm:$0xff] }
 0x2b6   :  { %10250 = vmatpush3.msra.mxu1 %v12736_v35  ;;  %10121 = vmatmul.mubr.f32.gmra.mxu0 %v3826_v63  ;;  %v16491_v63 = vand.u32 4294901760, %v13162_v53 }
 0x2b7   :  { %10171 = vmatmul.mubr.f32.gmra.mxu1 %v12958_v17  ;;  %10203 = vmatprep.subr.mxu0 %v12817_v46  ;;  %v9706_v40 = vpop.f32.mrf.mxu0  ;;  %v13233_v17 = vand.u32 4294901760, %v3654_v29 }
 0x2b8   :  { %10251 = vmatprep.subr.mxu1 %v12743_v31  ;;  %10204 = vmatpush3.msra.mxu0 %v12817_v46  ;;  %v3855_v54 = vsub.f32 %v13162_v53, %v16491_v63  ;;  %v1787_v62 = vadd.f32 %v9706_v40, %v13040_v18  ;;  %v9740_v1 = vpop.f32.mrf.mxu1  ;;  %v16493_v46 = vand.u32 4294901760, %v13176_v15  ;;  %v16175_v63 = vand.u32 4294901760, %v13204_v47 }
 0x2b9   :  { %10252 = vmatpush3.msra.mxu1 %v12743_v31  ;;  %10205 = vmatprep.subr.mxu0 %v12822_v8  ;;  %v13224_v4 = vadd.f32 %v9740_v1, %v1759_v20  ;;  %v13226_v3 = vpop.f32.mrf.mxu0  ;;  %v13242_v1 = vsub.f32 %v3653_v22, %v13219_v23 }
 0x2ba   :  { %16492 = vst [vmem:[#allocation64_spill] sm:$0xff] %v13226_v3  ;;  %10253 = vmatprep.subr.mxu1 %v12751_v34  ;;  %10123 = vmatprep.mubr.f32.mxu0 %v3836_v19  ;;  %v3865_v39 = vsub.f32 %v13176_v15, %v16493_v46  ;;  %v13235_v18 = vpop.f32.mrf.mxu1  ;;  %v3856_v20 = vand.u32 4294901760, %v3855_v54 }
 0x2bb   :  { %16494 = vst [vmem:[#allocation65_spill] sm:$0xff] %v13235_v18  ;;  %10173 = vmatprep.mubr.f32.mxu1 %v12985_v21  ;;  %10206 = vmatpush3.msra.mxu0 %v12822_v8  ;;  %v3875_v8 = vsub.f32 %v13204_v47, %v16175_v63 }
 0x2bc   :  { %10254 = vmatpush3.msra.mxu1 %v12751_v34  ;;  %10124 = vmatmul.mubr.f32.gmra.mxu0 %v3846_v59  ;;  %v3866_v46 = vand.u32 4294901760, %v3865_v39  ;;  %v13252_v59 = vsub.f32 %v3654_v29, %v13233_v17 }
 0x2bd   :  { %10174 = vmatmul.mubr.f32.gmra.mxu1 %v13019_v51  ;;  %10207 = vmatprep.subr.mxu0 %v12849_v6  ;;  %v9709_v19 = vpop.f32.mrf.mxu0 }
 0x2be   :  { %10255 = vmatprep.subr.mxu1 %v12763_v30  ;;  %10208 = vmatpush3.msra.mxu0 %v12849_v6  ;;  %v1801_v22 = vadd.f32 %v9709_v19, %v13073_v48  ;;  %v9743_v54 = vpop.f32.mrf.mxu1  ;;  %v16496_v6 = vand.u32 4294901760, %v13217_v61 }
 0x2bf   :  { %10256 = vmatpush3.msra.mxu1 %v12763_v30  ;;  %10209 = vmatprep.subr.mxu0 %v12856_v49  ;;  %v13257_v40 = vadd.f32 %v9743_v54, %v1773_v24  ;;  %v13259_v18 = vpop.f32.mrf.mxu0  ;;  %v3876_v24 = vand.u32 4294901760, %v3875_v8 }
 0x2c0   :  { %16495 = vst [vmem:[#allocation66_spill] sm:$0xff] %v13259_v18  ;;  %10257 = vmatprep.subr.mxu1 %v12772_v38  ;;  %10126 = vmatprep.mubr.f32.mxu0 %v3856_v20  ;;  %v3885_v39 = vsub.f32 %v13217_v61, %v16496_v6  ;;  %v13266_v63 = vpop.f32.mrf.mxu1 }
 0x2c1   :  { %16497 = vst [vmem:[#allocation67_spill] sm:$0xff] %v13266_v63  ;;  %10176 = vmatprep.mubr.f32.mxu1 %v13045_v33  ;;  %10210 = vmatpush3.msra.mxu0 %v12856_v49  ;;  %v9712_v48 = vpop.f32.mrf.mxu0  ;;  %v16526_v63 = vld [vmem:[#allocation23_spill] sm:$0xff] }
 0x2c2   :  { %10258 = vmatpush3.msra.mxu1 %v12772_v38  ;;  %10127 = vmatmul.mubr.f32.gmra.mxu0 %v3866_v46  ;;  %v1815_v20 = vadd.f32 %v9712_v48, %v13101_v26  ;;  %v9746_v54 = vpop.f32.mrf.mxu1  ;;  %v3886_v49 = vand.u32 4294901760, %v3885_v39  ;;  %v16499_v46 = vand.u32 4294901760, %v13242_v1 }
 0x2c3   :  { %10177 = vmatmul.mubr.f32.gmra.mxu1 %v13059_v60  ;;  %10211 = vmatprep.subr.mxu0 %v12897_v50  ;;  %v13275_v6 = vadd.f32 %v9746_v54, %v1787_v62  ;;  %v13277_v29 = vpop.f32.mrf.mxu0  ;;  %v16501_v62 = vand.u32 4294901760, %v13252_v59 }
 0x2c4   :  { %16498 = vst [vmem:[#allocation68_spill] sm:$0xff] %v13277_v29  ;;  %10259 = vmatprep.subr.mxu1 %v12793_v45  ;;  %10212 = vmatpush3.msra.mxu0 %v12897_v50  ;;  %v3895_v8 = vsub.f32 %v13242_v1, %v16499_v46  ;;  %v13284_v19 = vpop.f32.mrf.mxu1 }
 0x2c5   :  { %16500 = vst [vmem:[#allocation69_spill] sm:$0xff] %v13284_v19  ;;  %10260 = vmatpush3.msra.mxu1 %v12793_v45  ;;  %10213 = vmatprep.subr.mxu0 %v12907_v13  ;;  %v9715_v26 = vpop.f32.mrf.mxu0  ;;  %v3905_v48 = vsub.f32 %v13252_v59, %v16501_v62 }
 0x2c6   :  { %10261 = vmatprep.subr.mxu1 %v12802_v32  ;;  %10129 = vmatprep.mubr.f32.mxu0 %v3876_v24  ;;  %v1829_v50 = vadd.f32 %v9715_v26, %v13129_v7  ;;  %v9749_v39 = vpop.f32.mrf.mxu1  ;;  %v3896_v19 = vand.u32 4294901760, %v3895_v8  ;;  %v16504_v26 = vld [vmem:[#allocation27_spill] sm:$0xff] }
 0x2c7   :  { %10179 = vmatprep.mubr.f32.mxu1 %v13096_v43  ;;  %10214 = vmatpush3.msra.mxu0 %v12907_v13  ;;  %v13295_v54 = vadd.f32 %v9749_v39, %v1801_v22  ;;  %v13297_v46 = vpop.f32.mrf.mxu0  ;;  %v3906_v13 = vand.u32 4294901760, %v3905_v48  ;;  %v16506_v39 = vld [vmem:[#allocation21_spill] sm:$0xff] }
 0x2c8   :  { %16502 = vst [vmem:[#allocation70_spill] sm:$0xff] %v13297_v46  ;;  %10262 = vmatpush3.msra.mxu1 %v12802_v32  ;;  %10130 = vmatmul.mubr.f32.gmra.mxu0 %v3886_v49  ;;  %v13300_v24 = vpop.f32.mrf.mxu1 }
 0x2c9   :  { %16503 = vst [vmem:[#allocation71_spill] sm:$0xff] %v13300_v24  ;;  %10180 = vmatmul.mubr.f32.gmra.mxu1 %v13099_v27  ;;  %10215 = vmatprep.subr.mxu0 %v12931_v37  ;;  %v9718_v7 = vpop.f32.mrf.mxu0 }
 0x2ca   :  { %10263 = vmatprep.subr.mxu1 %v16504_v26  ;;  %10216 = vmatpush3.msra.mxu0 %v12931_v37  ;;  %v1843_v22 = vadd.f32 %v9718_v7, %v13155_v28  ;;  %v9752_v62 = vpop.f32.mrf.mxu1  ;;  %v16509_v7 = vld [vmem:[#allocation17_spill] sm:$0xff] }
 0x2cb   :  { %10264 = vmatpush3.msra.mxu1 %v16504_v26  ;;  %10217 = vmatprep.subr.mxu0 %v12956_v44  ;;  %v13309_v49 = vadd.f32 %v9752_v62, %v1815_v20  ;;  %v13311_v8 = vpop.f32.mrf.mxu0 }
 0x2cc   :  { %16505 = vst [vmem:[#allocation27_spill] sm:$0xff] %v13311_v8  ;;  %10265 = vmatprep.subr.mxu1 %v16506_v39  ;;  %10132 = vmatprep.mubr.f32.mxu0 %v3896_v19  ;;  %v13314_v46 = vpop.f32.mrf.mxu1  ;;  %v16514_v8 = vld [vmem:[#allocation29_spill] sm:$0xff] }
 0x2cd   :  { %16507 = vst [vmem:[#allocation21_spill] sm:$0xff] %v13314_v46  ;;  %10182 = vmatprep.mubr.f32.mxu1 %v13137_v0  ;;  %10218 = vmatpush3.msra.mxu0 %v12956_v44  ;;  %v9777_v37 = vpop.f32.mrf.mxu0  ;;  %v16516_v46 = vld [vmem:[#allocation43_spill] sm:$0xff] }
 0x2ce   :  { %10266 = vmatpush3.msra.mxu1 %v16506_v39  ;;  %10133 = vmatmul.mubr.f32.gmra.mxu0 %v3906_v13  ;;  %v9755_v28 = vpop.f32.mrf.mxu1  ;;  %v2145_v48 = vadd.f32 %v9777_v37, %v13186_v52  ;;  %v16511_v52 = vld [vmem:[#allocation30_spill] sm:$0xff] }
 0x2cf   :  { %10183 = vmatmul.mubr.f32.gmra.mxu1 %v13147_v12  ;;  %10219 = vmatprep.subr.mxu0 %v13001_v5  ;;  %v13322_v20 = vadd.f32 %v9755_v28, %v1829_v50  ;;  %v13324_v19 = vpop.f32.mrf.mxu0  ;;  %v16512_v37 = vld [vmem:[#allocation46_spill] sm:$0xff] }
 0x2d0   :  { %16508 = vst [vmem:[#allocation72_spill] sm:$0xff] %v13324_v19  ;;  %10267 = vmatprep.subr.mxu1 %v16509_v7  ;;  %10220 = vmatpush3.msra.mxu0 %v13001_v5  ;;  %v13328_v44 = vpop.f32.mrf.mxu1  ;;  %v16522_v19 = vld [vmem:[#allocation36_spill] sm:$0xff]  ;;  %v16527_v3 = vand.u32 4294901760, %v16512_v37 }
 0x2d1   :  { %16510 = vst [vmem:[#allocation17_spill] sm:$0xff] %v13328_v44  ;;  %10268 = vmatpush3.msra.mxu1 %v16509_v7  ;;  %10221 = vmatprep.subr.mxu0 %v13017_v11  ;;  %v9780_v13 = vpop.f32.mrf.mxu0 }
 0x2d2   :  { %10269 = vmatprep.subr.mxu1 %v16511_v52  ;;  %10185 = vmatprep.mubr.f32.mxu1 %v13178_v25  ;;  %v9758_v62 = vpop.f32.mrf.mxu1  ;;  %v2157_v50 = vadd.f32 %v9780_v13, %v13224_v4  ;;  %v16517_v4 = vld [vmem:[#allocation25_spill] sm:$0xff]  ;;  %v16518_v13 = vld [vmem:[#allocation51_spill] sm:$0xff] }
 0x2d3   :  { %10222 = vmatpush3.msra.mxu0 %v13017_v11  ;;  %10223 = vmatprep.mubr.f32.mxu0 %v16512_v37  ;;  %v13337_v28 = vadd.f32 %v9758_v62, %v1843_v22  ;;  %v13339_v5 = vpop.f32.mrf.mxu0 }
 0x2d4   :  { %16513 = vst [vmem:[#allocation30_spill] sm:$0xff] %v13339_v5  ;;  %10270 = vmatpush3.msra.mxu1 %v16511_v52  ;;  %10224 = vmatmul.mubr.f32.vlgmr.msra.gmra.mxu0 %v16514_v8  ;;  %v13343_v44 = vpop.f32.mrf.mxu1 }
 0x2d5   :  { %16515 = vst [vmem:[#allocation46_spill] sm:$0xff] %v13343_v44  ;;  %10186 = vmatmul.mubr.f32.gmra.mxu1 %v13192_v14  ;;  %10271 = vmatprep.subr.mxu1 %v16516_v46  ;;  %v9783_v24 = vpop.f32.mrf.mxu0  ;;  %v16520_v44 = vld [vmem:[#allocation24_spill] sm:$0xff] }
 0x2d6   :  { %10303 = vmatprep.subr.mxu0 %v16517_v4  ;;  %10272 = vmatpush3.msra.mxu1 %v16516_v46  ;;  %v2169_v11 = vadd.f32 %v9783_v24, %v13257_v40  ;;  %v9817_v22 = vpop.f32.mrf.mxu1  ;;  %v16523_v40 = vld [vmem:[#allocation32_spill] sm:$0xff] }
 0x2d7   :  { %10304 = vmatpush3.msra.mxu0 %v16517_v4  ;;  %10273 = vmatprep.subr.mxu1 %v16518_v13  ;;  %v13352_v62 = vadd.f32 %v9817_v22, %v2145_v48  ;;  %v13354_v5 = vpop.f32.mrf.mxu0  ;;  %v16524_v48 = vld [vmem:[#allocation16_spill] sm:$0xff] }
 0x2d8   :  { %16519 = vst [vmem:[#allocation29_spill] sm:$0xff] %v13354_v5  ;;  %10305 = vmatprep.subr.mxu0 %v16520_v44  ;;  %10188 = vmatprep.mubr.f32.mxu1 %v13219_v23  ;;  %v13358_v29 = vpop.f32.mrf.mxu1 }
 0x2d9   :  { %16521 = vst [vmem:[#allocation43_spill] sm:$0xff] %v13358_v29  ;;  %10226 = vmatprep.mubr.f32.mxu0 %v16522_v19  ;;  %10274 = vmatpush3.msra.mxu1 %v16518_v13  ;;  %v16525_v29 = vld [vmem:[#allocation45_spill] sm:$0xff] }
 0x2da   :  { %10306 = vmatpush3.msra.mxu0 %v16520_v44  ;;  %10189 = vmatmul.mubr.f32.gmra.mxu1 %v13233_v17 }
 0x2db   :  { %10227 = vmatmul.mubr.f32.gmra.mxu0 %v12998_v56  ;;  %10275 = vmatprep.subr.mxu1 %v16523_v40  ;;  %v9786_v24 = vpop.f32.mrf.mxu0 }
 0x2dc   :  { %10307 = vmatprep.subr.mxu0 %v16524_v48  ;;  %10276 = vmatpush3.msra.mxu1 %v16523_v40  ;;  %v2181_v4 = vadd.f32 %v9786_v24, %v13275_v6  ;;  %v9820_v22 = vpop.f32.mrf.mxu1  ;;  %v16528_v6 = vand.u32 4294901760, %v16514_v8 }
 0x2dd   :  { %10308 = vmatpush3.msra.mxu0 %v16524_v48  ;;  %10277 = vmatprep.subr.mxu1 %v16525_v29  ;;  %v13371_v5 = vadd.f32 %v9820_v22, %v2157_v50  ;;  %v13373_v44 = vpop.f32.mrf.mxu0  ;;  %v16529_v50 = vld [vmem:[#allocation20_spill] sm:$0xff] }
 0x2de   :  { %10309 = vmatprep.subr.mxu0 %v16526_v63  ;;  %10229 = vmatprep.mubr.f32.mxu0 %v13026_v36  ;;  %v13377_v18 = vpop.f32.mrf.mxu1 }
 0x2df   :  { %10278 = vmatpush3.msra.mxu1 %v16525_v29  ;;  %10279 = vmatprep.mubr.f32.mxu1 %v16527_v3  ;;  %v16530_v3 = vld [vmem:[#allocation22_spill] sm:$0xff] }
 0x2e0   :  { %10310 = vmatpush3.msra.mxu0 %v16526_v63  ;;  %10280 = vmatmul.mubr.f32.vlgmr.msra.gmra.mxu1 %v16528_v6  ;;  %v16532_v6 = vand.u32 4294901760, %v16522_v19 }
 0x2e1   :  { %10230 = vmatmul.mubr.f32.gmra.mxu0 %v13057_v2  ;;  %10311 = vmatprep.subr.mxu0 %v16529_v50  ;;  %v9789_v24 = vpop.f32.mrf.mxu0 }
 0x2e2   :  { %10359 = vmatprep.subr.mxu1 %v12693_v10  ;;  %10312 = vmatpush3.msra.mxu0 %v16529_v50  ;;  %v2193_v48 = vadd.f32 %v9789_v24, %v13295_v54  ;;  %v9823_v22 = vpop.f32.mrf.mxu1  ;;  %v16533_v50 = vand.u32 4294901760, %v12998_v56  ;;  %v16534_v24 = vld [vmem:[#allocation19_spill] sm:$0xff] }
 0x2e3   :  { %10360 = vmatpush3.msra.mxu1 %v12693_v10  ;;  %10313 = vmatprep.subr.mxu0 %v16530_v3  ;;  %v13392_v63 = vadd.f32 %v9823_v22, %v2169_v11  ;;  %v13394_v8 = vpop.f32.mrf.mxu0 }
 0x2e4   :  { %10361 = vmatprep.subr.mxu1 %v12736_v35  ;;  %10232 = vmatprep.mubr.f32.mxu0 %v13078_v58  ;;  %v13398_v37 = vpop.f32.mrf.mxu1 }
 0x2e5   :  { %16531 = vst [vmem:[#allocation25_spill] sm:$0xff] %v13398_v37  ;;  %10282 = vmatprep.mubr.f32.mxu1 %v16532_v6  ;;  %10314 = vmatpush3.msra.mxu0 %v16530_v3  ;;  %v9792_v54 = vpop.f32.mrf.mxu0  ;;  %v16536_v3 = vand.u32 4294901760, %v13026_v36 }
 0x2e6   :  { %10362 = vmatpush3.msra.mxu1 %v12736_v35  ;;  %10233 = vmatmul.mubr.f32.gmra.mxu0 %v13090_v41  ;;  %v2205_v10 = vadd.f32 %v9792_v54, %v13309_v49  ;;  %v9826_v11 = vpop.f32.mrf.mxu1  ;;  %v16535_v35 = vld [vmem:[#allocation28_spill] sm:$0xff] }
 0x2e7   :  { %10283 = vmatmul.mubr.f32.gmra.mxu1 %v16533_v50  ;;  %10315 = vmatprep.subr.mxu0 %v16534_v24  ;;  %v13409_v22 = vadd.f32 %v9826_v11, %v2181_v4  ;;  %v13411_v37 = vpop.f32.mrf.mxu0  ;;  %v16537_v11 = vand.u32 4294901760, %v13057_v2 }
 0x2e8   :  { %10363 = vmatprep.subr.mxu1 %v12743_v31  ;;  %10316 = vmatpush3.msra.mxu0 %v16534_v24  ;;  %v13415_v19 = vpop.f32.mrf.mxu1 }
 0x2e9   :  { %10364 = vmatpush3.msra.mxu1 %v12743_v31  ;;  %10317 = vmatprep.subr.mxu0 %v16535_v35  ;;  %v9795_v49 = vpop.f32.mrf.mxu0 }
 0x2ea   :  { %10365 = vmatprep.subr.mxu1 %v12751_v34  ;;  %10235 = vmatprep.mubr.f32.mxu0 %v13120_v16  ;;  %v2217_v56 = vadd.f32 %v9795_v49, %v13322_v20  ;;  %v9829_v4 = vpop.f32.mrf.mxu1  ;;  %v16538_v20 = vld [vmem:[#allocation33_spill] sm:$0xff]  ;;  %v16540_v49 = vand.u32 4294901760, %v13078_v58 }
 0x2eb   :  { %10285 = vmatprep.mubr.f32.mxu1 %v16536_v3  ;;  %10318 = vmatpush3.msra.mxu0 %v16535_v35  ;;  %v13425_v6 = vadd.f32 %v9829_v4, %v2193_v48  ;;  %v13427_v54 = vpop.f32.mrf.mxu0  ;;  %v16542_v4 = vld [vmem:[#allocation54_spill] sm:$0xff] }
 0x2ec   :  { %10366 = vmatpush3.msra.mxu1 %v12751_v34  ;;  %10236 = vmatmul.mubr.f32.gmra.mxu0 %v13124_v55  ;;  %v13431_v31 = vpop.f32.mrf.mxu1  ;;  %v16539_v34 = vld [vmem:[#allocation34_spill] sm:$0xff] }
 0x2ed   :  { %10286 = vmatmul.mubr.f32.gmra.mxu1 %v16537_v11  ;;  %10319 = vmatprep.subr.mxu0 %v16538_v20  ;;  %v9798_v50 = vpop.f32.mrf.mxu0 }
 0x2ee   :  { %10367 = vmatprep.subr.mxu1 %v12763_v30  ;;  %10320 = vmatpush3.msra.mxu0 %v16538_v20  ;;  %v2229_v36 = vadd.f32 %v9798_v50, %v13337_v28  ;;  %v9832_v48 = vpop.f32.mrf.mxu1 }
 0x2ef   :  { %10368 = vmatpush3.msra.mxu1 %v12763_v30  ;;  %10321 = vmatprep.subr.mxu0 %v16539_v34  ;;  %v13441_v24 = vadd.f32 %v9832_v48, %v2205_v10  ;;  %v13443_v35 = vpop.f32.mrf.mxu0  ;;  %v16541_v10 = vand.u32 4294901760, %v13090_v41 }
 0x2f0   :  { %10369 = vmatprep.subr.mxu1 %v12772_v38  ;;  %10238 = vmatprep.mubr.f32.mxu0 %v13162_v53  ;;  %v13447_v2 = vpop.f32.mrf.mxu1 }
 0x2f1   :  { %10288 = vmatprep.mubr.f32.mxu1 %v16540_v49  ;;  %10322 = vmatpush3.msra.mxu0 %v16539_v34  ;;  %v9857_v28 = vpop.f32.mrf.mxu0  ;;  %v16546_v34 = vand.u32 4294901760, %v13124_v55  ;;  %v16547_v49 = vld [vmem:[#allocation35_spill] sm:$0xff] }
 0x2f2   :  { %10370 = vmatpush3.msra.mxu1 %v12772_v38  ;;  %10239 = vmatmul.mubr.f32.gmra.mxu0 %v13176_v15  ;;  %v9835_v30 = vpop.f32.mrf.mxu1  ;;  %v16543_v38 = vld [vmem:[#allocation40_spill] sm:$0xff] }
 0x2f3   :  { %10289 = vmatmul.mubr.f32.gmra.mxu1 %v16541_v10  ;;  %10323 = vmatprep.subr.mxu0 %v16542_v4  ;;  %v13457_v3 = vadd.f32 %v9835_v30, %v2217_v56  ;;  %v13459_v11 = vpop.f32.mrf.mxu0  ;;  %v16544_v56 = vand.u32 4294901760, %v13120_v16 }
 0x2f4   :  { %10371 = vmatprep.subr.mxu1 %v12793_v45  ;;  %10324 = vmatpush3.msra.mxu0 %v16542_v4  ;;  %v13463_v58 = vpop.f32.mrf.mxu1  ;;  %v16549_v4 = vand.u32 4294901760, %v13162_v53  ;;  %v16552_v53 = vld [vmem:[#allocation56_spill] sm:$0xff] }
 0x2f5   :  { %10372 = vmatpush3.msra.mxu1 %v12793_v45  ;;  %10325 = vmatprep.subr.mxu0 %v16543_v38  ;;  %v9860_v20 = vpop.f32.mrf.mxu0 }
 0x2f6   :  { %10373 = vmatprep.subr.mxu1 %v12802_v32  ;;  %10241 = vmatprep.mubr.f32.mxu0 %v13204_v47  ;;  %v9838_v41 = vpop.f32.mrf.mxu1 }
 0x2f7   :  { %10291 = vmatprep.mubr.f32.mxu1 %v16544_v56  ;;  %10326 = vmatpush3.msra.mxu0 %v16543_v38  ;;  %v13472_v50 = vadd.f32 %v9838_v41, %v2229_v36  ;;  %v13474_v48 = vpop.f32.mrf.mxu0  ;;  %v16548_v36 = vld [vmem:[#allocation48_spill] sm:$0xff] }
 0x2f8   :  { %10374 = vmatpush3.msra.mxu1 %v12802_v32  ;;  %10242 = vmatmul.mubr.f32.gmra.mxu0 %v13217_v61  ;;  %v13478_v45 = vpop.f32.mrf.mxu1 }
 0x2f9   :  { %16545 = vst [vmem:[#allocation51_spill] sm:$0xff] %v13478_v45  ;;  %10292 = vmatmul.mubr.f32.gmra.mxu1 %v16546_v34  ;;  %10327 = vmatprep.subr.mxu0 %v16547_v49  ;;  %v9863_v30 = vpop.f32.mrf.mxu0 }
 0x2fa   :  { %10375 = vmatprep.subr.mxu1 %v16504_v26  ;;  %10328 = vmatpush3.msra.mxu0 %v16547_v49  ;;  %v9897_v16 = vpop.f32.mrf.mxu1 }
 0x2fb   :  { %10376 = vmatpush3.msra.mxu1 %v16504_v26  ;;  %10329 = vmatprep.subr.mxu0 %v16548_v36  ;;  %v13487_v32 = vadd.f32 %v9897_v16, %v9857_v28  ;;  %v13489_v10 = vpop.f32.mrf.mxu0  ;;  %v16550_v26 = vand.u32 4294901760, %v13176_v15  ;;  %v16551_v28 = vld [vmem:[#allocation44_spill] sm:$0xff]  ;;  %v16553_v15 = vand.u32 4294901760, %v13204_v47  ;;  %v16555_v47 = vand.u32 4294901760, %v13242_v1 }
 0x2fc   :  { %10377 = vmatprep.subr.mxu1 %v16506_v39  ;;  %10244 = vmatprep.mubr.f32.mxu0 %v13242_v1  ;;  %v13493_v55 = vpop.f32.mrf.mxu1 }
 0x2fd   :  { %10294 = vmatprep.mubr.f32.mxu1 %v16549_v4  ;;  %10330 = vmatpush3.msra.mxu0 %v16548_v36  ;;  %v16557_v4 = vand.u32 4294901760, %v13252_v59 }
 0x2fe   :  { %10378 = vmatpush3.msra.mxu1 %v16506_v39  ;;  %10245 = vmatmul.mubr.f32.gmra.mxu0 %v13252_v59 }
 0x2ff   :  { %10295 = vmatmul.mubr.f32.gmra.mxu1 %v16550_v26  ;;  %10331 = vmatprep.subr.mxu0 %v16551_v28  ;;  %v9866_v38 = vpop.f32.mrf.mxu0 }
 0x300   :  { %10379 = vmatprep.subr.mxu1 %v16509_v7  ;;  %10332 = vmatpush3.msra.mxu0 %v16551_v28  ;;  %v9900_v41 = vpop.f32.mrf.mxu1 }
 0x301   :  { %10380 = vmatpush3.msra.mxu1 %v16509_v7  ;;  %10333 = vmatprep.subr.mxu0 %v16552_v53  ;;  %v13507_v56 = vadd.f32 %v9900_v41, %v9860_v20  ;;  %v13509_v39 = vpop.f32.mrf.mxu0  ;;  %v16554_v7 = vand.u32 4294901760, %v13217_v61  ;;  %v16556_v61 = vld [vmem:[#allocation42_spill] sm:$0xff] }
 0x302   :  { %10381 = vmatprep.subr.mxu1 %v16511_v52  ;;  %10297 = vmatprep.mubr.f32.mxu1 %v16553_v15  ;;  %v13514_v34 = vpop.f32.mrf.mxu1 }
 0x303   :  { %10334 = vmatpush3.msra.mxu0 %v16552_v53  ;;  %10335 = vmatprep.mubr.f32.mxu0 %v12881_v57 }
 0x304   :  { %10382 = vmatpush3.msra.mxu1 %v16511_v52  ;;  %10336 = vmatmul.mubr.f32.vlgmr.msra.gmra.mxu0 %v12899_v9 }
 0x305   :  { %10298 = vmatmul.mubr.f32.gmra.mxu1 %v16554_v7  ;;  %10383 = vmatprep.subr.mxu1 %v16516_v46  ;;  %v9869_v20 = vpop.f32.mrf.mxu0 }
 0x306   :  { %10384 = vmatpush3.msra.mxu1 %v16516_v46  ;;  %10300 = vmatprep.mubr.f32.mxu1 %v16555_v47  ;;  %v9903_v49 = vpop.f32.mrf.mxu1 }
 0x307   :  { %10385 = vmatprep.subr.mxu1 %v16518_v13  ;;  %10338 = vmatprep.mubr.f32.mxu0 %v12940_v42  ;;  %v2780_v16 = vadd.f32 %v9903_v49, %v9863_v30  ;;  %v13528_v52 = vpop.f32.mrf.mxu0 }
 0x308   :  { %10386 = vmatpush3.msra.mxu1 %v16518_v13  ;;  %10339 = vmatmul.mubr.f32.gmra.mxu0 %v16556_v61  ;;  %v13532_v36 = vpop.f32.mrf.mxu1 }
 0x309   :  { %10301 = vmatmul.mubr.f32.gmra.mxu1 %v16557_v4  ;;  %10387 = vmatprep.subr.mxu1 %v16523_v40  ;;  %v9872_v1 = vpop.f32.mrf.mxu0 }
 0x30a   :  { %10388 = vmatpush3.msra.mxu1 %v16523_v40  ;;  %10341 = vmatprep.mubr.f32.mxu0 %v12985_v21  ;;  %v9906_v46 = vpop.f32.mrf.mxu1 }
 0x30b   :  { %10389 = vmatprep.subr.mxu1 %v16525_v29  ;;  %10391 = vmatprep.mubr.f32.mxu1 %v12881_v57  ;;  %v2792_v13 = vadd.f32 %v9906_v46, %v9866_v38  ;;  %v13541_v30 = vpop.f32.mrf.mxu0 }
 0x30c   :  { %10390 = vmatpush3.msra.mxu1 %v16525_v29  ;;  %10342 = vmatmul.mubr.f32.gmra.mxu0 %v13019_v51  ;;  %v13545_v59 = vpop.f32.mrf.mxu1 }
 0x30d   :  { %10392 = vmatmul.mubr.f32.vlgmr.msra.gmra.mxu1 %v12899_v9  ;;  %10344 = vmatprep.mubr.f32.mxu0 %v13045_v33  ;;  %v9875_v40 = vpop.f32.mrf.mxu0 }
 0x30e   :  { %10394 = vmatprep.mubr.f32.mxu1 %v12940_v42  ;;  %v9909_v26 = vpop.f32.mrf.mxu1 }
 0x30f   :  { %v2804_v28 = vadd.f32 %v9909_v26, %v9869_v20  ;;  %v13550_v41 = vpop.f32.mrf.mxu0 }
 0x310   :  { %16558 = vst [vmem:[#allocation24_spill] sm:$0xff] %v13550_v41  ;;  %10345 = vmatmul.mubr.f32.gmra.mxu0 %v13059_v60  ;;  %v13553_v57 = vpop.f32.mrf.mxu1 }
 0x311   :  { %10395 = vmatmul.mubr.f32.gmra.mxu1 %v16556_v61  ;;  %10347 = vmatprep.mubr.f32.mxu0 %v13096_v43  ;;  %v9878_v29 = vpop.f32.mrf.mxu0 }
 0x312   :  { %10397 = vmatprep.mubr.f32.mxu1 %v12985_v21  ;;  %v9912_v9 = vpop.f32.mrf.mxu1 }
 0x313   :  { %v2816_v38 = vadd.f32 %v9912_v9, %v9872_v1  ;;  %v13558_v53 = vpop.f32.mrf.mxu0 }
 0x314   :  { %16559 = vst [vmem:[#allocation36_spill] sm:$0xff] %v13558_v53  ;;  %10348 = vmatmul.mubr.f32.gmra.mxu0 %v13099_v27  ;;  %v13561_v42 = vpop.f32.mrf.mxu1 }
 0x315   :  { %10398 = vmatmul.mubr.f32.gmra.mxu1 %v13019_v51  ;;  %10350 = vmatprep.mubr.f32.mxu0 %v13137_v0  ;;  %v9937_v15 = vpop.f32.mrf.mxu0 }
 0x316   :  { %10400 = vmatprep.mubr.f32.mxu1 %v13045_v33  ;;  %v9915_v7 = vpop.f32.mrf.mxu1  ;;  %v2935_v20 = vadd.f32 %v9937_v15, %v13487_v32 }
 0x317   :  { %v2828_v47 = vadd.f32 %v9915_v7, %v9875_v40  ;;  %v13567_v21 = vpop.f32.mrf.mxu0 }
 0x318   :  { %10351 = vmatmul.mubr.f32.gmra.mxu0 %v13147_v12  ;;  %v13570_v49 = vpop.f32.mrf.mxu1 }
 0x319   :  { %16560 = vst [vmem:[#allocation32_spill] sm:$0xff] %v13570_v49  ;;  %10401 = vmatmul.mubr.f32.gmra.mxu1 %v13059_v60  ;;  %10353 = vmatprep.mubr.f32.mxu0 %v13178_v25  ;;  %v9940_v51 = vpop.f32.mrf.mxu0 }
 0x31a   :  { %10403 = vmatprep.mubr.f32.mxu1 %v13096_v43  ;;  %v9918_v61 = vpop.f32.mrf.mxu1  ;;  %v2949_v33 = vadd.f32 %v9940_v51, %v13507_v56 }
 0x31b   :  { %v13576_v4 = vadd.f32 %v9918_v61, %v9878_v29  ;;  %v13578_v32 = vpop.f32.mrf.mxu0 }
 0x31c   :  { %10354 = vmatmul.mubr.f32.gmra.mxu0 %v13192_v14  ;;  %v13581_v1 = vpop.f32.mrf.mxu1 }
 0x31d   :  { %16561 = vst [vmem:[#allocation16_spill] sm:$0xff] %v13581_v1  ;;  %10404 = vmatmul.mubr.f32.gmra.mxu1 %v13099_v27  ;;  %10356 = vmatprep.mubr.f32.mxu0 %v13219_v23  ;;  %v9943_v60 = vpop.f32.mrf.mxu0 }
 0x31e   :  { %10406 = vmatprep.mubr.f32.mxu1 %v13137_v0  ;;  %v2963_v46 = vadd.f32 %v9943_v60, %v2780_v16  ;;  %v9977_v43 = vpop.f32.mrf.mxu1  ;;  %v5011_v60 = vld [vmem:[#allocation8 + $0x78] sm:$0xff] }
 0x31f   :  { %v13586_v40 = vadd.f32 %v9977_v43, %v2935_v20  ;;  %v13588_v56 = vpop.f32.mrf.mxu0 }
 0x320   :  { %10357 = vmatmul.mubr.f32.gmra.mxu0 %v13233_v17  ;;  %v13591_v26 = vpop.f32.mrf.mxu1 }
 0x321   :  { %10407 = vmatmul.mubr.f32.gmra.mxu1 %v13147_v12 }
 0x322   :  { %10409 = vmatprep.mubr.f32.mxu1 %v13178_v25 }
 0x323   :  { %v9946_v27 = vpop.f32.mrf.mxu0 }
 0x324   :  { %v2977_v29 = vadd.f32 %v9946_v27, %v2792_v13  ;;  %v9980_v9 = vpop.f32.mrf.mxu1  ;;  %v13614_v27 = vand.u32 4294901760, %v5011_v60 }
 0x325   :  { %10410 = vmatmul.mubr.f32.gmra.mxu1 %v13192_v14  ;;  %v13596_v0 = vadd.f32 %v9980_v9, %v2949_v33  ;;  %v13598_v16 = vpop.f32.mrf.mxu0  ;;  %v5010_v9 = vld [vmem:[#allocation8 + $0x70] sm:$0xff] }
 0x326   :  { %10412 = vmatprep.mubr.f32.mxu1 %v13219_v23  ;;  %v13601_v15 = vpop.f32.mrf.mxu1  ;;  %16565 = vst [vmem:[#allocation22_spill] sm:$0xff] %v13614_v27  ;;  %10415 = vmatprep.subr.mxu0 %v13614_v27 }
 0x327   :  { %16562 = vst [vmem:[#allocation45_spill] sm:$0xff] %v13601_v15  ;;  %10416 = vmatpush3.msra.mxu0 %v13614_v27 }
 0x329   :  { %10413 = vmatmul.mubr.f32.gmra.mxu1 %v13233_v17  ;;  %v9949_v7 = vpop.f32.mrf.mxu0  ;;  %v9983_v20 = vpop.f32.mrf.mxu1 }
 0x32a   :  { %v2991_v12 = vadd.f32 %v9949_v7, %v2804_v28  ;;  %v13604_v51 = vadd.f32 %v9983_v20, %v2963_v46  ;;  %v13619_v46 = vsub.f32 %v5011_v60, %v13614_v27  ;;  %v13621_v7 = vand.u32 4294901760, %v5010_v9 }
 0x32b   :  { %v13606_v25 = vpop.f32.mrf.mxu0  ;;  %v13608_v13 = vpop.f32.mrf.mxu1 }
 0x32c   :  { %16563 = vst [vmem:[#allocation23_spill] sm:$0xff] %v13608_v13  ;;  %16567 = vst [vmem:[#allocation28_spill] sm:$0xff] %v13619_v46  ;;  %v13631_v53 = vand.u32 4294901760, %v13619_v46  ;;  %v13634_v60 = vsub.f32 %v5010_v9, %v13621_v7  ;;  %10417 = vmatprep.subr.mxu0 %v13621_v7 }
 0x32d   :  { %v9952_v14 = vpop.f32.mrf.mxu0  ;;  %16568 = vst [vmem:[#allocation33_spill] sm:$0xff] %v13621_v7  ;;  %10418 = vmatpush3.msra.mxu0 %v13621_v7 }
 0x32e   :  { %v3005_v61 = vadd.f32 %v9952_v14, %v2816_v38  ;;  %v9986_v33 = vpop.f32.mrf.mxu1  ;;  %v3592_v38 = vmax.f32 %v13352_v62, 1e-16  ;;  %v5009_v14 = vld [vmem:[#allocation8 + $0x68] sm:$0xff]  ;;  %16570 = vst [vmem:[#allocation54_spill] sm:$0xff] %v13631_v53  ;;  %16571 = vst [vmem:[#allocation40_spill] sm:$0xff] %v13634_v60 }
 0x32f   :  { %v13610_v43 = vadd.f32 %v9986_v33, %v2977_v29  ;;  %v13612_v23 = vpop.f32.mrf.mxu0  ;;  %v13636_v49 = vand.u32 4294901760, %v5009_v14 }
 0x330   :  { %16564 = vst [vmem:[#allocation20_spill] sm:$0xff] %v13612_v23  ;;  %v13616_v17 = vpop.f32.mrf.mxu1  ;;  %11111 = vrcp.f32 %v3592_v38  ;;  %v3594_v38 = vmax.f32 %v13371_v5, 1e-16 }
 0x331   :  { %16566 = vst [vmem:[#allocation19_spill] sm:$0xff] %v13616_v17  ;;  %v9955_v28 = vpop.f32.mrf.mxu0  ;;  %16572 = vst [vmem:[#allocation35_spill] sm:$0xff] %v13636_v49  ;;  %10419 = vmatprep.subr.mxu0 %v13636_v49  ;;  %v5007_v17 = vld [vmem:[#allocation8 + $0x58] sm:$0xff] }
 0x332   :  { %v3019_v20 = vadd.f32 %v9955_v28, %v2828_v47  ;;  %v9989_v29 = vpop.f32.mrf.mxu1  ;;  %v5008_v47 = vld [vmem:[#allocation8 + $0x60] sm:$0xff]  ;;  %10420 = vmatpush3.msra.mxu0 %v13636_v49  ;;  %v13670_v45 = vand.u32 4294901760, %v5007_v17  ;;  %11113 = vrcp.f32 %v3594_v38 }
 0x333   :  { %v13626_v33 = vadd.f32 %v9989_v29, %v2991_v12  ;;  %v13628_v1 = vpop.f32.mrf.mxu0  ;;  %v5264_v12 = vsub.f32 %v13619_v46, %v13631_v53  ;;  %v13645_v29 = vand.u32 4294901760, %v13634_v60 }
 0x334   :  { %16569 = vst [vmem:[#allocation34_spill] sm:$0xff] %v13628_v1  ;;  %v13639_v62 = vpop.f32.mrf.mxu1  ;;  %v13648_v1 = vsub.f32 %v5009_v14, %v13636_v49  ;;  %16581 = vst [vmem:[#allocation77_spill] sm:$0xff] %v13670_v45 }
 0x335   :  { %16573 = vst [vmem:[#allocation48_spill] sm:$0xff] %v13639_v62  ;;  %v9958_v28 = vpop.f32.mrf.mxu0  ;;  %16574 = vst [vmem:[#allocation44_spill] sm:$0xff] %v13645_v29  ;;  %v13652_v62 = vand.u32 4294901760, %v5008_v47  ;;  %v5265_v13 = vand.u32 4294901760, %v5264_v12  ;;  %v5271_v14 = vsub.f32 %v13634_v60, %v13645_v29 }
 0x336   :  { %16575 = vst [vmem:[#allocation56_spill] sm:$0xff] %v13648_v1  ;;  %v3033_v9 = vadd.f32 %v9958_v28, %v13576_v4  ;;  %v9992_v41 = vpop.f32.mrf.mxu1  ;;  %v13662_v15 = vand.u32 4294901760, %v13648_v1 }
 0x337   :  { %16576 = vst [vmem:[#allocation42_spill] sm:$0xff] %v13652_v62  ;;  %v13655_v7 = vadd.f32 %v9992_v41, %v3005_v61  ;;  %v13657_v53 = vpop.f32.mrf.mxu0  ;;  %v13668_v28 = vsub.f32 %v5008_v47, %v13652_v62  ;;  %v5006_v41 = vld [vmem:[#allocation8 + $0x50] sm:$0xff]  ;;  %10421 = vmatprep.subr.mxu0 %v13652_v62  ;;  %10471 = vmatprep.subr.mxu1 %v5265_v13  ;;  %v5272_v12 = vand.u32 4294901760, %v5271_v14 }
 0x338   :  { %16577 = vst [vmem:[#allocation73_spill] sm:$0xff] %v13657_v53  ;;  %16578 = vst [vmem:[#allocation74_spill] sm:$0xff] %v13662_v15  ;;  %v13665_v4 = vpop.f32.mrf.mxu1  ;;  %v5278_v29 = vsub.f32 %v13648_v1, %v13662_v15  ;;  %v13675_v60 = vand.u32 4294901760, %v5006_v41  ;;  %10422 = vmatpush3.msra.mxu0 %v13652_v62  ;;  %10472 = vmatpush3.msra.mxu1 %v5265_v13  ;;  %v13683_v53 = vsub.f32 %v5007_v17, %v13670_v45 }
 0x339   :  { %16579 = vst [vmem:[#allocation75_spill] sm:$0xff] %v13665_v4  ;;  %16580 = vst [vmem:[#allocation76_spill] sm:$0xff] %v13668_v28  ;;  %v10017_v61 = vpop.f32.mrf.mxu0  ;;  %v13680_v47 = vand.u32 4294901760, %v13668_v28  ;;  %v5005_v4 = vld [vmem:[#allocation8 + $0x48] sm:$0xff]  ;;  %10423 = vmatprep.subr.mxu0 %v13670_v45  ;;  %10473 = vmatprep.subr.mxu1 %v5272_v12 }
 0x33a   :  { %16582 = vst [vmem:[#allocation78_spill] sm:$0xff] %v13675_v60  ;;  %v9995_v5 = vpop.f32.mrf.mxu1  ;;  %v3335_v49 = vadd.f32 %v10017_v61, %v13586_v40  ;;  %16584 = vst [vmem:[#allocation80_spill] sm:$0xff] %v13683_v53  ;;  %v5279_v1 = vand.u32 4294901760, %v5278_v29  ;;  %v13691_v62 = vsub.f32 %v5006_v41, %v13675_v60  ;;  %v13693_v40 = vand.u32 4294901760, %v5005_v4  ;;  %10424 = vmatpush3.msra.mxu0 %v13670_v45  ;;  %v5004_v61 = vld [vmem:[#allocation8 + $0x40] sm:$0xff] }
 0x33b   :  { %16583 = vst [vmem:[#allocation79_spill] sm:$0xff] %v13680_v47  ;;  %v13686_v14 = vadd.f32 %v9995_v5, %v3019_v20  ;;  %v13688_v15 = vpop.f32.mrf.mxu0  ;;  %10474 = vmatpush3.msra.mxu1 %v5272_v12  ;;  %v5285_v17 = vsub.f32 %v13668_v28, %v13680_v47  ;;  %v13701_v20 = vand.u32 4294901760, %v13683_v53  ;;  %10425 = vmatprep.subr.mxu0 %v13675_v60  ;;  %v3596_v29 = vmax.f32 %v13392_v63, 1e-16 }
 0x33c   :  { %16585 = vst [vmem:[#allocation81_spill] sm:$0xff] %v13688_v15  ;;  %16586 = vst [vmem:[#allocation82_spill] sm:$0xff] %v13691_v62  ;;  %v13696_v13 = vpop.f32.mrf.mxu1  ;;  %10475 = vmatprep.subr.mxu1 %v5279_v1  ;;  %v13706_v5 = vand.u32 4294901760, %v13691_v62  ;;  %v13709_v38 = vsub.f32 %v5005_v4, %v13693_v40  ;;  %v13711_v12 = vand.u32 4294901760, %v5004_v61  ;;  %10426 = vmatpush3.msra.mxu0 %v13675_v60 }
 0x33d   :  { %16587 = vst [vmem:[#allocation83_spill] sm:$0xff] %v13693_v40  ;;  %16588 = vst [vmem:[#allocation84_spill] sm:$0xff] %v13696_v13  ;;  %v10020_v41 = vpop.f32.mrf.mxu0  ;;  %10476 = vmatpush3.msra.mxu1 %v5279_v1  ;;  %v5286_v45 = vand.u32 4294901760, %v5285_v17  ;;  %v5292_v63 = vsub.f32 %v13683_v53, %v13701_v20  ;;  %v5003_v13 = vld [vmem:[#allocation8 + $0x38] sm:$0xff]  ;;  %10427 = vmatprep.subr.mxu0 %v13693_v40  ;;  %11115 = vrcp.f32 %v3596_v29 }
 0x33e   :  { %16589 = vst [vmem:[#allocation85_spill] sm:$0xff] %v13701_v20  ;;  %16590 = vst [vmem:[#allocation86_spill] sm:$0xff] %v13706_v5  ;;  %v9998_v47 = vpop.f32.mrf.mxu1  ;;  %v13715_v28 = vadd.f32 %v10020_v41, %v13596_v0  ;;  %v5299_v23 = vsub.f32 %v13691_v62, %v13706_v5  ;;  %v13727_v60 = vand.u32 4294901760, %v13709_v38  ;;  %v13730_v0 = vsub.f32 %v5004_v61, %v13711_v12 }
 0x33f   :  { %16591 = vst [vmem:[#allocation87_spill] sm:$0xff] %v13709_v38  ;;  %16592 = vst [vmem:[#allocation88_spill] sm:$0xff] %v13711_v12  ;;  %v13720_v15 = vadd.f32 %v9998_v47, %v3033_v9  ;;  %v13722_v4 = vpop.f32.mrf.mxu0  ;;  %10428 = vmatpush3.msra.mxu0 %v13693_v40  ;;  %10477 = vmatprep.subr.mxu1 %v5286_v45  ;;  %v5293_v17 = vand.u32 4294901760, %v5292_v63  ;;  %v13735_v41 = vand.u32 4294901760, %v5003_v13  ;;  %v5002_v9 = vld [vmem:[#allocation8 + $0x30] sm:$0xff] }
 0x340   :  { %16593 = vst [vmem:[#allocation89_spill] sm:$0xff] %v13727_v60  ;;  %16594 = vst [vmem:[#allocation90_spill] sm:$0xff] %v13730_v0  ;;  %v13733_v1 = vpop.f32.mrf.mxu1  ;;  %10429 = vmatprep.subr.mxu0 %v13711_v12  ;;  %10478 = vmatpush3.msra.mxu1 %v5286_v45  ;;  %v5300_v5 = vand.u32 4294901760, %v5299_v23  ;;  %v5306_v20 = vsub.f32 %v13709_v38, %v13727_v60  ;;  %v13741_v61 = vand.u32 4294901760, %v13730_v0  ;;  %v3598_v62 = vmax.f32 %v13409_v22, 1e-16  ;;  %v11112_v60 = vpop.eup %11111 }
 0x341   :  { %16595 = vst [vmem:[#allocation91_spill] sm:$0xff] %v13733_v1  ;;  %16596 = vst [vmem:[#allocation92_spill] sm:$0xff] %v13735_v41  ;;  %v10023_v47 = vpop.f32.mrf.mxu0  ;;  %10430 = vmatpush3.msra.mxu0 %v13711_v12  ;;  %10479 = vmatprep.subr.mxu1 %v5293_v17  ;;  %v13749_v29 = vsub.f32 %v5003_v13, %v13735_v41  ;;  %v13751_v45 = vand.u32 4294901760, %v5002_v9  ;;  %v5001_v23 = vld [vmem:[#allocation8 + $0x28] sm:$0xff] }
 0x342   :  { %16597 = vst [vmem:[#allocation93_spill] sm:$0xff] %v13741_v61  ;;  %v13746_v63 = vadd.f32 %v10023_v47, %v13604_v51  ;;  %v10057_v53 = vpop.f32.mrf.mxu1  ;;  %10431 = vmatprep.subr.mxu0 %v13735_v41  ;;  %10480 = vmatpush3.msra.mxu1 %v5293_v17  ;;  %v5307_v12 = vand.u32 4294901760, %v5306_v20  ;;  %v5313_v22 = vsub.f32 %v13730_v0, %v13741_v61  ;;  %v13758_v51 = vand.u32 4294901760, %v5001_v23 }
 0x343   :  { %16598 = vst [vmem:[#allocation94_spill] sm:$0xff] %v13749_v29  ;;  %16599 = vst [vmem:[#allocation95_spill] sm:$0xff] %v13751_v45  ;;  %v3504_v38 = vadd.f32 %v10057_v53, %v3335_v49  ;;  %v13754_v40 = vpop.f32.mrf.mxu0  ;;  %10432 = vmatpush3.msra.mxu0 %v13735_v41  ;;  %10481 = vmatprep.subr.mxu1 %v5300_v5  ;;  %v13764_v47 = vand.u32 4294901760, %v13749_v29  ;;  %v13767_v1 = vsub.f32 %v5002_v9, %v13751_v45  ;;  %v5000_v53 = vld [vmem:[#allocation8 + $0x20] sm:$0xff] }
 0x344   :  { %16600 = vst [vmem:[#allocation96_spill] sm:$0xff] %v13758_v51  ;;  %v13761_v13 = vpop.f32.mrf.mxu1  ;;  %10433 = vmatprep.subr.mxu0 %v13751_v45  ;;  %10482 = vmatpush3.msra.mxu1 %v5300_v5  ;;  %v5314_v20 = vand.u32 4294901760, %v5313_v22  ;;  %v13773_v17 = vsub.f32 %v5001_v23, %v13758_v51  ;;  %v13781_v41 = vand.u32 4294901760, %v5000_v53  ;;  %11117 = vrcp.f32 %v3598_v62 }
 0x345   :  { %16601 = vst [vmem:[#allocation97_spill] sm:$0xff] %v13761_v13  ;;  %16602 = vst [vmem:[#allocation98_spill] sm:$0xff] %v13764_v47  ;;  %v13770_v49 = vmul.f32 %v11112_v60, %v3504_v38  ;;  %10434 = vmatpush3.msra.mxu0 %v13751_v45  ;;  %10483 = vmatprep.subr.mxu1 %v5307_v12  ;;  %v5320_v0 = vsub.f32 %v13749_v29, %v13764_v47  ;;  %v13779_v9 = vand.u32 4294901760, %v13767_v1  ;;  %v4999_v13 = vld [vmem:[#allocation8 + $0x18] sm:$0xff] }
 0x346   :  { %16603 = vst [vmem:[#allocation99_spill] sm:$0xff] %v13767_v1  ;;  %16605 = vst [vmem:[#allocation101_spill] sm:$0xff] %v13773_v17  ;;  %v10026_v61 = vpop.f32.mrf.mxu0  ;;  %10435 = vmatprep.subr.mxu0 %v13758_v51  ;;  %10484 = vmatpush3.msra.mxu1 %v5307_v12  ;;  %v13788_v38 = vand.u32 4294901760, %v13773_v17  ;;  %v13790_v23 = vand.u32 4294901760, %v4999_v13  ;;  %v4998_v12 = vld [vmem:[#allocation8 + $0x10] sm:$0xff] }
 0x347   :  { %16604 = vst [vmem:[#allocation100_spill] sm:$0xff] %v13770_v49  ;;  %16606 = vst [vmem:[#allocation102_spill] sm:$0xff] %v13779_v9  ;;  %v13785_v60 = vadd.f32 %v10026_v61, %v13610_v43  ;;  %v10060_v5 = vpop.f32.mrf.mxu1  ;;  %10436 = vmatpush3.msra.mxu0 %v13758_v51  ;;  %10485 = vmatprep.subr.mxu1 %v5314_v20  ;;  %v5321_v29 = vand.u32 4294901760, %v5320_v0  ;;  %v5327_v62 = vsub.f32 %v13767_v1, %v13779_v9  ;;  %v11114_v61 = vpop.eup %11113 }
 0x348   :  { %16607 = vst [vmem:[#allocation103_spill] sm:$0xff] %v13781_v41  ;;  %16608 = vst [vmem:[#allocation104_spill] sm:$0xff] %v13788_v38  ;;  %v3516_v22 = vadd.f32 %v10060_v5, %v13715_v28  ;;  %v13794_v47 = vpop.f32.mrf.mxu0  ;;  %v13799_v43 = vsub.f32 %v5000_v53, %v13781_v41  ;;  %10437 = vmatprep.subr.mxu0 %v13781_v41  ;;  %v3600_v45 = vmax.f32 %v13425_v6, 1e-16  ;;  %10486 = vmatpush3.msra.mxu1 %v5314_v20 }
 0x349   :  { %16609 = vst [vmem:[#allocation105_spill] sm:$0xff] %v13790_v23  ;;  %v13803_v49 = vpop.f32.mrf.mxu1  ;;  %v5334_v28 = vsub.f32 %v13773_v17, %v13788_v38  ;;  %v13808_v0 = vsub.f32 %v4999_v13, %v13790_v23  ;;  %v13810_v5 = vand.u32 4294901760, %v4998_v12  ;;  %10438 = vmatpush3.msra.mxu0 %v13781_v41  ;;  %10487 = vmatprep.subr.mxu1 %v5321_v29  ;;  %v5328_v9 = vand.u32 4294901760, %v5327_v62  ;;  %v4997_v38 = vld [vmem:[#allocation8 + $0x8] sm:$0xff] }
 0x34a   :  { %16610 = vst [vmem:[#allocation106_spill] sm:$0xff] %v13799_v43  ;;  %v13813_v53 = vmul.f32 %v11114_v61, %v3516_v22  ;;  %v13816_v1 = vand.u32 4294901760, %v13799_v43  ;;  %10439 = vmatprep.subr.mxu0 %v13790_v23  ;;  %10488 = vmatpush3.msra.mxu1 %v5321_v29  ;;  %v13828_v61 = vand.u32 4294901760, %v4997_v38  ;;  %11119 = vrcp.f32 %v3600_v45  ;;  %v11116_v41 = vpop.eup %11115 }
 0x34b   :  { %16611 = vst [vmem:[#allocation107_spill] sm:$0xff] %v13808_v0  ;;  %16612 = vst [vmem:[#allocation108_spill] sm:$0xff] %v13810_v5  ;;  %v5335_v6 = vand.u32 4294901760, %v5334_v28  ;;  %v13820_v20 = vand.u32 4294901760, %v13808_v0  ;;  %v13823_v13 = vsub.f32 %v4998_v12, %v13810_v5  ;;  %10440 = vmatpush3.msra.mxu0 %v13790_v23  ;;  %10489 = vmatprep.subr.mxu1 %v5328_v9  ;;  %v4996_v23 = vld [vmem:[#allocation8] sm:$0xff] }
 0x34c   :  { %16613 = vst [vmem:[#allocation109_spill] sm:$0xff] %v13813_v53  ;;  %16614 = vst [vmem:[#allocation110_spill] sm:$0xff] %v13816_v1  ;;  %v10029_v22 = vpop.f32.mrf.mxu0  ;;  %v5341_v62 = vsub.f32 %v13799_v43, %v13816_v1  ;;  %10441 = vmatprep.subr.mxu0 %v13810_v5  ;;  %10490 = vmatpush3.msra.mxu1 %v5328_v9  ;;  %v13844_v9 = vand.u32 4294901760, %v4996_v23 }
 0x34d   :  { %16615 = vst [vmem:[#allocation111_spill] sm:$0xff] %v13820_v20  ;;  %16616 = vst [vmem:[#allocation112_spill] sm:$0xff] %v13823_v13  ;;  %v3383_v29 = vadd.f32 %v10029_v22, %v13626_v33  ;;  %v10063_v28 = vpop.f32.mrf.mxu1  ;;  %v5348_v12 = vsub.f32 %v13808_v0, %v13820_v20  ;;  %v13835_v17 = vand.u32 4294901760, %v13823_v13  ;;  %10442 = vmatpush3.msra.mxu0 %v13810_v5  ;;  %10491 = vmatprep.subr.mxu1 %v5335_v6 }
 0x34e   :  { %16617 = vst [vmem:[#allocation113_spill] sm:$0xff] %v13828_v61  ;;  %v3528_v1 = vadd.f32 %v10063_v28, %v13746_v63  ;;  %v13839_v43 = vpop.f32.mrf.mxu0  ;;  %v5342_v45 = vand.u32 4294901760, %v5341_v62  ;;  %v13842_v33 = vsub.f32 %v4997_v38, %v13828_v61  ;;  %16620 = vst [vmem:[#allocation116_spill] sm:$0xff] %v13844_v9  ;;  %10443 = vmatprep.subr.mxu0 %v13828_v61  ;;  %10492 = vmatpush3.msra.mxu1 %v5335_v6 }
 0x34f   :  { %16618 = vst [vmem:[#allocation114_spill] sm:$0xff] %v13835_v17  ;;  %v13847_v22 = vpop.f32.mrf.mxu1  ;;  %v5349_v20 = vand.u32 4294901760, %v5348_v12  ;;  %v5355_v0 = vsub.f32 %v13823_v13, %v13835_v17  ;;  %10444 = vmatpush3.msra.mxu0 %v13828_v61  ;;  %v3602_v63 = vmax.f32 %v13441_v24, 1e-16  ;;  %v13859_v62 = vsub.f32 %v4996_v23, %v13844_v9 }
 0x350   :  { %16619 = vst [vmem:[#allocation115_spill] sm:$0xff] %v13842_v33  ;;  %v13853_v28 = vmul.f32 %v11116_v41, %v3528_v1  ;;  %10493 = vmatprep.subr.mxu1 %v5342_v45  ;;  %v13856_v38 = vand.u32 4294901760, %v13842_v33  ;;  %10445 = vmatprep.subr.mxu0 %v13844_v9 }
 0x351   :  { %16623 = vst [vmem:[#allocation119_spill] sm:$0xff] %v13859_v62  ;;  %10494 = vmatpush3.msra.mxu1 %v5342_v45  ;;  %v5356_v6 = vand.u32 4294901760, %v5355_v0  ;;  %10446 = vmatpush3.msra.mxu0 %v13844_v9  ;;  %v13866_v1 = vand.u32 4294901760, %v13859_v62  ;;  %v11118_v17 = vpop.eup %11117  ;;  %11121 = vrcp.f32 %v3602_v63  ;;  %v3604_v9 = vmax.f32 %v13457_v3, 1e-16 }
 0x352   :  { %16621 = vst [vmem:[#allocation117_spill] sm:$0xff] %v13853_v28  ;;  %16622 = vst [vmem:[#allocation118_spill] sm:$0xff] %v13856_v38  ;;  %v10032_v12 = vpop.f32.mrf.mxu0  ;;  %10495 = vmatprep.subr.mxu1 %v5349_v20  ;;  %v5362_v24 = vsub.f32 %v13842_v33, %v13856_v38  ;;  %10527 = vmatprep.subr.mxu0 %v13619_v46  ;;  %v3606_v3 = vmax.f32 %v13472_v50, 1e-16 }
 0x353   :  { %16624 = vst [vmem:[#allocation120_spill] sm:$0xff] %v13866_v1  ;;  %v3395_v41 = vadd.f32 %v10032_v12, %v13655_v7  ;;  %v10066_v23 = vpop.f32.mrf.mxu1  ;;  %10496 = vmatpush3.msra.mxu1 %v5349_v20  ;;  %v5369_v38 = vsub.f32 %v13859_v62, %v13866_v1  ;;  %11123 = vrcp.f32 %v3604_v9 }
 0x354   :  { %v3540_v0 = vadd.f32 %v10066_v23, %v13785_v60  ;;  %v13871_v45 = vpop.f32.mrf.mxu0  ;;  %10497 = vmatprep.subr.mxu1 %v5356_v6  ;;  %v5363_v13 = vand.u32 4294901760, %v5362_v24  ;;  %11125 = vrcp.f32 %v3606_v3 }
 0x355   :  { %v13875_v33 = vpop.f32.mrf.mxu1  ;;  %10498 = vmatpush3.msra.mxu1 %v5356_v6  ;;  %v5370_v7 = vand.u32 4294901760, %v5369_v38 }
 0x356   :  { %v13878_v61 = vmul.f32 %v11118_v17, %v3540_v0  ;;  %10499 = vmatprep.subr.mxu1 %v5363_v13 }
 0x357   :  { %10500 = vmatpush3.msra.mxu1 %v5363_v13  ;;  %v11120_v12 = vpop.eup %11119 }
 0x358   :  { %16625 = vst [vmem:[#allocation121_spill] sm:$0xff] %v13878_v61  ;;  %v10035_v20 = vpop.f32.mrf.mxu0  ;;  %10501 = vmatprep.subr.mxu1 %v5370_v7 }
 0x359   :  { %v3407_v60 = vadd.f32 %v10035_v20, %v13686_v14  ;;  %v10069_v63 = vpop.f32.mrf.mxu1  ;;  %10502 = vmatpush3.msra.mxu1 %v5370_v7 }
 0x35a   :  { %v3552_v24 = vadd.f32 %v10069_v63, %v3383_v29  ;;  %v13881_v23 = vpop.f32.mrf.mxu0  ;;  %10583 = vmatprep.subr.mxu1 %v13614_v27 }
 0x35b   :  { %16626 = vst [vmem:[#allocation122_spill] sm:$0xff] %v13881_v23  ;;  %v13885_v17 = vpop.f32.mrf.mxu1  ;;  %v16700_v23 = vld [vmem:[#allocation21_spill] sm:$0xff] }
 0x35c   :  { %v13887_v6 = vmul.f32 %v11120_v12, %v3552_v24 }
 0x35e   :  { %16627 = vst [vmem:[#allocation123_spill] sm:$0xff] %v13887_v6  ;;  %v10038_v13 = vpop.f32.mrf.mxu0  ;;  %v11122_v9 = vpop.eup %11121 }
 0x35f   :  { %v3419_v38 = vadd.f32 %v10038_v13, %v13720_v15  ;;  %v10072_v14 = vpop.f32.mrf.mxu1 }
 0x360   :  { %v3564_v0 = vadd.f32 %v10072_v14, %v3395_v41  ;;  %v13890_v7 = vpop.f32.mrf.mxu0  ;;  %v11124_v62 = vpop.eup %11123 }
 0x361   :  { %16628 = vst [vmem:[#allocation124_spill] sm:$0xff] %v13890_v7  ;;  %v13892_v29 = vpop.f32.mrf.mxu1  ;;  %v11126_v14 = vpop.eup %11125  ;;  %v16696_v7 = vld [vmem:[#allocation30_spill] sm:$0xff] }
 0x362   :  { %v13894_v20 = vmul.f32 %v11122_v9, %v3564_v0 }
 0x364   :  { %16629 = vst [vmem:[#allocation125_spill] sm:$0xff] %v13894_v20  ;;  %v13896_v63 = vpop.f32.mrf.mxu0 }
 0x365   :  { %16630 = vst [vmem:[#allocation126_spill] sm:$0xff] %v13896_v63  ;;  %v10075_v50 = vpop.f32.mrf.mxu1  ;;  %v16689_v63 = vld [vmem:[#allocation65_spill] sm:$0xff] }
 0x366   :  { %v3576_v1 = vadd.f32 %v10075_v50, %v3407_v60  ;;  %v13900_v24 = vpop.f32.mrf.mxu0 }
 0x367   :  { %v13898_v12 = vpop.f32.mrf.mxu1  ;;  %16632 = vst [vmem:[#allocation128_spill] sm:$0xff] %v13900_v24  ;;  %v16683_v24 = vld [vmem:[#allocation62_spill] sm:$0xff] }
 0x368   :  { %16631 = vst [vmem:[#allocation127_spill] sm:$0xff] %v13898_v12  ;;  %v13902_v3 = vmul.f32 %v11124_v62, %v3576_v1 }
 0x36a   :  { %16633 = vst [vmem:[#allocation129_spill] sm:$0xff] %v13902_v3  ;;  %v10078_v15 = vpop.f32.mrf.mxu1 }
 0x36b   :  { %v3588_v41 = vadd.f32 %v10078_v15, %v3419_v38  ;;  %v13904_v13 = vpop.f32.mrf.mxu0 }
 0x36c   :  { %16634 = vst [vmem:[#allocation130_spill] sm:$0xff] %v13904_v13  ;;  %v13906_v5 = vpop.f32.mrf.mxu1  ;;  %v16679_v13 = vld [vmem:[#allocation60_spill] sm:$0xff] }
 0x36d   :  { %16635 = vst [vmem:[#allocation131_spill] sm:$0xff] %v13906_v5  ;;  %v13908_v0 = vmul.f32 %v11126_v14, %v3588_v41  ;;  %v13910_v9 = vpop.f32.mrf.mxu0  ;;  %v16684_v5 = vld [vmem:[#allocation63_spill] sm:$0xff] }
 0x36e   :  { %16637 = vst [vmem:[#allocation133_spill] sm:$0xff] %v13910_v9 }
 0x36f   :  { %16636 = vst [vmem:[#allocation132_spill] sm:$0xff] %v13908_v0 }
 0x370   :  { %v13912_v51 = vpop.f32.mrf.mxu1 }
 0x371   :  { %16638 = vst [vmem:[#allocation134_spill] sm:$0xff] %v13912_v51  ;;  %v13914_v60 = vpop.f32.mrf.mxu0 }
 0x372   :  { %16639 = vst [vmem:[#allocation135_spill] sm:$0xff] %v13914_v60  ;;  %v13918_v20 = vpop.f32.mrf.mxu1 }
 0x373   :  { %v13916_v50 = vpop.f32.mrf.mxu0  ;;  %16641 = vst [vmem:[#allocation137_spill] sm:$0xff] %v13918_v20 }
 0x374   :  { %16640 = vst [vmem:[#allocation136_spill] sm:$0xff] %v13916_v50 }
 0x376   :  { %v13920_v62 = vpop.f32.mrf.mxu0 }
 0x377   :  { %16642 = vst [vmem:[#allocation138_spill] sm:$0xff] %v13920_v62  ;;  %v13922_v1 = vpop.f32.mrf.mxu1 }
 0x378   :  { %16643 = vst [vmem:[#allocation139_spill] sm:$0xff] %v13922_v1  ;;  %v13924_v38 = vpop.f32.mrf.mxu0  ;;  %v16678_v1 = vld [vmem:[#allocation47_spill] sm:$0xff] }
 0x379   :  { %16644 = vst [vmem:[#allocation140_spill] sm:$0xff] %v13924_v38  ;;  %v13926_v15 = vpop.f32.mrf.mxu1 }
 0x37a   :  { %16645 = vst [vmem:[#allocation141_spill] sm:$0xff] %v13926_v15 }
 0x37c   :  { %v10125_v41 = vpop.f32.mrf.mxu0 }
 0x37d   :  { %v13928_v14 = vpop.f32.mrf.mxu1 }
 0x37e   :  { %16646 = vst [vmem:[#allocation142_spill] sm:$0xff] %v13928_v14  ;;  %v13930_v0 = vpop.f32.mrf.mxu0 }
 0x37f   :  { %16647 = vst [vmem:[#allocation143_spill] sm:$0xff] %v13930_v0  ;;  %v13932_v3 = vpop.f32.mrf.mxu1 }
 0x380   :  { %16648 = vst [vmem:[#allocation144_spill] sm:$0xff] %v13932_v3 }
 0x382   :  { %v10128_v46 = vpop.f32.mrf.mxu0 }
 0x383   :  { %v13934_v6 = vpop.f32.mrf.mxu1 }
 0x384   :  { %16649 = vst [vmem:[#allocation145_spill] sm:$0xff] %v13934_v6  ;;  %v13936_v61 = vpop.f32.mrf.mxu0 }
 0x385   :  { %16650 = vst [vmem:[#allocation146_spill] sm:$0xff] %v13936_v61  ;;  %v13938_v27 = vpop.f32.mrf.mxu1 }
 0x386   :  { %16651 = vst [vmem:[#allocation147_spill] sm:$0xff] %v13938_v27 }
 0x388   :  { %v10131_v28 = vpop.f32.mrf.mxu0 }
 0x389   :  { %v10181_v53 = vpop.f32.mrf.mxu1 }
 0x38a   :  { %v13940_v62 = vadd.f32 %v10181_v53, %v10125_v41  ;;  %v13942_v38 = vpop.f32.mrf.mxu0 }
 0x38b   :  { %16653 = vst [vmem:[#allocation149_spill] sm:$0xff] %v13942_v38  ;;  %v13944_v50 = vpop.f32.mrf.mxu1 }
 0x38c   :  { %16652 = vst [vmem:[#allocation148_spill] sm:$0xff] %v13940_v62  ;;  %16654 = vst [vmem:[#allocation150_spill] sm:$0xff] %v13944_v50 }
 0x38e   :  { %v10134_v14 = vpop.f32.mrf.mxu0 }
 0x38f   :  { %v10184_v60 = vpop.f32.mrf.mxu1 }
 0x390   :  { %v13946_v0 = vadd.f32 %v10184_v60, %v10128_v46  ;;  %v13948_v3 = vpop.f32.mrf.mxu0 }
 0x391   :  { %16656 = vst [vmem:[#allocation152_spill] sm:$0xff] %v13948_v3  ;;  %v13950_v15 = vpop.f32.mrf.mxu1 }
 0x392   :  { %16655 = vst [vmem:[#allocation151_spill] sm:$0xff] %v13946_v0  ;;  %16657 = vst [vmem:[#allocation153_spill] sm:$0xff] %v13950_v15  ;;  %v16668_v15 = vld [vmem:[#allocation26_spill] sm:$0xff] }
 0x394   :  { %v13952_v6 = vpop.f32.mrf.mxu0 }
 0x395   :  { %16658 = vst [vmem:[#allocation154_spill] sm:$0xff] %v13952_v6  ;;  %v10187_v61 = vpop.f32.mrf.mxu1 }
 0x396   :  { %v13954_v27 = vadd.f32 %v10187_v61, %v10131_v28  ;;  %v13958_v53 = vpop.f32.mrf.mxu0  ;;  %v16669_v61 = vld [vmem:[#allocation39_spill] sm:$0xff] }
 0x397   :  { %v13956_v9 = vpop.f32.mrf.mxu1  ;;  %16661 = vst [vmem:[#allocation157_spill] sm:$0xff] %v13958_v53  ;;  %v1560_v28 = vadd.f32 %v16669_v61, %v16668_v15  ;;  %v16672_v53 = vld [vmem:[#allocation18_spill] sm:$0xff]  ;;  %v16681_v15 = vld [vmem:[#allocation41_spill] sm:$0xff]  ;;  %v16682_v61 = vld [vmem:[#allocation52_spill] sm:$0xff] }
 0x398   :  { %16659 = vst [vmem:[#allocation155_spill] sm:$0xff] %v13954_v27  ;;  %16660 = vst [vmem:[#allocation156_spill] sm:$0xff] %v13956_v9 }
 0x39a   :  { %v10190_v41 = vpop.f32.mrf.mxu1 }
 0x39b   :  { %v13960_v62 = vadd.f32 %v10190_v41, %v10134_v14  ;;  %v13962_v38 = vpop.f32.mrf.mxu0  ;;  %v16673_v14 = vld [vmem:[#allocation31_spill] sm:$0xff] }
 0x39c   :  { %16663 = vst [vmem:[#allocation159_spill] sm:$0xff] %v13962_v38  ;;  %v13964_v46 = vpop.f32.mrf.mxu1  ;;  %v1572_v41 = vadd.f32 %v16673_v14, %v16672_v53  ;;  %v16675_v38 = vld [vmem:[#allocation50_spill] sm:$0xff]  ;;  %v16686_v14 = vld [vmem:[#allocation53_spill] sm:$0xff] }
 0x39d   :  { %16662 = vst [vmem:[#allocation158_spill] sm:$0xff] %v13960_v62  ;;  %16664 = vst [vmem:[#allocation160_spill] sm:$0xff] %v13964_v46  ;;  %v13966_v60 = vpop.f32.mrf.mxu0  ;;  %v16674_v62 = vld [vmem:[#allocation37_spill] sm:$0xff]  ;;  %v16676_v46 = vld [vmem:[#allocation58_spill] sm:$0xff] }
 0x39e   :  { %16665 = vst [vmem:[#allocation161_spill] sm:$0xff] %v13966_v60  ;;  %v1584_v50 = vadd.f32 %v16675_v38, %v16674_v62  ;;  %v1738_v6 = vadd.f32 %v16676_v46, %v1560_v28  ;;  %v16677_v60 = vld [vmem:[#allocation38_spill] sm:$0xff]  ;;  %v16687_v62 = vld [vmem:[#allocation57_spill] sm:$0xff]  ;;  %v16688_v46 = vld [vmem:[#allocation64_spill] sm:$0xff] }
 0x39f   :  { %v1620_v38 = vadd.f32 %v16687_v62, %v16686_v14  ;;  %v16697_v62 = vld [vmem:[#allocation71_spill] sm:$0xff] }
 0x3a0   :  { %v13968_v0 = vpop.f32.mrf.mxu1  ;;  %v1924_v51 = vadd.f32 %v16684_v5, %v1738_v6  ;;  %v16694_v5 = vld [vmem:[#allocation68_spill] sm:$0xff] }
 0x3a1   :  { %16666 = vst [vmem:[#allocation162_spill] sm:$0xff] %v13968_v0  ;;  %v13970_v3 = vpop.f32.mrf.mxu0  ;;  %v1596_v0 = vadd.f32 %v16678_v1, %v16677_v60  ;;  %v1808_v6 = vadd.f32 %v16694_v5, %v1620_v38 }
 0x3a2   :  { %16667 = vst [vmem:[#allocation163_spill] sm:$0xff] %v13970_v3  ;;  %v13976_v9 = vpop.f32.mrf.mxu1  ;;  %v1752_v3 = vadd.f32 %v16679_v13, %v1572_v41  ;;  %v16691_v13 = vld [vmem:[#allocation66_spill] sm:$0xff] }
 0x3a3   :  { %v13974_v27 = vpop.f32.mrf.mxu0  ;;  %16671 = vst [vmem:[#allocation39_spill] sm:$0xff] %v13976_v9  ;;  %v1766_v9 = vadd.f32 %v16683_v24, %v1584_v50  ;;  %v1780_v28 = vadd.f32 %v16688_v46, %v1596_v0  ;;  %v16695_v50 = vld [vmem:[#allocation69_spill] sm:$0xff] }
 0x3a4   :  { %16670 = vst [vmem:[#allocation26_spill] sm:$0xff] %v13974_v27  ;;  %v1608_v27 = vadd.f32 %v16682_v61, %v16681_v15  ;;  %v1940_v1 = vadd.f32 %v16689_v63, %v1752_v3  ;;  %v16693_v15 = vld [vmem:[#allocation72_spill] sm:$0xff]  ;;  %v16698_v46 = vld [vmem:[#allocation29_spill] sm:$0xff]  ;;  %v16699_v3 = vld [vmem:[#allocation43_spill] sm:$0xff] }
 0x3a5   :  { %v2139_v61 = vadd.f32 %v16693_v15, %v1924_v51 }
 0x3a6   :  { %v13986_v20 = vpop.f32.mrf.mxu0  ;;  %v1794_v41 = vadd.f32 %v16691_v13, %v1608_v27  ;;  %v2151_v14 = vadd.f32 %v16696_v7, %v1940_v1  ;;  %v2004_v27 = vadd.f32 %v16700_v23, %v1808_v6  ;;  %v16701_v13 = vld [vmem:[#allocation25_spill] sm:$0xff] }
 0x3a7   :  { %16680 = vst [vmem:[#allocation18_spill] sm:$0xff] %v13986_v20  ;;  %v13992_v53 = vpop.f32.mrf.mxu1  ;;  %v16692_v20 = vld [vmem:[#allocation67_spill] sm:$0xff] }
 0x3a8   :  { %16685 = vst [vmem:[#allocation31_spill] sm:$0xff] %v13992_v53  ;;  %v13998_v60 = vpop.f32.mrf.mxu0  ;;  %v1956_v12 = vadd.f32 %v16692_v20, %v1766_v9  ;;  %v1972_v53 = vadd.f32 %v16695_v50, %v1780_v28  ;;  %v1988_v0 = vadd.f32 %v16697_v62, %v1794_v41  ;;  %v2320_v51 = vadd.f32 %v13377_v18, %v2151_v14  ;;  %v16702_v18 = vld [vmem:[#allocation49_spill] sm:$0xff]  ;;  %v16704_v50 = vld [vmem:[#allocation70_spill] sm:$0xff] }
 0x3a9   :  { %16690 = vst [vmem:[#allocation37_spill] sm:$0xff] %v13998_v60  ;;  %v14003_v24 = vpop.f32.mrf.mxu1  ;;  %v2308_v60 = vadd.f32 %v16699_v3, %v2139_v61  ;;  %v2199_v7 = vadd.f32 %v13411_v37, %v2004_v27  ;;  %v16706_v3 = vld [vmem:[#allocation55_spill] sm:$0xff]  ;;  %v16707_v27 = vld [vmem:[#allocation61_spill] sm:$0xff] }
 0x3aa   :  { %v2163_v63 = vadd.f32 %v16698_v46, %v1956_v12  ;;  %v2175_v20 = vadd.f32 %v13373_v44, %v1972_v53  ;;  %v2187_v38 = vadd.f32 %v13394_v8, %v1988_v0  ;;  %v16703_v53 = vld [vmem:[#allocation59_spill] sm:$0xff]  ;;  %v3593_v5 = vmax.f32 %v2320_v51, 1e-16 }
 0x3ab   :  { %v3591_v41 = vmax.f32 %v2308_v60, 1e-16  ;;  %v1632_v61 = vadd.f32 %v16703_v53, %v16702_v18  ;;  %v2368_v8 = vadd.f32 %v13447_v2, %v2199_v7  ;;  %v16705_v60 = vld [vmem:[#allocation17_spill] sm:$0xff]  ;;  %v2750_v7 = vadd.f32 %v13493_v55, %v13459_v11 }
 0x3ac   :  { %v14014_v9 = vpop.f32.mrf.mxu0  ;;  %v2332_v28 = vadd.f32 %v16701_v13, %v2163_v63  ;;  %v2344_v12 = vadd.f32 %v13415_v19, %v2175_v20  ;;  %v2356_v23 = vadd.f32 %v13431_v31, %v2187_v38  ;;  %v1644_v20 = vadd.f32 %v16707_v27, %v16706_v3  ;;  %v16708_v38 = vld [vmem:[#allocation27_spill] sm:$0xff]  ;;  %v16719_v3 = vld [vmem:[#allocation81_spill] sm:$0xff] }
 0x3ad   :  { %v14018_v15 = vpop.f32.mrf.mxu1  ;;  %v1822_v14 = vadd.f32 %v16704_v50, %v1632_v61  ;;  %11127 = vrcp.f32 %v3591_v41  ;;  %v3601_v46 = vmax.f32 %v2368_v8, 1e-16  ;;  %v16709_v41 = vld [vmem:[#allocation46_spill] sm:$0xff]  ;;  %v2762_v18 = vadd.f32 %v13514_v34, %v13474_v48  ;;  %v16713_v50 = vld [vmem:[#allocation23_spill] sm:$0xff] }
 0x3ae   :  { %v14022_v1 = vpop.f32.mrf.mxu0  ;;  %v3595_v6 = vmax.f32 %v2332_v28, 1e-16  ;;  %v3597_v62 = vmax.f32 %v2344_v12, 1e-16  ;;  %v3599_v19 = vmax.f32 %v2356_v23, 1e-16  ;;  %11129 = vrcp.f32 %v3593_v5 }
 0x3af   :  { %v14025_v44 = vpop.f32.mrf.mxu1  ;;  %v2020_v31 = vadd.f32 %v16705_v60, %v1822_v14  ;;  %v1836_v13 = vadd.f32 %v16708_v38, %v1644_v20  ;;  %v2774_v53 = vadd.f32 %v13532_v36, %v13489_v10  ;;  %v2810_v11 = vadd.f32 %v13561_v42, %v13541_v30  ;;  %v16710_v30 = vld [vmem:[#allocation20_spill] sm:$0xff]  ;;  %v16714_v14 = vld [vmem:[#allocation19_spill] sm:$0xff] }
 0x3b0   :  { %11131 = vrcp.f32 %v3595_v6  ;;  %v2928_v55 = vadd.f32 %v13567_v21, %v2750_v7  ;;  %v2942_v34 = vadd.f32 %v13578_v32, %v2762_v18  ;;  %v16711_v21 = vld [vmem:[#allocation51_spill] sm:$0xff]  ;;  %v16712_v6 = vld [vmem:[#allocation45_spill] sm:$0xff]  ;;  %v16717_v60 = vld [vmem:[#allocation48_spill] sm:$0xff] }
 0x3b1   :  { %11133 = vrcp.f32 %v3597_v62  ;;  %v2211_v51 = vadd.f32 %v13427_v54, %v2020_v31  ;;  %v2036_v23 = vadd.f32 %v16709_v41, %v1836_v13  ;;  %v2786_v54 = vadd.f32 %v13545_v59, %v13509_v39  ;;  %v16715_v62 = vld [vmem:[#allocation24_spill] sm:$0xff]  ;;  %v16722_v18 = vld [vmem:[#allocation34_spill] sm:$0xff] }
 0x3b2   :  { %v14031_v37 = vpop.f32.mrf.mxu0  ;;  %11135 = vrcp.f32 %v3599_v19  ;;  %v2956_v10 = vadd.f32 %v13588_v56, %v2774_v53  ;;  %v2998_v42 = vadd.f32 %v16710_v30, %v2810_v11  ;;  %v16720_v20 = vld [vmem:[#allocation36_spill] sm:$0xff] }
 0x3b3   :  { %v14033_v0 = vpop.f32.mrf.mxu1  ;;  %11137 = vrcp.f32 %v3601_v46  ;;  %v2380_v28 = vadd.f32 %v13463_v58, %v2211_v51  ;;  %v2798_v58 = vadd.f32 %v13553_v57, %v13528_v52  ;;  %v2223_v48 = vadd.f32 %v13443_v35, %v2036_v23  ;;  %v16718_v46 = vld [vmem:[#allocation75_spill] sm:$0xff]  ;;  %v16721_v51 = vld [vmem:[#allocation16_spill] sm:$0xff] }
 0x3b4   :  { %v14036_v63 = vpop.f32.mrf.mxu0  ;;  %v2970_v39 = vadd.f32 %v13598_v16, %v2786_v54  ;;  %v3114_v52 = vadd.f32 %v13591_v26, %v2928_v55  ;;  %v3130_v35 = vadd.f32 %v16712_v6, %v2942_v34  ;;  %v3146_v32 = vadd.f32 %v16713_v50, %v2956_v10  ;;  %v16716_v16 = vld [vmem:[#allocation32_spill] sm:$0xff]  ;;  %v16723_v54 = vld [vmem:[#allocation97_spill] sm:$0xff]  ;;  %v16726_v6 = vld [vmem:[#allocation91_spill] sm:$0xff] }
 0x3b5   :  { %v14040_v2 = vpop.f32.mrf.mxu1  ;;  %v3603_v59 = vmax.f32 %v2380_v28, 1e-16  ;;  %v2984_v57 = vadd.f32 %v13606_v25, %v2798_v58  ;;  %v14075_v8 = vadd.f32 %v16711_v21, %v2223_v48  ;;  %v2822_v19 = vadd.f32 %v16716_v16, %v16715_v62  ;;  %v16724_v10 = vld [vmem:[#allocation73_spill] sm:$0xff]  ;;  %v16725_v30 = vld [vmem:[#allocation84_spill] sm:$0xff] }
 0x3b6   :  { %v3162_v56 = vadd.f32 %v16714_v14, %v2970_v39  ;;  %v3194_v26 = vadd.f32 %v16718_v46, %v2998_v42  ;;  %v3329_v25 = vadd.f32 %v16719_v3, %v3114_v52  ;;  %v2834_v38 = vadd.f32 %v16721_v51, %v16720_v20  ;;  %v16729_v46 = vld [vmem:[#allocation127_spill] sm:$0xff]  ;;  %v16730_v3 = vld [vmem:[#allocation126_spill] sm:$0xff] }
 0x3b7   :  { %v3178_v31 = vadd.f32 %v16717_v60, %v2984_v57  ;;  %v3341_v13 = vadd.f32 %v13722_v4, %v3130_v35  ;;  %v3353_v28 = vadd.f32 %v13754_v40, %v3146_v32  ;;  %v3012_v53 = vadd.f32 %v16722_v18, %v2822_v19  ;;  %v16736_v18 = vld [vmem:[#allocation130_spill] sm:$0xff] }
 0x3b8   :  { %v14047_v12 = vpop.f32.mrf.mxu0  ;;  %v3365_v7 = vadd.f32 %v13794_v47, %v3162_v56  ;;  %v3498_v58 = vadd.f32 %v16723_v54, %v3329_v25  ;;  %v3389_v55 = vadd.f32 %v13871_v45, %v3194_v26  ;;  %v3026_v4 = vadd.f32 %v16724_v10, %v2834_v38  ;;  %v16731_v25 = vld [vmem:[#allocation134_spill] sm:$0xff]  ;;  %v16732_v38 = vld [vmem:[#allocation131_spill] sm:$0xff] }
 0x3b9   :  { %v14056_v61 = vpop.f32.mrf.mxu1  ;;  %v3377_v11 = vadd.f32 %v13839_v43, %v3178_v31  ;;  %v3510_v40 = vadd.f32 %v13803_v49, %v3341_v13  ;;  %v3522_v47 = vadd.f32 %v13847_v22, %v3353_v28  ;;  %v3210_v42 = vadd.f32 %v16725_v30, %v3012_v53  ;;  %v16727_v22 = vld [vmem:[#allocation122_spill] sm:$0xff]  ;;  %v16734_v28 = vld [vmem:[#allocation128_spill] sm:$0xff]  ;;  %v16737_v53 = vld [vmem:[#allocation139_spill] sm:$0xff] }
 0x3ba   :  { %v14063_v5 = vpop.f32.mrf.mxu0  ;;  %v11128_v23 = vpop.eup %11127  ;;  %v3534_v39 = vadd.f32 %v13875_v33, %v3365_v7  ;;  %v3558_v45 = vadd.f32 %v13892_v29, %v3389_v55  ;;  %v3226_v35 = vadd.f32 %v16726_v6, %v3026_v4  ;;  %11139 = vrcp.f32 %v3603_v59  ;;  %v16728_v29 = vld [vmem:[#allocation124_spill] sm:$0xff]  ;;  %v16735_v7 = vld [vmem:[#allocation137_spill] sm:$0xff]  ;;  %v16740_v10 = vld [vmem:[#allocation135_spill] sm:$0xff] }
 0x3bb   :  { %v14069_v36 = vpop.f32.mrf.mxu1  ;;  %v11130_v34 = vpop.eup %11129  ;;  %v3546_v43 = vadd.f32 %v13885_v17, %v3377_v11  ;;  %v14111_v32 = vmul.f32 %v11128_v23, %v3498_v58  ;;  %v3401_v33 = vadd.f32 %v16727_v22, %v3210_v42  ;;  %v4066_v20 = vadd.f32 %v16731_v25, %v16730_v3  ;;  %v16738_v58 = vld [vmem:[#allocation133_spill] sm:$0xff]  ;;  %v16741_v4 = vld [vmem:[#allocation142_spill] sm:$0xff] }
 0x3bc   :  { %v14114_v62 = vmul.f32 %v11130_v34, %v3510_v40  ;;  %v3413_v19 = vadd.f32 %v16728_v29, %v3226_v35  ;;  %v4060_v23 = vadd.f32 %v16735_v7, %v16734_v28  ;;  %v4078_v54 = vadd.f32 %v16737_v53, %v16736_v18  ;;  %v16739_v11 = vld [vmem:[#allocation141_spill] sm:$0xff]  ;;  %v16744_v30 = vld [vmem:[#allocation138_spill] sm:$0xff]  ;;  %v16747_v35 = vld [vmem:[#allocation140_spill] sm:$0xff] }
 0x3bd   :  { %v11132_v57 = vpop.eup %11131  ;;  %v14128_v26 = vadd.f32 %v16729_v46, %v3401_v33  ;;  %v4072_v55 = vadd.f32 %v16739_v11, %v16738_v58  ;;  %v4090_v40 = vadd.f32 %v16741_v4, %v16740_v10  ;;  %v16745_v42 = vld [vmem:[#allocation145_spill] sm:$0xff]  ;;  %v16749_v33 = vld [vmem:[#allocation143_spill] sm:$0xff]  ;;  %v16755_v18 = vld [vmem:[#allocation156_spill] sm:$0xff] }
 0x3be   :  { %v14085_v27 = vpop.f32.mrf.mxu0  ;;  %v11134_v21 = vpop.eup %11133  ;;  %v14116_v16 = vmul.f32 %v11132_v57, %v3522_v47  ;;  %v14133_v13 = vadd.f32 %v16732_v38, %v3413_v19  ;;  %v16742_v47 = vld [vmem:[#allocation136_spill] sm:$0xff]  ;;  %v16751_v19 = vld [vmem:[#allocation146_spill] sm:$0xff]  ;;  %v16752_v46 = vld [vmem:[#allocation153_spill] sm:$0xff] }
 0x3bf   :  { %v14092_v41 = vpop.f32.mrf.mxu1  ;;  %v11136_v50 = vpop.eup %11135  ;;  %v14118_v17 = vmul.f32 %v11134_v21, %v3534_v39  ;;  %v16743_v39 = vld [vmem:[#allocation144_spill] sm:$0xff]  ;;  %v4120_v3 = vadd.f32 %v16752_v46, %v16751_v19  ;;  %v16753_v25 = vld [vmem:[#allocation157_spill] sm:$0xff]  ;;  %v16756_v58 = vld [vmem:[#allocation159_spill] sm:$0xff] }
 0x3c0   :  { %v14098_v48 = vpop.f32.mrf.mxu0  ;;  %v11138_v56 = vpop.eup %11137  ;;  %v14123_v31 = vmul.f32 %v11136_v50, %v3546_v43  ;;  %16733 = vst [vmem:[#allocation50_spill] sm:$0xff] %v14133_v13  ;;  %v4084_v57 = vadd.f32 %v16743_v39, %v16742_v47  ;;  %v4102_v43 = vadd.f32 %v16745_v42, %v16744_v30  ;;  %v16748_v50 = vld [vmem:[#allocation147_spill] sm:$0xff]  ;;  %v4254_v38 = vadd.f32 %v16753_v25, %v4060_v23  ;;  %v16754_v7 = vld [vmem:[#allocation149_spill] sm:$0xff]  ;;  %v16757_v10 = vld [vmem:[#allocation152_spill] sm:$0xff] }
 0x3c1   :  { %v14104_v52 = vpop.f32.mrf.mxu1  ;;  %v14125_v59 = vmul.f32 %v11138_v56, %v3558_v45  ;;  %v16746_v45 = vld [vmem:[#allocation154_spill] sm:$0xff]  ;;  %v4096_v22 = vadd.f32 %v16748_v50, %v16747_v35  ;;  %v4132_v53 = vadd.f32 %v16755_v18, %v16754_v7  ;;  %v4275_v11 = vadd.f32 %v16756_v58, %v4078_v54  ;;  %v16760_v42 = vld [vmem:[#allocation161_spill] sm:$0xff]  ;;  %v16761_v35 = vld [vmem:[#allocation163_spill] sm:$0xff] }
 0x3c2   :  { %v4261_v21 = vadd.f32 %v16746_v45, %v4066_v20  ;;  %v16750_v56 = vld [vmem:[#allocation150_spill] sm:$0xff]  ;;  %v16758_v20 = vld [vmem:[#allocation160_spill] sm:$0xff]  ;;  %v4268_v45 = vadd.f32 %v16760_v42, %v4072_v55  ;;  %v4289_v50 = vadd.f32 %v16761_v35, %v4090_v40  ;;  %v16763_v19 = vld [vmem:[#allocation39_spill] sm:$0xff] }
 0x3c3   :  { %v4108_v29 = vadd.f32 %v16750_v56, %v16749_v33  ;;  %v4144_v4 = vadd.f32 %v16758_v20, %v16757_v10  ;;  %v16759_v47 = vld [vmem:[#allocation162_spill] sm:$0xff]  ;;  %v4448_v23 = vadd.f32 %v16763_v19, %v4254_v38  ;;  %v16765_v7 = vld [vmem:[#allocation31_spill] sm:$0xff]  ;;  %v16766_v54 = vld [vmem:[#allocation37_spill] sm:$0xff] }
 0x3c4   :  { %v10337_v14 = vpop.f32.mrf.mxu0  ;;  %v4456_v39 = vadd.f32 %v16759_v47, %v4261_v21  ;;  %v16762_v33 = vld [vmem:[#allocation26_spill] sm:$0xff]  ;;  %v4472_v18 = vadd.f32 %v16765_v7, %v4275_v11  ;;  %v4296_v58 = vadd.f32 %v16766_v54, %v4096_v22  ;;  %v4464_v21 = vadd.f32 %v14003_v24, %v4268_v45  ;;  %v16767_v20 = vld [vmem:[#allocation148_spill] sm:$0xff]  ;;  %v16768_v42 = vld [vmem:[#allocation151_spill] sm:$0xff] }
 0x3c5   :  { %v14121_v60 = vpop.f32.mrf.mxu1  ;;  %v4282_v56 = vadd.f32 %v16762_v33, %v4084_v57  ;;  %v16764_v25 = vld [vmem:[#allocation18_spill] sm:$0xff]  ;;  %v4317_v55 = vadd.f32 %v14014_v9, %v16767_v20  ;;  %v4488_v40 = vadd.f32 %v14018_v15, %v4289_v50  ;;  %v4310_v57 = vadd.f32 %v14022_v1, %v4108_v29  ;;  %v16769_v9 = vld [vmem:[#allocation155_spill] sm:$0xff]  ;;  %v14184_v1 = vld [vmem:[%s16050_s7] ss:$0 sm:$0xff] }
 0x3c6   :  { %v4686_v51 = vpop.f32.mrf.mxu0  ;;  %v4303_v49 = vadd.f32 %v16764_v25, %v4102_v43  ;;  %v4693_v13 = vadd.f32 %v10337_v14, %v4456_v39  ;;  %v4331_v43 = vadd.f32 %v14031_v37, %v16768_v42  ;;  %v4324_v24 = vadd.f32 %v14036_v63, %v4120_v3 }
 0x3c7   :  { %v4543_v34 = vpop.f32.mrf.mxu1  ;;  %v4480_v38 = vadd.f32 %v14025_v44, %v4282_v56  ;;  %v4687_v11 = vadd.f32 %v4686_v51, %v4448_v23  ;;  %v4496_v39 = vadd.f32 %v14040_v2, %v4296_v58  ;;  %v4345_v15 = vadd.f32 %v14047_v12, %v16769_v9  ;;  %v16771_v12 = vld [vmem:[#allocation158_spill] sm:$0xff] }
 0x3c8   :  { %v10340_v6 = vpop.f32.mrf.mxu0  ;;  %v4504_v14 = vadd.f32 %v14033_v0, %v4303_v49  ;;  %v4520_v37 = vadd.f32 %v14056_v61, %v4317_v55  ;;  %v14188_v49 = vpop.eup %11139  ;;  %v4338_v63 = vadd.f32 %v14063_v5, %v4132_v53  ;;  %v4512_v2 = vadd.f32 %v14069_v36, %v4310_v57 }
 0x3c9   :  { %v10302_v28 = vpop.f32.mrf.mxu1  ;;  %v4705_v51 = vadd.f32 %v10340_v6, %v4472_v18  ;;  %v4359_v3 = vadd.f32 %v14085_v27, %v16771_v12  ;;  %v4536_v50 = vadd.f32 %v14092_v41, %v4331_v43  ;;  %v4352_v25 = vadd.f32 %v14098_v48, %v4144_v4  ;;  %v16775_v12 = vld [vmem:[#allocation33_spill] sm:$0xff] }
 0x3ca   :  { %v4698_v30 = vpop.f32.mrf.mxu0  ;;  %v4528_v7 = vadd.f32 %v14104_v52, %v4324_v24  ;;  %v14200_v5 = vadd.f32 %v14121_v60, %v4345_v15  ;;  %v14202_v36 = vadd.f32 %v4543_v34, %v4338_v63 }
 0x3cb   :  { %v4559_v46 = vpop.f32.mrf.mxu1  ;;  %v4699_v56 = vadd.f32 %v4698_v30, %v4464_v21  ;;  %v16772_v30 = vld [vmem:[#allocation109_spill] sm:$0xff]  ;;  %v14208_v58 = vadd.f32 %v10302_v28, %v4359_v3 }
 0x3cc   :  { %v10343_v10 = vpop.f32.mrf.mxu0  ;;  %v14210_v21 = vadd.f32 %v4559_v46, %v4352_v25 }
 0x3cd   :  { %v10393_v47 = vpop.f32.mrf.mxu1  ;;  %v4717_v48 = vadd.f32 %v10343_v10, %v4488_v40 }
 0x3ce   :  { %v4870_v35 = vadd.f32 %v10393_v47, %v4693_v13  ;;  %v4710_v22 = vpop.f32.mrf.mxu0  ;;  %v16770_v13 = vld [vmem:[#allocation100_spill] sm:$0xff] }
 0x3cf   :  { %v4863_v44 = vpop.f32.mrf.mxu1  ;;  %v4711_v52 = vadd.f32 %v4710_v22, %v4480_v38  ;;  %v16773_v22 = vld [vmem:[#allocation117_spill] sm:$0xff] }
 0x3d0   :  { %v4958_v29 = vadd.f32 %v4870_v35, %v16770_v13  ;;  %v4864_v45 = vadd.f32 %v4863_v44, %v4687_v11  ;;  %v10346_v0 = vpop.f32.mrf.mxu0  ;;  %v16774_v13 = vld [vmem:[#allocation22_spill] sm:$0xff] }
 0x3d1   :  { %v10396_v33 = vpop.f32.mrf.mxu1  ;;  %v4729_v47 = vadd.f32 %v10346_v0, %v4504_v14 }
 0x3d2   :  { %v4981_v61 = vadd.f32 %v14184_v1, %v4958_v29  ;;  %v4957_v6 = vadd.f32 %v4864_v45, %v14111_v32  ;;  %v4882_v19 = vadd.f32 %v10396_v33, %v4705_v51  ;;  %v4722_v23 = vpop.f32.mrf.mxu0 }
 0x3d3   :  { %v4875_v27 = vpop.f32.mrf.mxu1  ;;  %v4723_v42 = vadd.f32 %v4722_v23, %v4496_v39 }
 0x3d4   :  { %v14204_v53 = vand.u32 4294901760, %v4981_v61  ;;  %v4980_v41 = vadd.f32 %v14184_v1, %v4957_v6  ;;  %v4960_v18 = vadd.f32 %v4882_v19, %v16772_v30  ;;  %v4876_v54 = vadd.f32 %v4875_v27, %v4699_v56  ;;  %v10349_v32 = vpop.f32.mrf.mxu0  ;;  %v16777_v56 = vld [vmem:[#allocation121_spill] sm:$0xff] }
 0x3d5   :  { %v10399_v4 = vpop.f32.mrf.mxu1  ;;  %v4741_v43 = vadd.f32 %v10349_v32, %v4520_v37 }
 0x3d6   :  { %v14213_v60 = vsub.f32 %v4981_v61, %v14204_v53  ;;  %v14215_v34 = vand.u32 4294901760, %v4980_v41  ;;  %v4983_v20 = vadd.f32 %v14184_v1, %v4960_v18  ;;  %v4959_v55 = vadd.f32 %v4876_v54, %v14114_v62  ;;  %v4734_v57 = vpop.f32.mrf.mxu0 }
 0x3d7   :  { %v4894_v28 = vadd.f32 %v10399_v4, %v4717_v48  ;;  %v4887_v11 = vpop.f32.mrf.mxu1  ;;  %v4735_v24 = vadd.f32 %v4734_v57, %v4512_v2 }
 0x3d8   :  { %v5112_v46 = vand.u32 4294901760, %v14213_v60  ;;  %v14221_v10 = vsub.f32 %v4980_v41, %v14215_v34  ;;  %v14223_v40 = vand.u32 4294901760, %v4983_v20  ;;  %v4982_v38 = vadd.f32 %v14184_v1, %v4959_v55  ;;  %10503 = vmatprep.mubr.f32.mxu1 %v14215_v34  ;;  %v10352_v35 = vpop.f32.mrf.mxu0  ;;  %v16779_v55 = vld [vmem:[#allocation42_spill] sm:$0xff] }
 0x3d9   :  { %v4962_v62 = vadd.f32 %v4894_v28, %v16773_v22  ;;  %v4888_v14 = vadd.f32 %v4887_v11, %v4711_v52  ;;  %v4753_v39 = vadd.f32 %v10352_v35, %v4536_v50  ;;  %v10402_v9 = vpop.f32.mrf.mxu1  ;;  %10504 = vmatmul.mubr.f32.vlgmr.msra.gmra.mxu1 %v14204_v53  ;;  %v16776_v50 = vmax.f32 %v14075_v8, 1e-16  ;;  %v16778_v8 = vld [vmem:[#allocation35_spill] sm:$0xff] }
 0x3da   :  { %v5113_v15 = vsub.f32 %v14213_v60, %v5112_v46  ;;  %v14233_v44 = vsub.f32 %v4983_v20, %v14223_v40  ;;  %v14235_v37 = vand.u32 4294901760, %v4982_v38  ;;  %v4906_v51 = vadd.f32 %v10402_v9, %v4729_v47  ;;  %10584 = vmatpush3.msra.mxu1 %v16774_v13  ;;  %v4746_v29 = vpop.f32.mrf.mxu0 }
 0x3db   :  { %v4985_v45 = vadd.f32 %v14184_v1, %v4962_v62  ;;  %v4961_v0 = vadd.f32 %v4888_v14, %v14116_v16  ;;  %v4747_v63 = vadd.f32 %v4746_v29, %v4528_v7  ;;  %v4899_v2 = vpop.f32.mrf.mxu1  ;;  %10585 = vmatprep.subr.mxu1 %v16775_v12  ;;  %v5102_v3 = vand.u32 4294901760, %v14221_v10  ;;  %v16781_v29 = vld [vmem:[#allocation77_spill] sm:$0xff] }
 0x3dc   :  { %11141 = vrcp.f32 %v16776_v50  ;;  %v14245_v33 = vsub.f32 %v4982_v38, %v14235_v37  ;;  %v4964_v61 = vadd.f32 %v4906_v51, %v16777_v56  ;;  %v4900_v6 = vadd.f32 %v4899_v2, %v4723_v42  ;;  %10506 = vmatprep.mubr.f32.mxu1 %v14235_v37  ;;  %10586 = vmatpush3.msra.mxu1 %v16775_v12  ;;  %v10355_v16 = vpop.f32.mrf.mxu0  ;;  %v16780_v42 = vld [vmem:[#allocation123_spill] sm:$0xff] }
 0x3dd   :  { %v5114_v19 = vand.u32 4294901760, %v5113_v15  ;;  %v14250_v23 = vand.u32 4294901760, %v4985_v45  ;;  %v4984_v25 = vadd.f32 %v14184_v1, %v4961_v0  ;;  %v10405_v7 = vpop.f32.mrf.mxu1  ;;  %10507 = vmatmul.mubr.f32.gmra.mxu1 %v14223_v40  ;;  %10587 = vmatprep.subr.mxu1 %v16778_v8  ;;  %v5103_v27 = vsub.f32 %v14221_v10, %v5102_v3 }
 0x3de   :  { %v4987_v41 = vadd.f32 %v14184_v1, %v4964_v61  ;;  %v4963_v30 = vadd.f32 %v4900_v6, %v14118_v17  ;;  %v4918_v18 = vadd.f32 %v10405_v7, %v4741_v43  ;;  %10588 = vmatpush3.msra.mxu1 %v16778_v8  ;;  %v4758_v54 = vpop.f32.mrf.mxu0  ;;  %v5122_v32 = vand.u32 4294901760, %v14245_v33  ;;  %v16783_v61 = vld [vmem:[#allocation40_spill] sm:$0xff] }
 0x3df   :  { %v14263_v48 = vsub.f32 %v4985_v45, %v14250_v23  ;;  %v14265_v52 = vand.u32 4294901760, %v4984_v25  ;;  %v4765_v4 = vadd.f32 %v10355_v16, %v14200_v5  ;;  %v4911_v20 = vpop.f32.mrf.mxu1  ;;  %10589 = vmatprep.subr.mxu1 %v16779_v55  ;;  %v5104_v57 = vand.u32 4294901760, %v5103_v27  ;;  %v16782_v45 = vld [vmem:[#allocation28_spill] sm:$0xff]  ;;  %v16785_v16 = vld [vmem:[#allocation78_spill] sm:$0xff] }
 0x3e0   :  { %v14269_v47 = vand.u32 4294901760, %v4987_v41  ;;  %v4986_v17 = vadd.f32 %v14184_v1, %v4963_v30  ;;  %v4966_v43 = vadd.f32 %v4918_v18, %v16780_v42  ;;  %v4912_v28 = vadd.f32 %v4911_v20, %v4735_v24  ;;  %10590 = vmatpush3.msra.mxu1 %v16779_v55  ;;  %v10358_v11 = vpop.f32.mrf.mxu0 }
 0x3e1   :  { %v14275_v38 = vsub.f32 %v4984_v25, %v14265_v52  ;;  %v4759_v35 = vadd.f32 %v4758_v54, %v14202_v36  ;;  %10447 = vmatprep.mubr.f32.mxu0 %v5104_v57  ;;  %10509 = vmatprep.mubr.f32.mxu1 %v14265_v52  ;;  %v10408_v5 = vpop.f32.mrf.mxu1  ;;  %v5123_v22 = vsub.f32 %v14245_v33, %v5122_v32  ;;  %v5132_v62 = vand.u32 4294901760, %v14233_v44 }
 0x3e2   :  { %v14283_v14 = vand.u32 4294901760, %v4986_v17  ;;  %v4989_v24 = vadd.f32 %v14184_v1, %v4966_v43  ;;  %v4965_v9 = vadd.f32 %v4912_v28, %v14123_v31  ;;  %v4777_v15 = vadd.f32 %v10358_v11, %v14208_v58  ;;  %10448 = vmatmul.mubr.f32.vlgmr.msra.gmra.mxu0 %v5114_v19  ;;  %10510 = vmatmul.mubr.f32.gmra.mxu1 %v14250_v23  ;;  %v4770_v20 = vpop.f32.mrf.mxu0  ;;  %v16786_v28 = vld [vmem:[#allocation129_spill] sm:$0xff] }
 0x3e3   :  { %v14290_v36 = vsub.f32 %v4987_v41, %v14269_v47  ;;  %v4930_v51 = vadd.f32 %v10408_v5, %v4753_v39  ;;  %10591 = vmatprep.subr.mxu1 %v16781_v29  ;;  %10528 = vmatpush3.msra.mxu0 %v16782_v45  ;;  %v4923_v0 = vpop.f32.mrf.mxu1  ;;  %v5124_v2 = vand.u32 4294901760, %v5123_v22  ;;  %v5133_v50 = vsub.f32 %v14233_v44, %v5132_v62  ;;  %v16784_v39 = vld [vmem:[#allocation125_spill] sm:$0xff]  ;;  %v16787_v5 = vld [vmem:[#allocation56_spill] sm:$0xff] }
 0x3e4   :  { %v14298_v31 = vsub.f32 %v4986_v17, %v14283_v14  ;;  %v4988_v58 = vadd.f32 %v14184_v1, %v4965_v9  ;;  %10592 = vmatpush3.msra.mxu1 %v16781_v29  ;;  %v4924_v56 = vadd.f32 %v4923_v0, %v4747_v63  ;;  %10529 = vmatprep.subr.mxu0 %v16783_v61  ;;  %v5142_v7 = vand.u32 4294901760, %v14275_v38 }
 0x3e5   :  { %v4968_v6 = vadd.f32 %v4930_v51, %v16784_v39  ;;  %10593 = vmatprep.subr.mxu1 %v16785_v16  ;;  %10450 = vmatprep.mubr.f32.mxu0 %v5124_v2  ;;  %v10411_v19 = vpop.f32.mrf.mxu1  ;;  %v5134_v25 = vand.u32 4294901760, %v5133_v50  ;;  %v5152_v27 = vand.u32 4294901760, %v14263_v48  ;;  %v14307_v41 = vand.u32 4294901760, %v4989_v24  ;;  %v16788_v51 = vld [vmem:[#allocation83_spill] sm:$0xff] }
 0x3e6   :  { %v14309_v30 = vand.u32 4294901760, %v4988_v58  ;;  %v4967_v18 = vadd.f32 %v4924_v56, %v14125_v59  ;;  %10512 = vmatprep.mubr.f32.mxu1 %v14283_v14  ;;  %10530 = vmatpush3.msra.mxu0 %v16783_v61  ;;  %v4942_v63 = vadd.f32 %v10411_v19, %v4765_v4  ;;  %v5143_v17 = vsub.f32 %v14275_v38, %v5142_v7  ;;  %v16789_v61 = vld [vmem:[#allocation76_spill] sm:$0xff] }
 0x3e7   :  { %v4991_v54 = vadd.f32 %v14184_v1, %v4968_v6  ;;  %10594 = vmatpush3.msra.mxu1 %v16785_v16  ;;  %10451 = vmatmul.mubr.f32.gmra.mxu0 %v5134_v25  ;;  %v4935_v57 = vpop.f32.mrf.mxu1  ;;  %v5153_v59 = vsub.f32 %v14263_v48, %v5152_v27  ;;  %v5162_v42 = vand.u32 4294901760, %v14298_v31  ;;  %v3635_v9 = vmul.f32 %v14188_v49, %v14128_v26  ;;  %v16790_v6 = vld [vmem:[#allocation88_spill] sm:$0xff] }
 0x3e8   :  { %v14324_v43 = vsub.f32 %v4988_v58, %v14309_v30  ;;  %v4990_v4 = vadd.f32 %v14184_v1, %v4967_v18  ;;  %v4970_v11 = vadd.f32 %v4942_v63, %v16786_v28  ;;  %10513 = vmatmul.mubr.f32.gmra.mxu1 %v14269_v47  ;;  %10531 = vmatprep.subr.mxu0 %v16787_v5  ;;  %v5144_v0 = vand.u32 4294901760, %v5143_v17  ;;  %v16791_v18 = vld [vmem:[#allocation50_spill] sm:$0xff] }
 0x3e9   :  { %v11142_v22 = vpop.eup %11141  ;;  %10595 = vmatprep.subr.mxu1 %v16788_v51  ;;  %10532 = vmatpush3.msra.mxu0 %v16787_v5  ;;  %v4936_v45 = vadd.f32 %v4935_v57, %v4759_v35  ;;  %v10414_v2 = vpop.f32.mrf.mxu1  ;;  %v5172_v50 = vand.u32 4294901760, %v14290_v36  ;;  %v4771_v58 = vadd.f32 %v4770_v20, %v14210_v21  ;;  %v5163_v26 = vsub.f32 %v14298_v31, %v5162_v42 }
 0x3ea   :  { %v14336_v56 = vand.u32 4294901760, %v4990_v4  ;;  %10596 = vmatpush3.msra.mxu1 %v16788_v51  ;;  %10533 = vmatprep.subr.mxu0 %v16789_v61  ;;  %v4954_v39 = vadd.f32 %v10414_v2, %v4777_v15  ;;  %v14344_v49 = vsub.f32 %v4989_v24, %v14307_v41  ;;  %v5154_v19 = vand.u32 4294901760, %v5153_v59  ;;  %v16792_v15 = vld [vmem:[#allocation132_spill] sm:$0xff] }
 0x3eb   :  { %v4969_v35 = vadd.f32 %v4936_v45, %v3635_v9  ;;  %10597 = vmatprep.subr.mxu1 %v16790_v6  ;;  %10453 = vmatprep.mubr.f32.mxu0 %v5144_v0  ;;  %v4947_v21 = vpop.f32.mrf.mxu1  ;;  %v16275_v25 = vand.u32 4294901760, %v14324_v43  ;;  %v3637_v63 = vmul.f32 %v11142_v22, %v16791_v18  ;;  %v14349_v20 = vand.u32 4294901760, %v4991_v54  ;;  %v16793_v22 = vld [vmem:[#allocation80_spill] sm:$0xff] }
 0x3ec   :  { %10515 = vmatprep.mubr.f32.mxu1 %v14309_v30  ;;  %10534 = vmatpush3.msra.mxu0 %v16789_v61  ;;  %v4972_v57 = vadd.f32 %v4954_v39, %v16792_v15  ;;  %v4948_v24 = vadd.f32 %v4947_v21, %v4771_v58  ;;  %v14355_v17 = vsub.f32 %v4990_v4, %v14336_v56  ;;  %v5164_v59 = vand.u32 4294901760, %v5163_v26  ;;  %v16794_v0 = vld [vmem:[#allocation92_spill] sm:$0xff]  ;;  %v16795_v61 = vld [vmem:[#allocation82_spill] sm:$0xff]  ;;  %v16797_v15 = vld [vmem:[#allocation87_spill] sm:$0xff] }
 0x3ed   :  { %v4992_v28 = vadd.f32 %v14184_v1, %v4969_v35  ;;  %10598 = vmatpush3.msra.mxu1 %v16790_v6  ;;  %10454 = vmatmul.mubr.f32.gmra.mxu0 %v5154_v19  ;;  %v5173_v5 = vsub.f32 %v14290_v36, %v5172_v50  ;;  %v4993_v45 = vadd.f32 %v14184_v1, %v4970_v11  ;;  %v16273_v2 = vand.u32 4294901760, %v14344_v49  ;;  %v16796_v11 = vld [vmem:[#allocation95_spill] sm:$0xff] }
 0x3ee   :  { %10516 = vmatmul.mubr.f32.gmra.mxu1 %v14307_v41  ;;  %10535 = vmatprep.subr.mxu0 %v16793_v22  ;;  %v4971_v9 = vadd.f32 %v4948_v24, %v3637_v63  ;;  %v5183_v4 = vsub.f32 %v14324_v43, %v16275_v25  ;;  %v14376_v39 = vsub.f32 %v4991_v54, %v14349_v20  ;;  %v16271_v35 = vand.u32 4294901760, %v14355_v17 }
 0x3ef   :  { %10599 = vmatprep.subr.mxu1 %v16794_v0  ;;  %10536 = vmatpush3.msra.mxu0 %v16793_v22  ;;  %v14371_v58 = vand.u32 4294901760, %v4992_v28  ;;  %v5174_v26 = vand.u32 4294901760, %v5173_v5  ;;  %v14383_v21 = vand.u32 4294901760, %v4993_v45  ;;  %v5193_v54 = vsub.f32 %v14344_v49, %v16273_v2 }
 0x3f0   :  { %10600 = vmatpush3.msra.mxu1 %v16794_v0  ;;  %10537 = vmatprep.subr.mxu0 %v16795_v61  ;;  %v4994_v19 = vadd.f32 %v14184_v1, %v4971_v9  ;;  %v5184_v18 = vand.u32 4294901760, %v5183_v4  ;;  %v4995_v24 = vadd.f32 %v14184_v1, %v4972_v57  ;;  %v5203_v5 = vsub.f32 %v14355_v17, %v16271_v35  ;;  %v16800_v1 = vld [vmem:[#allocation103_spill] sm:$0xff] }
 0x3f1   :  { %10601 = vmatprep.subr.mxu1 %v16796_v11  ;;  %10456 = vmatprep.mubr.f32.mxu0 %v5164_v59  ;;  %v14390_v63 = vsub.f32 %v4992_v28, %v14371_v58  ;;  %v16798_v59 = vld [vmem:[#allocation96_spill] sm:$0xff]  ;;  %v16272_v22 = vand.u32 4294901760, %v14376_v39  ;;  %v16799_v28 = vld [vmem:[#allocation90_spill] sm:$0xff]  ;;  %v14406_v4 = vsub.f32 %v4993_v45, %v14383_v21  ;;  %v5194_v57 = vand.u32 4294901760, %v5193_v54  ;;  %v16802_v54 = vld [vmem:[#allocation105_spill] sm:$0xff] }
 0x3f2   :  { %10518 = vmatprep.mubr.f32.mxu1 %v14336_v56  ;;  %10538 = vmatpush3.msra.mxu0 %v16795_v61  ;;  %v14401_v9 = vand.u32 4294901760, %v4994_v19 }
 0x3f3   :  { %10602 = vmatpush3.msra.mxu1 %v16796_v11  ;;  %10457 = vmatmul.mubr.f32.gmra.mxu0 %v5174_v26  ;;  %v16274_v61 = vand.u32 4294901760, %v14390_v63  ;;  %v14412_v26 = vand.u32 4294901760, %v4995_v24  ;;  %v5213_v45 = vsub.f32 %v14376_v39, %v16272_v22  ;;  %v16804_v22 = vld [vmem:[#allocation108_spill] sm:$0xff] }
 0x3f4   :  { %10519 = vmatmul.mubr.f32.gmra.mxu1 %v14349_v20  ;;  %10539 = vmatprep.subr.mxu0 %v16797_v15  ;;  %v14419_v35 = vsub.f32 %v4994_v19, %v14401_v9 }
 0x3f5   :  { %10603 = vmatprep.subr.mxu1 %v16798_v59  ;;  %10540 = vmatpush3.msra.mxu0 %v16797_v15  ;;  %v5204_v15 = vand.u32 4294901760, %v5203_v5  ;;  %v16803_v5 = vld [vmem:[#allocation99_spill] sm:$0xff]  ;;  %v14432_v19 = vsub.f32 %v4995_v24, %v14412_v26  ;;  %v5214_v2 = vand.u32 4294901760, %v5213_v45  ;;  %v16805_v24 = vld [vmem:[#allocation101_spill] sm:$0xff] }
 0x3f6   :  { %10604 = vmatpush3.msra.mxu1 %v16798_v59  ;;  %10541 = vmatprep.subr.mxu0 %v16799_v28 }
 0x3f7   :  { %10605 = vmatprep.subr.mxu1 %v16800_v1  ;;  %10459 = vmatprep.mubr.f32.mxu0 %v5184_v18  ;;  %v16801_v18 = vld [vmem:[#allocation94_spill] sm:$0xff]  ;;  %v5252_v45 = vand.u32 4294901760, %v14432_v19 }
 0x3f8   :  { %10521 = vmatprep.mubr.f32.mxu1 %v14371_v58  ;;  %10542 = vmatpush3.msra.mxu0 %v16799_v28  ;;  %v16276_v28 = vand.u32 4294901760, %v14406_v4 }
 0x3f9   :  { %10606 = vmatpush3.msra.mxu1 %v16800_v1  ;;  %10460 = vmatmul.mubr.f32.gmra.mxu0 %v5194_v57  ;;  %v5223_v57 = vsub.f32 %v14390_v63, %v16274_v61 }
 0x3fa   :  { %10522 = vmatmul.mubr.f32.gmra.mxu1 %v14383_v21  ;;  %10543 = vmatprep.subr.mxu0 %v16801_v18  ;;  %v5233_v61 = vsub.f32 %v14406_v4, %v16276_v28  ;;  %v16808_v28 = vld [vmem:[#allocation116_spill] sm:$0xff] }
 0x3fb   :  { %10607 = vmatprep.subr.mxu1 %v16802_v54  ;;  %10544 = vmatpush3.msra.mxu0 %v16801_v18  ;;  %v16277_v18 = vand.u32 4294901760, %v14419_v35  ;;  %v5224_v25 = vand.u32 4294901760, %v5223_v57 }
 0x3fc   :  { %10608 = vmatpush3.msra.mxu1 %v16802_v54  ;;  %10545 = vmatprep.subr.mxu0 %v16803_v5  ;;  %v5234_v57 = vand.u32 4294901760, %v5233_v61 }
 0x3fd   :  { %10609 = vmatprep.subr.mxu1 %v16804_v22  ;;  %10462 = vmatprep.mubr.f32.mxu0 %v5204_v15  ;;  %v16806_v15 = vld [vmem:[#allocation113_spill] sm:$0xff] }
 0x3fe   :  { %10524 = vmatprep.mubr.f32.mxu1 %v14401_v9  ;;  %10546 = vmatpush3.msra.mxu0 %v16803_v5  ;;  %v16807_v5 = vld [vmem:[#allocation106_spill] sm:$0xff] }
 0x3ff   :  { %10610 = vmatpush3.msra.mxu1 %v16804_v22  ;;  %10463 = vmatmul.mubr.f32.gmra.mxu0 %v5214_v2  ;;  %v5243_v2 = vsub.f32 %v14419_v35, %v16277_v18 }
 0x400   :  { %10525 = vmatmul.mubr.f32.gmra.mxu1 %v14412_v26  ;;  %10547 = vmatprep.subr.mxu0 %v16805_v24 }
 0x401   :  { %10611 = vmatprep.subr.mxu1 %v16806_v15  ;;  %10548 = vmatpush3.msra.mxu0 %v16805_v24  ;;  %v5253_v24 = vsub.f32 %v14432_v19, %v5252_v45  ;;  %v5244_v18 = vand.u32 4294901760, %v5243_v2 }
 0x402   :  { %10612 = vmatpush3.msra.mxu1 %v16806_v15  ;;  %10615 = vmatprep.mubr.f32.mxu1 %v5102_v3  ;;  %v16809_v3 = vld [vmem:[#allocation107_spill] sm:$0xff] }
 0x403   :  { %10549 = vmatprep.subr.mxu0 %v16807_v5  ;;  %10613 = vmatprep.subr.mxu1 %v16808_v28  ;;  %v5254_v61 = vand.u32 4294901760, %v5253_v24 }
 0x404   :  { %10465 = vmatprep.mubr.f32.mxu0 %v5224_v25  ;;  %10550 = vmatpush3.msra.mxu0 %v16807_v5  ;;  %v16810_v25 = vld [vmem:[#allocation112_spill] sm:$0xff] }
 0x405   :  { %10614 = vmatpush3.msra.mxu1 %v16808_v28  ;;  %10466 = vmatmul.mubr.f32.gmra.mxu0 %v5234_v57 }
 0x406   :  { %10551 = vmatprep.subr.mxu0 %v16809_v3  ;;  %10616 = vmatmul.mubr.f32.vlgmr.msra.gmra.mxu1 %v5112_v46  ;;  %v16811_v46 = vld [vmem:[#allocation115_spill] sm:$0xff] }
 0x407   :  { %10695 = vmatprep.subr.mxu1 %v16774_v13  ;;  %10552 = vmatpush3.msra.mxu0 %v16809_v3 }
 0x408   :  { %10618 = vmatprep.mubr.f32.mxu1 %v5122_v32  ;;  %10696 = vmatpush3.msra.mxu1 %v16774_v13  ;;  %v16812_v13 = vld [vmem:[#allocation119_spill] sm:$0xff]  ;;  %v16819_v32 = vld [vmem:[#allocation85_spill] sm:$0xff] }
 0x409   :  { %10553 = vmatprep.subr.mxu0 %v16810_v25  ;;  %10697 = vmatprep.subr.mxu1 %v16775_v12 }
 0x40a   :  { %10468 = vmatprep.mubr.f32.mxu0 %v5244_v18  ;;  %10554 = vmatpush3.msra.mxu0 %v16810_v25 }
 0x40b   :  { %10698 = vmatpush3.msra.mxu1 %v16775_v12  ;;  %10469 = vmatmul.mubr.f32.gmra.mxu0 %v5254_v61  ;;  %v16813_v12 = vld [vmem:[#allocation54_spill] sm:$0xff] }
 0x40c   :  { %10555 = vmatprep.subr.mxu0 %v16811_v46  ;;  %10619 = vmatmul.mubr.f32.gmra.mxu1 %v5132_v62  ;;  %v16823_v62 = vld [vmem:[#allocation89_spill] sm:$0xff] }
 0x40d   :  { %10699 = vmatprep.subr.mxu1 %v16778_v8  ;;  %10556 = vmatpush3.msra.mxu0 %v16811_v46 }
 0x40e   :  { %10559 = vmatprep.mubr.f32.mxu0 %v14221_v10  ;;  %10621 = vmatprep.mubr.f32.mxu1 %v5142_v7  ;;  %v16814_v10 = vld [vmem:[#allocation44_spill] sm:$0xff]  ;;  %v16828_v7 = vand.u32 4294901760, %v14419_v35 }
 0x40f   :  { %10700 = vmatpush3.msra.mxu1 %v16778_v8  ;;  %10557 = vmatprep.subr.mxu0 %v16812_v13  ;;  %v16817_v8 = vld [vmem:[#allocation79_spill] sm:$0xff] }
 0x410   :  { %10701 = vmatprep.subr.mxu1 %v16779_v55  ;;  %10558 = vmatpush3.msra.mxu0 %v16812_v13 }
 0x411   :  { %10702 = vmatpush3.msra.mxu1 %v16779_v55  ;;  %10560 = vmatmul.mubr.f32.vlgmr.msra.gmra.mxu0 %v14213_v60  ;;  %v16815_v60 = vld [vmem:[#allocation74_spill] sm:$0xff]  ;;  %v16820_v55 = vand.u32 4294901760, %v14355_v17 }
 0x412   :  { %10622 = vmatmul.mubr.f32.gmra.mxu1 %v5152_v27  ;;  %10639 = vmatprep.subr.mxu0 %v16813_v12  ;;  %v16829_v27 = vld [vmem:[#allocation102_spill] sm:$0xff] }
 0x413   :  { %10703 = vmatprep.subr.mxu1 %v16781_v29  ;;  %10562 = vmatprep.mubr.f32.mxu0 %v14245_v33  ;;  %v16816_v33 = vand.u32 4294901760, %v14324_v43 }
 0x414   :  { %10624 = vmatprep.mubr.f32.mxu1 %v5162_v42  ;;  %10640 = vmatpush3.msra.mxu0 %v16813_v12  ;;  %v16830_v42 = vld [vmem:[#allocation104_spill] sm:$0xff] }
 0x415   :  { %10704 = vmatpush3.msra.mxu1 %v16781_v29  ;;  %10641 = vmatprep.subr.mxu0 %v16814_v10  ;;  %v16824_v29 = vand.u32 4294901760, %v14390_v63 }
 0x416   :  { %10705 = vmatprep.subr.mxu1 %v16785_v16  ;;  %10642 = vmatpush3.msra.mxu0 %v16814_v10 }
 0x417   :  { %10706 = vmatpush3.msra.mxu1 %v16785_v16  ;;  %10563 = vmatmul.mubr.f32.gmra.mxu0 %v14233_v44  ;;  %v16818_v44 = vand.u32 4294901760, %v14344_v49  ;;  %v16827_v16 = vld [vmem:[#allocation98_spill] sm:$0xff] }
 0x418   :  { %10625 = vmatmul.mubr.f32.gmra.mxu1 %v5172_v50  ;;  %10643 = vmatprep.subr.mxu0 %v16815_v60  ;;  %v16833_v50 = vld [vmem:[#allocation114_spill] sm:$0xff] }
 0x419   :  { %10707 = vmatprep.subr.mxu1 %v16788_v51  ;;  %10565 = vmatprep.mubr.f32.mxu0 %v14275_v38  ;;  %v16821_v38 = vld [vmem:[#allocation86_spill] sm:$0xff] }
 0x41a   :  { %10627 = vmatprep.mubr.f32.mxu1 %v16816_v33  ;;  %10644 = vmatpush3.msra.mxu0 %v16815_v60 }
 0x41b   :  { %10708 = vmatpush3.msra.mxu1 %v16788_v51  ;;  %10645 = vmatprep.subr.mxu0 %v16817_v8  ;;  %v16832_v51 = vld [vmem:[#allocation111_spill] sm:$0xff] }
 0x41c   :  { %10709 = vmatprep.subr.mxu1 %v16790_v6  ;;  %10646 = vmatpush3.msra.mxu0 %v16817_v8 }
 0x41d   :  { %10710 = vmatpush3.msra.mxu1 %v16790_v6  ;;  %10566 = vmatmul.mubr.f32.gmra.mxu0 %v14263_v48  ;;  %v16822_v48 = vand.u32 4294901760, %v14376_v39  ;;  %v16835_v6 = vld [vmem:[#allocation120_spill] sm:$0xff] }
 0x41e   :  { %10628 = vmatmul.mubr.f32.gmra.mxu1 %v16818_v44  ;;  %10647 = vmatprep.subr.mxu0 %v16819_v32 }
 0x41f   :  { %10711 = vmatprep.subr.mxu1 %v16794_v0  ;;  %10568 = vmatprep.mubr.f32.mxu0 %v14298_v31  ;;  %v16825_v31 = vld [vmem:[#allocation93_spill] sm:$0xff] }
 0x420   :  { %10630 = vmatprep.mubr.f32.mxu1 %v16820_v55  ;;  %10648 = vmatpush3.msra.mxu0 %v16819_v32 }
 0x421   :  { %10712 = vmatpush3.msra.mxu1 %v16794_v0  ;;  %10649 = vmatprep.subr.mxu0 %v16821_v38 }
 0x422   :  { %10713 = vmatprep.subr.mxu1 %v16796_v11  ;;  %10650 = vmatpush3.msra.mxu0 %v16821_v38 }
 0x423   :  { %10714 = vmatpush3.msra.mxu1 %v16796_v11  ;;  %10569 = vmatmul.mubr.f32.gmra.mxu0 %v14290_v36  ;;  %v16826_v36 = vand.u32 4294901760, %v14406_v4 }
 0x424   :  { %10631 = vmatmul.mubr.f32.gmra.mxu1 %v16822_v48  ;;  %10651 = vmatprep.subr.mxu0 %v16823_v62 }
 0x425   :  { %10715 = vmatprep.subr.mxu1 %v16798_v59  ;;  %10571 = vmatprep.mubr.f32.mxu0 %v14324_v43  ;;  %v16831_v43 = vld [vmem:[#allocation110_spill] sm:$0xff] }
 0x426   :  { %10633 = vmatprep.mubr.f32.mxu1 %v16824_v29  ;;  %10652 = vmatpush3.msra.mxu0 %v16823_v62 }
 0x427   :  { %10716 = vmatpush3.msra.mxu1 %v16798_v59  ;;  %10653 = vmatprep.subr.mxu0 %v16825_v31 }
 0x428   :  { %10717 = vmatprep.subr.mxu1 %v16800_v1  ;;  %10654 = vmatpush3.msra.mxu0 %v16825_v31 }
 0x429   :  { %10718 = vmatpush3.msra.mxu1 %v16800_v1  ;;  %10572 = vmatmul.mubr.f32.gmra.mxu0 %v14344_v49  ;;  %v16834_v49 = vld [vmem:[#allocation118_spill] sm:$0xff] }
 0x42a   :  { %10634 = vmatmul.mubr.f32.gmra.mxu1 %v16826_v36  ;;  %10655 = vmatprep.subr.mxu0 %v16827_v16 }
 0x42b   :  { %10719 = vmatprep.subr.mxu1 %v16802_v54  ;;  %10574 = vmatprep.mubr.f32.mxu0 %v14355_v17 }
 0x42c   :  { %10636 = vmatprep.mubr.f32.mxu1 %v16828_v7  ;;  %10656 = vmatpush3.msra.mxu0 %v16827_v16 }
 0x42d   :  { %10720 = vmatpush3.msra.mxu1 %v16802_v54  ;;  %10657 = vmatprep.subr.mxu0 %v16829_v27 }
 0x42e   :  { %10721 = vmatprep.subr.mxu1 %v16804_v22  ;;  %10658 = vmatpush3.msra.mxu0 %v16829_v27 }
 0x42f   :  { %10722 = vmatpush3.msra.mxu1 %v16804_v22  ;;  %10575 = vmatmul.mubr.f32.gmra.mxu0 %v14376_v39 }
 0x430   :  { %10637 = vmatmul.mubr.f32.gmra.mxu1 %v5252_v45  ;;  %10659 = vmatprep.subr.mxu0 %v16830_v42 }
 0x431   :  { %10723 = vmatprep.subr.mxu1 %v16806_v15  ;;  %10577 = vmatprep.mubr.f32.mxu0 %v14390_v63 }
 0x432   :  { %10660 = vmatpush3.msra.mxu0 %v16830_v42  ;;  %10724 = vmatpush3.msra.mxu1 %v16806_v15 }
 0x433   :  { %10727 = vmatprep.mubr.f32.mxu1 %v14215_v34  ;;  %10661 = vmatprep.subr.mxu0 %v16831_v43 }
 0x434   :  { %10725 = vmatprep.subr.mxu1 %v16808_v28  ;;  %10662 = vmatpush3.msra.mxu0 %v16831_v43 }
 0x435   :  { %10726 = vmatpush3.msra.mxu1 %v16808_v28  ;;  %10578 = vmatmul.mubr.f32.gmra.mxu0 %v14406_v4 }
 0x436   :  { %10663 = vmatprep.subr.mxu0 %v16832_v51  ;;  %10728 = vmatmul.mubr.f32.vlgmr.msra.gmra.mxu1 %v14204_v53 }
 0x437   :  { %10580 = vmatprep.mubr.f32.mxu0 %v14419_v35  ;;  %10664 = vmatpush3.msra.mxu0 %v16832_v51  ;;  %v14709_v51 = vld [vmem:[%s16052_s9] ss:$0 sm:$0xff] }
 0x438   :  { %10730 = vmatprep.mubr.f32.mxu1 %v14235_v37  ;;  %10665 = vmatprep.subr.mxu0 %v16833_v50 }
 0x439   :  { %10666 = vmatpush3.msra.mxu0 %v16833_v50 }
 0x43a   :  { %10581 = vmatmul.mubr.f32.gmra.mxu0 %v14432_v19  ;;  %10667 = vmatprep.subr.mxu0 %v16834_v49 }
 0x43b   :  { %10731 = vmatmul.mubr.f32.gmra.mxu1 %v14223_v40  ;;  %10668 = vmatpush3.msra.mxu0 %v16834_v49 }
 0x43c   :  { %10671 = vmatprep.mubr.f32.mxu0 %v14215_v34  ;;  %10733 = vmatprep.mubr.f32.mxu1 %v14265_v52 }
 0x43d   :  { %10669 = vmatprep.subr.mxu0 %v16835_v6 }
 0x43e   :  { %10670 = vmatpush3.msra.mxu0 %v16835_v6 }
 0x43f   :  { %10672 = vmatmul.mubr.f32.vlgmr.msra.gmra.mxu0 %v14204_v53  ;;  %10734 = vmatmul.mubr.f32.gmra.mxu1 %v14250_v23 }
 0x440   :  { %10674 = vmatprep.mubr.f32.mxu0 %v14235_v37  ;;  %10736 = vmatprep.mubr.f32.mxu1 %v14283_v14 }
 0x443   :  { %10675 = vmatmul.mubr.f32.gmra.mxu0 %v14223_v40  ;;  %10737 = vmatmul.mubr.f32.gmra.mxu1 %v14269_v47 }
 0x444   :  { %10677 = vmatprep.mubr.f32.mxu0 %v14265_v52  ;;  %10739 = vmatprep.mubr.f32.mxu1 %v14309_v30 }
 0x447   :  { %10678 = vmatmul.mubr.f32.gmra.mxu0 %v14250_v23  ;;  %10740 = vmatmul.mubr.f32.gmra.mxu1 %v14307_v41 }
 0x448   :  { %10680 = vmatprep.mubr.f32.mxu0 %v14283_v14  ;;  %10742 = vmatprep.mubr.f32.mxu1 %v14336_v56 }
 0x44b   :  { %10681 = vmatmul.mubr.f32.gmra.mxu0 %v14269_v47  ;;  %10743 = vmatmul.mubr.f32.gmra.mxu1 %v14349_v20 }
 0x44c   :  { %10683 = vmatprep.mubr.f32.mxu0 %v14309_v30  ;;  %10745 = vmatprep.mubr.f32.mxu1 %v14371_v58 }
 0x44f   :  { %10684 = vmatmul.mubr.f32.gmra.mxu0 %v14307_v41  ;;  %10746 = vmatmul.mubr.f32.gmra.mxu1 %v14383_v21 }
 0x450   :  { %10686 = vmatprep.mubr.f32.mxu0 %v14336_v56  ;;  %10748 = vmatprep.mubr.f32.mxu1 %v14401_v9 }
 0x453   :  { %10687 = vmatmul.mubr.f32.gmra.mxu0 %v14349_v20  ;;  %10749 = vmatmul.mubr.f32.gmra.mxu1 %v14412_v26 }
 0x454   :  { %10689 = vmatprep.mubr.f32.mxu0 %v14371_v58 }
 0x457   :  { %10690 = vmatmul.mubr.f32.gmra.mxu0 %v14383_v21 }
 0x458   :  { %10692 = vmatprep.mubr.f32.mxu0 %v14401_v9 }
 0x45b   :  { %10693 = vmatmul.mubr.f32.gmra.mxu0 %v14412_v26 }
 0x499   :  { %v14610_v53 = vpop.f32.mrf.mxu1 }
 0x49b   :  { %v14612_v34 = vpop.f32.mrf.mxu1 }
 0x49d   :  { %v14614_v40 = vpop.f32.mrf.mxu1 }
 0x49f   :  { %v14616_v37 = vpop.f32.mrf.mxu1 }
 0x4a2   :  { %v10449_v23 = vpop.f32.mrf.mxu0  ;;  %v14618_v52 = vpop.f32.mrf.mxu1 }
 0x4a3   :  { %v5117_v49 = vadd.f32 %v10449_v23, %v14709_v51 }
 0x4a4   :  { %v5106_v47 = vpop.f32.mrf.mxu0  ;;  %v14620_v14 = vpop.f32.mrf.mxu1 }
 0x4a5   :  { %v5107_v6 = vadd.f32 %v14709_v51, %v5106_v47 }
 0x4a7   :  { %v10452_v41 = vpop.f32.mrf.mxu0 }
 0x4a8   :  { %v14622_v30 = vpop.f32.mrf.mxu1 }
 0x4a9   :  { %v5126_v56 = vpop.f32.mrf.mxu0 }
 0x4aa   :  { %v14624_v20 = vpop.f32.mrf.mxu1 }
 0x4ad   :  { %v14626_v17 = vpop.f32.mrf.mxu0 }
 0x4ae   :  { %v14628_v0 = vpop.f32.mrf.mxu1  ;;  %v5157_v47 = vadd.f32 %v14626_v17, %v14709_v51 }
 0x4af   :  { %v14630_v58 = vpop.f32.mrf.mxu0 }
 0x4b0   :  { %v14632_v39 = vpop.f32.mrf.mxu1 }
 0x4b3   :  { %v14634_v11 = vpop.f32.mrf.mxu0 }
 0x4b4   :  { %v14636_v35 = vpop.f32.mrf.mxu1  ;;  %v5177_v17 = vadd.f32 %v14634_v11, %v14709_v51 }
 0x4b5   :  { %v14638_v21 = vpop.f32.mrf.mxu0 }
 0x4b6   :  { %v14640_v63 = vpop.f32.mrf.mxu1 }
 0x4b9   :  { %v14642_v59 = vpop.f32.mrf.mxu0 }
 0x4ba   :  { %v14644_v22 = vpop.f32.mrf.mxu1 }
 0x4bb   :  { %v14646_v9 = vpop.f32.mrf.mxu0 }
 0x4bc   :  { %v14648_v4 = vpop.f32.mrf.mxu1 }
 0x4bd   :  { %16836 = vst [vmem:[#allocation58_spill] sm:$0xff] %v14648_v4 }
 0x4bf   :  { %v14650_v1 = vpop.f32.mrf.mxu0 }
 0x4c0   :  { %v14652_v26 = vpop.f32.mrf.mxu1 }
 0x4c1   :  { %16837 = vst [vmem:[#allocation38_spill] sm:$0xff] %v14652_v26  ;;  %v14654_v54 = vpop.f32.mrf.mxu0  ;;  %v5137_v26 = vadd.f32 %v10452_v41, %v14709_v51  ;;  %v5147_v41 = vadd.f32 %v14709_v51, %v14630_v58 }
 0x4c2   :  { %v14656_v28 = vpop.f32.mrf.mxu1 }
 0x4c3   :  { %16838 = vst [vmem:[#allocation47_spill] sm:$0xff] %v14656_v28 }
 0x4c5   :  { %v14658_v19 = vpop.f32.mrf.mxu0 }
 0x4c6   :  { %v10617_v18 = vpop.f32.mrf.mxu1 }
 0x4c7   :  { %v14660_v15 = vpop.f32.mrf.mxu0 }
 0x4c8   :  { %v5795_v45 = vpop.f32.mrf.mxu1 }
 0x4cb   :  { %v14662_v2 = vpop.f32.mrf.mxu0 }
 0x4cc   :  { %16839 = vst [vmem:[#allocation60_spill] sm:$0xff] %v14662_v2  ;;  %v14664_v5 = vpop.f32.mrf.mxu1 }
 0x4cd   :  { %v14666_v57 = vpop.f32.mrf.mxu0 }
 0x4ce   :  { %16840 = vst [vmem:[#allocation41_spill] sm:$0xff] %v14666_v57  ;;  %v14668_v24 = vpop.f32.mrf.mxu1 }
 0x4d1   :  { %v10561_v3 = vpop.f32.mrf.mxu0 }
 0x4d2   :  { %v14670_v25 = vpop.f32.mrf.mxu1 }
 0x4d3   :  { %v5601_v61 = vpop.f32.mrf.mxu0 }
 0x4d4   :  { %v14672_v46 = vpop.f32.mrf.mxu1 }
 0x4d7   :  { %v10564_v13 = vpop.f32.mrf.mxu0 }
 0x4d8   :  { %v14674_v12 = vpop.f32.mrf.mxu1 }
 0x4d9   :  { %v5615_v10 = vpop.f32.mrf.mxu0 }
 0x4da   :  { %v14676_v60 = vpop.f32.mrf.mxu1 }
 0x4dd   :  { %v10567_v33 = vpop.f32.mrf.mxu0 }
 0x4de   :  { %v14678_v8 = vpop.f32.mrf.mxu1 }
 0x4df   :  { %v5629_v44 = vpop.f32.mrf.mxu0 }
 0x4e0   :  { %v14680_v32 = vpop.f32.mrf.mxu1 }
 0x4e1   :  { %16841 = vst [vmem:[#allocation52_spill] sm:$0xff] %v14680_v32 }
 0x4e3   :  { %v14682_v55 = vpop.f32.mrf.mxu0 }
 0x4e4   :  { %v14684_v38 = vpop.f32.mrf.mxu1 }
 0x4e5   :  { %16842 = vst [vmem:[#allocation62_spill] sm:$0xff] %v14684_v38  ;;  %v14686_v48 = vpop.f32.mrf.mxu0  ;;  %v5408_v38 = vadd.f32 %v14612_v34, %v5107_v6  ;;  %v5438_v6 = vadd.f32 %v14618_v52, %v5157_v47 }
 0x4e6   :  { %v14688_v62 = vpop.f32.mrf.mxu1 }
 0x4e7   :  { %16843 = vst [vmem:[#allocation63_spill] sm:$0xff] %v14688_v62  ;;  %v5414_v62 = vadd.f32 %v14610_v53, %v5117_v49  ;;  %v5602_v23 = vadd.f32 %v5601_v61, %v5408_v38  ;;  %v5426_v53 = vadd.f32 %v14614_v40, %v5137_v26  ;;  %v5432_v40 = vadd.f32 %v14620_v14, %v5147_v41 }
 0x4e8   :  { %v5450_v14 = vadd.f32 %v14622_v30, %v5177_v17 }
 0x4e9   :  { %v14690_v29 = vpop.f32.mrf.mxu0  ;;  %v5609_v57 = vadd.f32 %v10561_v3, %v5414_v62  ;;  %v5623_v3 = vadd.f32 %v10564_v13, %v5426_v53  ;;  %v5796_v62 = vadd.f32 %v5795_v45, %v5602_v23  ;;  %v5637_v45 = vadd.f32 %v10567_v33, %v5438_v6 }
 0x4ea   :  { %v14692_v31 = vpop.f32.mrf.mxu1  ;;  %v5630_v11 = vadd.f32 %v5629_v44, %v5432_v40  ;;  %v16278_v33 = vmov 0.0  }
 0x4eb   :  { %16844 = vst [vmem:[#allocation53_spill] sm:$0xff] %v14692_v31  ;;  %v14694_v36 = vpop.f32.mrf.mxu0  ;;  %v5804_v38 = vadd.f32 %v10617_v18, %v5609_v57  ;;  %v5197_v18 = vadd.f32 %v14642_v59, %v14709_v51  ;;  %v5836_v30 = vadd.f32 %v14670_v25, %v5637_v45 }
 0x4ec   :  { %v14696_v16 = vpop.f32.mrf.mxu1 }
 0x4ed   :  { %16845 = vst [vmem:[#allocation57_spill] sm:$0xff] %v14696_v16 }
 0x4ef   :  { %v14698_v7 = vpop.f32.mrf.mxu0 }
 0x4f0   :  { %v14700_v27 = vpop.f32.mrf.mxu1 }
 0x4f1   :  { %16846 = vst [vmem:[#allocation64_spill] sm:$0xff] %v14700_v27  ;;  %v14702_v42 = vpop.f32.mrf.mxu0  ;;  %v111_v27 = vlaneseq }
 0x4f2   :  { %v14704_v43 = vpop.f32.mrf.mxu1 }
 0x4f3   :  { %16847 = vst [vmem:[#allocation65_spill] sm:$0xff] %v14704_v43  ;;  %v5127_v43 = vadd.f32 %v14709_v51, %v5126_v56  ;;  %v14727_v32 = vand.u32 127, %v111_v27  ;;  %v5167_v27 = vadd.f32 %v14709_v51, %v14638_v21  ;;  %v5820_v21 = vadd.f32 %v14664_v5, %v5623_v3 }
 0x4f5   :  { %v14711_v50 = vpop.f32.mrf.mxu0  ;;  %16851 = vst [vmem:[#allocation68_spill] sm:$0xff] %v14727_v32  ;;  %v5420_v34 = vadd.f32 %v14616_v37, %v5127_v43  ;;  %vm113_vm1 = vcmp.lt.s32.totalorder %v14727_v32, 64  ;;  %v5187_v43 = vadd.f32 %v14709_v51, %v14646_v9  ;;  %v5444_v23 = vadd.f32 %v14624_v20, %v5167_v27 }
 0x4f6   :  { %16848 = vst [vmem:[#allocation66_spill] sm:$0xff] %v14711_v50  ;;  %v10729_v16 = vpop.f32.mrf.mxu1  ;;  %v14757_v44 = vsel %vm113_vm1, 1.0, %v16278_v33  ;;  %v5651_v9 = vadd.f32 %v14682_v55, %v5450_v14  ;;  %v5207_v55 = vadd.f32 %v14709_v51, %v14654_v54 }
 0x4f7   :  { %v14715_v31 = vpop.f32.mrf.mxu0  ;;  %v5616_v61 = vadd.f32 %v5615_v10, %v5420_v34  ;;  %v5644_v34 = vadd.f32 %v14686_v48, %v5444_v23  ;;  %v5456_v25 = vadd.f32 %v14632_v39, %v5187_v43  ;;  %v16853_v43 = vld [vmem:[#allocation60_spill] sm:$0xff]  ;;  %v16854_v23 = vld [vmem:[#allocation41_spill] sm:$0xff] }
 0x4f8   :  { %16849 = vst [vmem:[#allocation67_spill] sm:$0xff] %v14715_v31  ;;  %v6211_v28 = vpop.f32.mrf.mxu1  ;;  %v5852_v54 = vadd.f32 %v14674_v12, %v5651_v9  ;;  %v5257_v14 = vadd.f32 %v16853_v43, %v14709_v51  ;;  %v16865_v43 = vld [vmem:[#allocation64_spill] sm:$0xff] }
 0x4f9   :  { %v5812_v52 = vadd.f32 %v14668_v24, %v5616_v61  ;;  %v5217_v61 = vadd.f32 %v14650_v1, %v14709_v51  ;;  %v5237_v1 = vadd.f32 %v14658_v19, %v14709_v51  ;;  %v5844_v40 = vadd.f32 %v14676_v60, %v5644_v34 }
 0x4fa   :  { %v14721_v4 = vpop.f32.mrf.mxu0  ;;  %v5468_v19 = vadd.f32 %v14640_v63, %v5207_v55 }
 0x4fb   :  { %v10732_v50 = vpop.f32.mrf.mxu1 }
 0x4fc   :  { %v14723_v2 = vpop.f32.mrf.mxu0 }
 0x4fd   :  { %16850 = vst [vmem:[#allocation72_spill] sm:$0xff] %v14723_v2  ;;  %v6223_v31 = vpop.f32.mrf.mxu1  ;;  %v16856_v9 = vld [vmem:[#allocation66_spill] sm:$0xff] }
 0x4ff   :  { %v10673_v56 = vpop.f32.mrf.mxu0  ;;  %v14733_v49 = vpop.f32.mrf.mxu1 }
 0x500   :  { %v6041_v37 = vadd.f32 %v10673_v56, %v5804_v38  ;;  %v5462_v56 = vadd.f32 %v14628_v0, %v5197_v18 }
 0x501   :  { %v6034_v58 = vpop.f32.mrf.mxu0  ;;  %v6235_v2 = vpop.f32.mrf.mxu1 }
 0x502   :  { %v6035_v26 = vadd.f32 %v6034_v58, %v5796_v62  ;;  %v14759_v5 = vadd.f32 %v10729_v16, %v6041_v37  ;;  %v5828_v16 = vadd.f32 %v14672_v46, %v5630_v11  ;;  %v5658_v58 = vadd.f32 %v14694_v36, %v5456_v25  ;;  %v16859_v25 = vld [vmem:[#allocation63_spill] sm:$0xff] }
 0x503   :  { %v10676_v57 = vpop.f32.mrf.mxu0  ;;  %v14744_v13 = vpop.f32.mrf.mxu1  ;;  %v5227_v37 = vadd.f32 %v14709_v51, %v14660_v15  ;;  %v5486_v15 = vadd.f32 %v14644_v22, %v5237_v1 }
 0x504   :  { %v14748_v10 = vadd.f32 %v6211_v28, %v6035_v26  ;;  %v6053_v24 = vadd.f32 %v10676_v57, %v5820_v21  ;;  %v6308_v46 = vmul.f32 %v14757_v44, %v14759_v5  ;;  %v5474_v26 = vadd.f32 %v14636_v35, %v5217_v61  ;;  %v16852_v21 = vld [vmem:[#allocation52_spill] sm:$0xff] }
 0x505   :  { %v6046_v47 = vpop.f32.mrf.mxu0  ;;  %v6247_v59 = vpop.f32.mrf.mxu1 }
 0x506   :  { %v6047_v28 = vadd.f32 %v6046_v47, %v5812_v52  ;;  %v6307_v41 = vmul.f32 %v14757_v44, %v14748_v10  ;;  %v14777_v27 = vadd.f32 %v10732_v50, %v6053_v24  ;;  %v5679_v60 = vadd.f32 %v14698_v7, %v5474_v26  ;;  %v16855_v47 = vld [vmem:[#allocation58_spill] sm:$0xff] }
 0x507   :  { %v10679_v20 = vpop.f32.mrf.mxu0  ;;  %v14765_v53 = vpop.f32.mrf.mxu1  ;;  %v5860_v52 = vadd.f32 %v16852_v21, %v5658_v58  ;;  %v5247_v7 = vadd.f32 %v14709_v51, %v16854_v23  ;;  %v5480_v22 = vadd.f32 %v16855_v47, %v5227_v37  ;;  %v16858_v51 = vld [vmem:[#allocation62_spill] sm:$0xff] }
 0x508   :  { %6323 = vadd.xlane.f32.xlu0 %v6307_v41  ;;  %v14770_v3 = vadd.f32 %v6223_v31, %v6047_v28  ;;  %v6065_v38 = vadd.f32 %v10679_v20, %v5836_v30  ;;  %v5665_v31 = vadd.f32 %v14690_v29, %v5462_v56  ;;  %v5693_v30 = vadd.f32 %v16856_v9, %v5486_v15  ;;  %v16857_v20 = vld [vmem:[#allocation67_spill] sm:$0xff] }
 0x509   :  { %v6058_v62 = vpop.f32.mrf.mxu0  ;;  %v6259_v17 = vpop.f32.mrf.mxu1  ;;  %v5686_v34 = vadd.f32 %v16857_v20, %v5480_v22 }
 0x50a   :  { %v6059_v48 = vadd.f32 %v6058_v62, %v5828_v16  ;;  %v6309_v0 = vmul.f32 %v14757_v44, %v14770_v3  ;;  %v14796_v29 = vadd.f32 %v14733_v49, %v6065_v38  ;;  %v5868_v35 = vadd.f32 %v14678_v8, %v5665_v31  ;;  %v16860_v38 = vld [vmem:[#allocation38_spill] sm:$0xff] }
 0x50b   :  { %v10682_v39 = vpop.f32.mrf.mxu0  ;;  %v10744_v6 = vpop.f32.mrf.mxu1  ;;  %v5672_v49 = vadd.f32 %v14702_v42, %v5468_v19  ;;  %v5884_v16 = vadd.f32 %v16858_v51, %v5679_v60  ;;  %v5498_v62 = vadd.f32 %v16860_v38, %v5257_v14  ;;  %v16863_v19 = vld [vmem:[#allocation57_spill] sm:$0xff] }
 0x50c   :  { %v14788_v50 = vadd.f32 %v6235_v2, %v6059_v48  ;;  %6327 = vadd.xlane.f32.xlu1 %v6309_v0  ;;  %6325 = vadd.xlane.f32.xlu0 %v6308_v46  ;;  %v6077_v18 = vadd.f32 %v10682_v39, %v5852_v54  ;;  %v6310_v2 = vmul.f32 %v14757_v44, %v14777_v27  ;;  %v16861_v48 = vld [vmem:[#allocation47_spill] sm:$0xff]  ;;  %v16866_v14 = vld [vmem:[#allocation65_spill] sm:$0xff] }
 0x50d   :  { %v6070_v12 = vpop.f32.mrf.mxu0  ;;  %v6271_v57 = vpop.f32.mrf.mxu1  ;;  %v6312_v8 = vmul.f32 %v14757_v44, %v14796_v29  ;;  %v5492_v0 = vadd.f32 %v16861_v48, %v5247_v7 }
 0x50e   :  { %v6071_v45 = vadd.f32 %v6070_v12, %v5844_v40  ;;  %v6311_v36 = vmul.f32 %v14757_v44, %v14788_v50  ;;  %v14817_v42 = vadd.f32 %v14744_v13, %v6077_v18  ;;  %v5876_v13 = vadd.f32 %v16859_v25, %v5672_v49  ;;  %v16862_v40 = vld [vmem:[#allocation53_spill] sm:$0xff] }
 0x50f   :  { %v10685_v63 = vpop.f32.mrf.mxu0  ;;  %v10747_v56 = vpop.f32.mrf.mxu1  ;;  %v5900_v37 = vadd.f32 %v16862_v40, %v5693_v30  ;;  %v5892_v12 = vadd.f32 %v16863_v19, %v5686_v34  ;;  %v5707_v18 = vadd.f32 %v14721_v4, %v5498_v62 }
 0x510   :  { %v14806_v11 = vadd.f32 %v6247_v59, %v6071_v45  ;;  %6329 = vadd.xlane.f32.xlu1 %v6310_v2  ;;  %6331 = vadd.xlane.f32.xlu0 %v6311_v36  ;;  %v6089_v59 = vadd.f32 %v10685_v63, %v5868_v35  ;;  %v6314_v39 = vmul.f32 %v14757_v44, %v14817_v42  ;;  %v16864_v45 = vld [vmem:[#allocation72_spill] sm:$0xff] }
 0x511   :  { %v6082_v24 = vpop.f32.mrf.mxu0  ;;  %v6283_v58 = vpop.f32.mrf.mxu1  ;;  %v5700_v2 = vadd.f32 %v16864_v45, %v5492_v0 }
 0x512   :  { %v6083_v28 = vadd.f32 %v6082_v24, %v5860_v52  ;;  %v6313_v41 = vmul.f32 %v14757_v44, %v14806_v11  ;;  %v14830_v31 = vadd.f32 %v14765_v53, %v6089_v59 }
 0x513   :  { %v10688_v61 = vpop.f32.mrf.mxu0  ;;  %v10750_v21 = vpop.f32.mrf.mxu1 }
 0x514   :  { %v14824_v55 = vadd.f32 %v6259_v17, %v6083_v28  ;;  %6333 = vadd.xlane.f32.xlu1 %v6312_v8  ;;  %6335 = vadd.xlane.f32.xlu0 %v6313_v41  ;;  %v6101_v46 = vadd.f32 %v10688_v61, %v5884_v16  ;;  %v6316_v63 = vmul.f32 %v14757_v44, %v14830_v31 }
 0x515   :  { %v6094_v1 = vpop.f32.mrf.mxu0  ;;  %v6295_v59 = vpop.f32.mrf.mxu1 }
 0x516   :  { %v6095_v54 = vadd.f32 %v6094_v1, %v5876_v13  ;;  %v6315_v17 = vmul.f32 %v14757_v44, %v14824_v55  ;;  %v14842_v53 = vadd.f32 %v10744_v6, %v6101_v46  ;;  %v5908_v6 = vadd.f32 %v16866_v14, %v5700_v2 }
 0x517   :  { %v10691_v26 = vpop.f32.mrf.mxu0 }
 0x518   :  { %v14840_v36 = vadd.f32 %v6271_v57, %v6095_v54  ;;  %6337 = vadd.xlane.f32.xlu1 %v6314_v39  ;;  %6339 = vadd.xlane.f32.xlu0 %v6315_v17  ;;  %v6113_v15 = vadd.f32 %v10691_v26, %v5900_v37  ;;  %v5916_v57 = vadd.f32 %v16865_v43, %v5707_v18  ;;  %v6590_v54 = vld [vmem:[#allocation9 + $0x78] sm:$0xff] }
 0x519   :  { %v6106_v60 = vpop.f32.mrf.mxu0  ;;  %v6318_v7 = vmul.f32 %v14757_v44, %v14842_v53  ;;  %v14883_v40 = vand.u32 4294901760, %v6590_v54 }
 0x51a   :  { %v6107_v35 = vadd.f32 %v6106_v60, %v5892_v12  ;;  %v6317_v49 = vmul.f32 %v14757_v44, %v14840_v36  ;;  %v14854_v47 = vadd.f32 %v10747_v56, %v6113_v15 }
 0x51b   :  { %v10694_v52 = vpop.f32.mrf.mxu0  ;;  %v14892_v45 = vsub.f32 %v6590_v54, %v14883_v40  ;;  %10751 = vmatprep.subr.mxu0 %v14883_v40 }
 0x51c   :  { %v14848_v4 = vadd.f32 %v6283_v58, %v6107_v35  ;;  %6341 = vadd.xlane.f32.xlu1 %v6316_v63  ;;  %6343 = vadd.xlane.f32.xlu0 %v6317_v49  ;;  %v6125_v22 = vadd.f32 %v10694_v52, %v5916_v57  ;;  %v6320_v9 = vmul.f32 %v14757_v44, %v14854_v47  ;;  %v6588_v35 = vld [vmem:[#allocation9 + $0x68] sm:$0xff] }
 0x51d   :  { %v6118_v23 = vpop.f32.mrf.mxu0  ;;  %v14902_v63 = vand.u32 4294901760, %v14892_v45  ;;  %10752 = vmatpush3.msra.mxu0 %v14883_v40 }
 0x51e   :  { %v6119_v24 = vadd.f32 %v6118_v23, %v5908_v6  ;;  %v6319_v8 = vmul.f32 %v14757_v44, %v14848_v4  ;;  %v14860_v41 = vadd.f32 %v10750_v21, %v6125_v22  ;;  %v14907_v21 = vand.u32 4294901760, %v6588_v35  ;;  %v6587_v6 = vld [vmem:[#allocation9 + $0x60] sm:$0xff] }
 0x51f   :  { %16867 = vst [vmem:[#allocation69_spill] sm:$0xff] %v14902_v63  ;;  %v6843_v22 = vsub.f32 %v14892_v45, %v14902_v63 }
 0x520   :  { %v14858_v28 = vadd.f32 %v6295_v59, %v6119_v24  ;;  %6345 = vadd.xlane.f32.xlu1 %v6318_v7  ;;  %6347 = vadd.xlane.f32.xlu0 %v6319_v8  ;;  %v6322_v20 = vmul.f32 %v14757_v44, %v14860_v41  ;;  %v14923_v8 = vsub.f32 %v6588_v35, %v14907_v21 }
 0x522   :  { %v6321_v30 = vmul.f32 %v14757_v44, %v14858_v28 }
 0x524   :  { %6349 = vadd.xlane.f32.xlu1 %v6320_v9  ;;  %6351 = vadd.xlane.f32.xlu0 %v6321_v30 }
 0x528   :  { %6353 = vadd.xlane.f32.xlu1 %v6322_v20  ;;  %v6586_v20 = vld [vmem:[#allocation9 + $0x58] sm:$0xff] }
 0x591   :  { %v6324_v34 = vpop.xlane.xlu0 %6323 }
 0x592   :  { %v6355_v56 = vmul.f32 0.015625, %v6324_v34  ;;  %v6844_v34 = vand.u32 4294901760, %v6843_v22 }
 0x594   :  { %v14869_v51 = vsub.f32 %v14748_v10, %v6355_v56  ;;  %10807 = vmatprep.subr.mxu1 %v6844_v34 }
 0x595   :  { %v6328_v16 = vpop.xlane.xlu1 %6327  ;;  %v6326_v61 = vpop.xlane.xlu0 %6325  ;;  %10808 = vmatpush3.msra.mxu1 %v6844_v34 }
 0x596   :  { %v6357_v25 = vmul.f32 0.015625, %v6328_v16  ;;  %v6356_v13 = vmul.f32 0.015625, %v6326_v61  ;;  %v6387_v38 = vmul.f32 %v14757_v44, %v14869_v51  ;;  %v14935_v16 = vand.u32 4294901760, %v14923_v8 }
 0x598   :  { %v14874_v62 = vsub.f32 %v14770_v3, %v6357_v25  ;;  %v14877_v48 = vsub.f32 %v14759_v5, %v6356_v13  ;;  %v6403_v0 = vmul.f32 %v6387_v38, %v6387_v38  ;;  %v6589_v3 = vld [vmem:[#allocation9 + $0x70] sm:$0xff]  ;;  %16869 = vst [vmem:[#allocation71_spill] sm:$0xff] %v14935_v16 }
 0x599   :  { %v6330_v46 = vpop.xlane.xlu1 %6329  ;;  %v6332_v1 = vpop.xlane.xlu0 %6331  ;;  %v14894_v2 = vand.u32 4294901760, %v6589_v3 }
 0x59a   :  { %v6358_v39 = vmul.f32 0.015625, %v6330_v46  ;;  %v6359_v10 = vmul.f32 0.015625, %v6332_v1  ;;  %6419 = vadd.xlane.f32.xlu0 %v6403_v0  ;;  %v6388_v17 = vmul.f32 %v14757_v44, %v14877_v48  ;;  %v6389_v58 = vmul.f32 %v14757_v44, %v14874_v62  ;;  %v6585_v46 = vld [vmem:[#allocation9 + $0x50] sm:$0xff] }
 0x59b   :  { %v14905_v49 = vsub.f32 %v6589_v3, %v14894_v2  ;;  %10753 = vmatprep.subr.mxu0 %v14894_v2 }
 0x59c   :  { %v14886_v37 = vsub.f32 %v14777_v27, %v6358_v39  ;;  %v14889_v5 = vsub.f32 %v14788_v50, %v6359_v10  ;;  %v6404_v26 = vmul.f32 %v6388_v17, %v6388_v17  ;;  %v6405_v19 = vmul.f32 %v6389_v58, %v6389_v58  ;;  %10754 = vmatpush3.msra.mxu0 %v14894_v2 }
 0x59d   :  { %v6334_v12 = vpop.xlane.xlu1 %6333  ;;  %v6336_v18 = vpop.xlane.xlu0 %6335  ;;  %v14920_v24 = vand.u32 4294901760, %v14905_v49  ;;  %10755 = vmatprep.subr.mxu0 %v14907_v21  ;;  %v6857_v10 = vsub.f32 %v14923_v8, %v14935_v16 }
 0x59e   :  { %v6360_v60 = vmul.f32 0.015625, %v6334_v12  ;;  %v6361_v15 = vmul.f32 0.015625, %v6336_v18  ;;  %6421 = vadd.xlane.f32.xlu1 %v6404_v26  ;;  %6423 = vadd.xlane.f32.xlu0 %v6405_v19  ;;  %v6390_v27 = vmul.f32 %v14757_v44, %v14886_v37  ;;  %v6391_v50 = vmul.f32 %v14757_v44, %v14889_v5  ;;  %v6584_v19 = vld [vmem:[#allocation9 + $0x48] sm:$0xff] }
 0x59f   :  { %16868 = vst [vmem:[#allocation30_spill] sm:$0xff] %v14920_v24  ;;  %v6850_v56 = vsub.f32 %v14905_v49, %v14920_v24  ;;  %10756 = vmatpush3.msra.mxu0 %v14907_v21  ;;  %v6858_v12 = vand.u32 4294901760, %v6857_v10 }
 0x5a0   :  { %v14911_v52 = vsub.f32 %v14796_v29, %v6360_v60  ;;  %v14914_v43 = vsub.f32 %v14806_v11, %v6361_v15  ;;  %v6406_v57 = vmul.f32 %v6390_v27, %v6390_v27  ;;  %v6407_v14 = vmul.f32 %v6391_v50, %v6391_v50 }
 0x5a1   :  { %v6338_v23 = vpop.xlane.xlu1 %6337  ;;  %v6340_v7 = vpop.xlane.xlu0 %6339  ;;  %v14925_v29 = vand.u32 4294901760, %v6587_v6  ;;  %v6851_v39 = vand.u32 4294901760, %v6850_v56  ;;  %v14965_v15 = vand.u32 4294901760, %v6585_v46 }
 0x5a2   :  { %v6362_v11 = vmul.f32 0.015625, %v6338_v23  ;;  %v6363_v59 = vmul.f32 0.015625, %v6340_v7  ;;  %6425 = vadd.xlane.f32.xlu1 %v6406_v57  ;;  %6427 = vadd.xlane.f32.xlu0 %v6407_v14  ;;  %v6392_v9 = vmul.f32 %v14757_v44, %v14911_v52  ;;  %v6393_v30 = vmul.f32 %v14757_v44, %v14914_v43  ;;  %v6583_v14 = vld [vmem:[#allocation9 + $0x40] sm:$0xff] }
 0x5a3   :  { %v14938_v61 = vsub.f32 %v6587_v6, %v14925_v29  ;;  %10757 = vmatprep.subr.mxu0 %v14925_v29  ;;  %10809 = vmatprep.subr.mxu1 %v6851_v39 }
 0x5a4   :  { %v14942_v25 = vsub.f32 %v14817_v42, %v6362_v11  ;;  %v14945_v13 = vsub.f32 %v14824_v55, %v6363_v59  ;;  %v6408_v38 = vmul.f32 %v6392_v9, %v6392_v9  ;;  %v6409_v0 = vmul.f32 %v6393_v30, %v6393_v30  ;;  %10758 = vmatpush3.msra.mxu0 %v14925_v29 }
 0x5a5   :  { %v6342_v1 = vpop.xlane.xlu1 %6341  ;;  %v6344_v54 = vpop.xlane.xlu0 %6343  ;;  %v14951_v17 = vand.u32 4294901760, %v14938_v61  ;;  %v14953_v42 = vand.u32 4294901760, %v6586_v20  ;;  %10810 = vmatpush3.msra.mxu1 %v6851_v39  ;;  %v14978_v11 = vsub.f32 %v6585_v46, %v14965_v15  ;;  %v14980_v59 = vand.u32 4294901760, %v6584_v19  ;;  %v6582_v39 = vld [vmem:[#allocation9 + $0x38] sm:$0xff] }
 0x5a6   :  { %v6364_v55 = vmul.f32 0.015625, %v6342_v1  ;;  %v6365_v58 = vmul.f32 0.015625, %v6344_v54  ;;  %6429 = vadd.xlane.f32.xlu1 %v6408_v38  ;;  %6431 = vadd.xlane.f32.xlu0 %v6409_v0  ;;  %v6394_v3 = vmul.f32 %v14757_v44, %v14942_v25  ;;  %v6395_v26 = vmul.f32 %v14757_v44, %v14945_v13 }
 0x5a7   :  { %16870 = vst [vmem:[#allocation29_spill] sm:$0xff] %v14951_v17  ;;  %v6864_v18 = vsub.f32 %v14938_v61, %v14951_v17  ;;  %v14963_v60 = vsub.f32 %v6586_v20, %v14953_v42  ;;  %10759 = vmatprep.subr.mxu0 %v14953_v42  ;;  %10811 = vmatprep.subr.mxu1 %v6858_v12  ;;  %v14990_v34 = vand.u32 4294901760, %v14978_v11  ;;  %v14995_v38 = vand.u32 4294901760, %v6583_v14 }
 0x5a8   :  { %v14969_v27 = vsub.f32 %v14830_v31, %v6364_v55  ;;  %v14972_v50 = vsub.f32 %v14840_v36, %v6365_v58  ;;  %v6410_v35 = vmul.f32 %v6394_v3, %v6394_v3  ;;  %v6411_v57 = vmul.f32 %v6395_v26, %v6395_v26  ;;  %10760 = vmatpush3.msra.mxu0 %v14953_v42 }
 0x5a9   :  { %v6346_v6 = vpop.xlane.xlu1 %6345  ;;  %v6348_v23 = vpop.xlane.xlu0 %6347  ;;  %v6865_v7 = vand.u32 4294901760, %v6864_v18  ;;  %v14975_v22 = vand.u32 4294901760, %v14963_v60  ;;  %16872 = vst [vmem:[#allocation21_spill] sm:$0xff] %v14990_v34  ;;  %v14993_v56 = vsub.f32 %v6584_v19, %v14980_v59  ;;  %10812 = vmatpush3.msra.mxu1 %v6858_v12  ;;  %v6878_v3 = vsub.f32 %v14978_v11, %v14990_v34  ;;  %10761 = vmatprep.subr.mxu0 %v14965_v15 }
 0x5aa   :  { %v6366_v31 = vmul.f32 0.015625, %v6346_v6  ;;  %v6367_v36 = vmul.f32 0.015625, %v6348_v23  ;;  %6433 = vadd.xlane.f32.xlu1 %v6410_v35  ;;  %6435 = vadd.xlane.f32.xlu0 %v6411_v57  ;;  %v6396_v9 = vmul.f32 %v14757_v44, %v14969_v27  ;;  %v6397_v30 = vmul.f32 %v14757_v44, %v14972_v50  ;;  %v6581_v35 = vld [vmem:[#allocation9 + $0x30] sm:$0xff] }
 0x5ab   :  { %16871 = vst [vmem:[#allocation43_spill] sm:$0xff] %v14975_v22  ;;  %v6871_v20 = vsub.f32 %v14963_v60, %v14975_v22  ;;  %10813 = vmatprep.subr.mxu1 %v6865_v7  ;;  %v15007_v26 = vand.u32 4294901760, %v14993_v56  ;;  %v6879_v57 = vand.u32 4294901760, %v6878_v3  ;;  %v15022_v23 = vand.u32 4294901760, %v6582_v39  ;;  %10762 = vmatpush3.msra.mxu0 %v14965_v15 }
 0x5ac   :  { %v14999_v0 = vsub.f32 %v14842_v53, %v6366_v31  ;;  %v15002_v46 = vsub.f32 %v14848_v4, %v6367_v36  ;;  %v6412_v1 = vmul.f32 %v6396_v9, %v6396_v9  ;;  %v6413_v54 = vmul.f32 %v6397_v30, %v6397_v30  ;;  %10814 = vmatpush3.msra.mxu1 %v6865_v7  ;;  %v6580_v31 = vld [vmem:[#allocation9 + $0x28] sm:$0xff] }
 0x5ad   :  { %v6350_v10 = vpop.xlane.xlu1 %6349  ;;  %v6352_v55 = vpop.xlane.xlu0 %6351  ;;  %v6872_v58 = vand.u32 4294901760, %v6871_v20  ;;  %16873 = vst [vmem:[#allocation25_spill] sm:$0xff] %v15007_v26  ;;  %v15010_v53 = vsub.f32 %v6583_v14, %v14995_v38  ;;  %v6885_v6 = vsub.f32 %v14993_v56, %v15007_v26  ;;  %v6579_v20 = vld [vmem:[#allocation9 + $0x20] sm:$0xff]  ;;  %v15036_v3 = vand.u32 4294901760, %v6581_v35  ;;  %10763 = vmatprep.subr.mxu0 %v14980_v59 }
 0x5ae   :  { %v6368_v4 = vmul.f32 0.015625, %v6350_v10  ;;  %v6369_v19 = vmul.f32 0.015625, %v6352_v55  ;;  %6437 = vadd.xlane.f32.xlu1 %v6412_v1  ;;  %6439 = vadd.xlane.f32.xlu0 %v6413_v54  ;;  %v6398_v12 = vmul.f32 %v14757_v44, %v14999_v0  ;;  %v6399_v18 = vmul.f32 %v14757_v44, %v15002_v46 }
 0x5af   :  { %v15020_v14 = vand.u32 4294901760, %v15010_v53  ;;  %10815 = vmatprep.subr.mxu1 %v6872_v58  ;;  %v6886_v54 = vand.u32 4294901760, %v6885_v6  ;;  %v15034_v55 = vsub.f32 %v6582_v39, %v15022_v23  ;;  %10764 = vmatpush3.msra.mxu0 %v14980_v59  ;;  %v15052_v6 = vand.u32 4294901760, %v6579_v20 }
 0x5b0   :  { %v15026_v36 = vsub.f32 %v14854_v47, %v6368_v4  ;;  %v15029_v9 = vsub.f32 %v14858_v28, %v6369_v19  ;;  %v6414_v30 = vmul.f32 %v6398_v12, %v6398_v12  ;;  %v6415_v7 = vmul.f32 %v6399_v18, %v6399_v18  ;;  %10816 = vmatpush3.msra.mxu1 %v6872_v58  ;;  %v6578_v19 = vld [vmem:[#allocation9 + $0x18] sm:$0xff] }
 0x5b1   :  { %16874 = vst [vmem:[#allocation49_spill] sm:$0xff] %v15020_v14  ;;  %v6354_v1 = vpop.xlane.xlu1 %6353  ;;  %v6892_v10 = vsub.f32 %v15010_v53, %v15020_v14  ;;  %v15043_v4 = vand.u32 4294901760, %v6580_v31  ;;  %10817 = vmatprep.subr.mxu1 %v6879_v57  ;;  %v15046_v39 = vand.u32 4294901760, %v15034_v55  ;;  %v15049_v18 = vsub.f32 %v6581_v35, %v15036_v3  ;;  %10765 = vmatprep.subr.mxu0 %v14995_v38 }
 0x5b2   :  { %v6370_v47 = vmul.f32 0.015625, %v6354_v1  ;;  %6441 = vadd.xlane.f32.xlu1 %v6414_v30  ;;  %6443 = vadd.xlane.f32.xlu0 %v6415_v7  ;;  %v6400_v28 = vmul.f32 %v14757_v44, %v15026_v36  ;;  %v6401_v58 = vmul.f32 %v14757_v44, %v15029_v9  ;;  %v15067_v14 = vsub.f32 %v6579_v20, %v15052_v6 }
 0x5b3   :  { %v6893_v12 = vand.u32 4294901760, %v6892_v10  ;;  %16875 = vst [vmem:[#allocation59_spill] sm:$0xff] %v15046_v39  ;;  %10818 = vmatpush3.msra.mxu1 %v6879_v57  ;;  %v15058_v33 = vsub.f32 %v6580_v31, %v15043_v4  ;;  %v6577_v10 = vld [vmem:[#allocation9 + $0x10] sm:$0xff]  ;;  %v6899_v32 = vsub.f32 %v15034_v55, %v15046_v39  ;;  %v15063_v35 = vand.u32 4294901760, %v15049_v18  ;;  %10766 = vmatpush3.msra.mxu0 %v14995_v38 }
 0x5b4   :  { %v15055_v30 = vsub.f32 %v14860_v41, %v6370_v47  ;;  %v6416_v7 = vmul.f32 %v6400_v28, %v6400_v28  ;;  %v6417_v1 = vmul.f32 %v6401_v58, %v6401_v58  ;;  %10819 = vmatprep.subr.mxu1 %v6886_v54  ;;  %v15069_v41 = vand.u32 4294901760, %v6578_v19  ;;  %v6576_v28 = vld [vmem:[#allocation9 + $0x8] sm:$0xff]  ;;  %10767 = vmatprep.subr.mxu0 %v15022_v23 }
 0x5b5   :  { %16876 = vst [vmem:[#allocation70_spill] sm:$0xff] %v15063_v35  ;;  %v15074_v31 = vand.u32 4294901760, %v15058_v33  ;;  %v15076_v47 = vand.u32 4294901760, %v6577_v10  ;;  %10820 = vmatpush3.msra.mxu1 %v6886_v54  ;;  %v6900_v58 = vand.u32 4294901760, %v6899_v32  ;;  %v6906_v39 = vsub.f32 %v15049_v18, %v15063_v35  ;;  %v6575_v35 = vld [vmem:[#allocation9] sm:$0xff]  ;;  %10768 = vmatpush3.msra.mxu0 %v15022_v23 }
 0x5b6   :  { %6445 = vadd.xlane.f32.xlu1 %v6416_v7  ;;  %6447 = vadd.xlane.f32.xlu0 %v6417_v1  ;;  %v6402_v57 = vmul.f32 %v14757_v44, %v15055_v30  ;;  %v15081_v20 = vand.u32 4294901760, %v15067_v14  ;;  %v15085_v7 = vsub.f32 %v6578_v19, %v15069_v41  ;;  %v15093_v54 = vand.u32 4294901760, %v6576_v28 }
 0x5b7   :  { %16877 = vst [vmem:[#allocation17_spill] sm:$0xff] %v15074_v31  ;;  %10821 = vmatprep.subr.mxu1 %v6893_v12  ;;  %v6913_v1 = vsub.f32 %v15058_v33, %v15074_v31  ;;  %v15091_v32 = vsub.f32 %v6577_v10, %v15076_v47  ;;  %v6907_v26 = vand.u32 4294901760, %v6906_v39  ;;  %10769 = vmatprep.subr.mxu0 %v15036_v3 }
 0x5b8   :  { %16878 = vst [vmem:[#allocation55_spill] sm:$0xff] %v15081_v20  ;;  %16879 = vst [vmem:[#allocation61_spill] sm:$0xff] %v15085_v7  ;;  %v6418_v44 = vmul.f32 %v6402_v57, %v6402_v57  ;;  %10822 = vmatpush3.msra.mxu1 %v6893_v12  ;;  %v6920_v34 = vsub.f32 %v15067_v14, %v15081_v20  ;;  %v15098_v19 = vand.u32 4294901760, %v15085_v7  ;;  %v15101_v57 = vand.u32 4294901760, %v6575_v35 }
 0x5b9   :  { %16880 = vst [vmem:[#allocation27_spill] sm:$0xff] %v15091_v32  ;;  %10823 = vmatprep.subr.mxu1 %v6900_v58  ;;  %v6914_v31 = vand.u32 4294901760, %v6913_v1  ;;  %v15104_v10 = vand.u32 4294901760, %v15091_v32  ;;  %v15107_v22 = vsub.f32 %v6576_v28, %v15093_v54  ;;  %10770 = vmatpush3.msra.mxu0 %v15036_v3 }
 0x5ba   :  { %16881 = vst [vmem:[#allocation46_spill] sm:$0xff] %v15098_v19  ;;  %16882 = vst [vmem:[#allocation20_spill] sm:$0xff] %v15101_v57  ;;  %6449 = vadd.xlane.f32.xlu1 %v6418_v44  ;;  %10824 = vmatpush3.msra.mxu1 %v6900_v58  ;;  %v6927_v12 = vsub.f32 %v15085_v7, %v15098_v19  ;;  %v15113_v39 = vsub.f32 %v6575_v35, %v15101_v57  ;;  %v6921_v20 = vand.u32 4294901760, %v6920_v34 }
 0x5bb   :  { %16883 = vst [vmem:[#allocation51_spill] sm:$0xff] %v15104_v10  ;;  %16884 = vst [vmem:[#allocation45_spill] sm:$0xff] %v15107_v22  ;;  %10825 = vmatprep.subr.mxu1 %v6907_v26  ;;  %v6934_v44 = vsub.f32 %v15091_v32, %v15104_v10  ;;  %v15119_v1 = vand.u32 4294901760, %v15107_v22  ;;  %10771 = vmatprep.subr.mxu0 %v15043_v4 }
 0x5bc   :  { %16885 = vst [vmem:[#allocation23_spill] sm:$0xff] %v15113_v39  ;;  %10826 = vmatpush3.msra.mxu1 %v6907_v26  ;;  %v15123_v28 = vand.u32 4294901760, %v15113_v39  ;;  %v6928_v58 = vand.u32 4294901760, %v6927_v12  ;;  %10772 = vmatpush3.msra.mxu0 %v15043_v4 }
 0x5bd   :  { %16886 = vst [vmem:[#allocation19_spill] sm:$0xff] %v15119_v1  ;;  %10827 = vmatprep.subr.mxu1 %v6914_v31  ;;  %v6941_v35 = vsub.f32 %v15107_v22, %v15119_v1  ;;  %10773 = vmatprep.subr.mxu0 %v15052_v6  ;;  %v6935_v34 = vand.u32 4294901760, %v6934_v44 }
 0x5be   :  { %16887 = vst [vmem:[#allocation24_spill] sm:$0xff] %v15123_v28  ;;  %10828 = vmatpush3.msra.mxu1 %v6914_v31  ;;  %v6948_v26 = vsub.f32 %v15113_v39, %v15123_v28  ;;  %10774 = vmatpush3.msra.mxu0 %v15052_v6 }
 0x5bf   :  { %10829 = vmatprep.subr.mxu1 %v6921_v20  ;;  %10775 = vmatprep.subr.mxu0 %v15069_v41  ;;  %v6942_v12 = vand.u32 4294901760, %v6941_v35 }
 0x5c0   :  { %10830 = vmatpush3.msra.mxu1 %v6921_v20  ;;  %10776 = vmatpush3.msra.mxu0 %v15069_v41  ;;  %v6949_v31 = vand.u32 4294901760, %v6948_v26 }
 0x5c1   :  { %10831 = vmatprep.subr.mxu1 %v6928_v58  ;;  %10777 = vmatprep.subr.mxu0 %v15076_v47 }
 0x5c2   :  { %10832 = vmatpush3.msra.mxu1 %v6928_v58  ;;  %10778 = vmatpush3.msra.mxu0 %v15076_v47 }
 0x5c3   :  { %10833 = vmatprep.subr.mxu1 %v6935_v34  ;;  %10779 = vmatprep.subr.mxu0 %v15093_v54 }
 0x5c4   :  { %10834 = vmatpush3.msra.mxu1 %v6935_v34  ;;  %10780 = vmatpush3.msra.mxu0 %v15093_v54 }
 0x5c5   :  { %10835 = vmatprep.subr.mxu1 %v6942_v12  ;;  %10781 = vmatprep.subr.mxu0 %v15101_v57 }
 0x5c6   :  { %10836 = vmatpush3.msra.mxu1 %v6942_v12  ;;  %10782 = vmatpush3.msra.mxu0 %v15101_v57 }
 0x5c7   :  { %10837 = vmatprep.subr.mxu1 %v6949_v31  ;;  %10863 = vmatprep.subr.mxu0 %v14892_v45 }
 0x5c8   :  { %10838 = vmatpush3.msra.mxu1 %v6949_v31 }
 0x5c9   :  { %10919 = vmatprep.subr.mxu1 %v14883_v40 }
 0x623   :  { %v6420_v20 = vpop.xlane.xlu0 %6419 }
 0x624   :  { %v6451_v44 = vmul.f32 0.015625, %v6420_v20 }
 0x626   :  { %v6467_v58 = vadd.f32 1e-05, %v6451_v44 }
 0x627   :  { %v6422_v35 = vpop.xlane.xlu1 %6421  ;;  %v6424_v34 = vpop.xlane.xlu0 %6423 }
 0x628   :  { %11143 = vrsqrt.f32 %v6467_v58  ;;  %v6452_v26 = vmul.f32 0.015625, %v6422_v35  ;;  %v6453_v28 = vmul.f32 0.015625, %v6424_v34 }
 0x62a   :  { %v6468_v1 = vadd.f32 1e-05, %v6452_v26  ;;  %v6469_v12 = vadd.f32 1e-05, %v6453_v28 }
 0x62b   :  { %v6426_v10 = vpop.xlane.xlu1 %6425  ;;  %v6428_v19 = vpop.xlane.xlu0 %6427 }
 0x62c   :  { %11145 = vrsqrt.f32 %v6468_v1  ;;  %v6454_v17 = vmul.f32 0.015625, %v6426_v10  ;;  %v6455_v16 = vmul.f32 0.015625, %v6428_v19  ;;  %v15145_v19 = vld [vmem:[%s16053_s10] ss:$0 sm:$0xff] }
 0x62d   :  { %11147 = vrsqrt.f32 %v6469_v12 }
 0x62e   :  { %v6470_v31 = vadd.f32 1e-05, %v6454_v17  ;;  %v6471_v24 = vadd.f32 1e-05, %v6455_v16 }
 0x62f   :  { %v6430_v63 = vpop.xlane.xlu1 %6429  ;;  %v6432_v39 = vpop.xlane.xlu0 %6431 }
 0x630   :  { %11149 = vrsqrt.f32 %v6470_v31  ;;  %v6456_v20 = vmul.f32 0.015625, %v6430_v63  ;;  %v6457_v44 = vmul.f32 0.015625, %v6432_v39  ;;  %v15151_v63 = vld [vmem:[%s16054_s11] ss:$0 sm:$0xff] }
 0x631   :  { %11151 = vrsqrt.f32 %v6471_v24 }
 0x632   :  { %v6472_v22 = vadd.f32 1e-05, %v6456_v20  ;;  %v6473_v58 = vadd.f32 1e-05, %v6457_v44 }
 0x633   :  { %v6434_v35 = vpop.xlane.xlu1 %6433  ;;  %v6436_v34 = vpop.xlane.xlu0 %6435 }
 0x634   :  { %11153 = vrsqrt.f32 %v6472_v22  ;;  %v6458_v28 = vmul.f32 0.015625, %v6434_v35  ;;  %v6459_v26 = vmul.f32 0.015625, %v6436_v34 }
 0x635   :  { %v11144_v32 = vpop.eup %11143  ;;  %11155 = vrsqrt.f32 %v6473_v58 }
 0x636   :  { %v6474_v16 = vadd.f32 1e-05, %v6458_v28  ;;  %v6475_v17 = vadd.f32 1e-05, %v6459_v26  ;;  %v6499_v10 = vmul.f32 %v11144_v32, %v14869_v51 }
 0x637   :  { %v6438_v24 = vpop.xlane.xlu1 %6437  ;;  %v6440_v22 = vpop.xlane.xlu0 %6439 }
 0x638   :  { %v6460_v39 = vmul.f32 0.015625, %v6438_v24  ;;  %v6461_v1 = vmul.f32 0.015625, %v6440_v22  ;;  %v6521_v12 = vmul.f32 %v15145_v19, %v6499_v10  ;;  %11157 = vrsqrt.f32 %v6474_v16 }
 0x639   :  { %v11146_v31 = vpop.eup %11145  ;;  %11159 = vrsqrt.f32 %v6475_v17 }
 0x63a   :  { %v11148_v20 = vpop.eup %11147  ;;  %v6500_v44 = vmul.f32 %v11146_v31, %v14877_v48  ;;  %v6476_v35 = vadd.f32 1e-05, %v6460_v39  ;;  %v6543_v51 = vadd.f32 %v15151_v63, %v6521_v12  ;;  %v6477_v32 = vadd.f32 1e-05, %v6461_v1 }
 0x63b   :  { %v6442_v34 = vpop.xlane.xlu1 %6441  ;;  %v6444_v28 = vpop.xlane.xlu0 %6443  ;;  %v6501_v58 = vmul.f32 %v11148_v20, %v14874_v62 }
 0x63c   :  { %v6522_v26 = vmul.f32 %v15145_v19, %v6500_v44  ;;  %11161 = vrsqrt.f32 %v6476_v35  ;;  %v6462_v24 = vmul.f32 0.015625, %v6442_v34  ;;  %v6463_v22 = vmul.f32 0.015625, %v6444_v28 }
 0x63d   :  { %v11150_v10 = vpop.eup %11149  ;;  %v6559_v7 = vmax.f32 %v6543_v51, 0.0  ;;  %v6523_v16 = vmul.f32 %v15145_v19, %v6501_v58  ;;  %11163 = vrsqrt.f32 %v6477_v32 }
 0x63e   :  { %v11152_v57 = vpop.eup %11151  ;;  %v6544_v48 = vadd.f32 %v15151_v63, %v6522_v26  ;;  %v6478_v17 = vadd.f32 1e-05, %v6462_v24  ;;  %v6479_v39 = vadd.f32 1e-05, %v6463_v22  ;;  %v6502_v1 = vmul.f32 %v11150_v10, %v14886_v37 }
 0x63f   :  { %v6446_v12 = vpop.xlane.xlu1 %6445  ;;  %v6448_v31 = vpop.xlane.xlu0 %6447  ;;  %v15161_v62 = vand.u32 4294901760, %v6559_v7  ;;  %v6545_v20 = vadd.f32 %v15151_v63, %v6523_v16  ;;  %v6503_v44 = vmul.f32 %v11152_v57, %v14889_v5 }
 0x640   :  { %11165 = vrsqrt.f32 %v6478_v17  ;;  %v6464_v35 = vmul.f32 0.015625, %v6446_v12  ;;  %v6465_v51 = vmul.f32 0.015625, %v6448_v31  ;;  %v6560_v34 = vmax.f32 %v6544_v48, 0.0 }
 0x641   :  { %v11154_v28 = vpop.eup %11153  ;;  %11167 = vrsqrt.f32 %v6479_v39  ;;  %10839 = vmatprep.mubr.f32.mxu1 %v15161_v62  ;;  %v6561_v58 = vmax.f32 %v6545_v20, 0.0  ;;  %v15167_v37 = vsub.f32 %v6559_v7, %v15161_v62  ;;  %v6524_v32 = vmul.f32 %v15145_v19, %v6502_v1 }
 0x642   :  { %v6480_v26 = vadd.f32 1e-05, %v6464_v35  ;;  %v6481_v24 = vadd.f32 1e-05, %v6465_v51  ;;  %v15170_v22 = vand.u32 4294901760, %v6560_v34  ;;  %v6525_v5 = vmul.f32 %v15145_v19, %v6503_v44  ;;  %v11156_v39 = vpop.eup %11155 }
 0x643   :  { %v6450_v57 = vpop.xlane.xlu1 %6449  ;;  %v15173_v10 = vand.u32 4294901760, %v6561_v58  ;;  %v16324_v16 = vand.u32 4294901760, %v15167_v37  ;;  %v6546_v48 = vadd.f32 %v15151_v63, %v6524_v32  ;;  %v6504_v17 = vmul.f32 %v11154_v28, %v14911_v52 }
 0x644   :  { %11169 = vrsqrt.f32 %v6480_v26  ;;  %v6466_v7 = vmul.f32 0.015625, %v6450_v57  ;;  %v15179_v1 = vsub.f32 %v6560_v34, %v15170_v22  ;;  %10840 = vmatmul.mubr.f32.vlgmr.msra.gmra.mxu1 %v15170_v22  ;;  %v6547_v12 = vadd.f32 %v15151_v63, %v6525_v5 }
 0x645   :  { %11171 = vrsqrt.f32 %v6481_v24  ;;  %10842 = vmatprep.mubr.f32.mxu1 %v15173_v10  ;;  %10920 = vmatpush3.msra.mxu1 %v14883_v40  ;;  %v6682_v31 = vsub.f32 %v15167_v37, %v16324_v16  ;;  %v6562_v52 = vmax.f32 %v6546_v48, 0.0  ;;  %v6526_v20 = vmul.f32 %v15145_v19, %v6504_v17  ;;  %v11158_v44 = vpop.eup %11157 }
 0x646   :  { %v6482_v35 = vadd.f32 1e-05, %v6466_v7  ;;  %10921 = vmatprep.subr.mxu1 %v14894_v2  ;;  %v6563_v51 = vmax.f32 %v6547_v12, 0.0  ;;  %v16323_v34 = vand.u32 4294901760, %v15179_v1  ;;  %v15192_v28 = vsub.f32 %v6561_v58, %v15173_v10  ;;  %v11160_v32 = vpop.eup %11159 }
 0x647   :  { %10922 = vmatpush3.msra.mxu1 %v14894_v2  ;;  %v6683_v26 = vand.u32 4294901760, %v6682_v31  ;;  %v15195_v24 = vand.u32 4294901760, %v6562_v52  ;;  %v6548_v5 = vadd.f32 %v15151_v63, %v6526_v20  ;;  %v6505_v57 = vmul.f32 %v11156_v39, %v14914_v43 }
 0x648   :  { %11173 = vrsqrt.f32 %v6482_v35  ;;  %10923 = vmatprep.subr.mxu1 %v14907_v21  ;;  %v15200_v48 = vand.u32 4294901760, %v6563_v51  ;;  %v6692_v58 = vsub.f32 %v15179_v1, %v16323_v34  ;;  %v16322_v17 = vand.u32 4294901760, %v15192_v28 }
 0x649   :  { %v11162_v7 = vpop.eup %11161  ;;  %10783 = vmatprep.mubr.f32.mxu0 %v6683_v26  ;;  %v15207_v12 = vsub.f32 %v6562_v52, %v15195_v24  ;;  %10843 = vmatmul.mubr.f32.gmra.mxu1 %v15195_v24  ;;  %v6564_v31 = vmax.f32 %v6548_v5, 0.0  ;;  %v6527_v43 = vmul.f32 %v15145_v19, %v6505_v57  ;;  %v6506_v39 = vmul.f32 %v11158_v44, %v14942_v25 }
 0x64a   :  { %16888 = vst [vmem:[#allocation32_spill] sm:$0xff] %v15200_v48  ;;  %10845 = vmatprep.mubr.f32.mxu1 %v15200_v48  ;;  %10924 = vmatpush3.msra.mxu1 %v14907_v21  ;;  %v6693_v20 = vand.u32 4294901760, %v6692_v58  ;;  %v6702_v35 = vsub.f32 %v15192_v28, %v16322_v17  ;;  %v15218_v26 = vsub.f32 %v6563_v51, %v15200_v48  ;;  %v11164_v58 = vpop.eup %11163 }
 0x64b   :  { %v6507_v52 = vmul.f32 %v11160_v32, %v14945_v13  ;;  %10925 = vmatprep.subr.mxu1 %v14925_v29  ;;  %v15222_v5 = vand.u32 4294901760, %v6564_v31  ;;  %v6549_v25 = vadd.f32 %v15151_v63, %v6527_v43  ;;  %v16326_v44 = vand.u32 4294901760, %v15207_v12 }
 0x64c   :  { %v6528_v57 = vmul.f32 %v15145_v19, %v6506_v39  ;;  %10926 = vmatpush3.msra.mxu1 %v14925_v29  ;;  %10784 = vmatmul.mubr.f32.vlgmr.msra.gmra.mxu0 %v6693_v20  ;;  %v6703_v17 = vand.u32 4294901760, %v6702_v35  ;;  %v16325_v51 = vand.u32 4294901760, %v15218_v26  ;;  %v6508_v13 = vmul.f32 %v11162_v7, %v14969_v27 }
 0x64d   :  { %16889 = vst [vmem:[#allocation48_spill] sm:$0xff] %v15222_v5  ;;  %v6529_v34 = vmul.f32 %v15145_v19, %v6507_v52  ;;  %v11166_v32 = vpop.eup %11165  ;;  %v15232_v16 = vsub.f32 %v6564_v31, %v15222_v5  ;;  %10846 = vmatmul.mubr.f32.gmra.mxu1 %v15222_v5  ;;  %10927 = vmatprep.subr.mxu1 %v14953_v42  ;;  %v6565_v43 = vmax.f32 %v6549_v25, 0.0 }
 0x64e   :  { %v6712_v39 = vsub.f32 %v15207_v12, %v16326_v44  ;;  %v6550_v20 = vadd.f32 %v15151_v63, %v6528_v57  ;;  %v11168_v35 = vpop.eup %11167  ;;  %10786 = vmatprep.mubr.f32.mxu0 %v6703_v17  ;;  %10864 = vmatpush3.msra.mxu0 %v14892_v45  ;;  %v6722_v27 = vsub.f32 %v15218_v26, %v16325_v51 }
 0x64f   :  { %v6551_v7 = vadd.f32 %v15151_v63, %v6529_v34  ;;  %v6530_v31 = vmul.f32 %v15145_v19, %v6508_v13  ;;  %v15246_v52 = vand.u32 4294901760, %v6565_v43  ;;  %10928 = vmatpush3.msra.mxu1 %v14953_v42  ;;  %10865 = vmatprep.subr.mxu0 %v14905_v49  ;;  %v16334_v17 = vand.u32 4294901760, %v15232_v16 }
 0x650   :  { %v6713_v25 = vand.u32 4294901760, %v6712_v39  ;;  %v6566_v57 = vmax.f32 %v6550_v20, 0.0  ;;  %10929 = vmatprep.subr.mxu1 %v14965_v15  ;;  %10866 = vmatpush3.msra.mxu0 %v14905_v49  ;;  %v6723_v45 = vand.u32 4294901760, %v6722_v27  ;;  %v6509_v13 = vmul.f32 %v11164_v58, %v14972_v50 }
 0x651   :  { %v6567_v51 = vmax.f32 %v6551_v7, 0.0  ;;  %v6552_v34 = vadd.f32 %v15151_v63, %v6530_v31  ;;  %v11170_v44 = vpop.eup %11169  ;;  %10848 = vmatprep.mubr.f32.mxu1 %v15246_v52  ;;  %10930 = vmatpush3.msra.mxu1 %v14965_v15  ;;  %v6732_v39 = vsub.f32 %v15232_v16, %v16334_v17  ;;  %v15263_v20 = vsub.f32 %v6565_v43, %v15246_v52 }
 0x652   :  { %v15257_v5 = vand.u32 4294901760, %v6566_v57  ;;  %v6510_v49 = vmul.f32 %v11166_v32, %v14999_v0  ;;  %v11172_v27 = vpop.eup %11171  ;;  %10787 = vmatmul.mubr.f32.gmra.mxu0 %v6713_v25  ;;  %10867 = vmatprep.subr.mxu0 %v14923_v8  ;;  %v6531_v7 = vmul.f32 %v15145_v19, %v6509_v13  ;;  %v6511_v31 = vmul.f32 %v11168_v35, %v15002_v46 }
 0x653   :  { %v15267_v50 = vand.u32 4294901760, %v6567_v51  ;;  %v6568_v58 = vmax.f32 %v6552_v34, 0.0  ;;  %10931 = vmatprep.subr.mxu1 %v14980_v59  ;;  %v6733_v43 = vand.u32 4294901760, %v6732_v39  ;;  %v16331_v0 = vand.u32 4294901760, %v15263_v20  ;;  %10789 = vmatprep.mubr.f32.mxu0 %v6723_v45 }
 0x654   :  { %v15272_v48 = vsub.f32 %v6566_v57, %v15257_v5  ;;  %10849 = vmatmul.mubr.f32.gmra.mxu1 %v15257_v5  ;;  %v6532_v32 = vmul.f32 %v15145_v19, %v6510_v49  ;;  %v6553_v34 = vadd.f32 %v15151_v63, %v6531_v7  ;;  %v6533_v35 = vmul.f32 %v15145_v19, %v6511_v31 }
 0x655   :  { %10851 = vmatprep.mubr.f32.mxu1 %v15267_v50  ;;  %v15279_v25 = vand.u32 4294901760, %v6568_v58  ;;  %v15283_v46 = vsub.f32 %v6567_v51, %v15267_v50  ;;  %v11174_v57 = vpop.eup %11173  ;;  %10868 = vmatpush3.msra.mxu0 %v14923_v8  ;;  %v6742_v45 = vsub.f32 %v15263_v20, %v16331_v0  ;;  %v6512_v49 = vmul.f32 %v11170_v44, %v15026_v36 }
 0x656   :  { %10932 = vmatpush3.msra.mxu1 %v14980_v59  ;;  %v16332_v13 = vand.u32 4294901760, %v15272_v48  ;;  %v6554_v39 = vadd.f32 %v15151_v63, %v6532_v32  ;;  %10869 = vmatprep.subr.mxu0 %v14938_v61  ;;  %v6569_v8 = vmax.f32 %v6553_v34, 0.0  ;;  %v6555_v31 = vadd.f32 %v15151_v63, %v6533_v35 }
 0x657   :  { %10933 = vmatprep.subr.mxu1 %v14995_v38  ;;  %v15297_v51 = vsub.f32 %v6568_v58, %v15279_v25  ;;  %v16333_v7 = vand.u32 4294901760, %v15283_v46  ;;  %10870 = vmatpush3.msra.mxu0 %v14938_v61  ;;  %v6743_v0 = vand.u32 4294901760, %v6742_v45  ;;  %v6534_v32 = vmul.f32 %v15145_v19, %v6512_v49 }
 0x658   :  { %10934 = vmatpush3.msra.mxu1 %v14995_v38  ;;  %v6752_v36 = vsub.f32 %v15272_v48, %v16332_v13  ;;  %v6570_v44 = vmax.f32 %v6554_v39, 0.0  ;;  %10790 = vmatmul.mubr.f32.gmra.mxu0 %v6733_v43  ;;  %v15308_v58 = vand.u32 4294901760, %v6569_v8  ;;  %v6571_v61 = vmax.f32 %v6555_v31, 0.0 }
 0x659   :  { %10852 = vmatmul.mubr.f32.gmra.mxu1 %v15279_v25  ;;  %v6762_v34 = vsub.f32 %v15283_v46, %v16333_v7  ;;  %v6771_v35 = vand.u32 4294901760, %v15297_v51  ;;  %10871 = vmatprep.subr.mxu0 %v14963_v60  ;;  %v6556_v39 = vadd.f32 %v15151_v63, %v6534_v32  ;;  %v6513_v43 = vmul.f32 %v11172_v27, %v15029_v9 }
 0x65a   :  { %10935 = vmatprep.subr.mxu1 %v15022_v23  ;;  %v15316_v45 = vand.u32 4294901760, %v6570_v44  ;;  %10792 = vmatprep.mubr.f32.mxu0 %v6743_v0  ;;  %v6753_v49 = vand.u32 4294901760, %v6752_v36  ;;  %v15321_v13 = vand.u32 4294901760, %v6571_v61  ;;  %v15324_v31 = vsub.f32 %v6569_v8, %v15308_v58 }
 0x65b   :  { %10854 = vmatprep.mubr.f32.mxu1 %v15308_v58  ;;  %10872 = vmatpush3.msra.mxu0 %v14963_v60  ;;  %v6572_v17 = vmax.f32 %v6556_v39, 0.0  ;;  %v6535_v32 = vmul.f32 %v15145_v19, %v6513_v43  ;;  %v6514_v9 = vmul.f32 %v11174_v57, %v15055_v30  ;;  %v6763_v27 = vand.u32 4294901760, %v6762_v34 }
 0x65c   :  { %10936 = vmatpush3.msra.mxu1 %v15022_v23  ;;  %v15329_v7 = vsub.f32 %v6570_v44, %v15316_v45  ;;  %10873 = vmatprep.subr.mxu0 %v14978_v11  ;;  %v6772_v0 = vsub.f32 %v15297_v51, %v6771_v35  ;;  %v6781_v60 = vand.u32 4294901760, %v15324_v31  ;;  %v15340_v8 = vsub.f32 %v6571_v61, %v15321_v13 }
 0x65d   :  { %10937 = vmatprep.subr.mxu1 %v15036_v3  ;;  %10874 = vmatpush3.msra.mxu0 %v14978_v11  ;;  %v15344_v36 = vand.u32 4294901760, %v6572_v17  ;;  %v6557_v30 = vadd.f32 %v15151_v63, %v6535_v32  ;;  %v6536_v57 = vmul.f32 %v15145_v19, %v6514_v9 }
 0x65e   :  { %10938 = vmatpush3.msra.mxu1 %v15036_v3  ;;  %10793 = vmatmul.mubr.f32.gmra.mxu0 %v6753_v49  ;;  %v6782_v44 = vsub.f32 %v15324_v31, %v6781_v60  ;;  %v6791_v34 = vand.u32 4294901760, %v15329_v7  ;;  %v6773_v19 = vand.u32 4294901760, %v6772_v0  ;;  %v6801_v43 = vand.u32 4294901760, %v15340_v8 }
 0x65f   :  { %10855 = vmatmul.mubr.f32.gmra.mxu1 %v15316_v45  ;;  %10875 = vmatprep.subr.mxu0 %v14993_v56  ;;  %v6573_v11 = vmax.f32 %v6557_v30, 0.0  ;;  %v6558_v61 = vadd.f32 %v15151_v63, %v6536_v57  ;;  %v15358_v39 = vsub.f32 %v6572_v17, %v15344_v36 }
 0x660   :  { %10939 = vmatprep.subr.mxu1 %v15043_v4  ;;  %10795 = vmatprep.mubr.f32.mxu0 %v6763_v27  ;;  %v6783_v63 = vand.u32 4294901760, %v6782_v44  ;;  %v6792_v9 = vsub.f32 %v15329_v7, %v6791_v34  ;;  %v6802_v27 = vsub.f32 %v15340_v8, %v6801_v43 }
 0x661   :  { %10857 = vmatprep.mubr.f32.mxu1 %v15321_v13  ;;  %10876 = vmatpush3.msra.mxu0 %v14993_v56  ;;  %v15363_v49 = vand.u32 4294901760, %v6573_v11  ;;  %v6574_v32 = vmax.f32 %v6558_v61, 0.0  ;;  %v6811_v0 = vand.u32 4294901760, %v15358_v39 }
 0x662   :  { %10940 = vmatpush3.msra.mxu1 %v15043_v4  ;;  %10877 = vmatprep.subr.mxu0 %v15010_v53  ;;  %v6803_v44 = vand.u32 4294901760, %v6802_v27  ;;  %v16893_v27 = vand.u32 4294901760, %v15179_v1 }
 0x663   :  { %10941 = vmatprep.subr.mxu1 %v15052_v6  ;;  %10878 = vmatpush3.msra.mxu0 %v15010_v53  ;;  %v15372_v17 = vand.u32 4294901760, %v6574_v32  ;;  %v15375_v56 = vsub.f32 %v6573_v11, %v15363_v49  ;;  %v6793_v53 = vand.u32 4294901760, %v6792_v9  ;;  %v6812_v11 = vsub.f32 %v15358_v39, %v6811_v0 }
 0x664   :  { %10942 = vmatpush3.msra.mxu1 %v15052_v6  ;;  %10796 = vmatmul.mubr.f32.gmra.mxu0 %v6773_v19 }
 0x665   :  { %10858 = vmatmul.mubr.f32.gmra.mxu1 %v15344_v36  ;;  %10879 = vmatprep.subr.mxu0 %v15034_v55  ;;  %v15386_v30 = vsub.f32 %v6574_v32, %v15372_v17  ;;  %v6821_v57 = vand.u32 4294901760, %v15375_v56  ;;  %v6813_v19 = vand.u32 4294901760, %v6812_v11  ;;  %v16891_v32 = vld [vmem:[#allocation20_spill] sm:$0xff]  ;;  %v16896_v11 = vld [vmem:[#allocation45_spill] sm:$0xff] }
 0x666   :  { %10943 = vmatprep.subr.mxu1 %v15069_v41  ;;  %10798 = vmatprep.mubr.f32.mxu0 %v6783_v63 }
 0x667   :  { %10860 = vmatprep.mubr.f32.mxu1 %v15363_v49  ;;  %10880 = vmatpush3.msra.mxu0 %v15034_v55  ;;  %v6822_v55 = vsub.f32 %v15375_v56, %v6821_v57  ;;  %v6831_v61 = vand.u32 4294901760, %v15386_v30 }
 0x668   :  { %10944 = vmatpush3.msra.mxu1 %v15069_v41  ;;  %10881 = vmatprep.subr.mxu0 %v15049_v18 }
 0x669   :  { %10945 = vmatprep.subr.mxu1 %v15076_v47  ;;  %10882 = vmatpush3.msra.mxu0 %v15049_v18  ;;  %v16890_v18 = vand.u32 4294901760, %v15167_v37  ;;  %v6823_v63 = vand.u32 4294901760, %v6822_v55  ;;  %v6832_v9 = vsub.f32 %v15386_v30, %v6831_v61  ;;  %v16897_v55 = vand.u32 4294901760, %v15207_v12 }
 0x66a   :  { %10946 = vmatpush3.msra.mxu1 %v15076_v47  ;;  %10799 = vmatmul.mubr.f32.gmra.mxu0 %v6793_v53 }
 0x66b   :  { %10861 = vmatmul.mubr.f32.gmra.mxu1 %v15372_v17  ;;  %10883 = vmatprep.subr.mxu0 %v15058_v33  ;;  %v6833_v53 = vand.u32 4294901760, %v6832_v9 }
 0x66c   :  { %10947 = vmatprep.subr.mxu1 %v15093_v54  ;;  %10801 = vmatprep.mubr.f32.mxu0 %v6803_v44  ;;  %v16894_v44 = vand.u32 4294901760, %v15192_v28 }
 0x66d   :  { %10884 = vmatpush3.msra.mxu0 %v15058_v33  ;;  %10948 = vmatpush3.msra.mxu1 %v15093_v54  ;;  %v16892_v33 = vld [vmem:[#allocation61_spill] sm:$0xff] }
 0x66e   :  { %10951 = vmatprep.mubr.f32.mxu1 %v16890_v18  ;;  %10885 = vmatprep.subr.mxu0 %v15067_v14  ;;  %v16901_v18 = vld [vmem:[#allocation69_spill] sm:$0xff] }
 0x66f   :  { %10949 = vmatprep.subr.mxu1 %v16891_v32  ;;  %10886 = vmatpush3.msra.mxu0 %v15067_v14  ;;  %v16895_v14 = vld [vmem:[#allocation27_spill] sm:$0xff] }
 0x670   :  { %10950 = vmatpush3.msra.mxu1 %v16891_v32  ;;  %10802 = vmatmul.mubr.f32.gmra.mxu0 %v6813_v19  ;;  %v16899_v19 = vld [vmem:[#allocation23_spill] sm:$0xff] }
 0x671   :  { %10887 = vmatprep.subr.mxu0 %v16892_v33  ;;  %10952 = vmatmul.mubr.f32.vlgmr.msra.gmra.mxu1 %v16893_v27 }
 0x672   :  { %11031 = vmatprep.subr.mxu1 %v14883_v40  ;;  %10804 = vmatprep.mubr.f32.mxu0 %v6823_v63 }
 0x673   :  { %10888 = vmatpush3.msra.mxu0 %v16892_v33  ;;  %10954 = vmatprep.mubr.f32.mxu1 %v16894_v44 }
 0x674   :  { %11032 = vmatpush3.msra.mxu1 %v14883_v40  ;;  %10889 = vmatprep.subr.mxu0 %v16895_v14  ;;  %v16898_v40 = vand.u32 4294901760, %v15218_v26 }
 0x675   :  { %11033 = vmatprep.subr.mxu1 %v14894_v2  ;;  %10890 = vmatpush3.msra.mxu0 %v16895_v14 }
 0x676   :  { %11034 = vmatpush3.msra.mxu1 %v14894_v2  ;;  %10805 = vmatmul.mubr.f32.gmra.mxu0 %v6833_v53  ;;  %v16900_v2 = vand.u32 4294901760, %v15232_v16 }
 0x677   :  { %10891 = vmatprep.subr.mxu0 %v16896_v11  ;;  %10955 = vmatmul.mubr.f32.gmra.mxu1 %v16897_v55 }
 0x678   :  { %11035 = vmatprep.subr.mxu1 %v14907_v21  ;;  %10892 = vmatpush3.msra.mxu0 %v16896_v11 }
 0x679   :  { %10895 = vmatprep.mubr.f32.mxu0 %v15167_v37  ;;  %10957 = vmatprep.mubr.f32.mxu1 %v16898_v40  ;;  %v16903_v37 = vld [vmem:[#allocation30_spill] sm:$0xff] }
 0x67a   :  { %11036 = vmatpush3.msra.mxu1 %v14907_v21  ;;  %10893 = vmatprep.subr.mxu0 %v16899_v19  ;;  %v16902_v21 = vand.u32 4294901760, %v15263_v20 }
 0x67b   :  { %11037 = vmatprep.subr.mxu1 %v14925_v29  ;;  %10894 = vmatpush3.msra.mxu0 %v16899_v19 }
 0x67c   :  { %11038 = vmatpush3.msra.mxu1 %v14925_v29  ;;  %10896 = vmatmul.mubr.f32.vlgmr.msra.gmra.mxu0 %v15179_v1  ;;  %v16904_v29 = vand.u32 4294901760, %v15272_v48  ;;  %v16905_v1 = vld [vmem:[#allocation71_spill] sm:$0xff] }
 0x67d   :  { %10958 = vmatmul.mubr.f32.gmra.mxu1 %v16900_v2  ;;  %10975 = vmatprep.subr.mxu0 %v16901_v18 }
 0x67e   :  { %11039 = vmatprep.subr.mxu1 %v14953_v42  ;;  %10898 = vmatprep.mubr.f32.mxu0 %v15192_v28  ;;  %v16907_v28 = vld [vmem:[#allocation29_spill] sm:$0xff] }
 0x67f   :  { %10960 = vmatprep.mubr.f32.mxu1 %v16902_v21  ;;  %10976 = vmatpush3.msra.mxu0 %v16901_v18 }
 0x680   :  { %11040 = vmatpush3.msra.mxu1 %v14953_v42  ;;  %10977 = vmatprep.subr.mxu0 %v16903_v37  ;;  %v16906_v42 = vand.u32 4294901760, %v15283_v46 }
 0x681   :  { %11041 = vmatprep.subr.mxu1 %v14965_v15  ;;  %10978 = vmatpush3.msra.mxu0 %v16903_v37 }
 0x682   :  { %11042 = vmatpush3.msra.mxu1 %v14965_v15  ;;  %10899 = vmatmul.mubr.f32.gmra.mxu0 %v15207_v12  ;;  %v16908_v15 = vld [vmem:[#allocation43_spill] sm:$0xff]  ;;  %v16920_v12 = vld [vmem:[#allocation24_spill] sm:$0xff] }
 0x683   :  { %10961 = vmatmul.mubr.f32.gmra.mxu1 %v16904_v29  ;;  %10979 = vmatprep.subr.mxu0 %v16905_v1 }
 0x684   :  { %11043 = vmatprep.subr.mxu1 %v14980_v59  ;;  %10901 = vmatprep.mubr.f32.mxu0 %v15218_v26  ;;  %v16921_v26 = vld [vmem:[#allocation48_spill] sm:$0xff] }
 0x685   :  { %10963 = vmatprep.mubr.f32.mxu1 %v16906_v42  ;;  %10980 = vmatpush3.msra.mxu0 %v16905_v1 }
 0x686   :  { %11044 = vmatpush3.msra.mxu1 %v14980_v59  ;;  %10981 = vmatprep.subr.mxu0 %v16907_v28  ;;  %v16909_v59 = vld [vmem:[#allocation21_spill] sm:$0xff] }
 0x687   :  { %11045 = vmatprep.subr.mxu1 %v14995_v38  ;;  %10982 = vmatpush3.msra.mxu0 %v16907_v28 }
 0x688   :  { %11046 = vmatpush3.msra.mxu1 %v14995_v38  ;;  %10902 = vmatmul.mubr.f32.gmra.mxu0 %v15232_v16  ;;  %v16910_v38 = vld [vmem:[#allocation25_spill] sm:$0xff]  ;;  %v16918_v16 = vld [vmem:[#allocation19_spill] sm:$0xff] }
 0x689   :  { %10964 = vmatmul.mubr.f32.gmra.mxu1 %v6771_v35  ;;  %10983 = vmatprep.subr.mxu0 %v16908_v15 }
 0x68a   :  { %11047 = vmatprep.subr.mxu1 %v15022_v23  ;;  %10904 = vmatprep.mubr.f32.mxu0 %v15263_v20 }
 0x68b   :  { %10966 = vmatprep.mubr.f32.mxu1 %v6781_v60  ;;  %10984 = vmatpush3.msra.mxu0 %v16908_v15 }
 0x68c   :  { %11048 = vmatpush3.msra.mxu1 %v15022_v23  ;;  %10985 = vmatprep.subr.mxu0 %v16909_v59  ;;  %v16911_v23 = vld [vmem:[#allocation49_spill] sm:$0xff] }
 0x68d   :  { %11049 = vmatprep.subr.mxu1 %v15036_v3  ;;  %10986 = vmatpush3.msra.mxu0 %v16909_v59 }
 0x68e   :  { %11050 = vmatpush3.msra.mxu1 %v15036_v3  ;;  %10905 = vmatmul.mubr.f32.gmra.mxu0 %v15272_v48  ;;  %v16912_v3 = vld [vmem:[#allocation59_spill] sm:$0xff]  ;;  %v16919_v48 = vld [vmem:[#allocation32_spill] sm:$0xff] }
 0x68f   :  { %10967 = vmatmul.mubr.f32.gmra.mxu1 %v6791_v34  ;;  %10987 = vmatprep.subr.mxu0 %v16910_v38 }
 0x690   :  { %11051 = vmatprep.subr.mxu1 %v15043_v4  ;;  %10907 = vmatprep.mubr.f32.mxu0 %v15283_v46 }
 0x691   :  { %10969 = vmatprep.mubr.f32.mxu1 %v6801_v43  ;;  %10988 = vmatpush3.msra.mxu0 %v16910_v38 }
 0x692   :  { %11052 = vmatpush3.msra.mxu1 %v15043_v4  ;;  %10989 = vmatprep.subr.mxu0 %v16911_v23  ;;  %v16913_v4 = vld [vmem:[#allocation70_spill] sm:$0xff] }
 0x693   :  { %11053 = vmatprep.subr.mxu1 %v15052_v6  ;;  %10990 = vmatpush3.msra.mxu0 %v16911_v23 }
 0x694   :  { %11054 = vmatpush3.msra.mxu1 %v15052_v6  ;;  %10908 = vmatmul.mubr.f32.gmra.mxu0 %v15297_v51  ;;  %v16914_v6 = vld [vmem:[#allocation17_spill] sm:$0xff] }
 0x695   :  { %10970 = vmatmul.mubr.f32.gmra.mxu1 %v6811_v0  ;;  %10991 = vmatprep.subr.mxu0 %v16912_v3 }
 0x696   :  { %11055 = vmatprep.subr.mxu1 %v15069_v41  ;;  %10910 = vmatprep.mubr.f32.mxu0 %v15324_v31 }
 0x697   :  { %10972 = vmatprep.mubr.f32.mxu1 %v6821_v57  ;;  %10992 = vmatpush3.msra.mxu0 %v16912_v3 }
 0x698   :  { %11056 = vmatpush3.msra.mxu1 %v15069_v41  ;;  %10993 = vmatprep.subr.mxu0 %v16913_v4  ;;  %v16915_v41 = vld [vmem:[#allocation55_spill] sm:$0xff] }
 0x699   :  { %11057 = vmatprep.subr.mxu1 %v15076_v47  ;;  %10994 = vmatpush3.msra.mxu0 %v16913_v4 }
 0x69a   :  { %11058 = vmatpush3.msra.mxu1 %v15076_v47  ;;  %10911 = vmatmul.mubr.f32.gmra.mxu0 %v15329_v7  ;;  %v16916_v47 = vld [vmem:[#allocation46_spill] sm:$0xff] }
 0x69b   :  { %10973 = vmatmul.mubr.f32.gmra.mxu1 %v6831_v61  ;;  %10995 = vmatprep.subr.mxu0 %v16914_v6 }
 0x69c   :  { %11059 = vmatprep.subr.mxu1 %v15093_v54  ;;  %10913 = vmatprep.mubr.f32.mxu0 %v15340_v8 }
 0x69d   :  { %10996 = vmatpush3.msra.mxu0 %v16914_v6  ;;  %11060 = vmatpush3.msra.mxu1 %v15093_v54  ;;  %v16917_v54 = vld [vmem:[#allocation51_spill] sm:$0xff] }
 0x69e   :  { %11063 = vmatprep.mubr.f32.mxu1 %v15161_v62  ;;  %10997 = vmatprep.subr.mxu0 %v16915_v41 }
 0x69f   :  { %11061 = vmatprep.subr.mxu1 %v16891_v32  ;;  %10998 = vmatpush3.msra.mxu0 %v16915_v41 }
 0x6a0   :  { %11062 = vmatpush3.msra.mxu1 %v16891_v32  ;;  %10914 = vmatmul.mubr.f32.gmra.mxu0 %v15358_v39 }
 0x6a1   :  { %10999 = vmatprep.subr.mxu0 %v16916_v47  ;;  %11064 = vmatmul.mubr.f32.vlgmr.msra.gmra.mxu1 %v15170_v22 }
 0x6a2   :  { %10916 = vmatprep.mubr.f32.mxu0 %v15375_v56  ;;  %11000 = vmatpush3.msra.mxu0 %v16916_v47  ;;  %v15659_v47 = vld [vmem:[%s16056_s13] ss:$0 sm:$0xff] }
 0x6a3   :  { %11066 = vmatprep.mubr.f32.mxu1 %v15173_v10  ;;  %11001 = vmatprep.subr.mxu0 %v16917_v54 }
 0x6a4   :  { %11002 = vmatpush3.msra.mxu0 %v16917_v54 }
 0x6a5   :  { %10917 = vmatmul.mubr.f32.gmra.mxu0 %v15386_v30  ;;  %11003 = vmatprep.subr.mxu0 %v16918_v16 }
 0x6a6   :  { %11067 = vmatmul.mubr.f32.gmra.mxu1 %v15195_v24  ;;  %11004 = vmatpush3.msra.mxu0 %v16918_v16 }
 0x6a7   :  { %11007 = vmatprep.mubr.f32.mxu0 %v15161_v62  ;;  %11069 = vmatprep.mubr.f32.mxu1 %v16919_v48 }
 0x6a8   :  { %11005 = vmatprep.subr.mxu0 %v16920_v12 }
 0x6a9   :  { %11006 = vmatpush3.msra.mxu0 %v16920_v12 }
 0x6aa   :  { %11008 = vmatmul.mubr.f32.vlgmr.msra.gmra.mxu0 %v15170_v22  ;;  %11070 = vmatmul.mubr.f32.gmra.mxu1 %v16921_v26 }
 0x6ab   :  { %11010 = vmatprep.mubr.f32.mxu0 %v15173_v10  ;;  %11072 = vmatprep.mubr.f32.mxu1 %v15246_v52 }
 0x6ae   :  { %11011 = vmatmul.mubr.f32.gmra.mxu0 %v15195_v24  ;;  %11073 = vmatmul.mubr.f32.gmra.mxu1 %v15257_v5 }
 0x6af   :  { %11013 = vmatprep.mubr.f32.mxu0 %v16919_v48  ;;  %11075 = vmatprep.mubr.f32.mxu1 %v15267_v50 }
 0x6b2   :  { %11014 = vmatmul.mubr.f32.gmra.mxu0 %v16921_v26  ;;  %11076 = vmatmul.mubr.f32.gmra.mxu1 %v15279_v25 }
 0x6b3   :  { %11016 = vmatprep.mubr.f32.mxu0 %v15246_v52  ;;  %11078 = vmatprep.mubr.f32.mxu1 %v15308_v58 }
 0x6b6   :  { %11017 = vmatmul.mubr.f32.gmra.mxu0 %v15257_v5  ;;  %11079 = vmatmul.mubr.f32.gmra.mxu1 %v15316_v45 }
 0x6b7   :  { %11019 = vmatprep.mubr.f32.mxu0 %v15267_v50  ;;  %11081 = vmatprep.mubr.f32.mxu1 %v15321_v13 }
 0x6ba   :  { %11020 = vmatmul.mubr.f32.gmra.mxu0 %v15279_v25  ;;  %11082 = vmatmul.mubr.f32.gmra.mxu1 %v15344_v36 }
 0x6bb   :  { %11022 = vmatprep.mubr.f32.mxu0 %v15308_v58  ;;  %11084 = vmatprep.mubr.f32.mxu1 %v15363_v49 }
 0x6be   :  { %11023 = vmatmul.mubr.f32.gmra.mxu0 %v15316_v45  ;;  %11085 = vmatmul.mubr.f32.gmra.mxu1 %v15372_v17 }
 0x6bf   :  { %11025 = vmatprep.mubr.f32.mxu0 %v15321_v13 }
 0x6c2   :  { %11026 = vmatmul.mubr.f32.gmra.mxu0 %v15344_v36 }
 0x6c3   :  { %11028 = vmatprep.mubr.f32.mxu0 %v15363_v49 }
 0x6c6   :  { %11029 = vmatmul.mubr.f32.gmra.mxu0 %v15372_v17 }
 0x704   :  { %v15566_v62 = vpop.f32.mrf.mxu1 }
 0x706   :  { %v15568_v22 = vpop.f32.mrf.mxu1 }
 0x709   :  { %v15570_v10 = vpop.f32.mrf.mxu1 }
 0x70b   :  { %v15572_v24 = vpop.f32.mrf.mxu1 }
 0x70c   :  { %v10785_v5 = vpop.f32.mrf.mxu0 }
 0x70d   :  { %v15574_v52 = vpop.f32.mrf.mxu1  ;;  %v6696_v48 = vadd.f32 %v10785_v5, %v15659_v47 }
 0x70e   :  { %v6685_v20 = vpop.f32.mrf.mxu0 }
 0x70f   :  { %v15576_v50 = vpop.f32.mrf.mxu1  ;;  %v6686_v26 = vadd.f32 %v15659_v47, %v6685_v20 }
 0x712   :  { %v10788_v25 = vpop.f32.mrf.mxu0 }
 0x714   :  { %v15578_v46 = vpop.f32.mrf.mxu1  ;;  %v6705_v13 = vpop.f32.mrf.mxu0 }
 0x716   :  { %v15580_v51 = vpop.f32.mrf.mxu1 }
 0x718   :  { %v10791_v7 = vpop.f32.mrf.mxu0 }
 0x719   :  { %v15582_v58 = vpop.f32.mrf.mxu1  ;;  %v6736_v5 = vadd.f32 %v10791_v7, %v15659_v47 }
 0x71a   :  { %v15584_v35 = vpop.f32.mrf.mxu0 }
 0x71b   :  { %v15586_v45 = vpop.f32.mrf.mxu1  ;;  %v7017_v7 = vadd.f32 %v15574_v52, %v6736_v5 }
 0x71e   :  { %v15588_v31 = vpop.f32.mrf.mxu0 }
 0x71f   :  { %v15590_v60 = vpop.f32.mrf.mxu1 }
 0x720   :  { %v15592_v8 = vpop.f32.mrf.mxu0 }
 0x721   :  { %v15594_v36 = vpop.f32.mrf.mxu1 }
 0x724   :  { %v15596_v34 = vpop.f32.mrf.mxu0 }
 0x725   :  { %v15598_v39 = vpop.f32.mrf.mxu1 }
 0x726   :  { %v15600_v43 = vpop.f32.mrf.mxu0 }
 0x727   :  { %v15602_v49 = vpop.f32.mrf.mxu1 }
 0x728   :  { %16922 = vst [vmem:[#allocation75_spill] sm:$0xff] %v15602_v49  ;;  %v6987_v49 = vadd.f32 %v15568_v22, %v6686_v26  ;;  %v6756_v22 = vadd.f32 %v15588_v31, %v15659_v47 }
 0x72a   :  { %v15604_v17 = vpop.f32.mrf.mxu0 }
 0x72b   :  { %v15606_v56 = vpop.f32.mrf.mxu1 }
 0x72c   :  { %16923 = vst [vmem:[#allocation81_spill] sm:$0xff] %v15606_v56  ;;  %v15608_v0 = vpop.f32.mrf.mxu0  ;;  %v6706_v56 = vadd.f32 %v15659_v47, %v6705_v13 }
 0x72d   :  { %v15610_v30 = vpop.f32.mrf.mxu1 }
 0x72e   :  { %16924 = vst [vmem:[#allocation36_spill] sm:$0xff] %v15610_v30  ;;  %v6993_v30 = vadd.f32 %v15566_v62, %v6696_v48  ;;  %v6999_v13 = vadd.f32 %v15572_v24, %v6706_v56 }
 0x730   :  { %v15612_v57 = vpop.f32.mrf.mxu0 }
 0x731   :  { %v10953_v61 = vpop.f32.mrf.mxu1 }
 0x732   :  { %v15614_v32 = vpop.f32.mrf.mxu0 }
 0x733   :  { %v7374_v63 = vpop.f32.mrf.mxu1 }
 0x736   :  { %v15616_v9 = vpop.f32.mrf.mxu0 }
 0x737   :  { %v15618_v33 = vpop.f32.mrf.mxu1 }
 0x738   :  { %v15620_v27 = vpop.f32.mrf.mxu0 }
 0x739   :  { %16925 = vst [vmem:[#allocation16_spill] sm:$0xff] %v15620_v27  ;;  %v15622_v53 = vpop.f32.mrf.mxu1 }
 0x73c   :  { %v10897_v44 = vpop.f32.mrf.mxu0 }
 0x73d   :  { %v15624_v14 = vpop.f32.mrf.mxu1 }
 0x73e   :  { %v7180_v11 = vpop.f32.mrf.mxu0 }
 0x73f   :  { %v15626_v55 = vpop.f32.mrf.mxu1  ;;  %v7181_v27 = vadd.f32 %v7180_v11, %v6987_v49 }
 0x741   :  { %v7375_v26 = vadd.f32 %v7374_v63, %v7181_v27  ;;  %v7029_v27 = vadd.f32 %v15578_v46, %v6756_v22 }
 0x742   :  { %v10900_v40 = vpop.f32.mrf.mxu0 }
 0x743   :  { %v15628_v19 = vpop.f32.mrf.mxu1 }
 0x744   :  { %v7194_v2 = vpop.f32.mrf.mxu0 }
 0x745   :  { %v15630_v18 = vpop.f32.mrf.mxu1 }
 0x748   :  { %v10903_v21 = vpop.f32.mrf.mxu0 }
 0x749   :  { %v15632_v37 = vpop.f32.mrf.mxu1 }
 0x74a   :  { %v7208_v29 = vpop.f32.mrf.mxu0 }
 0x74b   :  { %v15634_v1 = vpop.f32.mrf.mxu1 }
 0x74e   :  { %v15636_v42 = vpop.f32.mrf.mxu0 }
 0x74f   :  { %v15638_v28 = vpop.f32.mrf.mxu1  ;;  %v7230_v46 = vadd.f32 %v15636_v42, %v7029_v27 }
 0x750   :  { %16926 = vst [vmem:[#allocation34_spill] sm:$0xff] %v15638_v28  ;;  %v15640_v15 = vpop.f32.mrf.mxu0  ;;  %v7188_v28 = vadd.f32 %v10897_v44, %v6993_v30  ;;  %v16935_v44 = vld [vmem:[#allocation68_spill] sm:$0xff] }
 0x751   :  { %v15642_v59 = vpop.f32.mrf.mxu1  ;;  %vm116_vm2 = vcmp.lt.s32.totalorder %v16935_v44, 32  ;;  %v6796_v44 = vadd.f32 %v15604_v17, %v15659_v47 }
 0x752   :  { %16927 = vst [vmem:[#allocation97_spill] sm:$0xff] %v15642_v59  ;;  %v7383_v30 = vadd.f32 %v10953_v61, %v7188_v28  ;;  %v16936_v61 = vmov 0.0  }
 0x753   :  { %v15692_v28 = vsel %vm116_vm2, 1.0, %v16936_v61 }
 0x754   :  { %v15644_v38 = vpop.f32.mrf.mxu0 }
 0x755   :  { %v15646_v23 = vpop.f32.mrf.mxu1 }
 0x756   :  { %16928 = vst [vmem:[#allocation73_spill] sm:$0xff] %v15646_v23  ;;  %v15648_v3 = vpop.f32.mrf.mxu0 }
 0x757   :  { %v15650_v4 = vpop.f32.mrf.mxu1 }
 0x758   :  { %16929 = vst [vmem:[#allocation84_spill] sm:$0xff] %v15650_v4 }
 0x75a   :  { %v15652_v6 = vpop.f32.mrf.mxu0 }
 0x75b   :  { %v15654_v41 = vpop.f32.mrf.mxu1 }
 0x75c   :  { %16930 = vst [vmem:[#allocation91_spill] sm:$0xff] %v15654_v41  ;;  %v15661_v54 = vpop.f32.mrf.mxu0  ;;  %v6716_v41 = vadd.f32 %v10788_v25, %v15659_v47  ;;  %v6726_v25 = vadd.f32 %v15659_v47, %v15584_v35  ;;  %v6746_v35 = vadd.f32 %v15659_v47, %v15592_v8 }
 0x75d   :  { %16931 = vst [vmem:[#allocation122_spill] sm:$0xff] %v15661_v54  ;;  %v15663_v16 = vpop.f32.mrf.mxu1 }
 0x75e   :  { %16932 = vst [vmem:[#allocation124_spill] sm:$0xff] %v15663_v16  ;;  %v7005_v20 = vadd.f32 %v15570_v10, %v6716_v41  ;;  %v7195_v10 = vadd.f32 %v7194_v2, %v6999_v13  ;;  %v6776_v2 = vadd.f32 %v15596_v34, %v15659_v47  ;;  %v6766_v13 = vadd.f32 %v15659_v47, %v15600_v43 }
 0x760   :  { %v15666_v12 = vpop.f32.mrf.mxu0  ;;  %v7202_v48 = vadd.f32 %v10900_v40, %v7005_v20  ;;  %v7011_v40 = vadd.f32 %v15576_v50, %v6726_v25  ;;  %v7391_v25 = vadd.f32 %v15622_v53, %v7195_v10  ;;  %v7041_v43 = vadd.f32 %v15582_v58, %v6776_v2 }
 0x761   :  { %16933 = vst [vmem:[#allocation127_spill] sm:$0xff] %v15666_v12  ;;  %v11065_v4 = vpop.f32.mrf.mxu1  ;;  %v7035_v58 = vadd.f32 %v15586_v45, %v6766_v13 }
 0x762   :  { %v15669_v23 = vpop.f32.mrf.mxu0  ;;  %v7399_v52 = vadd.f32 %v15618_v33, %v7202_v48  ;;  %v7209_v63 = vadd.f32 %v7208_v29, %v7011_v40  ;;  %v7023_v33 = vadd.f32 %v15580_v51, %v6746_v35  ;;  %v7244_v17 = vadd.f32 %v15644_v38, %v7041_v43  ;;  %v16942_v43 = vld [vmem:[#allocation81_spill] sm:$0xff] }
 0x763   :  { %v7790_v59 = vpop.f32.mrf.mxu1  ;;  %v6816_v35 = vadd.f32 %v15612_v57, %v15659_v47  ;;  %v7053_v38 = vadd.f32 %v15590_v60, %v6796_v44 }
 0x765   :  { %v15675_v16 = vpop.f32.mrf.mxu0  ;;  %v7258_v60 = vadd.f32 %v15652_v6, %v7053_v38  ;;  %v7065_v27 = vadd.f32 %v15598_v39, %v6816_v35 }
 0x766   :  { %v11068_v12 = vpop.f32.mrf.mxu1 }
 0x767   :  { %v15679_v54 = vpop.f32.mrf.mxu0 }
 0x768   :  { %16934 = vst [vmem:[#allocation126_spill] sm:$0xff] %v15679_v54  ;;  %v7802_v62 = vpop.f32.mrf.mxu1  ;;  %v7216_v54 = vadd.f32 %v10903_v21, %v7017_v7  ;;  %v7407_v7 = vadd.f32 %v15626_v55, %v7209_v63  ;;  %v6836_v63 = vadd.f32 %v15616_v9, %v15659_v47 }
 0x76a   :  { %v11009_v49 = vpop.f32.mrf.mxu0  ;;  %v11071_v11 = vpop.f32.mrf.mxu1  ;;  %v7415_v29 = vadd.f32 %v15624_v14, %v7216_v54  ;;  %v7223_v14 = vadd.f32 %v15640_v15, %v7023_v33  ;;  %v7431_v15 = vadd.f32 %v15628_v19, %v7230_v46  ;;  %v16939_v33 = vld [vmem:[#allocation127_spill] sm:$0xff] }
 0x76b   :  { %v7620_v41 = vadd.f32 %v11009_v49, %v7383_v30  ;;  %v6786_v49 = vadd.f32 %v15659_v47, %v15608_v0  ;;  %v7237_v0 = vadd.f32 %v15648_v3, %v7035_v58  ;;  %v7447_v3 = vadd.f32 %v15632_v37, %v7244_v17  ;;  %v16944_v17 = vld [vmem:[#allocation36_spill] sm:$0xff] }
 0x76c   :  { %v7613_v24 = vpop.f32.mrf.mxu0  ;;  %v7814_v56 = vpop.f32.mrf.mxu1  ;;  %v7423_v61 = vadd.f32 %v15630_v18, %v7223_v14  ;;  %v7272_v9 = vadd.f32 %v16939_v33, %v7065_v27 }
 0x76d   :  { %v15694_v20 = vadd.f32 %v11065_v4, %v7620_v41  ;;  %v7614_v31 = vadd.f32 %v7613_v24, %v7375_v26  ;;  %v7047_v57 = vadd.f32 %v15594_v36, %v6786_v49  ;;  %v7439_v36 = vadd.f32 %v15634_v1, %v7237_v0 }
 0x76e   :  { %v11012_v8 = vpop.f32.mrf.mxu0  ;;  %v11074_v21 = vpop.f32.mrf.mxu1 }
 0x76f   :  { %v15700_v5 = vadd.f32 %v7790_v59, %v7614_v31  ;;  %v7632_v50 = vadd.f32 %v11012_v8, %v7399_v52  ;;  %v7887_v4 = vmul.f32 %v15692_v28, %v15694_v20  ;;  %v6806_v31 = vadd.f32 %v15659_v47, %v15614_v32 }
 0x770   :  { %v7625_v48 = vpop.f32.mrf.mxu0  ;;  %v7826_v34 = vpop.f32.mrf.mxu1 }
 0x771   :  { %v15710_v30 = vadd.f32 %v11068_v12, %v7632_v50  ;;  %v7626_v59 = vadd.f32 %v7625_v48, %v7391_v25  ;;  %7904 = vadd.xlane.f32.xlu1 %v7887_v4  ;;  %v7886_v53 = vmul.f32 %v15692_v28, %v15700_v5  ;;  %v16937_v50 = vld [vmem:[#allocation122_spill] sm:$0xff]  ;;  %v16938_v4 = vld [vmem:[#allocation16_spill] sm:$0xff]  ;;  %v16940_v48 = vld [vmem:[#allocation75_spill] sm:$0xff] }
 0x772   :  { %v11015_v22 = vpop.f32.mrf.mxu0  ;;  %v11077_v51 = vpop.f32.mrf.mxu1  ;;  %v7251_v37 = vadd.f32 %v16937_v50, %v7047_v57  ;;  %v6826_v13 = vadd.f32 %v15659_v47, %v16938_v4  ;;  %v7059_v39 = vadd.f32 %v16940_v48, %v6806_v31 }
 0x773   :  { %v15719_v54 = vadd.f32 %v7802_v62, %v7626_v59  ;;  %v7644_v42 = vadd.f32 %v11015_v22, %v7415_v29  ;;  %7902 = vadd.xlane.f32.xlu0 %v7886_v53  ;;  %v7889_v12 = vmul.f32 %v15692_v28, %v15710_v30  ;;  %v16941_v59 = vld [vmem:[#allocation34_spill] sm:$0xff]  ;;  %v7077_v22 = vadd.f32 %v16942_v43, %v6836_v63 }
 0x774   :  { %v7637_v10 = vpop.f32.mrf.mxu0  ;;  %v7838_v41 = vpop.f32.mrf.mxu1  ;;  %v7265_v44 = vadd.f32 %v15669_v23, %v7059_v39  ;;  %v7071_v58 = vadd.f32 %v16944_v17, %v6826_v13 }
 0x775   :  { %v15727_v26 = vadd.f32 %v11071_v11, %v7644_v42  ;;  %v7638_v55 = vadd.f32 %v7637_v10, %v7407_v7  ;;  %7908 = vadd.xlane.f32.xlu1 %v7889_v12  ;;  %v7888_v62 = vmul.f32 %v15692_v28, %v15719_v54  ;;  %v16943_v12 = vld [vmem:[#allocation97_spill] sm:$0xff]  ;;  %v7286_v23 = vadd.f32 %v15675_v16, %v7077_v22 }
 0x776   :  { %v11018_v40 = vpop.f32.mrf.mxu0  ;;  %v11080_v45 = vpop.f32.mrf.mxu1 }
 0x777   :  { %v15736_v24 = vadd.f32 %v7814_v56, %v7638_v55  ;;  %v7656_v11 = vadd.f32 %v11018_v40, %v7431_v15  ;;  %7906 = vadd.xlane.f32.xlu0 %v7888_v62  ;;  %v7891_v19 = vmul.f32 %v15692_v28, %v15727_v26  ;;  %v16945_v55 = vld [vmem:[#allocation73_spill] sm:$0xff]  ;;  %v16946_v40 = vld [vmem:[#allocation84_spill] sm:$0xff] }
 0x778   :  { %v7649_v52 = vpop.f32.mrf.mxu0  ;;  %v7850_v32 = vpop.f32.mrf.mxu1  ;;  %v7479_v15 = vadd.f32 %v16945_v55, %v7272_v9 }
 0x779   :  { %v15746_v2 = vadd.f32 %v11074_v21, %v7656_v11  ;;  %v7650_v56 = vadd.f32 %v7649_v52, %v7423_v61  ;;  %7912 = vadd.xlane.f32.xlu1 %v7891_v19  ;;  %v7890_v18 = vmul.f32 %v15692_v28, %v15736_v24  ;;  %v7471_v11 = vadd.f32 %v16946_v40, %v7265_v44  ;;  %v16947_v61 = vld [vmem:[#allocation126_spill] sm:$0xff] }
 0x77a   :  { %v11021_v8 = vpop.f32.mrf.mxu0  ;;  %v11083_v7 = vpop.f32.mrf.mxu1  ;;  %v7279_v19 = vadd.f32 %v16947_v61, %v7071_v58 }
 0x77b   :  { %v15755_v25 = vadd.f32 %v7826_v34, %v7650_v56  ;;  %v7668_v6 = vadd.f32 %v11021_v8, %v7447_v3  ;;  %7910 = vadd.xlane.f32.xlu0 %v7890_v18  ;;  %v7893_v21 = vmul.f32 %v15692_v28, %v15746_v2  ;;  %v7463_v34 = vadd.f32 %v16941_v59, %v7258_v60  ;;  %v16948_v60 = vld [vmem:[#allocation91_spill] sm:$0xff] }
 0x77c   :  { %v7661_v29 = vpop.f32.mrf.mxu0  ;;  %v7862_v0 = vpop.f32.mrf.mxu1  ;;  %v7495_v56 = vadd.f32 %v16948_v60, %v7286_v23 }
 0x77d   :  { %v15763_v46 = vadd.f32 %v11077_v51, %v7668_v6  ;;  %v7662_v1 = vadd.f32 %v7661_v29, %v7439_v36  ;;  %7916 = vadd.xlane.f32.xlu1 %v7893_v21  ;;  %v7892_v53 = vmul.f32 %v15692_v28, %v15755_v25  ;;  %v7455_v51 = vadd.f32 %v16943_v12, %v7251_v37  ;;  %v16949_v36 = vld [vmem:[#allocation124_spill] sm:$0xff] }
 0x77e   :  { %v11024_v47 = vpop.f32.mrf.mxu0  ;;  %v11086_v63 = vpop.f32.mrf.mxu1  ;;  %v7487_v50 = vadd.f32 %v16949_v36, %v7279_v19 }
 0x77f   :  { %v15770_v14 = vadd.f32 %v7838_v41, %v7662_v1  ;;  %v7680_v42 = vadd.f32 %v11024_v47, %v7463_v34  ;;  %7914 = vadd.xlane.f32.xlu0 %v7892_v53  ;;  %v7895_v49 = vmul.f32 %v15692_v28, %v15763_v46 }
 0x780   :  { %v7673_v10 = vpop.f32.mrf.mxu0  ;;  %v7874_v33 = vpop.f32.mrf.mxu1 }
 0x781   :  { %v15778_v62 = vadd.f32 %v11080_v45, %v7680_v42  ;;  %v7674_v35 = vadd.f32 %v7673_v10, %v7455_v51  ;;  %7920 = vadd.xlane.f32.xlu1 %v7895_v49  ;;  %v7894_v41 = vmul.f32 %v15692_v28, %v15770_v14 }
 0x782   :  { %v11027_v38 = vpop.f32.mrf.mxu0 }
 0x783   :  { %v15784_v31 = vadd.f32 %v7850_v32, %v7674_v35  ;;  %v7692_v57 = vadd.f32 %v11027_v38, %v7479_v15  ;;  %7918 = vadd.xlane.f32.xlu0 %v7894_v41  ;;  %v7897_v16 = vmul.f32 %v15692_v28, %v15778_v62 }
 0x784   :  { %v7685_v45 = vpop.f32.mrf.mxu0 }
 0x785   :  { %v15788_v52 = vadd.f32 %v11083_v7, %v7692_v57  ;;  %v7686_v3 = vadd.f32 %v7685_v45, %v7471_v11  ;;  %7924 = vadd.xlane.f32.xlu1 %v7897_v16  ;;  %v7896_v18 = vmul.f32 %v15692_v28, %v15784_v31 }
 0x786   :  { %v11030_v27 = vpop.f32.mrf.mxu0 }
 0x787   :  { %v15793_v8 = vadd.f32 %v7862_v0, %v7686_v3  ;;  %v7704_v32 = vadd.f32 %v11030_v27, %v7495_v56  ;;  %7922 = vadd.xlane.f32.xlu0 %v7896_v18  ;;  %v7899_v37 = vmul.f32 %v15692_v28, %v15788_v52 }
 0x788   :  { %v7697_v6 = vpop.f32.mrf.mxu0 }
 0x789   :  { %v15798_v21 = vadd.f32 %v11086_v63, %v7704_v32  ;;  %v7698_v4 = vadd.f32 %v7697_v6, %v7487_v50  ;;  %7928 = vadd.xlane.f32.xlu1 %v7899_v37  ;;  %v7898_v13 = vmul.f32 %v15692_v28, %v15793_v8 }
 0x78b   :  { %v15802_v9 = vadd.f32 %v7874_v33, %v7698_v4  ;;  %7926 = vadd.xlane.f32.xlu0 %v7898_v13  ;;  %v7901_v48 = vmul.f32 %v15692_v28, %v15798_v21 }
 0x78d   :  { %7932 = vadd.xlane.f32.xlu1 %v7901_v48  ;;  %v7900_v39 = vmul.f32 %v15692_v28, %v15802_v9 }
 0x78f   :  { %7930 = vadd.xlane.f32.xlu0 %v7900_v39 }
 0x7fa   :  { %v7905_v29 = vpop.xlane.xlu1 %7904 }
 0x7fb   :  { %v7935_v1 = vmul.f32 0.03125, %v7905_v29 }
 0x7fc   :  { %v7903_v59 = vpop.xlane.xlu0 %7902 }
 0x7fd   :  { %v15809_v34 = vsub.f32 %v15694_v20, %v7935_v1  ;;  %v7934_v53 = vmul.f32 0.03125, %v7903_v59 }
 0x7fe   :  { %v7909_v44 = vpop.xlane.xlu1 %7908 }
 0x7ff   :  { %v15812_v43 = vsub.f32 %v15700_v5, %v7934_v53  ;;  %v7937_v22 = vmul.f32 0.03125, %v7909_v44  ;;  %v7967_v7 = vmul.f32 %v15692_v28, %v15809_v34 }
 0x800   :  { %v7907_v47 = vpop.xlane.xlu0 %7906 }
 0x801   :  { %v15817_v42 = vsub.f32 %v15710_v30, %v7937_v22  ;;  %v7936_v12 = vmul.f32 0.03125, %v7907_v47  ;;  %v7983_v51 = vmul.f32 %v7967_v7, %v7967_v7  ;;  %v7966_v49 = vmul.f32 %v15692_v28, %v15812_v43 }
 0x802   :  { %v7913_v20 = vpop.xlane.xlu1 %7912 }
 0x803   :  { %v15822_v17 = vsub.f32 %v15719_v54, %v7936_v12  ;;  %v7939_v58 = vmul.f32 0.03125, %v7913_v20  ;;  %8000 = vadd.xlane.f32.xlu1 %v7983_v51  ;;  %v7982_v5 = vmul.f32 %v7966_v49, %v7966_v49  ;;  %v7969_v10 = vmul.f32 %v15692_v28, %v15817_v42 }
 0x804   :  { %v7911_v55 = vpop.xlane.xlu0 %7910 }
 0x805   :  { %v15827_v15 = vsub.f32 %v15727_v26, %v7939_v58  ;;  %v7938_v30 = vmul.f32 0.03125, %v7911_v55  ;;  %7998 = vadd.xlane.f32.xlu0 %v7982_v5  ;;  %v7985_v23 = vmul.f32 %v7969_v10, %v7969_v10  ;;  %v7968_v35 = vmul.f32 %v15692_v28, %v15822_v17 }
 0x806   :  { %v7917_v41 = vpop.xlane.xlu1 %7916 }
 0x807   :  { %v15832_v54 = vsub.f32 %v15736_v24, %v7938_v30  ;;  %v7941_v0 = vmul.f32 0.03125, %v7917_v41  ;;  %8004 = vadd.xlane.f32.xlu1 %v7985_v23  ;;  %v7984_v38 = vmul.f32 %v7968_v35, %v7968_v35  ;;  %v7971_v40 = vmul.f32 %v15692_v28, %v15827_v15 }
 0x808   :  { %v7915_v11 = vpop.xlane.xlu0 %7914 }
 0x809   :  { %v15837_v26 = vsub.f32 %v15746_v2, %v7941_v0  ;;  %v7940_v61 = vmul.f32 0.03125, %v7915_v11  ;;  %8002 = vadd.xlane.f32.xlu0 %v7984_v38  ;;  %v7987_v19 = vmul.f32 %v7971_v40, %v7971_v40  ;;  %v7970_v57 = vmul.f32 %v15692_v28, %v15832_v54 }
 0x80a   :  { %v7921_v16 = vpop.xlane.xlu1 %7920 }
 0x80b   :  { %v15842_v24 = vsub.f32 %v15755_v25, %v7940_v61  ;;  %v7943_v45 = vmul.f32 0.03125, %v7921_v16  ;;  %8008 = vadd.xlane.f32.xlu1 %v7987_v19  ;;  %v7986_v3 = vmul.f32 %v7970_v57, %v7970_v57  ;;  %v7973_v60 = vmul.f32 %v15692_v28, %v15837_v26 }
 0x80c   :  { %v7919_v56 = vpop.xlane.xlu0 %7918 }
 0x80d   :  { %v15847_v2 = vsub.f32 %v15763_v46, %v7943_v45  ;;  %v7942_v18 = vmul.f32 0.03125, %v7919_v56  ;;  %8006 = vadd.xlane.f32.xlu0 %v7986_v3  ;;  %v7989_v63 = vmul.f32 %v7973_v60, %v7973_v60  ;;  %v7972_v27 = vmul.f32 %v15692_v28, %v15842_v24 }
 0x80e   :  { %v7925_v32 = vpop.xlane.xlu1 %7924 }
 0x80f   :  { %v15852_v25 = vsub.f32 %v15770_v14, %v7942_v18  ;;  %v7945_v36 = vmul.f32 0.03125, %v7925_v32  ;;  %8012 = vadd.xlane.f32.xlu1 %v7989_v63  ;;  %v7988_v50 = vmul.f32 %v7972_v27, %v7972_v27  ;;  %v7975_v37 = vmul.f32 %v15692_v28, %v15847_v2 }
 0x810   :  { %v7923_v6 = vpop.xlane.xlu0 %7922 }
 0x811   :  { %v15857_v46 = vsub.f32 %v15778_v62, %v7945_v36  ;;  %v7944_v4 = vmul.f32 0.03125, %v7923_v6  ;;  %8010 = vadd.xlane.f32.xlu0 %v7988_v50  ;;  %v7991_v13 = vmul.f32 %v7975_v37, %v7975_v37  ;;  %v7974_v33 = vmul.f32 %v15692_v28, %v15852_v25 }
 0x812   :  { %v7929_v48 = vpop.xlane.xlu1 %7928 }
 0x813   :  { %v15862_v14 = vsub.f32 %v15784_v31, %v7944_v4  ;;  %v7947_v39 = vmul.f32 0.03125, %v7929_v48  ;;  %8016 = vadd.xlane.f32.xlu1 %v7991_v13  ;;  %v7990_v29 = vmul.f32 %v7974_v33, %v7974_v33  ;;  %v7977_v1 = vmul.f32 %v15692_v28, %v15857_v46  ;;  %v15891_v48 = vld [vmem:[%s16057_s14] ss:$0 sm:$0xff]  ;;  %s11354_s14 = smov [#allocation11]  }
 0x814   :  { %v7927_v59 = vpop.xlane.xlu0 %7926 }
 0x815   :  { %v15867_v62 = vsub.f32 %v15788_v52, %v7947_v39  ;;  %v7946_v53 = vmul.f32 0.03125, %v7927_v59  ;;  %8014 = vadd.xlane.f32.xlu0 %v7990_v29  ;;  %v7993_v44 = vmul.f32 %v7977_v1, %v7977_v1  ;;  %v7976_v22 = vmul.f32 %v15692_v28, %v15862_v14 }
 0x816   :  { %v7933_v7 = vpop.xlane.xlu1 %7932 }
 0x817   :  { %v15872_v31 = vsub.f32 %v15793_v8, %v7946_v53  ;;  %v7949_v47 = vmul.f32 0.03125, %v7933_v7  ;;  %8020 = vadd.xlane.f32.xlu1 %v7993_v44  ;;  %v7992_v12 = vmul.f32 %v7976_v22, %v7976_v22  ;;  %v7979_v51 = vmul.f32 %v15692_v28, %v15867_v62  ;;  %v15897_v44 = vld [vmem:[%s16058_s15] ss:$0 sm:$0xff]  ;;  %s8303_s15 = sshll.u32 %s11354_s14, 4  ;;  %s8304_s15 = int_to_ptr.vmem [resolvable:$true] %s8303_s15 }
 0x818   :  { %v7931_v49 = vpop.xlane.xlu0 %7930  ;;  %s11319_s2 = scalar_lea.vmem %s8304_s15, 2048  ;;  %p11324_p7 = scmp.lt.s32.totalorder %s8304_s15, %s8304_s15 }
 0x819   :  { %v15877_v52 = vsub.f32 %v15798_v21, %v7949_v47  ;;  %v7948_v20 = vmul.f32 0.03125, %v7931_v49  ;;  %8018 = vadd.xlane.f32.xlu0 %v7992_v12  ;;  %v7995_v58 = vmul.f32 %v7979_v51, %v7979_v51  ;;  %v7978_v5 = vmul.f32 %v15692_v28, %v15872_v31  ;;  %p11320_p6 = scmp.ne.s32.totalorder %s8304_s15, %s11319_s2  ;;  %p11325_p8 = scmp.lt.s32.totalorder %s11319_s2, %s11319_s2 }
 0x81b   :  { %v15882_v10 = vsub.f32 %v15802_v9, %v7948_v20  ;;  %8024 = vadd.xlane.f32.xlu1 %v7995_v58  ;;  %v7994_v8 = vmul.f32 %v7978_v5, %v7978_v5  ;;  %v7981_v55 = vmul.f32 %v15692_v28, %v15877_v52  ;;  %p11326_p9 = por %p11325_p8, %p11324_p7 }
 0x81d   :  { %8022 = vadd.xlane.f32.xlu0 %v7994_v8  ;;  %v7997_v30 = vmul.f32 %v7981_v55, %v7981_v55  ;;  %v7980_v21 = vmul.f32 %v15692_v28, %v15882_v10  ;;  %p11327_p10 = pnand %p11326_p9, %p11320_p6 }
 0x81f   :  { %8028 = vadd.xlane.f32.xlu1 %v7997_v30  ;;  %v7996_v23 = vmul.f32 %v7980_v21, %v7980_v21 }
 0x821   :  { %8026 = vadd.xlane.f32.xlu0 %v7996_v23 }
 0x88c   :  { %v8001_v35 = vpop.xlane.xlu1 %8000 }
 0x88d   :  { %v8031_v41 = vmul.f32 0.03125, %v8001_v35 }
 0x88e   :  { %v7999_v0 = vpop.xlane.xlu0 %7998 }
 0x88f   :  { %v8047_v38 = vadd.f32 1e-05, %v8031_v41  ;;  %v8030_v40 = vmul.f32 0.03125, %v7999_v0 }
 0x890   :  { %v8005_v9 = vpop.xlane.xlu1 %8004 }
 0x891   :  { %11175 = vrsqrt.f32 %v8047_v38  ;;  %v8046_v11 = vadd.f32 1e-05, %v8030_v40  ;;  %v8033_v61 = vmul.f32 0.03125, %v8005_v9 }
 0x892   :  { %v8003_v19 = vpop.xlane.xlu0 %8002 }
 0x893   :  { %11177 = vrsqrt.f32 %v8046_v11  ;;  %v8049_v57 = vadd.f32 1e-05, %v8033_v61  ;;  %v8032_v16 = vmul.f32 0.03125, %v8003_v19 }
 0x894   :  { %v8009_v45 = vpop.xlane.xlu1 %8008 }
 0x895   :  { %11179 = vrsqrt.f32 %v8049_v57  ;;  %v8048_v3 = vadd.f32 1e-05, %v8032_v16  ;;  %v8035_v28 = vmul.f32 0.03125, %v8009_v45 }
 0x896   :  { %v8007_v60 = vpop.xlane.xlu0 %8006 }
 0x897   :  { %11181 = vrsqrt.f32 %v8048_v3  ;;  %v8051_v56 = vadd.f32 1e-05, %v8035_v28  ;;  %v8034_v18 = vmul.f32 0.03125, %v8007_v60 }
 0x898   :  { %v8013_v63 = vpop.xlane.xlu1 %8012 }
 0x899   :  { %11183 = vrsqrt.f32 %v8051_v56  ;;  %v8050_v27 = vadd.f32 1e-05, %v8034_v18  ;;  %v8037_v32 = vmul.f32 0.03125, %v8013_v63 }
 0x89a   :  { %v8011_v36 = vpop.xlane.xlu0 %8010 }
 0x89b   :  { %11185 = vrsqrt.f32 %v8050_v27  ;;  %v8053_v50 = vadd.f32 1e-05, %v8037_v32  ;;  %v8036_v37 = vmul.f32 0.03125, %v8011_v36 }
 0x89c   :  { %v8017_v6 = vpop.xlane.xlu1 %8016 }
 0x89d   :  { %11187 = vrsqrt.f32 %v8053_v50  ;;  %v8052_v4 = vadd.f32 1e-05, %v8036_v37  ;;  %v8039_v13 = vmul.f32 0.03125, %v8017_v6 }
 0x89e   :  { %v11176_v33 = vpop.eup %11175  ;;  %v8015_v39 = vpop.xlane.xlu0 %8014 }
 0x89f   :  { %v8079_v29 = vmul.f32 %v11176_v33, %v15809_v34  ;;  %v8055_v1 = vadd.f32 1e-05, %v8039_v13  ;;  %v8038_v59 = vmul.f32 0.03125, %v8015_v39  ;;  %11189 = vrsqrt.f32 %v8052_v4 }
 0x8a0   :  { %v11178_v53 = vpop.eup %11177  ;;  %v8021_v22 = vpop.xlane.xlu1 %8020 }
 0x8a1   :  { %v8101_v7 = vmul.f32 %v15891_v48, %v8079_v29  ;;  %v8078_v47 = vmul.f32 %v11178_v53, %v15812_v43  ;;  %v8054_v12 = vadd.f32 1e-05, %v8038_v59  ;;  %11191 = vrsqrt.f32 %v8055_v1 }
 0x8a2   :  { %v11180_v51 = vpop.eup %11179  ;;  %v8041_v49 = vmul.f32 0.03125, %v8021_v22  ;;  %v8019_v20 = vpop.xlane.xlu0 %8018 }
 0x8a3   :  { %v15902_v34 = vadd.f32 %v15897_v44, %v8101_v7  ;;  %v8100_v58 = vmul.f32 %v15891_v48, %v8078_v47  ;;  %v8081_v5 = vmul.f32 %v11180_v51, %v15817_v42  ;;  %11193 = vrsqrt.f32 %v8054_v12 }
 0x8a4   :  { %v11182_v8 = vpop.eup %11181  ;;  %v8057_v55 = vadd.f32 1e-05, %v8041_v49  ;;  %v8040_v30 = vmul.f32 0.03125, %v8019_v20  ;;  %v8025_v21 = vpop.xlane.xlu1 %8024 }
 0x8a5   :  { %v8155_v43 = vmul.f32 0.044715, %v15902_v34  ;;  %v15908_v23 = vadd.f32 %v15897_v44, %v8100_v58  ;;  %v8103_v35 = vmul.f32 %v15891_v48, %v8081_v5  ;;  %v8080_v0 = vmul.f32 %v11182_v8, %v15822_v17 }
 0x8a6   :  { %v11184_v41 = vpop.eup %11183  ;;  %11195 = vrsqrt.f32 %v8057_v55  ;;  %v8056_v38 = vadd.f32 1e-05, %v8040_v30  ;;  %v8043_v40 = vmul.f32 0.03125, %v8025_v21 }
 0x8a7   :  { %v8171_v42 = vmul.f32 %v8155_v43, %v15902_v34  ;;  %v8154_v9 = vmul.f32 0.044715, %v15908_v23  ;;  %v15915_v11 = vadd.f32 %v15897_v44, %v8103_v35  ;;  %v8102_v19 = vmul.f32 %v15891_v48, %v8080_v0 }
 0x8a8   :  { %v11186_v61 = vpop.eup %11185  ;;  %v8083_v57 = vmul.f32 %v11184_v41, %v15827_v15  ;;  %v8059_v16 = vadd.f32 1e-05, %v8043_v40  ;;  %11197 = vrsqrt.f32 %v8056_v38 }
 0x8a9   :  { %v8187_v45 = vmul.f32 %v8171_v42, %v15902_v34  ;;  %v8170_v17 = vmul.f32 %v8154_v9, %v15908_v23  ;;  %v8157_v3 = vmul.f32 0.044715, %v15915_v11  ;;  %v15923_v60 = vadd.f32 %v15897_v44, %v8102_v19 }
 0x8aa   :  { %v11188_v28 = vpop.eup %11187  ;;  %v8105_v56 = vmul.f32 %v15891_v48, %v8083_v57  ;;  %v8082_v18 = vmul.f32 %v11186_v61, %v15832_v54  ;;  %11199 = vrsqrt.f32 %v8059_v16 }
 0x8ab   :  { %v8203_v63 = vadd.f32 %v8187_v45, %v15902_v34  ;;  %v8186_v15 = vmul.f32 %v8170_v17, %v15908_v23  ;;  %v8173_v27 = vmul.f32 %v8157_v3, %v15915_v11  ;;  %v8085_v32 = vmul.f32 %v11188_v28, %v15837_v26 }
 0x8ac   :  { %v8156_v36 = vmul.f32 0.044715, %v15923_v60  ;;  %v15933_v50 = vadd.f32 %v15897_v44, %v8105_v56  ;;  %v8104_v37 = vmul.f32 %v15891_v48, %v8082_v18  ;;  %v11190_v33 = vpop.eup %11189  ;;  %v8139_v18 = vmul.f32 0.5, %v15902_v34 }
 0x8ad   :  { %v8219_v6 = vmul.f32 0.7978846, %v8203_v63  ;;  %v8202_v4 = vadd.f32 %v8186_v15, %v15908_v23  ;;  %v8189_v54 = vmul.f32 %v8173_v27, %v15915_v11  ;;  %v8107_v13 = vmul.f32 %v15891_v48, %v8085_v32 }
 0x8ae   :  { %v8172_v39 = vmul.f32 %v8156_v36, %v15923_v60  ;;  %v8159_v29 = vmul.f32 0.044715, %v15933_v50  ;;  %v15942_v26 = vadd.f32 %v15897_v44, %v8104_v37  ;;  %v11192_v1 = vpop.eup %11191  ;;  %v8084_v55 = vmul.f32 %v11190_v33, %v15842_v24 }
 0x8af   :  { %11201 = vtanh.f32 %v8219_v6  ;;  %v8218_v59 = vmul.f32 0.7978846, %v8202_v4  ;;  %v8205_v53 = vadd.f32 %v8189_v54, %v15915_v11  ;;  %v15946_v22 = vadd.f32 %v15897_v44, %v8107_v13 }
 0x8b0   :  { %v11194_v7 = vpop.eup %11193  ;;  %v8188_v47 = vmul.f32 %v8172_v39, %v15923_v60  ;;  %v8175_v12 = vmul.f32 %v8159_v29, %v15933_v50  ;;  %v8158_v51 = vmul.f32 0.044715, %v15942_v26  ;;  %v8087_v43 = vmul.f32 %v11192_v1, %v15847_v2  ;;  %v8023_v29 = vpop.xlane.xlu0 %8022 }
 0x8b1   :  { %11203 = vtanh.f32 %v8218_v59  ;;  %v8221_v49 = vmul.f32 0.7978846, %v8205_v53  ;;  %v8161_v20 = vmul.f32 0.044715, %v15946_v22  ;;  %v8086_v35 = vmul.f32 %v11194_v7, %v15852_v25 }
 0x8b2   :  { %v8204_v58 = vadd.f32 %v8188_v47, %v15923_v60  ;;  %v8191_v5 = vmul.f32 %v8175_v12, %v15933_v50  ;;  %v8174_v8 = vmul.f32 %v8158_v51, %v15942_v26  ;;  %v8106_v40 = vmul.f32 %v15891_v48, %v8084_v55 }
 0x8b3   :  { %v11196_v30 = vpop.eup %11195  ;;  %11205 = vtanh.f32 %v8221_v49  ;;  %v8177_v21 = vmul.f32 %v8161_v20, %v15946_v22  ;;  %v8109_v9 = vmul.f32 %v15891_v48, %v8087_v43  ;;  %v8108_v24 = vmul.f32 %v15891_v48, %v8086_v35 }
 0x8b4   :  { %v8220_v41 = vmul.f32 0.7978846, %v8204_v58  ;;  %v8207_v0 = vadd.f32 %v8191_v5, %v15933_v50  ;;  %v8190_v38 = vmul.f32 %v8174_v8, %v15942_v26  ;;  %v8089_v61 = vmul.f32 %v11196_v30, %v15857_v46 }
 0x8b5   :  { %v8193_v42 = vmul.f32 %v8177_v21, %v15946_v22  ;;  %v11198_v19 = vpop.eup %11197  ;;  %v15968_v57 = vadd.f32 %v15897_v44, %v8106_v40  ;;  %v15972_v17 = vadd.f32 %v15897_v44, %v8109_v9  ;;  %v15975_v3 = vadd.f32 %v15897_v44, %v8108_v24  ;;  %v8027_v9 = vpop.xlane.xlu0 %8026 }
 0x8b6   :  { %11207 = vtanh.f32 %v8220_v41  ;;  %v8223_v2 = vmul.f32 0.7978846, %v8207_v0  ;;  %v8206_v25 = vadd.f32 %v8190_v38, %v15942_v26  ;;  %v8111_v28 = vmul.f32 %v15891_v48, %v8089_v61 }
 0x8b7   :  { %v11200_v16 = vpop.eup %11199  ;;  %v8209_v45 = vadd.f32 %v8193_v42, %v15946_v22  ;;  %v8160_v56 = vmul.f32 0.044715, %v15968_v57  ;;  %v8138_v63 = vmul.f32 0.5, %v15908_v23  ;;  %v8163_v27 = vmul.f32 0.044715, %v15972_v17  ;;  %v8029_v42 = vpop.xlane.xlu1 %8028 }
 0x8b8   :  { %11209 = vtanh.f32 %v8223_v2  ;;  %v8222_v46 = vmul.f32 0.7978846, %v8206_v25  ;;  %v8162_v36 = vmul.f32 0.044715, %v15975_v3  ;;  %v15985_v37 = vadd.f32 %v15897_v44, %v8111_v28 }
 0x8b9   :  { %v8225_v15 = vmul.f32 0.7978846, %v8209_v45  ;;  %v8176_v32 = vmul.f32 %v8160_v56, %v15968_v57  ;;  %v8179_v6 = vmul.f32 %v8163_v27, %v15972_v17  ;;  %v8088_v4 = vmul.f32 %v11198_v19, %v15862_v14 }
 0x8ba   :  { %11211 = vtanh.f32 %v8222_v46  ;;  %v8091_v34 = vmul.f32 %v11200_v16, %v15867_v62  ;;  %v8141_v23 = vmul.f32 0.5, %v15915_v11  ;;  %v8178_v33 = vmul.f32 %v8162_v36, %v15975_v3 }
 0x8bb   :  { %11213 = vtanh.f32 %v8225_v15  ;;  %v8192_v13 = vmul.f32 %v8176_v32, %v15968_v57  ;;  %v8165_v39 = vmul.f32 0.044715, %v15985_v37  ;;  %v8195_v59 = vmul.f32 %v8179_v6, %v15972_v17 }
 0x8bc   :  { %v11202_v54 = vpop.eup %11201  ;;  %v8110_v53 = vmul.f32 %v15891_v48, %v8088_v4  ;;  %v8113_v7 = vmul.f32 %v15891_v48, %v8091_v34  ;;  %v8140_v62 = vmul.f32 0.5, %v15923_v60  ;;  %v8194_v11 = vmul.f32 %v8178_v33, %v15975_v3 }
 0x8bd   :  { %v8251_v1 = vadd.f32 1.0, %v11202_v54  ;;  %v8208_v47 = vadd.f32 %v8192_v13, %v15968_v57  ;;  %v8181_v12 = vmul.f32 %v8165_v39, %v15985_v37  ;;  %v8211_v20 = vadd.f32 %v8195_v59, %v15972_v17 }
 0x8be   :  { %v11204_v14 = vpop.eup %11203  ;;  %v16003_v58 = vadd.f32 %v15897_v44, %v8110_v53  ;;  %v8210_v55 = vadd.f32 %v8194_v11, %v15975_v3  ;;  %v16008_v60 = vadd.f32 %v15897_v44, %v8113_v7  ;;  %v8042_v41 = vmul.f32 0.03125, %v8023_v29 }
 0x8bf   :  { %v8267_v51 = vmul.f32 %v8251_v1, %v8139_v18  ;;  %v8250_v49 = vadd.f32 1.0, %v11204_v14  ;;  %v8224_v8 = vmul.f32 0.7978846, %v8208_v47  ;;  %v8197_v30 = vmul.f32 %v8181_v12, %v15985_v37 }
 0x8c0   :  { %v11206_v5 = vpop.eup %11205  ;;  %v8227_v35 = vmul.f32 0.7978846, %v8211_v20  ;;  %v8226_v0 = vmul.f32 0.7978846, %v8210_v55  ;;  %v8164_v40 = vmul.f32 0.044715, %v16003_v58 }
 0x8c1   :  { %8283 = vst [vmem:[#allocation11 + $0x8] sm:$0xff] %v8267_v51  ;;  %v8266_v21 = vmul.f32 %v8250_v49, %v8138_v63  ;;  %v8253_v43 = vadd.f32 1.0, %v11206_v5  ;;  %11215 = vtanh.f32 %v8224_v8  ;;  %v8213_v38 = vadd.f32 %v8197_v30, %v15985_v37 }
 0x8c2   :  { %v8143_v19 = vmul.f32 0.5, %v15933_v50  ;;  %11217 = vtanh.f32 %v8227_v35  ;;  %v8167_v2 = vmul.f32 0.044715, %v16008_v60  ;;  %v8180_v45 = vmul.f32 %v8164_v40, %v16003_v58 }
 0x8c3   :  { %v11208_v24 = vpop.eup %11207  ;;  %8282 = vst [vmem:[#allocation11] sm:$0xff] %v8266_v21  ;;  %v8269_v61 = vmul.f32 %v8253_v43, %v8141_v23  ;;  %11219 = vtanh.f32 %v8226_v0  ;;  %v8229_v16 = vmul.f32 0.7978846, %v8213_v38  ;;  %v8058_v56 = vadd.f32 1e-05, %v8042_v41 }
 0x8c4   :  { %v8252_v25 = vadd.f32 1.0, %v11208_v24  ;;  %v8183_v46 = vmul.f32 %v8167_v2, %v16008_v60  ;;  %v8045_v18 = vmul.f32 0.03125, %v8029_v42  ;;  %v8044_v63 = vmul.f32 0.03125, %v8027_v9 }
 0x8c5   :  { %v11210_v28 = vpop.eup %11209  ;;  %8285 = vst [vmem:[#allocation11 + $0x18] sm:$0xff] %v8269_v61  ;;  %11221 = vtanh.f32 %v8229_v16  ;;  %v8196_v50 = vmul.f32 %v8180_v45, %v16003_v58  ;;  %v8142_v23 = vmul.f32 0.5, %v15942_v26  ;;  %v8145_v39 = vmul.f32 0.5, %v15946_v22 }
 0x8c6   :  { %v8268_v15 = vmul.f32 %v8252_v25, %v8140_v62  ;;  %v8255_v27 = vadd.f32 1.0, %v11210_v28  ;;  %v8199_v36 = vmul.f32 %v8183_v46, %v16008_v60  ;;  %11223 = vrsqrt.f32 %v8058_v56 }
 0x8c7   :  { %v11212_v32 = vpop.eup %11211  ;;  %v8061_v6 = vadd.f32 1e-05, %v8045_v18  ;;  %v8060_v4 = vadd.f32 1e-05, %v8044_v63  ;;  %v8212_v33 = vadd.f32 %v8196_v50, %v16003_v58  ;;  %v8144_v47 = vmul.f32 0.5, %v15968_v57 }
 0x8c8   :  { %v11214_v34 = vpop.eup %11213  ;;  %8284 = vst [vmem:[#allocation11 + $0x10] sm:$0xff] %v8268_v15  ;;  %v8271_v54 = vmul.f32 %v8255_v27, %v8143_v19  ;;  %v8254_v13 = vadd.f32 1.0, %v11212_v32  ;;  %v8215_v1 = vadd.f32 %v8199_v36, %v16008_v60  ;;  %v8147_v12 = vmul.f32 0.5, %v15972_v17 }
 0x8c9   :  { %v8257_v29 = vadd.f32 1.0, %v11214_v34  ;;  %11225 = vrsqrt.f32 %v8061_v6  ;;  %v8228_v53 = vmul.f32 0.7978846, %v8212_v33  ;;  %v8146_v20 = vmul.f32 0.5, %v15975_v3 }
 0x8ca   :  { %8287 = vst [vmem:[#allocation11 + $0x28] sm:$0xff] %v8271_v54  ;;  %v8270_v59 = vmul.f32 %v8254_v13, %v8142_v23  ;;  %11227 = vrsqrt.f32 %v8060_v4  ;;  %v8231_v14 = vmul.f32 0.7978846, %v8215_v1  ;;  %v8149_v43 = vmul.f32 0.5, %v15985_v37 }
 0x8cb   :  { %v8273_v7 = vmul.f32 %v8257_v29, %v8145_v39  ;;  %11229 = vtanh.f32 %v8228_v53  ;;  %v8148_v61 = vmul.f32 0.5, %v16003_v58  ;;  %v8151_v2 = vmul.f32 0.5, %v16008_v60 }
 0x8cc   :  { %8286 = vst [vmem:[#allocation11 + $0x20] sm:$0xff] %v8270_v59  ;;  %11231 = vtanh.f32 %v8231_v14 }
 0x8cd   :  { %8289 = vst [vmem:[#allocation11 + $0x38] sm:$0xff] %v8273_v7 }
 0x8ce   :  { %v11216_v26 = vpop.eup %11215 }
 0x8cf   :  { %v11218_v62 = vpop.eup %11217  ;;  %v8256_v11 = vadd.f32 1.0, %v11216_v26 }
 0x8d0   :  { %v11220_v22 = vpop.eup %11219  ;;  %v8259_v51 = vadd.f32 1.0, %v11218_v62 }
 0x8d1   :  { %v8272_v49 = vmul.f32 %v8256_v11, %v8144_v47  ;;  %v8258_v5 = vadd.f32 1.0, %v11220_v22 }
 0x8d2   :  { %v11222_v8 = vpop.eup %11221  ;;  %v8275_v55 = vmul.f32 %v8259_v51, %v8147_v12 }
 0x8d3   :  { %v11224_v30 = vpop.eup %11223  ;;  %8288 = vst [vmem:[#allocation11 + $0x30] sm:$0xff] %v8272_v49  ;;  %v8274_v21 = vmul.f32 %v8258_v5, %v8146_v20  ;;  %v8261_v35 = vadd.f32 1.0, %v11222_v8 }
 0x8d4   :  { %8291 = vst [vmem:[#allocation11 + $0x48] sm:$0xff] %v8275_v55  ;;  %v8090_v57 = vmul.f32 %v11224_v30, %v15872_v31 }
 0x8d5   :  { %8290 = vst [vmem:[#allocation11 + $0x40] sm:$0xff] %v8274_v21  ;;  %v8277_v0 = vmul.f32 %v8261_v35, %v8149_v43 }
 0x8d6   :  { %v11226_v41 = vpop.eup %11225  ;;  %v8112_v38 = vmul.f32 %v15891_v48, %v8090_v57 }
 0x8d7   :  { %v11228_v17 = vpop.eup %11227  ;;  %v8093_v3 = vmul.f32 %v11226_v41, %v15877_v52  ;;  %8293 = vst [vmem:[#allocation11 + $0x58] sm:$0xff] %v8277_v0 }
 0x8d8   :  { %v8092_v40 = vmul.f32 %v11228_v17, %v15882_v10  ;;  %v11230_v42 = vpop.eup %11229  ;;  %v8134_v9 = vadd.f32 %v15897_v44, %v8112_v38 }
 0x8d9   :  { %v8115_v37 = vmul.f32 %v15891_v48, %v8093_v3  ;;  %v11232_v24 = vpop.eup %11231  ;;  %v8260_v31 = vadd.f32 1.0, %v11230_v42 }
 0x8da   :  { %v8114_v19 = vmul.f32 %v15891_v48, %v8092_v40  ;;  %v8263_v25 = vadd.f32 1.0, %v11232_v24  ;;  %v8166_v16 = vmul.f32 0.044715, %v8134_v9  ;;  %v8150_v34 = vmul.f32 0.5, %v8134_v9 }
 0x8db   :  { %v8137_v52 = vadd.f32 %v15897_v44, %v8115_v37  ;;  %v8276_v45 = vmul.f32 %v8260_v31, %v8148_v61 }
 0x8dc   :  { %v8136_v10 = vadd.f32 %v15897_v44, %v8114_v19  ;;  %v8279_v28 = vmul.f32 %v8263_v25, %v8151_v2  ;;  %v8182_v46 = vmul.f32 %v8166_v16, %v8134_v9 }
 0x8dd   :  { %v8169_v56 = vmul.f32 0.044715, %v8137_v52  ;;  %8292 = vst [vmem:[#allocation11 + $0x50] sm:$0xff] %v8276_v45  ;;  %v8153_v39 = vmul.f32 0.5, %v8137_v52 }
 0x8de   :  { %v8168_v18 = vmul.f32 0.044715, %v8136_v10  ;;  %8295 = vst [vmem:[#allocation11 + $0x68] sm:$0xff] %v8279_v28  ;;  %v8198_v63 = vmul.f32 %v8182_v46, %v8134_v9  ;;  %v8152_v1 = vmul.f32 0.5, %v8136_v10 }
 0x8df   :  { %v8185_v58 = vmul.f32 %v8169_v56, %v8137_v52 }
 0x8e0   :  { %v8184_v15 = vmul.f32 %v8168_v18, %v8136_v10  ;;  %v8214_v27 = vadd.f32 %v8198_v63, %v8134_v9 }
 0x8e1   :  { %v8201_v48 = vmul.f32 %v8185_v58, %v8137_v52 }
 0x8e2   :  { %v8200_v50 = vmul.f32 %v8184_v15, %v8136_v10  ;;  %v8230_v60 = vmul.f32 0.7978846, %v8214_v27 }
 0x8e3   :  { %v8217_v32 = vadd.f32 %v8201_v48, %v8137_v52 }
 0x8e4   :  { %v8216_v36 = vadd.f32 %v8200_v50, %v8136_v10  ;;  %11233 = vtanh.f32 %v8230_v60 }
 0x8e5   :  { %v8233_v6 = vmul.f32 0.7978846, %v8217_v32 }
 0x8e6   :  { %v8232_v4 = vmul.f32 0.7978846, %v8216_v36 }
 0x8e7   :  { %11235 = vtanh.f32 %v8233_v6 }
 0x8e8   :  { %11237 = vtanh.f32 %v8232_v4 }
 0x8f1   :  { %v11234_v44 = vpop.eup %11233 }
 0x8f2   :  { %v8262_v54 = vadd.f32 1.0, %v11234_v44 }
 0x8f4   :  { %v11236_v23 = vpop.eup %11235  ;;  %v8278_v33 = vmul.f32 %v8262_v54, %v8150_v34 }
 0x8f5   :  { %v11238_v13 = vpop.eup %11237  ;;  %v8265_v29 = vadd.f32 1.0, %v11236_v23 }
 0x8f6   :  { %v8264_v59 = vadd.f32 1.0, %v11238_v13  ;;  %8294 = vst [vmem:[#allocation11 + $0x60] sm:$0xff] %v8278_v33 }
 0x8f7   :  { %v8281_v53 = vmul.f32 %v8265_v29, %v8153_v39 }
 0x8f8   :  { %v8280_v7 = vmul.f32 %v8264_v59, %v8152_v1 }
 0x8f9   :  { %8297 = vst [vmem:[#allocation11 + $0x78] sm:$0xff] %v8281_v53 }
 0x8fa   :  { %8296 = vst [vmem:[#allocation11 + $0x70] sm:$0xff] %v8280_v7 }
 0x8fb   :  { %11330 = shalt.err (!%p11327_p10)
}
 0x8fc   :  { %8309 = dma.vmem_to_hbm [thread:$0]  %s8304_s15, 2048, %s16059_s16, [#allocation5], %s11349_s26, %s11349_s26, %s11350_s27  }
 0x8fd   :  { %11345 = dma.done.wait [#allocation5], 2048  }
 0x8fe   :  { %11346 = vsyncadd [#allocation5], 4294965248 }
 0x8ff   :  { %8313 = vsyncpa [#allocation4], 1 }
 0x900   :  { %8314 = vsyncpa [#allocation7], 1 }
 0x901   :  { %8315 = vsyncpa [#allocation10], 1 }
 0x902   :  { %8316 = vsyncpa [#allocation5], 1 }

</bundles_post_ra>
